<compile_context>
chip_gen: v7x
topology: tpu7x:2x2x1
jax: 0.10.0
libtpu: 0.0.40
codegen_flags: <defaults>
</compile_context>

<pallas_src>
import functools
import jax
import jax.numpy as jnp
from jax.experimental import pallas as pl
from jax.experimental.pallas import tpu as pltpu

NEG_SLOPE = 0.2
ACC_ELEMS = 32 * 1024      # f32 accumulator tile cap: 32 vregs (128 KiB)
TM_MAX = 512               # leave vreg headroom for the bf16 tap slab
FULL_FOLD_MAX_K = 128      # full im2col only when kh*kw*C is tiny (conv0)


# ----------------------------------------------------------------------------
# Fused conv kernel: for a pre-padded, channel-folded image flattened to
# (L, K), each row-tap t is a shifted (tm, K) slab;
#   out = [lrelu]( sum_t slab_t @ W_t [+ b] ) [+ res]
# accumulated in a local f32 value (no scratch RMW), stored once.
# ----------------------------------------------------------------------------
def _make_conv_kernel(has_bias, has_res, act, row_offs, tm, num_m):
    ntaps = len(row_offs)

    def kernel(*refs):
        x_ref, w_ref = refs[0], refs[1]
        idx = 2
        b_ref = r_ref = None
        if has_bias:
            b_ref = refs[idx]; idx += 1
        if has_res:
            r_ref = refs[idx]; idx += 1
        o_ref = refs[idx]

        if num_m == 1:
            base = 0
        else:
            # tm and every row_off are multiples of 8 -> sublane-aligned slabs.
            base = pl.multiple_of(pl.program_id(1) * tm, 8)

        # Value-register accumulation; bias folded into the t==0 init.
        acc = jnp.dot(x_ref[pl.ds(base + row_offs[0], tm), :], w_ref[0],
                      preferred_element_type=jnp.float32)
        if has_bias:
            acc = acc + b_ref[...]
        for t in range(1, ntaps):
            acc = acc + jnp.dot(x_ref[pl.ds(base + row_offs[t], tm), :],
                                w_ref[t], preferred_element_type=jnp.float32)
        if act:
            acc = jnp.where(acc >= 0, acc, NEG_SLOPE * acc)
        if has_res:
            acc = acc + r_ref[...].astype(jnp.float32)
        o_ref[...] = acc.astype(o_ref.dtype)        # single fused store

    return kernel


def _pick_tile(m_rows, cout):
    """M-band size: large, but capped so the f32 accumulator stays <=32 vregs."""
    cap = max(8, min(TM_MAX, (ACC_ELEMS // cout) // 8 * 8))
    m8 = ((m_rows + 7) // 8) * 8
    if m8 <= cap:
        return m8, m8
    tm = cap
    return tm, ((m_rows + tm - 1) // tm) * tm


def _fold_taps(xp, fh, fw):
    """Concatenate the fh x fw shifted copies of xp along channels:
    out[..., h, w, (i*fw+j)*C:(i*fw+j+1)*C] = xp[..., h+i, w+j, :] (zero past edge)."""
    if fh == 1 and fw == 1:
        return xp
    parts = []
    for i in range(fh):
        for j in range(fw):
            part = xp[:, i:, j:, :]
            if i or j:
                part = jnp.pad(part, ((0, 0), (0, i), (0, j), (0, 0)))
            parts.append(part)
    return jnp.concatenate(parts, axis=-1)


def _fused_conv_aligned(xp, w_hwio, kh, kw, wo, bias=None, res=None, act=True,
                        out_dtype=jnp.bfloat16):
    """Stride-1 VALID conv of a pre-padded NHWC image whose width is a multiple
    of 8.  `wo` is the true output width; the extra columns per flat row are
    garbage and are sliced away by the caller-side reshape below."""
    N, Hp, Wp, C = xp.shape
    assert Wp % 8 == 0
    cout = w_hwio.shape[-1]
    Ho = Hp - kh + 1

    full_fold = (kh * kw * C) <= FULL_FOLD_MAX_K
    if full_fold:                       # conv0: one K=kh*kw*C matmul
        xf4 = _fold_taps(xp, kh, kw)
        wt = w_hwio.reshape(1, kh * kw * C, cout)
        kh_taps = 1
    else:                               # width fold: kh taps, K = kw*C
        xf4 = _fold_taps(xp, 1, kw)
        wt = w_hwio.reshape(kh, kw * C, cout)
        kh_taps = kh
    kdim = xf4.shape[-1]
    kpad = (-kdim) % 8
    if kpad:
        xf4 = jnp.pad(xf4, ((0, 0), (0, 0), (0, 0), (0, kpad)))
        wt = jnp.pad(wt, ((0, 0), (0, kpad), (0, 0)))
        kdim += kpad

    m_rows = Ho * Wp                    # padded-width flat output rows
    tm, m_pad = _pick_tile(m_rows, cout)
    num_m = m_pad // tm
    offs = tuple(i * Wp for i in range(kh_taps))   # all multiples of 8
    l_in = m_pad + offs[-1]

    xf = xf4.reshape(N, Hp * Wp, kdim).astype(jnp.bfloat16)
    if l_in > Hp * Wp:
        xf = jnp.pad(xf, ((0, 0), (0, l_in - Hp * Wp), (0, 0)))
    wt = wt.astype(jnp.bfloat16)

    args = [xf, wt]
    in_specs = [
        # whole flattened image per batch element (block idx constant over m,
        # so it is DMA'd only once per batch element)
        pl.BlockSpec((None, l_in, kdim), lambda n, m: (n, 0, 0)),
        pl.BlockSpec((kh_taps, kdim, cout), lambda n, m: (0, 0, 0)),
    ]
    if bias is not None:
        args.append(bias.astype(jnp.float32).reshape(1, cout))
        in_specs.append(pl.BlockSpec((1, cout), lambda n, m: (0, 0)))
    if res is not None:
        r = jnp.pad(res.astype(jnp.bfloat16),
                    ((0, 0), (0, 0), (0, Wp - wo), (0, 0)))
        r = r.reshape(N, m_rows, cout)
        if m_pad > m_rows:
            r = jnp.pad(r, ((0, 0), (0, m_pad - m_rows), (0, 0)))
        args.append(r)
        in_specs.append(pl.BlockSpec((None, tm, cout), lambda n, m: (n, m, 0)))

    out_bytes = jnp.dtype(out_dtype).itemsize
    need = (2 * l_in * kdim * 2 + 2 * kh_taps * kdim * cout * 2
            + 2 * tm * cout * out_bytes
            + (2 * tm * cout * 2 if res is not None else 0)
            + (2 * cout * 4 if bias is not None else 0)
            + (1 << 20))
    vmem_limit = int(min(64 << 20, max(32 << 20, int(need * 1.5))))

    kernel = _make_conv_kernel(bias is not None, res is not None, act, offs,
                               tm, num_m)
    out = pl.pallas_call(
        kernel,
        out_shape=jax.ShapeDtypeStruct((N, m_pad, cout), out_dtype),
        grid_spec=pltpu.PrefetchScalarGridSpec(
            num_scalar_prefetch=0,
            grid=(N, num_m),
            in_specs=in_specs,
            out_specs=pl.BlockSpec((None, tm, cout), lambda n, m: (n, m, 0)),
        ),
        compiler_params=pltpu.CompilerParams(
            dimension_semantics=("parallel", "parallel"),
            vmem_limit_bytes=vmem_limit),
    )(*args)

    out = out[:, :m_rows, :].reshape(N, Ho, Wp, cout)[:, :, :wo, :]
    return out


# ----------------------------------------------------------------------------
# Conv wrappers
# ----------------------------------------------------------------------------
def conv3x3(x, w_hwio, bias=None, res=None, act=True, out_dtype=jnp.bfloat16):
    """3x3, stride 1, pad 1 conv (NHWC), fused bias/lrelu/skip-add."""
    N, H, W, C = x.shape
    extra = (-(W + 2)) % 8                       # align flat width to 8
    xp = jnp.pad(x, ((0, 0), (1, 1), (1, 1 + extra), (0, 0)))
    return _fused_conv_aligned(xp, w_hwio, 3, 3, W, bias=bias, res=res,
                               act=act, out_dtype=out_dtype)


def conv4x4_s2(x, w_hwio, act=True, out_dtype=jnp.bfloat16):
    """4x4, stride 2, pad 1 conv == space-to-depth(2) + 2x2 stride-1 VALID."""
    N, H, W, C = x.shape
    assert H % 2 == 0 and W % 2 == 0, "even spatial dims required for stride-2"
    ws8 = (((W + 2) // 2 + 7) // 8) * 8          # s2d width, aligned to 8
    pr = 2 * ws8 - W - 1                         # right pad (>=1)
    xp = jnp.pad(x, ((0, 0), (1, 1), (1, pr), (0, 0)))
    Hp, Wpad = H + 2, 2 * ws8
    xs = xp.reshape(N, Hp // 2, 2, Wpad // 2, 2, C)
    xs = xs.transpose(0, 1, 3, 2, 4, 5).reshape(N, Hp // 2, Wpad // 2, 4 * C)
    cout = w_hwio.shape[-1]
    w2 = w_hwio.reshape(2, 2, 2, 2, C, cout).transpose(0, 2, 1, 3, 4, 5)
    w2 = w2.reshape(2, 2, 4 * C, cout)
    return _fused_conv_aligned(xs, w2, 2, 2, W // 2, bias=None, res=None,
                               act=act, out_dtype=out_dtype)


# ----------------------------------------------------------------------------
# Bilinear x2 upsample, align_corners=False: fixed 0.75/0.25 two-phase pattern
# implemented with static slices + weighted adds (no gathers).
# ----------------------------------------------------------------------------
def upsample_bilinear_2x(x):
    N, H, W, C = x.shape
    v = x
    # rows
    prev = jnp.concatenate([v[:, :1], v[:, :-1]], axis=1)
    nxt = jnp.concatenate([v[:, 1:], v[:, -1:]], axis=1)
    even = 0.75 * v + 0.25 * prev
    odd = 0.75 * v + 0.25 * nxt
    v = jnp.stack([even, odd], axis=2).reshape(N, 2 * H, W, C)
    # cols
    prev = jnp.concatenate([v[:, :, :1], v[:, :, :-1]], axis=2)
    nxt = jnp.concatenate([v[:, :, 1:], v[:, :, -1:]], axis=2)
    even = 0.75 * v + 0.25 * prev
    odd = 0.75 * v + 0.25 * nxt
    v = jnp.stack([even, odd], axis=3).reshape(N, 2 * H, 2 * W, C)
    return v.astype(x.dtype)


# ----------------------------------------------------------------------------
# Spectral normalization (weight / sigma) via power iteration (init-time glue)
# ----------------------------------------------------------------------------
def spectral_normalize(w_hwio, n_iter=30):
    # TODO(synk): PyTorch uses 1 iteration with a persistent `u` buffer; this
    # init-time approximation converges to the same sigma.
    cout = w_hwio.shape[-1]
    m = w_hwio.reshape(-1, cout).astype(jnp.float32)
    v = jnp.ones((cout,), jnp.float32) / jnp.sqrt(float(cout))

    def body(_, v):
        u = m @ v
        u = u / (jnp.linalg.norm(u) + 1e-12)
        v = m.T @ u
        return v / (jnp.linalg.norm(v) + 1e-12)

    v = jax.lax.fori_loop(0, n_iter, body, v)
    sigma = jnp.linalg.norm(m @ v)
    return w_hwio / sigma


# ----------------------------------------------------------------------------
# Model: parameter construction + forward
# ----------------------------------------------------------------------------
def init_params(key, num_in_ch=3, num_feat=32):
    def w_init(k, kh, kw, cin, cout):
        return 0.05 * jax.random.normal(k, (kh, kw, cin, cout), jnp.float32)

    keys = jax.random.split(key, 12)
    nf = num_feat
    p = {}
    p['w0'] = w_init(keys[0], 3, 3, num_in_ch, nf)
    p['b0'] = 0.05 * jax.random.normal(keys[1], (nf,), jnp.float32)
    p['w1'] = spectral_normalize(w_init(keys[2], 4, 4, nf, nf * 2))
    p['w2'] = spectral_normalize(w_init(keys[3], 4, 4, nf * 2, nf * 4))
    p['w3'] = spectral_normalize(w_init(keys[4], 4, 4, nf * 4, nf * 8))
    p['w4'] = spectral_normalize(w_init(keys[5], 3, 3, nf * 8, nf * 4))
    p['w5'] = spectral_normalize(w_init(keys[6], 3, 3, nf * 4, nf * 2))
    p['w6'] = spectral_normalize(w_init(keys[7], 3, 3, nf * 2, nf))
    p['w7'] = spectral_normalize(w_init(keys[8], 3, 3, nf, nf))
    p['w8'] = spectral_normalize(w_init(keys[9], 3, 3, nf, nf))
    p['w9'] = w_init(keys[10], 3, 3, nf, 1)
    p['b9'] = 0.05 * jax.random.normal(keys[11], (1,), jnp.float32)
    return p


def unet_discriminator_sn(x_nchw, params, skip_connection=True):
    x = jnp.transpose(x_nchw, (0, 2, 3, 1)).astype(jnp.bfloat16)  # NCHW->NHWC

    x0 = conv3x3(x, params['w0'], bias=params['b0'], act=True)
    x1 = conv4x4_s2(x0, params['w1'], act=True)
    x2 = conv4x4_s2(x1, params['w2'], act=True)
    x3 = conv4x4_s2(x2, params['w3'], act=True)

    x3u = upsample_bilinear_2x(x3)
    x4 = conv3x3(x3u, params['w4'], act=True,
                 res=x2 if skip_connection else None)

    x4u = upsample_bilinear_2x(x4)
    x5 = conv3x3(x4u, params['w5'], act=True,
                 res=x1 if skip_connection else None)

    x5u = upsample_bilinear_2x(x5)
    x6 = conv3x3(x5u, params['w6'], act=True,
                 res=x0 if skip_connection else None)

    out = conv3x3(x6, params['w7'], act=True)
    out = conv3x3(out, params['w8'], act=True)

    # final conv: pad cout 1 -> 32 (f32 stores, channel 0 sliced afterwards).
    w9 = jnp.pad(params['w9'], ((0, 0), (0, 0), (0, 0), (0, 31)))
    b9 = jnp.pad(params['b9'], ((0, 31),))
    out = conv3x3(out, w9, bias=b9, act=False, out_dtype=jnp.float32)[..., :1]

    return jnp.transpose(out, (0, 3, 1, 2))  # NHWC -> NCHW


if __name__ == "__main__":
    key = jax.random.PRNGKey(0)
    k_x, k_p = jax.random.split(key)

    num_in_ch, num_feat = 3, 32
    x = jax.random.normal(k_x, (2, num_in_ch, 16, 16), jnp.float32)
    params = init_params(k_p, num_in_ch=num_in_ch, num_feat=num_feat)

    fwd = jax.jit(functools.partial(unet_discriminator_sn, skip_connection=True))
    out = fwd(x, params)
    out = jax.block_until_ready(out)

    assert out.shape == (2, 1, 16, 16), out.shape
    assert out.dtype == jnp.float32
    assert bool(jnp.all(jnp.isfinite(out)))
    print("KERNEL_OK")
</pallas_src>

<mosaic_0001>
module attributes {stable_mosaic.version = 11 : i64} {
  func.func @kernel(%arg0: i32, %arg1: i32, %arg2: memref<1x384x32xbf16, #tpu.memory_space<vmem>>, %arg3: memref<1x32x32xbf16, #tpu.memory_space<vmem>>, %arg4: memref<1x32xf32, #tpu.memory_space<vmem>>, %arg5: memref<1x384x32xbf16, #tpu.memory_space<vmem>>) attributes {dimension_semantics = [#tpu.dimension_semantics<parallel>, #tpu.dimension_semantics<parallel>], iteration_bounds = array<i64: 2, 1>, scalar_prefetch = 0 : i64, scratch_operands = 0 : i64, tpu.core_type = #tpu.core_type<tc>, window_params = [{transform_indices = @transform_0, window_bounds = array<i64: 1, 384, 32>}, {pipeline_mode = #tpu.pipeline_mode<synchronous>, transform_indices = @transform_1, window_bounds = array<i64: 1, 32, 32>}, {pipeline_mode = #tpu.pipeline_mode<synchronous>, transform_indices = @transform_2, window_bounds = array<i64: 1, 32>}, {transform_indices = @transform_3, window_bounds = array<i64: 1, 384, 32>}]} {
    %c0 = arith.constant 0 : index
    %c0_0 = arith.constant 0 : index
    %c0_1 = arith.constant 0 : index
    %0 = vector.load %arg2[%c0, %c0_0, %c0_1] : memref<1x384x32xbf16, #tpu.memory_space<vmem>>, vector<1x384x32xbf16>
    %1 = vector.shape_cast %0 : vector<1x384x32xbf16> to vector<384x32xbf16>
    %c0_2 = arith.constant 0 : index
    %c0_3 = arith.constant 0 : index
    %c0_4 = arith.constant 0 : index
    %2 = vector.load %arg3[%c0_2, %c0_3, %c0_4] : memref<1x32x32xbf16, #tpu.memory_space<vmem>>, vector<1x32x32xbf16>
    %3 = vector.shape_cast %2 : vector<1x32x32xbf16> to vector<32x32xbf16>
    %cst = arith.constant dense<0.000000e+00> : vector<384x32xf32>
    %4 = tpu.matmul %1, %3, %cst {dimension_numbers = #tpu.dot_dimension_numbers<[1], [0], [0], [1], [0, 0, 1, 1], [], []>} : vector<384x32xbf16>, vector<32x32xbf16>, vector<384x32xf32> -> vector<384x32xf32>
    %c0_5 = arith.constant 0 : index
    %c0_6 = arith.constant 0 : index
    %5 = vector.load %arg4[%c0_5, %c0_6] : memref<1x32xf32, #tpu.memory_space<vmem>>, vector<1x32xf32>
    %6 = vector.broadcast %5 : vector<1x32xf32> to vector<384x32xf32>
    %7 = arith.addf %4, %6 : vector<384x32xf32>
    %cst_7 = arith.constant 0.000000e+00 : f32
    %8 = vector.broadcast %cst_7 : f32 to vector<384x32xf32>
    %9 = arith.cmpf oge, %7, %8 : vector<384x32xf32>
    %cst_8 = arith.constant 2.000000e-01 : f32
    %10 = vector.broadcast %cst_8 : f32 to vector<384x32xf32>
    %11 = arith.mulf %10, %7 : vector<384x32xf32>
    %12 = arith.select %9, %7, %11 : vector<384x32xi1>, vector<384x32xf32>
    %13 = arith.truncf %12 : vector<384x32xf32> to vector<384x32xbf16>
    %c0_9 = arith.constant 0 : index
    %c0_10 = arith.constant 0 : index
    %c0_11 = arith.constant 0 : index
    %14 = vector.load %arg5[%c0_9, %c0_10, %c0_11] : memref<1x384x32xbf16, #tpu.memory_space<vmem>>, vector<1x384x32xbf16>
    %15 = vector.shape_cast %14 : vector<1x384x32xbf16> to vector<384x32xbf16>
    %16 = vector.shape_cast %13 : vector<384x32xbf16> to vector<1x384x32xbf16>
    tpu.vector_store %arg5[%c0_9, %c0_10, %c0_11], %16 {strides = array<i32>} : memref<1x384x32xbf16, #tpu.memory_space<vmem>>, vector<1x384x32xbf16>,
    return
  }
  func.func @transform_0(%arg0: i32, %arg1: i32) -> (i32, i32, i32) {
    %c0_i32 = arith.constant 0 : i32
    %c0_i32_0 = arith.constant 0 : i32
    %c0_i32_1 = arith.constant 0 : i32
    return %arg0, %c0_i32, %c0_i32_0 : i32, i32, i32
  }
  func.func @transform_1(%arg0: i32, %arg1: i32) -> (i32, i32, i32) {
    %c0_i32 = arith.constant 0 : i32
    %c0_i32_0 = arith.constant 0 : i32
    %c0_i32_1 = arith.constant 0 : i32
    %c0_i32_2 = arith.constant 0 : i32
    return %c0_i32, %c0_i32_0, %c0_i32_1 : i32, i32, i32
  }
  func.func @transform_2(%arg0: i32, %arg1: i32) -> (i32, i32) {
    %c0_i32 = arith.constant 0 : i32
    %c0_i32_0 = arith.constant 0 : i32
    %c0_i32_1 = arith.constant 0 : i32
    return %c0_i32, %c0_i32_0 : i32, i32
  }
  func.func @transform_3(%arg0: i32, %arg1: i32) -> (i32, i32, i32) {
    %c0_i32 = arith.constant 0 : i32
    %c0_i32_0 = arith.constant 0 : i32
    return %arg0, %arg1, %c0_i32 : i32, i32, i32
  }
}

module attributes {stable_mosaic.version = 11 : i64} {
  func.func @kernel(%arg0: i32, %arg1: i32, %arg2: memref<1x144x256xbf16, #tpu.memory_space<vmem>>, %arg3: memref<2x256x64xbf16, #tpu.memory_space<vmem>>, %arg4: memref<1x128x64xbf16, #tpu.memory_space<vmem>>) attributes {dimension_semantics = [#tpu.dimension_semantics<parallel>, #tpu.dimension_semantics<parallel>], iteration_bounds = array<i64: 2, 1>, scalar_prefetch = 0 : i64, scratch_operands = 0 : i64, tpu.core_type = #tpu.core_type<tc>, window_params = [{transform_indices = @transform_0, window_bounds = array<i64: 1, 144, 256>}, {pipeline_mode = #tpu.pipeline_mode<synchronous>, transform_indices = @transform_1, window_bounds = array<i64: 2, 256, 64>}, {transform_indices = @transform_2, window_bounds = array<i64: 1, 128, 64>}]} {
    %c0 = arith.constant 0 : index
    %c0_0 = arith.constant 0 : index
    %c0_1 = arith.constant 0 : index
    %0 = vector.load %arg2[%c0, %c0_0, %c0_1] : memref<1x144x256xbf16, #tpu.memory_space<vmem>>, vector<1x128x256xbf16>
    %1 = vector.shape_cast %0 : vector<1x128x256xbf16> to vector<128x256xbf16>
    %c0_2 = arith.constant 0 : index
    %c0_3 = arith.constant 0 : index
    %c0_4 = arith.constant 0 : index
    %2 = vector.load %arg3[%c0_2, %c0_3, %c0_4] : memref<2x256x64xbf16, #tpu.memory_space<vmem>>, vector<1x256x64xbf16>
    %3 = vector.shape_cast %2 : vector<1x256x64xbf16> to vector<256x64xbf16>
    %cst = arith.constant dense<0.000000e+00> : vector<128x64xf32>
    %4 = tpu.matmul %1, %3, %cst {dimension_numbers = #tpu.dot_dimension_numbers<[1], [0], [0], [1], [0, 0, 1, 1], [], []>} : vector<128x256xbf16>, vector<256x64xbf16>, vector<128x64xf32> -> vector<128x64xf32>
    %c0_5 = arith.constant 0 : index
    %c16 = arith.constant 16 : index
    %c0_6 = arith.constant 0 : index
    %5 = vector.load %arg2[%c0_5, %c16, %c0_6] : memref<1x144x256xbf16, #tpu.memory_space<vmem>>, vector<1x128x256xbf16>
    %6 = vector.shape_cast %5 : vector<1x128x256xbf16> to vector<128x256xbf16>
    %c1 = arith.constant 1 : index
    %c0_7 = arith.constant 0 : index
    %c0_8 = arith.constant 0 : index
    %7 = vector.load %arg3[%c1, %c0_7, %c0_8] : memref<2x256x64xbf16, #tpu.memory_space<vmem>>, vector<1x256x64xbf16>
    %8 = vector.shape_cast %7 : vector<1x256x64xbf16> to vector<256x64xbf16>
    %cst_9 = arith.constant dense<0.000000e+00> : vector<128x64xf32>
    %9 = tpu.matmul %6, %8, %cst_9 {dimension_numbers = #tpu.dot_dimension_numbers<[1], [0], [0], [1], [0, 0, 1, 1], [], []>} : vector<128x256xbf16>, vector<256x64xbf16>, vector<128x64xf32> -> vector<128x64xf32>
    %10 = arith.addf %4, %9 : vector<128x64xf32>
    %cst_10 = arith.constant 0.000000e+00 : f32
    %11 = vector.broadcast %cst_10 : f32 to vector<128x64xf32>
    %12 = arith.cmpf oge, %10, %11 : vector<128x64xf32>
    %cst_11 = arith.constant 2.000000e-01 : f32
    %13 = vector.broadcast %cst_11 : f32 to vector<128x64xf32>
    %14 = arith.mulf %13, %10 : vector<128x64xf32>
    %15 = arith.select %12, %10, %14 : vector<128x64xi1>, vector<128x64xf32>
    %16 = arith.truncf %15 : vector<128x64xf32> to vector<128x64xbf16>
    %c0_12 = arith.constant 0 : index
    %c0_13 = arith.constant 0 : index
    %c0_14 = arith.constant 0 : index
    %17 = vector.load %arg4[%c0_12, %c0_13, %c0_14] : memref<1x128x64xbf16, #tpu.memory_space<vmem>>, vector<1x128x64xbf16>
    %18 = vector.shape_cast %17 : vector<1x128x64xbf16> to vector<128x64xbf16>
    %19 = vector.shape_cast %16 : vector<128x64xbf16> to vector<1x128x64xbf16>
    tpu.vector_store %arg4[%c0_12, %c0_13, %c0_14], %19 {strides = array<i32>} : memref<1x128x64xbf16, #tpu.memory_space<vmem>>, vector<1x128x64xbf16>,
    return
  }
  func.func @transform_0(%arg0: i32, %arg1: i32) -> (i32, i32, i32) {
    %c0_i32 = arith.constant 0 : i32
    %c0_i32_0 = arith.constant 0 : i32
    %c0_i32_1 = arith.constant 0 : i32
    return %arg0, %c0_i32, %c0_i32_0 : i32, i32, i32
  }
  func.func @transform_1(%arg0: i32, %arg1: i32) -> (i32, i32, i32) {
    %c0_i32 = arith.constant 0 : i32
    %c0_i32_0 = arith.constant 0 : i32
    %c0_i32_1 = arith.constant 0 : i32
    %c0_i32_2 = arith.constant 0 : i32
    return %c0_i32, %c0_i32_0, %c0_i32_1 : i32, i32, i32
  }
  func.func @transform_2(%arg0: i32, %arg1: i32) -> (i32, i32, i32) {
    %c0_i32 = arith.constant 0 : i32
    %c0_i32_0 = arith.constant 0 : i32
    return %arg0, %arg1, %c0_i32 : i32, i32, i32
  }
}

module attributes {stable_mosaic.version = 11 : i64} {
  func.func @kernel(%arg0: i32, %arg1: i32, %arg2: memref<1x40x512xbf16, #tpu.memory_space<vmem>>, %arg3: memref<2x512x128xbf16, #tpu.memory_space<vmem>>, %arg4: memref<1x32x128xbf16, #tpu.memory_space<vmem>>) attributes {dimension_semantics = [#tpu.dimension_semantics<parallel>, #tpu.dimension_semantics<parallel>], iteration_bounds = array<i64: 2, 1>, scalar_prefetch = 0 : i64, scratch_operands = 0 : i64, tpu.core_type = #tpu.core_type<tc>, window_params = [{transform_indices = @transform_0, window_bounds = array<i64: 1, 40, 512>}, {pipeline_mode = #tpu.pipeline_mode<synchronous>, transform_indices = @transform_1, window_bounds = array<i64: 2, 512, 128>}, {transform_indices = @transform_2, window_bounds = array<i64: 1, 32, 128>}]} {
    %c0 = arith.constant 0 : index
    %c0_0 = arith.constant 0 : index
    %c0_1 = arith.constant 0 : index
    %0 = vector.load %arg2[%c0, %c0_0, %c0_1] : memref<1x40x512xbf16, #tpu.memory_space<vmem>>, vector<1x32x512xbf16>
    %1 = vector.shape_cast %0 : vector<1x32x512xbf16> to vector<32x512xbf16>
    %c0_2 = arith.constant 0 : index
    %c0_3 = arith.constant 0 : index
    %c0_4 = arith.constant 0 : index
    %2 = vector.load %arg3[%c0_2, %c0_3, %c0_4] : memref<2x512x128xbf16, #tpu.memory_space<vmem>>, vector<1x512x128xbf16>
    %3 = vector.shape_cast %2 : vector<1x512x128xbf16> to vector<512x128xbf16>
    %cst = arith.constant dense<0.000000e+00> : vector<32x128xf32>
    %4 = tpu.matmul %1, %3, %cst {dimension_numbers = #tpu.dot_dimension_numbers<[1], [0], [0], [1], [0, 0, 1, 1], [], []>} : vector<32x512xbf16>, vector<512x128xbf16>, vector<32x128xf32> -> vector<32x128xf32>
    %c0_5 = arith.constant 0 : index
    %c8 = arith.constant 8 : index
    %c0_6 = arith.constant 0 : index
    %5 = vector.load %arg2[%c0_5, %c8, %c0_6] : memref<1x40x512xbf16, #tpu.memory_space<vmem>>, vector<1x32x512xbf16>
    %6 = vector.shape_cast %5 : vector<1x32x512xbf16> to vector<32x512xbf16>
    %c1 = arith.constant 1 : index
    %c0_7 = arith.constant 0 : index
    %c0_8 = arith.constant 0 : index
    %7 = vector.load %arg3[%c1, %c0_7, %c0_8] : memref<2x512x128xbf16, #tpu.memory_space<vmem>>, vector<1x512x128xbf16>
    %8 = vector.shape_cast %7 : vector<1x512x128xbf16> to vector<512x128xbf16>
    %cst_9 = arith.constant dense<0.000000e+00> : vector<32x128xf32>
    %9 = tpu.matmul %6, %8, %cst_9 {dimension_numbers = #tpu.dot_dimension_numbers<[1], [0], [0], [1], [0, 0, 1, 1], [], []>} : vector<32x512xbf16>, vector<512x128xbf16>, vector<32x128xf32> -> vector<32x128xf32>
    %10 = arith.addf %4, %9 : vector<32x128xf32>
    %cst_10 = arith.constant 0.000000e+00 : f32
    %11 = vector.broadcast %cst_10 : f32 to vector<32x128xf32>
    %12 = arith.cmpf oge, %10, %11 : vector<32x128xf32>
    %cst_11 = arith.constant 2.000000e-01 : f32
    %13 = vector.broadcast %cst_11 : f32 to vector<32x128xf32>
    %14 = arith.mulf %13, %10 : vector<32x128xf32>
    %15 = arith.select %12, %10, %14 : vector<32x128xi1>, vector<32x128xf32>
    %16 = arith.truncf %15 : vector<32x128xf32> to vector<32x128xbf16>
    %c0_12 = arith.constant 0 : index
    %c0_13 = arith.constant 0 : index
    %c0_14 = arith.constant 0 : index
    %17 = vector.load %arg4[%c0_12, %c0_13, %c0_14] : memref<1x32x128xbf16, #tpu.memory_space<vmem>>, vector<1x32x128xbf16>
    %18 = vector.shape_cast %17 : vector<1x32x128xbf16> to vector<32x128xbf16>
    %19 = vector.shape_cast %16 : vector<32x128xbf16> to vector<1x32x128xbf16>
    tpu.vector_store %arg4[%c0_12, %c0_13, %c0_14], %19 {strides = array<i32>} : memref<1x32x128xbf16, #tpu.memory_space<vmem>>, vector<1x32x128xbf16>,
    return
  }
  func.func @transform_0(%arg0: i32, %arg1: i32) -> (i32, i32, i32) {
    %c0_i32 = arith.constant 0 : i32
    %c0_i32_0 = arith.constant 0 : i32
    %c0_i32_1 = arith.constant 0 : i32
    return %arg0, %c0_i32, %c0_i32_0 : i32, i32, i32
  }
  func.func @transform_1(%arg0: i32, %arg1: i32) -> (i32, i32, i32) {
    %c0_i32 = arith.constant 0 : i32
    %c0_i32_0 = arith.constant 0 : i32
    %c0_i32_1 = arith.constant 0 : i32
    %c0_i32_2 = arith.constant 0 : i32
    return %c0_i32, %c0_i32_0, %c0_i32_1 : i32, i32, i32
  }
  func.func @transform_2(%arg0: i32, %arg1: i32) -> (i32, i32, i32) {
    %c0_i32 = arith.constant 0 : i32
    %c0_i32_0 = arith.constant 0 : i32
    return %arg0, %arg1, %c0_i32 : i32, i32, i32
  }
}

module attributes {stable_mosaic.version = 11 : i64} {
  func.func @kernel(%arg0: i32, %arg1: i32, %arg2: memref<1x24x1024xbf16, #tpu.memory_space<vmem>>, %arg3: memref<2x1024x256xbf16, #tpu.memory_space<vmem>>, %arg4: memref<1x16x256xbf16, #tpu.memory_space<vmem>>) attributes {dimension_semantics = [#tpu.dimension_semantics<parallel>, #tpu.dimension_semantics<parallel>], iteration_bounds = array<i64: 2, 1>, scalar_prefetch = 0 : i64, scratch_operands = 0 : i64, tpu.core_type = #tpu.core_type<tc>, window_params = [{transform_indices = @transform_0, window_bounds = array<i64: 1, 24, 1024>}, {pipeline_mode = #tpu.pipeline_mode<synchronous>, transform_indices = @transform_1, window_bounds = array<i64: 2, 1024, 256>}, {transform_indices = @transform_2, window_bounds = array<i64: 1, 16, 256>}]} {
    %c0 = arith.constant 0 : index
    %c0_0 = arith.constant 0 : index
    %c0_1 = arith.constant 0 : index
    %0 = vector.load %arg2[%c0, %c0_0, %c0_1] : memref<1x24x1024xbf16, #tpu.memory_space<vmem>>, vector<1x16x1024xbf16>
    %1 = vector.shape_cast %0 : vector<1x16x1024xbf16> to vector<16x1024xbf16>
    %c0_2 = arith.constant 0 : index
    %c0_3 = arith.constant 0 : index
    %c0_4 = arith.constant 0 : index
    %2 = vector.load %arg3[%c0_2, %c0_3, %c0_4] : memref<2x1024x256xbf16, #tpu.memory_space<vmem>>, vector<1x1024x256xbf16>
    %3 = vector.shape_cast %2 : vector<1x1024x256xbf16> to vector<1024x256xbf16>
    %cst = arith.constant dense<0.000000e+00> : vector<16x256xf32>
    %4 = tpu.matmul %1, %3, %cst {dimension_numbers = #tpu.dot_dimension_numbers<[1], [0], [0], [1], [0, 0, 1, 1], [], []>} : vector<16x1024xbf16>, vector<1024x256xbf16>, vector<16x256xf32> -> vector<16x256xf32>
    %c0_5 = arith.constant 0 : index
    %c8 = arith.constant 8 : index
    %c0_6 = arith.constant 0 : index
    %5 = vector.load %arg2[%c0_5, %c8, %c0_6] : memref<1x24x1024xbf16, #tpu.memory_space<vmem>>, vector<1x16x1024xbf16>
    %6 = vector.shape_cast %5 : vector<1x16x1024xbf16> to vector<16x1024xbf16>
    %c1 = arith.constant 1 : index
    %c0_7 = arith.constant 0 : index
    %c0_8 = arith.constant 0 : index
    %7 = vector.load %arg3[%c1, %c0_7, %c0_8] : memref<2x1024x256xbf16, #tpu.memory_space<vmem>>, vector<1x1024x256xbf16>
    %8 = vector.shape_cast %7 : vector<1x1024x256xbf16> to vector<1024x256xbf16>
    %cst_9 = arith.constant dense<0.000000e+00> : vector<16x256xf32>
    %9 = tpu.matmul %6, %8, %cst_9 {dimension_numbers = #tpu.dot_dimension_numbers<[1], [0], [0], [1], [0, 0, 1, 1], [], []>} : vector<16x1024xbf16>, vector<1024x256xbf16>, vector<16x256xf32> -> vector<16x256xf32>
    %10 = arith.addf %4, %9 : vector<16x256xf32>
    %cst_10 = arith.constant 0.000000e+00 : f32
    %11 = vector.broadcast %cst_10 : f32 to vector<16x256xf32>
    %12 = arith.cmpf oge, %10, %11 : vector<16x256xf32>
    %cst_11 = arith.constant 2.000000e-01 : f32
    %13 = vector.broadcast %cst_11 : f32 to vector<16x256xf32>
    %14 = arith.mulf %13, %10 : vector<16x256xf32>
    %15 = arith.select %12, %10, %14 : vector<16x256xi1>, vector<16x256xf32>
    %16 = arith.truncf %15 : vector<16x256xf32> to vector<16x256xbf16>
    %c0_12 = arith.constant 0 : index
    %c0_13 = arith.constant 0 : index
    %c0_14 = arith.constant 0 : index
    %17 = vector.load %arg4[%c0_12, %c0_13, %c0_14] : memref<1x16x256xbf16, #tpu.memory_space<vmem>>, vector<1x16x256xbf16>
    %18 = vector.shape_cast %17 : vector<1x16x256xbf16> to vector<16x256xbf16>
    %19 = vector.shape_cast %16 : vector<16x256xbf16> to vector<1x16x256xbf16>
    tpu.vector_store %arg4[%c0_12, %c0_13, %c0_14], %19 {strides = array<i32>} : memref<1x16x256xbf16, #tpu.memory_space<vmem>>, vector<1x16x256xbf16>,
    return
  }
  func.func @transform_0(%arg0: i32, %arg1: i32) -> (i32, i32, i32) {
    %c0_i32 = arith.constant 0 : i32
    %c0_i32_0 = arith.constant 0 : i32
    %c0_i32_1 = arith.constant 0 : i32
    return %arg0, %c0_i32, %c0_i32_0 : i32, i32, i32
  }
  func.func @transform_1(%arg0: i32, %arg1: i32) -> (i32, i32, i32) {
    %c0_i32 = arith.constant 0 : i32
    %c0_i32_0 = arith.constant 0 : i32
    %c0_i32_1 = arith.constant 0 : i32
    %c0_i32_2 = arith.constant 0 : i32
    return %c0_i32, %c0_i32_0, %c0_i32_1 : i32, i32, i32
  }
  func.func @transform_2(%arg0: i32, %arg1: i32) -> (i32, i32, i32) {
    %c0_i32 = arith.constant 0 : i32
    %c0_i32_0 = arith.constant 0 : i32
    return %arg0, %arg1, %c0_i32 : i32, i32, i32
  }
}

module attributes {stable_mosaic.version = 11 : i64} {
  func.func @kernel(%arg0: i32, %arg1: i32, %arg2: memref<1x48x768xbf16, #tpu.memory_space<vmem>>, %arg3: memref<3x768x128xbf16, #tpu.memory_space<vmem>>, %arg4: memref<1x32x128xbf16, #tpu.memory_space<vmem>>, %arg5: memref<1x32x128xbf16, #tpu.memory_space<vmem>>) attributes {dimension_semantics = [#tpu.dimension_semantics<parallel>, #tpu.dimension_semantics<parallel>], iteration_bounds = array<i64: 2, 1>, scalar_prefetch = 0 : i64, scratch_operands = 0 : i64, tpu.core_type = #tpu.core_type<tc>, window_params = [{transform_indices = @transform_0, window_bounds = array<i64: 1, 48, 768>}, {pipeline_mode = #tpu.pipeline_mode<synchronous>, transform_indices = @transform_1, window_bounds = array<i64: 3, 768, 128>}, {transform_indices = @transform_2, window_bounds = array<i64: 1, 32, 128>}, {transform_indices = @transform_3, window_bounds = array<i64: 1, 32, 128>}]} {
    %c0 = arith.constant 0 : index
    %c0_0 = arith.constant 0 : index
    %c0_1 = arith.constant 0 : index
    %0 = vector.load %arg2[%c0, %c0_0, %c0_1] : memref<1x48x768xbf16, #tpu.memory_space<vmem>>, vector<1x32x768xbf16>
    %1 = vector.shape_cast %0 : vector<1x32x768xbf16> to vector<32x768xbf16>
    %c0_2 = arith.constant 0 : index
    %c0_3 = arith.constant 0 : index
    %c0_4 = arith.constant 0 : index
    %2 = vector.load %arg3[%c0_2, %c0_3, %c0_4] : memref<3x768x128xbf16, #tpu.memory_space<vmem>>, vector<1x768x128xbf16>
    %3 = vector.shape_cast %2 : vector<1x768x128xbf16> to vector<768x128xbf16>
    %cst = arith.constant dense<0.000000e+00> : vector<32x128xf32>
    %4 = tpu.matmul %1, %3, %cst {dimension_numbers = #tpu.dot_dimension_numbers<[1], [0], [0], [1], [0, 0, 1, 1], [], []>} : vector<32x768xbf16>, vector<768x128xbf16>, vector<32x128xf32> -> vector<32x128xf32>
    %c0_5 = arith.constant 0 : index
    %c8 = arith.constant 8 : index
    %c0_6 = arith.constant 0 : index
    %5 = vector.load %arg2[%c0_5, %c8, %c0_6] : memref<1x48x768xbf16, #tpu.memory_space<vmem>>, vector<1x32x768xbf16>
    %6 = vector.shape_cast %5 : vector<1x32x768xbf16> to vector<32x768xbf16>
    %c1 = arith.constant 1 : index
    %c0_7 = arith.constant 0 : index
    %c0_8 = arith.constant 0 : index
    %7 = vector.load %arg3[%c1, %c0_7, %c0_8] : memref<3x768x128xbf16, #tpu.memory_space<vmem>>, vector<1x768x128xbf16>
    %8 = vector.shape_cast %7 : vector<1x768x128xbf16> to vector<768x128xbf16>
    %cst_9 = arith.constant dense<0.000000e+00> : vector<32x128xf32>
    %9 = tpu.matmul %6, %8, %cst_9 {dimension_numbers = #tpu.dot_dimension_numbers<[1], [0], [0], [1], [0, 0, 1, 1], [], []>} : vector<32x768xbf16>, vector<768x128xbf16>, vector<32x128xf32> -> vector<32x128xf32>
    %10 = arith.addf %4, %9 : vector<32x128xf32>
    %c0_10 = arith.constant 0 : index
    %c16 = arith.constant 16 : index
    %c0_11 = arith.constant 0 : index
    %11 = vector.load %arg2[%c0_10, %c16, %c0_11] : memref<1x48x768xbf16, #tpu.memory_space<vmem>>, vector<1x32x768xbf16>
    %12 = vector.shape_cast %11 : vector<1x32x768xbf16> to vector<32x768xbf16>
    %c2 = arith.constant 2 : index
    %c0_12 = arith.constant 0 : index
    %c0_13 = arith.constant 0 : index
    %13 = vector.load %arg3[%c2, %c0_12, %c0_13] : memref<3x768x128xbf16, #tpu.memory_space<vmem>>, vector<1x768x128xbf16>
    %14 = vector.shape_cast %13 : vector<1x768x128xbf16> to vector<768x128xbf16>
    %cst_14 = arith.constant dense<0.000000e+00> : vector<32x128xf32>
    %15 = tpu.matmul %12, %14, %cst_14 {dimension_numbers = #tpu.dot_dimension_numbers<[1], [0], [0], [1], [0, 0, 1, 1], [], []>} : vector<32x768xbf16>, vector<768x128xbf16>, vector<32x128xf32> -> vector<32x128xf32>
    %16 = arith.addf %10, %15 : vector<32x128xf32>
    %cst_15 = arith.constant 0.000000e+00 : f32
    %17 = vector.broadcast %cst_15 : f32 to vector<32x128xf32>
    %18 = arith.cmpf oge, %16, %17 : vector<32x128xf32>
    %cst_16 = arith.constant 2.000000e-01 : f32
    %19 = vector.broadcast %cst_16 : f32 to vector<32x128xf32>
    %20 = arith.mulf %19, %16 : vector<32x128xf32>
    %21 = arith.select %18, %16, %20 : vector<32x128xi1>, vector<32x128xf32>
    %c0_17 = arith.constant 0 : index
    %c0_18 = arith.constant 0 : index
    %c0_19 = arith.constant 0 : index
    %22 = vector.load %arg4[%c0_17, %c0_18, %c0_19] : memref<1x32x128xbf16, #tpu.memory_space<vmem>>, vector<1x32x128xbf16>
    %23 = vector.shape_cast %22 : vector<1x32x128xbf16> to vector<32x128xbf16>
    %24 = arith.extf %23 : vector<32x128xbf16> to vector<32x128xf32>
    %25 = arith.addf %21, %24 : vector<32x128xf32>
    %26 = arith.truncf %25 : vector<32x128xf32> to vector<32x128xbf16>
    %c0_20 = arith.constant 0 : index
    %c0_21 = arith.constant 0 : index
    %c0_22 = arith.constant 0 : index
    %27 = vector.load %arg5[%c0_20, %c0_21, %c0_22] : memref<1x32x128xbf16, #tpu.memory_space<vmem>>, vector<1x32x128xbf16>
    %28 = vector.shape_cast %27 : vector<1x32x128xbf16> to vector<32x128xbf16>
    %29 = vector.shape_cast %26 : vector<32x128xbf16> to vector<1x32x128xbf16>
    tpu.vector_store %arg5[%c0_20, %c0_21, %c0_22], %29 {strides = array<i32>} : memref<1x32x128xbf16, #tpu.memory_space<vmem>>, vector<1x32x128xbf16>,
    return
  }
  func.func @transform_0(%arg0: i32, %arg1: i32) -> (i32, i32, i32) {
    %c0_i32 = arith.constant 0 : i32
    %c0_i32_0 = arith.constant 0 : i32
    %c0_i32_1 = arith.constant 0 : i32
    return %arg0, %c0_i32, %c0_i32_0 : i32, i32, i32
  }
  func.func @transform_1(%arg0: i32, %arg1: i32) -> (i32, i32, i32) {
    %c0_i32 = arith.constant 0 : i32
    %c0_i32_0 = arith.constant 0 : i32
    %c0_i32_1 = arith.constant 0 : i32
    %c0_i32_2 = arith.constant 0 : i32
    return %c0_i32, %c0_i32_0, %c0_i32_1 : i32, i32, i32
  }
  func.func @transform_2(%arg0: i32, %arg1: i32) -> (i32, i32, i32) {
    %c0_i32 = arith.constant 0 : i32
    %c0_i32_0 = arith.constant 0 : i32
    return %arg0, %arg1, %c0_i32 : i32, i32, i32
  }
  func.func @transform_3(%arg0: i32, %arg1: i32) -> (i32, i32, i32) {
    %c0_i32 = arith.constant 0 : i32
    %c0_i32_0 = arith.constant 0 : i32
    return %arg0, %arg1, %c0_i32 : i32, i32, i32
  }
}

module attributes {stable_mosaic.version = 11 : i64} {
  func.func @kernel(%arg0: i32, %arg1: i32, %arg2: memref<1x160x384xbf16, #tpu.memory_space<vmem>>, %arg3: memref<3x384x64xbf16, #tpu.memory_space<vmem>>, %arg4: memref<1x128x64xbf16, #tpu.memory_space<vmem>>, %arg5: memref<1x128x64xbf16, #tpu.memory_space<vmem>>) attributes {dimension_semantics = [#tpu.dimension_semantics<parallel>, #tpu.dimension_semantics<parallel>], iteration_bounds = array<i64: 2, 1>, scalar_prefetch = 0 : i64, scratch_operands = 0 : i64, tpu.core_type = #tpu.core_type<tc>, window_params = [{transform_indices = @transform_0, window_bounds = array<i64: 1, 160, 384>}, {pipeline_mode = #tpu.pipeline_mode<synchronous>, transform_indices = @transform_1, window_bounds = array<i64: 3, 384, 64>}, {transform_indices = @transform_2, window_bounds = array<i64: 1, 128, 64>}, {transform_indices = @transform_3, window_bounds = array<i64: 1, 128, 64>}]} {
    %c0 = arith.constant 0 : index
    %c0_0 = arith.constant 0 : index
    %c0_1 = arith.constant 0 : index
    %0 = vector.load %arg2[%c0, %c0_0, %c0_1] : memref<1x160x384xbf16, #tpu.memory_space<vmem>>, vector<1x128x384xbf16>
    %1 = vector.shape_cast %0 : vector<1x128x384xbf16> to vector<128x384xbf16>
    %c0_2 = arith.constant 0 : index
    %c0_3 = arith.constant 0 : index
    %c0_4 = arith.constant 0 : index
    %2 = vector.load %arg3[%c0_2, %c0_3, %c0_4] : memref<3x384x64xbf16, #tpu.memory_space<vmem>>, vector<1x384x64xbf16>
    %3 = vector.shape_cast %2 : vector<1x384x64xbf16> to vector<384x64xbf16>
    %cst = arith.constant dense<0.000000e+00> : vector<128x64xf32>
    %4 = tpu.matmul %1, %3, %cst {dimension_numbers = #tpu.dot_dimension_numbers<[1], [0], [0], [1], [0, 0, 1, 1], [], []>} : vector<128x384xbf16>, vector<384x64xbf16>, vector<128x64xf32> -> vector<128x64xf32>
    %c0_5 = arith.constant 0 : index
    %c16 = arith.constant 16 : index
    %c0_6 = arith.constant 0 : index
    %5 = vector.load %arg2[%c0_5, %c16, %c0_6] : memref<1x160x384xbf16, #tpu.memory_space<vmem>>, vector<1x128x384xbf16>
    %6 = vector.shape_cast %5 : vector<1x128x384xbf16> to vector<128x384xbf16>
    %c1 = arith.constant 1 : index
    %c0_7 = arith.constant 0 : index
    %c0_8 = arith.constant 0 : index
    %7 = vector.load %arg3[%c1, %c0_7, %c0_8] : memref<3x384x64xbf16, #tpu.memory_space<vmem>>, vector<1x384x64xbf16>
    %8 = vector.shape_cast %7 : vector<1x384x64xbf16> to vector<384x64xbf16>
    %cst_9 = arith.constant dense<0.000000e+00> : vector<128x64xf32>
    %9 = tpu.matmul %6, %8, %cst_9 {dimension_numbers = #tpu.dot_dimension_numbers<[1], [0], [0], [1], [0, 0, 1, 1], [], []>} : vector<128x384xbf16>, vector<384x64xbf16>, vector<128x64xf32> -> vector<128x64xf32>
    %10 = arith.addf %4, %9 : vector<128x64xf32>
    %c0_10 = arith.constant 0 : index
    %c32 = arith.constant 32 : index
    %c0_11 = arith.constant 0 : index
    %11 = vector.load %arg2[%c0_10, %c32, %c0_11] : memref<1x160x384xbf16, #tpu.memory_space<vmem>>, vector<1x128x384xbf16>
    %12 = vector.shape_cast %11 : vector<1x128x384xbf16> to vector<128x384xbf16>
    %c2 = arith.constant 2 : index
    %c0_12 = arith.constant 0 : index
    %c0_13 = arith.constant 0 : index
    %13 = vector.load %arg3[%c2, %c0_12, %c0_13] : memref<3x384x64xbf16, #tpu.memory_space<vmem>>, vector<1x384x64xbf16>
    %14 = vector.shape_cast %13 : vector<1x384x64xbf16> to vector<384x64xbf16>
    %cst_14 = arith.constant dense<0.000000e+00> : vector<128x64xf32>
    %15 = tpu.matmul %12, %14, %cst_14 {dimension_numbers = #tpu.dot_dimension_numbers<[1], [0], [0], [1], [0, 0, 1, 1], [], []>} : vector<128x384xbf16>, vector<384x64xbf16>, vector<128x64xf32> -> vector<128x64xf32>
    %16 = arith.addf %10, %15 : vector<128x64xf32>
    %cst_15 = arith.constant 0.000000e+00 : f32
    %17 = vector.broadcast %cst_15 : f32 to vector<128x64xf32>
    %18 = arith.cmpf oge, %16, %17 : vector<128x64xf32>
    %cst_16 = arith.constant 2.000000e-01 : f32
    %19 = vector.broadcast %cst_16 : f32 to vector<128x64xf32>
    %20 = arith.mulf %19, %16 : vector<128x64xf32>
    %21 = arith.select %18, %16, %20 : vector<128x64xi1>, vector<128x64xf32>
    %c0_17 = arith.constant 0 : index
    %c0_18 = arith.constant 0 : index
    %c0_19 = arith.constant 0 : index
    %22 = vector.load %arg4[%c0_17, %c0_18, %c0_19] : memref<1x128x64xbf16, #tpu.memory_space<vmem>>, vector<1x128x64xbf16>
    %23 = vector.shape_cast %22 : vector<1x128x64xbf16> to vector<128x64xbf16>
    %24 = arith.extf %23 : vector<128x64xbf16> to vector<128x64xf32>
    %25 = arith.addf %21, %24 : vector<128x64xf32>
    %26 = arith.truncf %25 : vector<128x64xf32> to vector<128x64xbf16>
    %c0_20 = arith.constant 0 : index
    %c0_21 = arith.constant 0 : index
    %c0_22 = arith.constant 0 : index
    %27 = vector.load %arg5[%c0_20, %c0_21, %c0_22] : memref<1x128x64xbf16, #tpu.memory_space<vmem>>, vector<1x128x64xbf16>
    %28 = vector.shape_cast %27 : vector<1x128x64xbf16> to vector<128x64xbf16>
    %29 = vector.shape_cast %26 : vector<128x64xbf16> to vector<1x128x64xbf16>
    tpu.vector_store %arg5[%c0_20, %c0_21, %c0_22], %29 {strides = array<i32>} : memref<1x128x64xbf16, #tpu.memory_space<vmem>>, vector<1x128x64xbf16>,
    return
  }
  func.func @transform_0(%arg0: i32, %arg1: i32) -> (i32, i32, i32) {
    %c0_i32 = arith.constant 0 : i32
    %c0_i32_0 = arith.constant 0 : i32
    %c0_i32_1 = arith.constant 0 : i32
    return %arg0, %c0_i32, %c0_i32_0 : i32, i32, i32
  }
  func.func @transform_1(%arg0: i32, %arg1: i32) -> (i32, i32, i32) {
    %c0_i32 = arith.constant 0 : i32
    %c0_i32_0 = arith.constant 0 : i32
    %c0_i32_1 = arith.constant 0 : i32
    %c0_i32_2 = arith.constant 0 : i32
    return %c0_i32, %c0_i32_0, %c0_i32_1 : i32, i32, i32
  }
  func.func @transform_2(%arg0: i32, %arg1: i32) -> (i32, i32, i32) {
    %c0_i32 = arith.constant 0 : i32
    %c0_i32_0 = arith.constant 0 : i32
    return %arg0, %arg1, %c0_i32 : i32, i32, i32
  }
  func.func @transform_3(%arg0: i32, %arg1: i32) -> (i32, i32, i32) {
    %c0_i32 = arith.constant 0 : i32
    %c0_i32_0 = arith.constant 0 : i32
    return %arg0, %arg1, %c0_i32 : i32, i32, i32
  }
}

module attributes {stable_mosaic.version = 11 : i64} {
  func.func @kernel(%arg0: i32, %arg1: i32, %arg2: memref<1x432x192xbf16, #tpu.memory_space<vmem>>, %arg3: memref<3x192x32xbf16, #tpu.memory_space<vmem>>, %arg4: memref<1x384x32xbf16, #tpu.memory_space<vmem>>, %arg5: memref<1x384x32xbf16, #tpu.memory_space<vmem>>) attributes {dimension_semantics = [#tpu.dimension_semantics<parallel>, #tpu.dimension_semantics<parallel>], iteration_bounds = array<i64: 2, 1>, scalar_prefetch = 0 : i64, scratch_operands = 0 : i64, tpu.core_type = #tpu.core_type<tc>, window_params = [{transform_indices = @transform_0, window_bounds = array<i64: 1, 432, 192>}, {pipeline_mode = #tpu.pipeline_mode<synchronous>, transform_indices = @transform_1, window_bounds = array<i64: 3, 192, 32>}, {transform_indices = @transform_2, window_bounds = array<i64: 1, 384, 32>}, {transform_indices = @transform_3, window_bounds = array<i64: 1, 384, 32>}]} {
    %c0 = arith.constant 0 : index
    %c0_0 = arith.constant 0 : index
    %c0_1 = arith.constant 0 : index
    %0 = vector.load %arg2[%c0, %c0_0, %c0_1] : memref<1x432x192xbf16, #tpu.memory_space<vmem>>, vector<1x384x192xbf16>
    %1 = vector.shape_cast %0 : vector<1x384x192xbf16> to vector<384x192xbf16>
    %c0_2 = arith.constant 0 : index
    %c0_3 = arith.constant 0 : index
    %c0_4 = arith.constant 0 : index
    %2 = vector.load %arg3[%c0_2, %c0_3, %c0_4] : memref<3x192x32xbf16, #tpu.memory_space<vmem>>, vector<1x192x32xbf16>
    %3 = vector.shape_cast %2 : vector<1x192x32xbf16> to vector<192x32xbf16>
    %cst = arith.constant dense<0.000000e+00> : vector<384x32xf32>
    %4 = tpu.matmul %1, %3, %cst {dimension_numbers = #tpu.dot_dimension_numbers<[1], [0], [0], [1], [0, 0, 1, 1], [], []>} : vector<384x192xbf16>, vector<192x32xbf16>, vector<384x32xf32> -> vector<384x32xf32>
    %c0_5 = arith.constant 0 : index
    %c24 = arith.constant 24 : index
    %c0_6 = arith.constant 0 : index
    %5 = vector.load %arg2[%c0_5, %c24, %c0_6] : memref<1x432x192xbf16, #tpu.memory_space<vmem>>, vector<1x384x192xbf16>
    %6 = vector.shape_cast %5 : vector<1x384x192xbf16> to vector<384x192xbf16>
    %c1 = arith.constant 1 : index
    %c0_7 = arith.constant 0 : index
    %c0_8 = arith.constant 0 : index
    %7 = vector.load %arg3[%c1, %c0_7, %c0_8] : memref<3x192x32xbf16, #tpu.memory_space<vmem>>, vector<1x192x32xbf16>
    %8 = vector.shape_cast %7 : vector<1x192x32xbf16> to vector<192x32xbf16>
    %cst_9 = arith.constant dense<0.000000e+00> : vector<384x32xf32>
    %9 = tpu.matmul %6, %8, %cst_9 {dimension_numbers = #tpu.dot_dimension_numbers<[1], [0], [0], [1], [0, 0, 1, 1], [], []>} : vector<384x192xbf16>, vector<192x32xbf16>, vector<384x32xf32> -> vector<384x32xf32>
    %10 = arith.addf %4, %9 : vector<384x32xf32>
    %c0_10 = arith.constant 0 : index
    %c48 = arith.constant 48 : index
    %c0_11 = arith.constant 0 : index
    %11 = vector.load %arg2[%c0_10, %c48, %c0_11] : memref<1x432x192xbf16, #tpu.memory_space<vmem>>, vector<1x384x192xbf16>
    %12 = vector.shape_cast %11 : vector<1x384x192xbf16> to vector<384x192xbf16>
    %c2 = arith.constant 2 : index
    %c0_12 = arith.constant 0 : index
    %c0_13 = arith.constant 0 : index
    %13 = vector.load %arg3[%c2, %c0_12, %c0_13] : memref<3x192x32xbf16, #tpu.memory_space<vmem>>, vector<1x192x32xbf16>
    %14 = vector.shape_cast %13 : vector<1x192x32xbf16> to vector<192x32xbf16>
    %cst_14 = arith.constant dense<0.000000e+00> : vector<384x32xf32>
    %15 = tpu.matmul %12, %14, %cst_14 {dimension_numbers = #tpu.dot_dimension_numbers<[1], [0], [0], [1], [0, 0, 1, 1], [], []>} : vector<384x192xbf16>, vector<192x32xbf16>, vector<384x32xf32> -> vector<384x32xf32>
    %16 = arith.addf %10, %15 : vector<384x32xf32>
    %cst_15 = arith.constant 0.000000e+00 : f32
    %17 = vector.broadcast %cst_15 : f32 to vector<384x32xf32>
    %18 = arith.cmpf oge, %16, %17 : vector<384x32xf32>
    %cst_16 = arith.constant 2.000000e-01 : f32
    %19 = vector.broadcast %cst_16 : f32 to vector<384x32xf32>
    %20 = arith.mulf %19, %16 : vector<384x32xf32>
    %21 = arith.select %18, %16, %20 : vector<384x32xi1>, vector<384x32xf32>
    %c0_17 = arith.constant 0 : index
    %c0_18 = arith.constant 0 : index
    %c0_19 = arith.constant 0 : index
    %22 = vector.load %arg4[%c0_17, %c0_18, %c0_19] : memref<1x384x32xbf16, #tpu.memory_space<vmem>>, vector<1x384x32xbf16>
    %23 = vector.shape_cast %22 : vector<1x384x32xbf16> to vector<384x32xbf16>
    %24 = arith.extf %23 : vector<384x32xbf16> to vector<384x32xf32>
    %25 = arith.addf %21, %24 : vector<384x32xf32>
    %26 = arith.truncf %25 : vector<384x32xf32> to vector<384x32xbf16>
    %c0_20 = arith.constant 0 : index
    %c0_21 = arith.constant 0 : index
    %c0_22 = arith.constant 0 : index
    %27 = vector.load %arg5[%c0_20, %c0_21, %c0_22] : memref<1x384x32xbf16, #tpu.memory_space<vmem>>, vector<1x384x32xbf16>
    %28 = vector.shape_cast %27 : vector<1x384x32xbf16> to vector<384x32xbf16>
    %29 = vector.shape_cast %26 : vector<384x32xbf16> to vector<1x384x32xbf16>
    tpu.vector_store %arg5[%c0_20, %c0_21, %c0_22], %29 {strides = array<i32>} : memref<1x384x32xbf16, #tpu.memory_space<vmem>>, vector<1x384x32xbf16>,
    return
  }
  func.func @transform_0(%arg0: i32, %arg1: i32) -> (i32, i32, i32) {
    %c0_i32 = arith.constant 0 : i32
    %c0_i32_0 = arith.constant 0 : i32
    %c0_i32_1 = arith.constant 0 : i32
    return %arg0, %c0_i32, %c0_i32_0 : i32, i32, i32
  }
  func.func @transform_1(%arg0: i32, %arg1: i32) -> (i32, i32, i32) {
    %c0_i32 = arith.constant 0 : i32
    %c0_i32_0 = arith.constant 0 : i32
    %c0_i32_1 = arith.constant 0 : i32
    %c0_i32_2 = arith.constant 0 : i32
    return %c0_i32, %c0_i32_0, %c0_i32_1 : i32, i32, i32
  }
  func.func @transform_2(%arg0: i32, %arg1: i32) -> (i32, i32, i32) {
    %c0_i32 = arith.constant 0 : i32
    %c0_i32_0 = arith.constant 0 : i32
    return %arg0, %arg1, %c0_i32 : i32, i32, i32
  }
  func.func @transform_3(%arg0: i32, %arg1: i32) -> (i32, i32, i32) {
    %c0_i32 = arith.constant 0 : i32
    %c0_i32_0 = arith.constant 0 : i32
    return %arg0, %arg1, %c0_i32 : i32, i32, i32
  }
}

module attributes {stable_mosaic.version = 11 : i64} {
  func.func @kernel(%arg0: i32, %arg1: i32, %arg2: memref<1x432x96xbf16, #tpu.memory_space<vmem>>, %arg3: memref<3x96x32xbf16, #tpu.memory_space<vmem>>, %arg4: memref<1x384x32xbf16, #tpu.memory_space<vmem>>) attributes {dimension_semantics = [#tpu.dimension_semantics<parallel>, #tpu.dimension_semantics<parallel>], iteration_bounds = array<i64: 2, 1>, scalar_prefetch = 0 : i64, scratch_operands = 0 : i64, tpu.core_type = #tpu.core_type<tc>, window_params = [{transform_indices = @transform_0, window_bounds = array<i64: 1, 432, 96>}, {pipeline_mode = #tpu.pipeline_mode<synchronous>, transform_indices = @transform_1, window_bounds = array<i64: 3, 96, 32>}, {transform_indices = @transform_2, window_bounds = array<i64: 1, 384, 32>}]} {
    %c0 = arith.constant 0 : index
    %c0_0 = arith.constant 0 : index
    %c0_1 = arith.constant 0 : index
    %0 = vector.load %arg2[%c0, %c0_0, %c0_1] : memref<1x432x96xbf16, #tpu.memory_space<vmem>>, vector<1x384x96xbf16>
    %1 = vector.shape_cast %0 : vector<1x384x96xbf16> to vector<384x96xbf16>
    %c0_2 = arith.constant 0 : index
    %c0_3 = arith.constant 0 : index
    %c0_4 = arith.constant 0 : index
    %2 = vector.load %arg3[%c0_2, %c0_3, %c0_4] : memref<3x96x32xbf16, #tpu.memory_space<vmem>>, vector<1x96x32xbf16>
    %3 = vector.shape_cast %2 : vector<1x96x32xbf16> to vector<96x32xbf16>
    %cst = arith.constant dense<0.000000e+00> : vector<384x32xf32>
    %4 = tpu.matmul %1, %3, %cst {dimension_numbers = #tpu.dot_dimension_numbers<[1], [0], [0], [1], [0, 0, 1, 1], [], []>} : vector<384x96xbf16>, vector<96x32xbf16>, vector<384x32xf32> -> vector<384x32xf32>
    %c0_5 = arith.constant 0 : index
    %c24 = arith.constant 24 : index
    %c0_6 = arith.constant 0 : index
    %5 = vector.load %arg2[%c0_5, %c24, %c0_6] : memref<1x432x96xbf16, #tpu.memory_space<vmem>>, vector<1x384x96xbf16>
    %6 = vector.shape_cast %5 : vector<1x384x96xbf16> to vector<384x96xbf16>
    %c1 = arith.constant 1 : index
    %c0_7 = arith.constant 0 : index
    %c0_8 = arith.constant 0 : index
    %7 = vector.load %arg3[%c1, %c0_7, %c0_8] : memref<3x96x32xbf16, #tpu.memory_space<vmem>>, vector<1x96x32xbf16>
    %8 = vector.shape_cast %7 : vector<1x96x32xbf16> to vector<96x32xbf16>
    %cst_9 = arith.constant dense<0.000000e+00> : vector<384x32xf32>
    %9 = tpu.matmul %6, %8, %cst_9 {dimension_numbers = #tpu.dot_dimension_numbers<[1], [0], [0], [1], [0, 0, 1, 1], [], []>} : vector<384x96xbf16>, vector<96x32xbf16>, vector<384x32xf32> -> vector<384x32xf32>
    %10 = arith.addf %4, %9 : vector<384x32xf32>
    %c0_10 = arith.constant 0 : index
    %c48 = arith.constant 48 : index
    %c0_11 = arith.constant 0 : index
    %11 = vector.load %arg2[%c0_10, %c48, %c0_11] : memref<1x432x96xbf16, #tpu.memory_space<vmem>>, vector<1x384x96xbf16>
    %12 = vector.shape_cast %11 : vector<1x384x96xbf16> to vector<384x96xbf16>
    %c2 = arith.constant 2 : index
    %c0_12 = arith.constant 0 : index
    %c0_13 = arith.constant 0 : index
    %13 = vector.load %arg3[%c2, %c0_12, %c0_13] : memref<3x96x32xbf16, #tpu.memory_space<vmem>>, vector<1x96x32xbf16>
    %14 = vector.shape_cast %13 : vector<1x96x32xbf16> to vector<96x32xbf16>
    %cst_14 = arith.constant dense<0.000000e+00> : vector<384x32xf32>
    %15 = tpu.matmul %12, %14, %cst_14 {dimension_numbers = #tpu.dot_dimension_numbers<[1], [0], [0], [1], [0, 0, 1, 1], [], []>} : vector<384x96xbf16>, vector<96x32xbf16>, vector<384x32xf32> -> vector<384x32xf32>
    %16 = arith.addf %10, %15 : vector<384x32xf32>
    %cst_15 = arith.constant 0.000000e+00 : f32
    %17 = vector.broadcast %cst_15 : f32 to vector<384x32xf32>
    %18 = arith.cmpf oge, %16, %17 : vector<384x32xf32>
    %cst_16 = arith.constant 2.000000e-01 : f32
    %19 = vector.broadcast %cst_16 : f32 to vector<384x32xf32>
    %20 = arith.mulf %19, %16 : vector<384x32xf32>
    %21 = arith.select %18, %16, %20 : vector<384x32xi1>, vector<384x32xf32>
    %22 = arith.truncf %21 : vector<384x32xf32> to vector<384x32xbf16>
    %c0_17 = arith.constant 0 : index
    %c0_18 = arith.constant 0 : index
    %c0_19 = arith.constant 0 : index
    %23 = vector.load %arg4[%c0_17, %c0_18, %c0_19] : memref<1x384x32xbf16, #tpu.memory_space<vmem>>, vector<1x384x32xbf16>
    %24 = vector.shape_cast %23 : vector<1x384x32xbf16> to vector<384x32xbf16>
    %25 = vector.shape_cast %22 : vector<384x32xbf16> to vector<1x384x32xbf16>
    tpu.vector_store %arg4[%c0_17, %c0_18, %c0_19], %25 {strides = array<i32>} : memref<1x384x32xbf16, #tpu.memory_space<vmem>>, vector<1x384x32xbf16>,
    return
  }
  func.func @transform_0(%arg0: i32, %arg1: i32) -> (i32, i32, i32) {
    %c0_i32 = arith.constant 0 : i32
    %c0_i32_0 = arith.constant 0 : i32
    %c0_i32_1 = arith.constant 0 : i32
    return %arg0, %c0_i32, %c0_i32_0 : i32, i32, i32
  }
  func.func @transform_1(%arg0: i32, %arg1: i32) -> (i32, i32, i32) {
    %c0_i32 = arith.constant 0 : i32
    %c0_i32_0 = arith.constant 0 : i32
    %c0_i32_1 = arith.constant 0 : i32
    %c0_i32_2 = arith.constant 0 : i32
    return %c0_i32, %c0_i32_0, %c0_i32_1 : i32, i32, i32
  }
  func.func @transform_2(%arg0: i32, %arg1: i32) -> (i32, i32, i32) {
    %c0_i32 = arith.constant 0 : i32
    %c0_i32_0 = arith.constant 0 : i32
    return %arg0, %arg1, %c0_i32 : i32, i32, i32
  }
}

module attributes {stable_mosaic.version = 11 : i64} {
  func.func @kernel(%arg0: i32, %arg1: i32, %arg2: memref<1x432x96xbf16, #tpu.memory_space<vmem>>, %arg3: memref<3x96x32xbf16, #tpu.memory_space<vmem>>, %arg4: memref<1x32xf32, #tpu.memory_space<vmem>>, %arg5: memref<1x384x32xf32, #tpu.memory_space<vmem>>) attributes {dimension_semantics = [#tpu.dimension_semantics<parallel>, #tpu.dimension_semantics<parallel>], iteration_bounds = array<i64: 2, 1>, scalar_prefetch = 0 : i64, scratch_operands = 0 : i64, tpu.core_type = #tpu.core_type<tc>, window_params = [{transform_indices = @transform_0, window_bounds = array<i64: 1, 432, 96>}, {pipeline_mode = #tpu.pipeline_mode<synchronous>, transform_indices = @transform_1, window_bounds = array<i64: 3, 96, 32>}, {pipeline_mode = #tpu.pipeline_mode<synchronous>, transform_indices = @transform_2, window_bounds = array<i64: 1, 32>}, {transform_indices = @transform_3, window_bounds = array<i64: 1, 384, 32>}]} {
    %c0 = arith.constant 0 : index
    %c0_0 = arith.constant 0 : index
    %c0_1 = arith.constant 0 : index
    %0 = vector.load %arg2[%c0, %c0_0, %c0_1] : memref<1x432x96xbf16, #tpu.memory_space<vmem>>, vector<1x384x96xbf16>
    %1 = vector.shape_cast %0 : vector<1x384x96xbf16> to vector<384x96xbf16>
    %c0_2 = arith.constant 0 : index
    %c0_3 = arith.constant 0 : index
    %c0_4 = arith.constant 0 : index
    %2 = vector.load %arg3[%c0_2, %c0_3, %c0_4] : memref<3x96x32xbf16, #tpu.memory_space<vmem>>, vector<1x96x32xbf16>
    %3 = vector.shape_cast %2 : vector<1x96x32xbf16> to vector<96x32xbf16>
    %cst = arith.constant dense<0.000000e+00> : vector<384x32xf32>
    %4 = tpu.matmul %1, %3, %cst {dimension_numbers = #tpu.dot_dimension_numbers<[1], [0], [0], [1], [0, 0, 1, 1], [], []>} : vector<384x96xbf16>, vector<96x32xbf16>, vector<384x32xf32> -> vector<384x32xf32>
    %c0_5 = arith.constant 0 : index
    %c0_6 = arith.constant 0 : index
    %5 = vector.load %arg4[%c0_5, %c0_6] : memref<1x32xf32, #tpu.memory_space<vmem>>, vector<1x32xf32>
    %6 = vector.broadcast %5 : vector<1x32xf32> to vector<384x32xf32>
    %7 = arith.addf %4, %6 : vector<384x32xf32>
    %c0_7 = arith.constant 0 : index
    %c24 = arith.constant 24 : index
    %c0_8 = arith.constant 0 : index
    %8 = vector.load %arg2[%c0_7, %c24, %c0_8] : memref<1x432x96xbf16, #tpu.memory_space<vmem>>, vector<1x384x96xbf16>
    %9 = vector.shape_cast %8 : vector<1x384x96xbf16> to vector<384x96xbf16>
    %c1 = arith.constant 1 : index
    %c0_9 = arith.constant 0 : index
    %c0_10 = arith.constant 0 : index
    %10 = vector.load %arg3[%c1, %c0_9, %c0_10] : memref<3x96x32xbf16, #tpu.memory_space<vmem>>, vector<1x96x32xbf16>
    %11 = vector.shape_cast %10 : vector<1x96x32xbf16> to vector<96x32xbf16>
    %cst_11 = arith.constant dense<0.000000e+00> : vector<384x32xf32>
    %12 = tpu.matmul %9, %11, %cst_11 {dimension_numbers = #tpu.dot_dimension_numbers<[1], [0], [0], [1], [0, 0, 1, 1], [], []>} : vector<384x96xbf16>, vector<96x32xbf16>, vector<384x32xf32> -> vector<384x32xf32>
    %13 = arith.addf %7, %12 : vector<384x32xf32>
    %c0_12 = arith.constant 0 : index
    %c48 = arith.constant 48 : index
    %c0_13 = arith.constant 0 : index
    %14 = vector.load %arg2[%c0_12, %c48, %c0_13] : memref<1x432x96xbf16, #tpu.memory_space<vmem>>, vector<1x384x96xbf16>
    %15 = vector.shape_cast %14 : vector<1x384x96xbf16> to vector<384x96xbf16>
    %c2 = arith.constant 2 : index
    %c0_14 = arith.constant 0 : index
    %c0_15 = arith.constant 0 : index
    %16 = vector.load %arg3[%c2, %c0_14, %c0_15] : memref<3x96x32xbf16, #tpu.memory_space<vmem>>, vector<1x96x32xbf16>
    %17 = vector.shape_cast %16 : vector<1x96x32xbf16> to vector<96x32xbf16>
    %cst_16 = arith.constant dense<0.000000e+00> : vector<384x32xf32>
    %18 = tpu.matmul %15, %17, %cst_16 {dimension_numbers = #tpu.dot_dimension_numbers<[1], [0], [0], [1], [0, 0, 1, 1], [], []>} : vector<384x96xbf16>, vector<96x32xbf16>, vector<384x32xf32> -> vector<384x32xf32>
    %19 = arith.addf %13, %18 : vector<384x32xf32>
    %c0_17 = arith.constant 0 : index
    %c0_18 = arith.constant 0 : index
    %c0_19 = arith.constant 0 : index
    %20 = vector.load %arg5[%c0_17, %c0_18, %c0_19] : memref<1x384x32xf32, #tpu.memory_space<vmem>>, vector<1x384x32xf32>
    %21 = vector.shape_cast %20 : vector<1x384x32xf32> to vector<384x32xf32>
    %22 = vector.shape_cast %19 : vector<384x32xf32> to vector<1x384x32xf32>
    tpu.vector_store %arg5[%c0_17, %c0_18, %c0_19], %22 {strides = array<i32>} : memref<1x384x32xf32, #tpu.memory_space<vmem>>, vector<1x384x32xf32>,
    return
  }
  func.func @transform_0(%arg0: i32, %arg1: i32) -> (i32, i32, i32) {
    %c0_i32 = arith.constant 0 : i32
    %c0_i32_0 = arith.constant 0 : i32
    %c0_i32_1 = arith.constant 0 : i32
    return %arg0, %c0_i32, %c0_i32_0 : i32, i32, i32
  }
  func.func @transform_1(%arg0: i32, %arg1: i32) -> (i32, i32, i32) {
    %c0_i32 = arith.constant 0 : i32
    %c0_i32_0 = arith.constant 0 : i32
    %c0_i32_1 = arith.constant 0 : i32
    %c0_i32_2 = arith.constant 0 : i32
    return %c0_i32, %c0_i32_0, %c0_i32_1 : i32, i32, i32
  }
  func.func @transform_2(%arg0: i32, %arg1: i32) -> (i32, i32) {
    %c0_i32 = arith.constant 0 : i32
    %c0_i32_0 = arith.constant 0 : i32
    %c0_i32_1 = arith.constant 0 : i32
    return %c0_i32, %c0_i32_0 : i32, i32
  }
  func.func @transform_3(%arg0: i32, %arg1: i32) -> (i32, i32, i32) {
    %c0_i32 = arith.constant 0 : i32
    %c0_i32_0 = arith.constant 0 : i32
    return %arg0, %arg1, %c0_i32 : i32, i32, i32
  }
}

</mosaic_0001>

<bundles_post_ra>
// kernel: unet_discriminator_sn.10
= control target key start
LH: loop header
LB: loop body
LE: loop exit
PB: predicated region body
PF: predicated region fallthrough
CT: control target
= control target key end

     0   :  { %s1484_s12 = smov 0   ;;  %s1486_s13 = smov 0   ;;  %s1741_s0 = inlined_call_operand.vmem [shape: bf16[2,432,32], index: 0, kind: input, shape index: {}]   ;;  %s1742_s1 = inlined_call_operand.vmem [shape: bf16[1,32,32], index: 1, kind: input, shape index: {}]   ;;  %s1743_s2 = inlined_call_operand.vmem [shape: f32[1,32], index: 2, kind: input, shape index: {}]   ;;  %s1744_s3 = inlined_call_operand.vmem [shape: bf16[2,384,32], index: 3, kind: output, shape index: {}]  }
   0x1   :  { %s1488_s14 = smov 0  }
   0x2 LB: > { %s25_s15 = sadd.s32 1, %s1458_s13  ;;  %p1154_p0 = scmp.ge.s32.totalorder %s1462_s14, 1  ;;  %s1462_s14 = sphi %s1488_s14, %s13_s14   ;;  %s1458_s13 = sphi %s1486_s13, %s1746_s13   ;;  %s1454_s12 = sphi %s1484_s12, %s1745_s12  }
   0x3   : > { %p27_p1 = scmp.ge.s32.totalorder %s25_s15, 2  ;;  %p151_p2 = scmp.lt.s32.totalorder %s1462_s14, 3 }
   0x5   : > { %s1748_s15 = smov (%p27_p1, %s25_s15), 0  ;;  %p152_p3 = pnand %p1154_p0, %p151_p2 }
   0x6   : > { %v1414_v0 = vld [vmem:[%s1742_s1] sm:$0xff] (!%p152_p3)   ;;  %p179_p4 = scmp.lt.s32.totalorder (!%p152_p3), %s1454_s12, 1  ;;  %v1415_v1 = vld [vmem:[%s1742_s1 + $0x8] sm:$0xff] (!%p152_p3)   ;;  %vm386_vm0 = vcmask (!%p152_p3), 261120   ;;  %vm1020_vm1 = vcmask (!%p152_p3), 257024  }
   0x7   : > { %155 = sbr.rel (%p152_p3) target bundleno = 299 (0x12b), region = 32  ;;  %1332 = vmatprep.subr.bf16.mxu0 (!%p152_p3), %v1414_v0  ;;  %1384 = vmatprep.subr.bf16.mxu1 (!%p152_p3), %v1414_v0  ;;  %v1567_v26 = vld [vmem:[%s1743_s2] ss:$0 sm:$0xff] (!%p152_p3) }
   0x8   : > { %1333 = vmatpush3.bf16.msra.mxu0 (!%p152_p3), %v1414_v0  ;;  %1386 = vmatpush3.bf16.msra.mxu1 (!%p152_p3), %v1414_v0 }
   0x9   : > { %1334 = vmatprep.subr.bf16.mxu0 (!%p152_p3), %v1415_v1  ;;  %1385 = vmatprep.subr.bf16.mxu1 (!%p152_p3), %v1415_v1 }
   0xc   : > { %1335 = vmatpush3.bf16.msra.mxu0 (!%p152_p3), %v1415_v1  ;;  %1387 = vmatpush3.bf16.msra.mxu1 (!%p152_p3), %v1415_v1 }
   0xe   : > { %s1750_s12 = smov (!%p179_p4, %s1454_s12), 1 }
   0xf   : > { %s1388_s20 = smul.u32 216, %s1750_s12 }
  0x10   : > { %s1389_s26 = smul.u32 192, %s1750_s12 }
  0x11   : > { %s1514_s23 = scalar_lea.vmem %s1741_s0, %s1388_s20 }
  0x12   : > { %v1416_v2 = vld [vmem:[%s1514_s23] sm:$0xff]   ;;  %v1418_v4 = vld [vmem:[%s1514_s23 + $0x8] sm:$0xff]   ;;  %v1420_v6 = vld [vmem:[%s1514_s23 + $0x10] sm:$0xff]   ;;  %s1578_s29 = scalar_lea.vmem %s1744_s3, %s1389_s26 }
  0x13   : > { %v1417_v3 = vld [vmem:[%s1514_s23 + $0x60] sm:$0xff]   ;;  %1336 = vmatprep.mubr.msk.bf16.mxu0 %vm386_vm0, %v1416_v2  ;;  %v1419_v5 = vld [vmem:[%s1514_s23 + $0x68] sm:$0xff]   ;;  %v1421_v7 = vld [vmem:[%s1514_s23 + $0x70] sm:$0xff]  }
  0x14   : > { %1360 = vmatprep.mubr.msk.bf16.mxu1 %vm386_vm0, %v1417_v3  ;;  %1337 = vmatmul.mubr.msk.bf16.vlgmr.msra.gmra.mrb[0].mxu0 %vm386_vm0, %v1418_v4  ;;  %v1422_v8 = vld [vmem:[%s1514_s23 + $0x18] sm:$0xff]   ;;  %v1424_v10 = vld [vmem:[%s1514_s23 + $0x20] sm:$0xff]   ;;  %v1426_v12 = vld [vmem:[%s1514_s23 + $0x28] sm:$0xff]  }
  0x15   : > { %1361 = vmatmul.mubr.msk.bf16.vlgmr.msra.gmra.mrb[0].mxu1 %vm386_vm0, %v1419_v5  ;;  %1340 = vmatprep.mubr.msk.bf16.mxu0 %vm386_vm0, %v1420_v6  ;;  %v1423_v9 = vld [vmem:[%s1514_s23 + $0x78] sm:$0xff]   ;;  %v1425_v11 = vld [vmem:[%s1514_s23 + $0x80] sm:$0xff]   ;;  %v1427_v13 = vld [vmem:[%s1514_s23 + $0x88] sm:$0xff]  }
  0x16   : > { %1364 = vmatprep.mubr.msk.bf16.mxu1 %vm386_vm0, %v1421_v7  ;;  %v1428_v14 = vld [vmem:[%s1514_s23 + $0x30] sm:$0xff]   ;;  %v1430_v16 = vld [vmem:[%s1514_s23 + $0x38] sm:$0xff]   ;;  %v1432_v18 = vld [vmem:[%s1514_s23 + $0x40] sm:$0xff]  }
  0x17   : > { %v1429_v15 = vld [vmem:[%s1514_s23 + $0x90] sm:$0xff]   ;;  %v1431_v17 = vld [vmem:[%s1514_s23 + $0x98] sm:$0xff]   ;;  %v1433_v19 = vld [vmem:[%s1514_s23 + $0xa0] sm:$0xff]  }
  0x18   : > { %v1434_v20 = vld [vmem:[%s1514_s23 + $0x48] sm:$0xff]   ;;  %v1436_v22 = vld [vmem:[%s1514_s23 + $0x50] sm:$0xff]   ;;  %v1438_v24 = vld [vmem:[%s1514_s23 + $0x58] sm:$0xff]  }
  0x19   : > { %v1435_v21 = vld [vmem:[%s1514_s23 + $0xa8] sm:$0xff]   ;;  %v1437_v23 = vld [vmem:[%s1514_s23 + $0xb0] sm:$0xff]   ;;  %v1439_v25 = vld [vmem:[%s1514_s23 + $0xb8] sm:$0xff]  }
  0x1c   : > { %1341 = vmatmul.mubr.msk.bf16.gmra.mrb[4].mxu0 %vm386_vm0, %v1422_v8 }
  0x1d   : > { %1365 = vmatmul.mubr.msk.bf16.gmra.mrb[4].mxu1 %vm386_vm0, %v1423_v9  ;;  %1344 = vmatprep.mubr.msk.bf16.mxu0 %vm386_vm0, %v1424_v10 }
  0x1e   : > { %1368 = vmatprep.mubr.msk.bf16.mxu1 %vm386_vm0, %v1425_v11 }
  0x24   : > { %1345 = vmatmul.mubr.msk.bf16.gmra.mrb[8].mxu0 %vm386_vm0, %v1426_v12 }
  0x25   : > { %1369 = vmatmul.mubr.msk.bf16.gmra.mrb[8].mxu1 %vm386_vm0, %v1427_v13  ;;  %1348 = vmatprep.mubr.msk.bf16.mxu0 %vm386_vm0, %v1428_v14 }
  0x26   : > { %1372 = vmatprep.mubr.msk.bf16.mxu1 %vm386_vm0, %v1429_v15 }
  0x2c   : > { %1349 = vmatmul.mubr.msk.bf16.gmra.mrb[12].mxu0 %vm386_vm0, %v1430_v16 }
  0x2d   : > { %1373 = vmatmul.mubr.msk.bf16.gmra.mrb[12].mxu1 %vm386_vm0, %v1431_v17  ;;  %1352 = vmatprep.mubr.msk.bf16.mxu0 %vm386_vm0, %v1432_v18 }
  0x2e   : > { %1376 = vmatprep.mubr.msk.bf16.mxu1 %vm386_vm0, %v1433_v19 }
  0x34   : > { %1353 = vmatmul.mubr.msk.bf16.gmra.mrb[16].mxu0 %vm386_vm0, %v1434_v20 }
  0x35   : > { %1377 = vmatmul.mubr.msk.bf16.gmra.mrb[16].mxu1 %vm386_vm0, %v1435_v21  ;;  %1356 = vmatprep.mubr.msk.bf16.mxu0 %vm386_vm0, %v1436_v22 }
  0x36   : > { %1380 = vmatprep.mubr.msk.bf16.mxu1 %vm386_vm0, %v1437_v23 }
  0x3c   : > { %1357 = vmatmul.mubr.msk.bf16.gmra.mrb[20].mxu0 %vm386_vm0, %v1438_v24 }
  0x3d   : > { %1381 = vmatmul.mubr.msk.bf16.gmra.mrb[20].mxu1 %vm386_vm0, %v1439_v25 }
  0xe7   : > { %v1338_v27 = vpop.f32.mrb[0].mxu0 }
  0xe8   : > { %v502_v28 = vadd.f32 %v1338_v27, %v1567_v26  ;;  %v1362_v29 = vpop.f32.mrb[0].mxu1  ;;  %v493_v30 = vpop.f32.mrb[1].mxu0 }
  0xe9   : > { %v598_v31 = vadd.f32 %v1362_v29, %v1567_v26  ;;  %v494_v32 = vadd.f32 %v1567_v26, %v493_v30  ;;  %v589_v33 = vpop.f32.mrb[1].mxu1  ;;  %v1339_v34 = vpop.f32.mrb[2].mxu0 }
  0xea   : > { %vm686_vm2 = vcmp.ge.f32.partialorder %v502_v28, 0.0  ;;  %v734_v35 = vmul.f32 0.2, %v502_v28  ;;  %v590_v36 = vadd.f32 %v1567_v26, %v589_v33  ;;  %v505_v37 = vadd.f32 %v1339_v34, %v1567_v26  ;;  %v1363_v38 = vpop.f32.mrb[2].mxu1  ;;  %v496_v39 = vpop.f32.mrb[3].mxu0 }
  0xeb   : > { %vm710_vm3 = vcmp.ge.f32.partialorder %v598_v31, 0.0  ;;  %v758_v40 = vmul.f32 0.2, %v598_v31  ;;  %vm684_vm4 = vcmp.ge.f32.partialorder %v494_v32, 0.0  ;;  %v732_v41 = vmul.f32 0.2, %v494_v32 }
  0xec   : > { %v782_v42 = vsel %vm686_vm2, %v502_v28, %v734_v35  ;;  %vm708_vm5 = vcmp.ge.f32.partialorder %v590_v36, 0.0  ;;  %v756_v43 = vmul.f32 0.2, %v590_v36  ;;  %vm687_vm6 = vcmp.ge.f32.partialorder %v505_v37, 0.0  ;;  %v592_v44 = vpop.f32.mrb[3].mxu1 }
  0xed   : > { %v1260_v45 = vpack.c.bf16 %v782_v42, %v782_v42  ;;  %v806_v46 = vsel %vm710_vm3, %v598_v31, %v758_v40  ;;  %v780_v47 = vsel %vm684_vm4, %v494_v32, %v732_v41  ;;  %v735_v48 = vmul.f32 0.2, %v505_v37 }
  0xee   : > { %v1284_v49 = vpack.c.bf16 %v806_v46, %v806_v46  ;;  %v1258_v50 = vpack.c.bf16 %v780_v47, %v780_v47  ;;  %v804_v51 = vsel %vm708_vm5, %v590_v36, %v756_v43  ;;  %v601_v52 = vadd.f32 %v1363_v38, %v1567_v26 }
  0xef   : > { %1023 = vst.msk [vmem:[%s1578_s29 + $0x8] sm:$0xf] %vm1020_vm1, %v1260_v45  ;;  %v1282_v53 = vpack.c.bf16 %v804_v51, %v804_v51  ;;  %v783_v54 = vsel %vm687_vm6, %v505_v37, %v735_v48  ;;  %v497_v55 = vadd.f32 %v1567_v26, %v496_v39  ;;  %v593_v56 = vadd.f32 %v1567_v26, %v592_v44  ;;  %v1342_v57 = vpop.f32.mrb[4].mxu0 }
  0xf0   : > { %1047 = vst.msk [vmem:[%s1578_s29 + $0x68] sm:$0xf] %vm1020_vm1, %v1284_v49  ;;  %1021 = vst.msk [vmem:[%s1578_s29] sm:$0xf] %vm1020_vm1, %v1258_v50  ;;  %v1261_v58 = vpack.c.bf16 %v783_v54, %v783_v54  ;;  %vm711_vm7 = vcmp.ge.f32.partialorder %v601_v52, 0.0  ;;  %v518_v60 = vadd.f32 %v1342_v57, %v1567_v26  ;;  %v1366_v61 = vpop.f32.mrb[4].mxu1 }
  0xf1   : > { %v759_v59 = vmul.f32 0.2, %v601_v52  ;;  %v509_v62 = vpop.f32.mrb[5].mxu0  ;;  %1045 = vst.msk [vmem:[%s1578_s29 + $0x60] sm:$0xf] %vm1020_vm1, %v1282_v53  ;;  %vm685_vm8 = vcmp.ge.f32.partialorder %v497_v55, 0.0  ;;  %v614_v3 = vadd.f32 %v1366_v61, %v1567_v26 }
  0xf2   : > { %v733_v63 = vmul.f32 0.2, %v497_v55  ;;  %vm709_vm9 = vcmp.ge.f32.partialorder %v593_v56, 0.0  ;;  %v757_v0 = vmul.f32 0.2, %v593_v56  ;;  %vm690_vm10 = vcmp.ge.f32.partialorder %v518_v60, 0.0 }
  0xf3   : > { %1024 = vst.msk [vmem:[%s1578_s29 + $0xc] sm:$0xf] %vm1020_vm1, %v1261_v58  ;;  %v807_v1 = vsel %vm711_vm7, %v601_v52, %v759_v59  ;;  %v738_v2 = vmul.f32 0.2, %v518_v60  ;;  %v605_v4 = vpop.f32.mrb[5].mxu1  ;;  %v1343_v5 = vpop.f32.mrb[6].mxu0  ;;  %v510_v9 = vadd.f32 %v1567_v26, %v509_v62 }
  0xf4   : > { %v1285_v6 = vpack.c.bf16 %v807_v1, %v807_v1  ;;  %v781_v7 = vsel %vm685_vm8, %v497_v55, %v733_v63  ;;  %v805_v8 = vsel %vm709_vm9, %v593_v56, %v757_v0  ;;  %v1367_v10 = vpop.f32.mrb[6].mxu1  ;;  %v512_v11 = vpop.f32.mrb[7].mxu0  ;;  %vm714_vm11 = vcmp.ge.f32.partialorder %v614_v3, 0.0 }
  0xf5   : > { %v1259_v12 = vpack.c.bf16 %v781_v7, %v781_v7  ;;  %v1283_v13 = vpack.c.bf16 %v805_v8, %v805_v8  ;;  %v786_v14 = vsel %vm690_vm10, %v518_v60, %v738_v2  ;;  %v608_v15 = vpop.f32.mrb[7].mxu1  ;;  %v762_v17 = vmul.f32 0.2, %v614_v3 }
  0xf6   : > { %1048 = vst.msk [vmem:[%s1578_s29 + $0x6c] sm:$0xf] %vm1020_vm1, %v1285_v6  ;;  %v1264_v16 = vpack.c.bf16 %v786_v14, %v786_v14  ;;  %vm688_vm12 = vcmp.ge.f32.partialorder %v510_v9, 0.0  ;;  %v736_v18 = vmul.f32 0.2, %v510_v9  ;;  %v606_v19 = vadd.f32 %v1567_v26, %v605_v4 }
  0xf7   : > { %1022 = vst.msk [vmem:[%s1578_s29 + $0x4] sm:$0xf] %vm1020_vm1, %v1259_v12  ;;  %1046 = vst.msk [vmem:[%s1578_s29 + $0x64] sm:$0xf] %vm1020_vm1, %v1283_v13  ;;  %v521_v20 = vadd.f32 %v1343_v5, %v1567_v26  ;;  %v617_v21 = vadd.f32 %v1367_v10, %v1567_v26  ;;  %v513_v22 = vadd.f32 %v1567_v26, %v512_v11  ;;  %v1346_v27 = vpop.f32.mrb[8].mxu0 }
  0xf8   : > { %1027 = vst.msk [vmem:[%s1578_s29 + $0x18] sm:$0xf] %vm1020_vm1, %v1264_v16  ;;  %v810_v23 = vsel %vm714_vm11, %v614_v3, %v762_v17  ;;  %v784_v24 = vsel %vm688_vm12, %v510_v9, %v736_v18  ;;  %v609_v25 = vadd.f32 %v1567_v26, %v608_v15  ;;  %vm712_vm13 = vcmp.ge.f32.partialorder %v606_v19, 0.0  ;;  %v1370_v31 = vpop.f32.mrb[8].mxu1  ;;  %v525_v32 = vpop.f32.mrb[9].mxu0 }
  0xf9   : > { %v1288_v28 = vpack.c.bf16 %v810_v23, %v810_v23  ;;  %v1262_v29 = vpack.c.bf16 %v784_v24, %v784_v24  ;;  %v760_v30 = vmul.f32 0.2, %v606_v19  ;;  %vm691_vm14 = vcmp.ge.f32.partialorder %v521_v20, 0.0  ;;  %v621_v37 = vpop.f32.mrb[9].mxu1  ;;  %v1347_v38 = vpop.f32.mrb[10].mxu0 }
  0xfa   : > { %v739_v33 = vmul.f32 0.2, %v521_v20  ;;  %vm715_vm15 = vcmp.ge.f32.partialorder %v617_v21, 0.0  ;;  %v763_v34 = vmul.f32 0.2, %v617_v21  ;;  %vm689_vm0 = vcmp.ge.f32.partialorder %v513_v22, 0.0 }
  0xfb   : > { %1051 = vst.msk [vmem:[%s1578_s29 + $0x78] sm:$0xf] %vm1020_vm1, %v1288_v28  ;;  %1025 = vst.msk [vmem:[%s1578_s29 + $0x10] sm:$0xf] %vm1020_vm1, %v1262_v29  ;;  %v808_v35 = vsel %vm712_vm13, %v606_v19, %v760_v30  ;;  %v737_v36 = vmul.f32 0.2, %v513_v22  ;;  %v534_v48 = vadd.f32 %v1346_v27, %v1567_v26  ;;  %v630_v52 = vadd.f32 %v1370_v31, %v1567_v26 }
  0xfc   : > { %vm713_vm2 = vcmp.ge.f32.partialorder %v609_v25, 0.0  ;;  %v1286_v39 = vpack.c.bf16 %v808_v35, %v808_v35  ;;  %v787_v40 = vsel %vm691_vm14, %v521_v20, %v739_v33  ;;  %v811_v41 = vsel %vm715_vm15, %v617_v21, %v763_v34  ;;  %v1371_v43 = vpop.f32.mrb[10].mxu1  ;;  %v528_v44 = vpop.f32.mrb[11].mxu0 }
  0xfd   : > { %v761_v42 = vmul.f32 0.2, %v609_v25  ;;  %v1265_v45 = vpack.c.bf16 %v787_v40, %v787_v40  ;;  %v1289_v46 = vpack.c.bf16 %v811_v41, %v811_v41  ;;  %v785_v47 = vsel %vm689_vm0, %v513_v22, %v737_v36  ;;  %v624_v49 = vpop.f32.mrb[11].mxu1 }
  0xfe   : > { %1049 = vst.msk [vmem:[%s1578_s29 + $0x70] sm:$0xf] %vm1020_vm1, %v1286_v39  ;;  %v1263_v50 = vpack.c.bf16 %v785_v47, %v785_v47  ;;  %v526_v53 = vadd.f32 %v1567_v26, %v525_v32  ;;  %vm694_vm3 = vcmp.ge.f32.partialorder %v534_v48, 0.0  ;;  %v742_v55 = vmul.f32 0.2, %v534_v48 }
  0xff   : > { %v809_v51 = vsel %vm713_vm2, %v609_v25, %v761_v42  ;;  %1028 = vst.msk [vmem:[%s1578_s29 + $0x1c] sm:$0xf] %vm1020_vm1, %v1265_v45  ;;  %1052 = vst.msk [vmem:[%s1578_s29 + $0x7c] sm:$0xf] %vm1020_vm1, %v1289_v46  ;;  %v622_v56 = vadd.f32 %v1567_v26, %v621_v37  ;;  %vm718_vm4 = vcmp.ge.f32.partialorder %v630_v52, 0.0  ;;  %v537_v61 = vadd.f32 %v1347_v38, %v1567_v26  ;;  %v1350_v62 = vpop.f32.mrb[12].mxu0 }
 0x100   : > { %v1287_v54 = vpack.c.bf16 %v809_v51, %v809_v51  ;;  %1026 = vst.msk [vmem:[%s1578_s29 + $0x14] sm:$0xf] %vm1020_vm1, %v1263_v50  ;;  %v766_v57 = vmul.f32 0.2, %v630_v52  ;;  %vm692_vm5 = vcmp.ge.f32.partialorder %v526_v53, 0.0  ;;  %v790_v59 = vsel %vm694_vm3, %v534_v48, %v742_v55  ;;  %v1374_v63 = vpop.f32.mrb[12].mxu1 }
 0x101   : > { %v740_v58 = vmul.f32 0.2, %v526_v53  ;;  %vm716_vm6 = vcmp.ge.f32.partialorder %v622_v56, 0.0  ;;  %v764_v60 = vmul.f32 0.2, %v622_v56  ;;  %v1268_v0 = vpack.c.bf16 %v790_v59, %v790_v59  ;;  %v541_v4 = vpop.f32.mrb[13].mxu0 }
 0x102   : > { %1050 = vst.msk [vmem:[%s1578_s29 + $0x74] sm:$0xf] %vm1020_vm1, %v1287_v54  ;;  %v814_v1 = vsel %vm718_vm4, %v630_v52, %v766_v57  ;;  %v633_v3 = vadd.f32 %v1371_v43, %v1567_v26  ;;  %v637_v5 = vpop.f32.mrb[13].mxu1  ;;  %vm695_vm7 = vcmp.ge.f32.partialorder %v537_v61, 0.0  ;;  %v1351_v9 = vpop.f32.mrb[14].mxu0  ;;  %v529_v15 = vadd.f32 %v1567_v26, %v528_v44 }
 0x103   : > { %v788_v2 = vsel %vm692_vm5, %v526_v53, %v740_v58  ;;  %v1292_v6 = vpack.c.bf16 %v814_v1, %v814_v1  ;;  %v812_v8 = vsel %vm716_vm6, %v622_v56, %v764_v60  ;;  %v1375_v10 = vpop.f32.mrb[14].mxu1  ;;  %1031 = vst.msk [vmem:[%s1578_s29 + $0x28] sm:$0xf] %vm1020_vm1, %v1268_v0  ;;  %v743_v12 = vmul.f32 0.2, %v537_v61  ;;  %v544_v14 = vpop.f32.mrb[15].mxu0 }
 0x104   : > { %v1266_v7 = vpack.c.bf16 %v788_v2, %v788_v2  ;;  %v1290_v11 = vpack.c.bf16 %v812_v8, %v812_v8  ;;  %vm719_vm8 = vcmp.ge.f32.partialorder %v633_v3, 0.0  ;;  %v767_v13 = vmul.f32 0.2, %v633_v3  ;;  %v640_v19 = vpop.f32.mrb[15].mxu1 }
 0x105   : > { %1055 = vst.msk [vmem:[%s1578_s29 + $0x88] sm:$0xf] %vm1020_vm1, %v1292_v6  ;;  %v625_v16 = vadd.f32 %v1567_v26, %v624_v49  ;;  %v550_v17 = vadd.f32 %v1350_v62, %v1567_v26  ;;  %v646_v18 = vadd.f32 %v1374_v63, %v1567_v26  ;;  %v791_v20 = vsel %vm695_vm7, %v537_v61, %v743_v12 }
 0x106   : > { %1029 = vst.msk [vmem:[%s1578_s29 + $0x20] sm:$0xf] %vm1020_vm1, %v1266_v7  ;;  %1053 = vst.msk [vmem:[%s1578_s29 + $0x80] sm:$0xf] %vm1020_vm1, %v1290_v11  ;;  %v815_v21 = vsel %vm719_vm8, %v633_v3, %v767_v13  ;;  %v542_v22 = vadd.f32 %v1567_v26, %v541_v4  ;;  %v638_v23 = vadd.f32 %v1567_v26, %v637_v5  ;;  %vm693_vm9 = vcmp.ge.f32.partialorder %v529_v15, 0.0 }
 0x107   : > { %v1269_v24 = vpack.c.bf16 %v791_v20, %v791_v20  ;;  %v1293_v25 = vpack.c.bf16 %v815_v21, %v815_v21  ;;  %v741_v27 = vmul.f32 0.2, %v529_v15  ;;  %vm717_vm10 = vcmp.ge.f32.partialorder %v625_v16, 0.0  ;;  %v1354_v32 = vpop.f32.mrb[16].mxu0 }
 0x108   : > { %v765_v28 = vmul.f32 0.2, %v625_v16  ;;  %vm698_vm11 = vcmp.ge.f32.partialorder %v550_v17, 0.0  ;;  %v746_v29 = vmul.f32 0.2, %v550_v17  ;;  %vm722_vm12 = vcmp.ge.f32.partialorder %v646_v18, 0.0 }
 0x109   : > { %1032 = vst.msk [vmem:[%s1578_s29 + $0x2c] sm:$0xf] %vm1020_vm1, %v1269_v24  ;;  %1056 = vst.msk [vmem:[%s1578_s29 + $0x8c] sm:$0xf] %vm1020_vm1, %v1293_v25  ;;  %v789_v30 = vsel %vm693_vm9, %v529_v15, %v741_v27  ;;  %v770_v31 = vmul.f32 0.2, %v646_v18  ;;  %v553_v48 = vadd.f32 %v1351_v9, %v1567_v26  ;;  %v649_v52 = vadd.f32 %v1375_v10, %v1567_v26 }
 0x10a   : > { %vm696_vm13 = vcmp.ge.f32.partialorder %v542_v22, 0.0  ;;  %v1378_v33 = vpop.f32.mrb[16].mxu1  ;;  %v1267_v34 = vpack.c.bf16 %v789_v30, %v789_v30  ;;  %v813_v35 = vsel %vm717_vm10, %v625_v16, %v765_v28  ;;  %v794_v36 = vsel %vm698_vm11, %v550_v17, %v746_v29  ;;  %v557_v38 = vpop.f32.mrb[17].mxu0 }
 0x10b   : > { %v744_v37 = vmul.f32 0.2, %v542_v22  ;;  %v653_v39 = vpop.f32.mrb[17].mxu1  ;;  %v1291_v40 = vpack.c.bf16 %v813_v35, %v813_v35  ;;  %v1272_v41 = vpack.c.bf16 %v794_v36, %v794_v36  ;;  %v818_v42 = vsel %vm722_vm12, %v646_v18, %v770_v31  ;;  %v1355_v43 = vpop.f32.mrb[18].mxu0 }
 0x10c   : > { %vm720_vm14 = vcmp.ge.f32.partialorder %v638_v23, 0.0  ;;  %v1379_v44 = vpop.f32.mrb[18].mxu1  ;;  %1030 = vst.msk [vmem:[%s1578_s29 + $0x24] sm:$0xf] %vm1020_vm1, %v1267_v34  ;;  %v1296_v45 = vpack.c.bf16 %v818_v42, %v818_v42  ;;  %v768_v47 = vmul.f32 0.2, %v638_v23  ;;  %v545_v53 = vadd.f32 %v1567_v26, %v544_v14 }
 0x10d   : > { %v792_v46 = vsel %vm696_vm13, %v542_v22, %v744_v37  ;;  %v560_v49 = vpop.f32.mrb[19].mxu0  ;;  %v1653_v50 = vpop.f32.mrb[19].mxu1  ;;  %1054 = vst.msk [vmem:[%s1578_s29 + $0x84] sm:$0xf] %vm1020_vm1, %v1291_v40  ;;  %1035 = vst.msk [vmem:[%s1578_s29 + $0x38] sm:$0xf] %vm1020_vm1, %v1272_v41  ;;  %v641_v54 = vadd.f32 %v1567_v26, %v640_v19  ;;  %v566_v57 = vadd.f32 %v1354_v32, %v1567_v26 }
 0x10e   : > { %v1270_v51 = vpack.c.bf16 %v792_v46, %v792_v46  ;;  %1059 = vst.msk [vmem:[%s1578_s29 + $0x98] sm:$0xf] %vm1020_vm1, %v1296_v45  ;;  %v816_v55 = vsel %vm720_vm14, %v638_v23, %v768_v47  ;;  %vm699_vm15 = vcmp.ge.f32.partialorder %v553_v48, 0.0  ;;  %v747_v56 = vmul.f32 0.2, %v553_v48 }
 0x10f   : > { %v1294_v58 = vpack.c.bf16 %v816_v55, %v816_v55  ;;  %vm723_vm0 = vcmp.ge.f32.partialorder %v649_v52, 0.0  ;;  %v771_v59 = vmul.f32 0.2, %v649_v52  ;;  %vm697_vm2 = vcmp.ge.f32.partialorder %v545_v53, 0.0  ;;  %v1358_v63 = vpop.f32.mrb[20].mxu0 }
 0x110   : > { %1033 = vst.msk [vmem:[%s1578_s29 + $0x30] sm:$0xf] %vm1020_vm1, %v1270_v51  ;;  %v795_v60 = vsel %vm699_vm15, %v553_v48, %v747_v56  ;;  %v745_v61 = vmul.f32 0.2, %v545_v53  ;;  %vm721_vm3 = vcmp.ge.f32.partialorder %v641_v54, 0.0  ;;  %vm702_vm4 = vcmp.ge.f32.partialorder %v566_v57, 0.0 }
 0x111   : > { %v769_v62 = vmul.f32 0.2, %v641_v54  ;;  %1057 = vst.msk [vmem:[%s1578_s29 + $0x90] sm:$0xf] %vm1020_vm1, %v1294_v58  ;;  %v1273_v0 = vpack.c.bf16 %v795_v60, %v795_v60  ;;  %v819_v1 = vsel %vm723_vm0, %v649_v52, %v771_v59  ;;  %v750_v2 = vmul.f32 0.2, %v566_v57 }
 0x112   : > { %v1382_v3 = vpop.f32.mrb[20].mxu1  ;;  %v573_v4 = vpop.f32.mrb[21].mxu0  ;;  %v1297_v5 = vpack.c.bf16 %v819_v1, %v819_v1  ;;  %v793_v6 = vsel %vm697_vm2, %v545_v53, %v745_v61  ;;  %v662_v8 = vadd.f32 %v1378_v33, %v1567_v26  ;;  %v558_v14 = vadd.f32 %v1567_v26, %v557_v38 }
 0x113   : > { %v817_v7 = vsel %vm721_vm3, %v641_v54, %v769_v62  ;;  %v669_v9 = vpop.f32.mrb[21].mxu1  ;;  %v1359_v10 = vpop.f32.mrb[22].mxu0  ;;  %1036 = vst.msk [vmem:[%s1578_s29 + $0x3c] sm:$0xf] %vm1020_vm1, %v1273_v0  ;;  %v1271_v11 = vpack.c.bf16 %v793_v6, %v793_v6  ;;  %v798_v13 = vsel %vm702_vm4, %v566_v57, %v750_v2  ;;  %v654_v19 = vadd.f32 %v1567_v26, %v653_v39 }
 0x114   : > { %v1295_v12 = vpack.c.bf16 %v817_v7, %v817_v7  ;;  %v1383_v15 = vpop.f32.mrb[22].mxu1  ;;  %v1674_v16 = vpop.f32.mrb[23].mxu0  ;;  %1060 = vst.msk [vmem:[%s1578_s29 + $0x9c] sm:$0xf] %vm1020_vm1, %v1297_v5  ;;  %v1276_v17 = vpack.c.bf16 %v798_v13, %v798_v13  ;;  %vm726_vm5 = vcmp.ge.f32.partialorder %v662_v8, 0.0  ;;  %vm700_vm6 = vcmp.ge.f32.partialorder %v558_v14, 0.0 }
 0x115   : > { %v774_v18 = vmul.f32 0.2, %v662_v8  ;;  %v1679_v20 = vpop.f32.mrb[23].mxu1  ;;  %1034 = vst.msk [vmem:[%s1578_s29 + $0x34] sm:$0xf] %vm1020_vm1, %v1271_v11  ;;  %v569_v22 = vadd.f32 %v1355_v43, %v1567_v26  ;;  %v665_v23 = vadd.f32 %v1379_v44, %v1567_v26  ;;  %vm724_vm7 = vcmp.ge.f32.partialorder %v654_v19, 0.0 }
 0x116   : > { %1058 = vst.msk [vmem:[%s1578_s29 + $0x94] sm:$0xf] %vm1020_vm1, %v1295_v12  ;;  %v748_v21 = vmul.f32 0.2, %v558_v14  ;;  %1039 = vst.msk [vmem:[%s1578_s29 + $0x48] sm:$0xf] %vm1020_vm1, %v1276_v17  ;;  %v561_v27 = vadd.f32 %v1567_v26, %v560_v49  ;;  %v657_v39 = vadd.f32 %v1567_v26, %v1653_v50  ;;  %v582_v40 = vadd.f32 %v1358_v63, %v1567_v26 }
 0x117   : > { %v822_v24 = vsel %vm726_vm5, %v662_v8, %v774_v18  ;;  %v772_v25 = vmul.f32 0.2, %v654_v19  ;;  %vm703_vm8 = vcmp.ge.f32.partialorder %v569_v22, 0.0  ;;  %v751_v30 = vmul.f32 0.2, %v569_v22 }
 0x118   : > { %v1300_v28 = vpack.c.bf16 %v822_v24, %v822_v24  ;;  %v796_v29 = vsel %vm700_vm6, %v558_v14, %v748_v21  ;;  %vm727_vm9 = vcmp.ge.f32.partialorder %v665_v23, 0.0  ;;  %v775_v33 = vmul.f32 0.2, %v665_v23 }
 0x119   : > { %v1274_v31 = vpack.c.bf16 %v796_v29, %v796_v29  ;;  %v820_v32 = vsel %vm724_vm7, %v654_v19, %v772_v25  ;;  %v799_v35 = vsel %vm703_vm8, %v569_v22, %v751_v30  ;;  %vm701_vm10 = vcmp.ge.f32.partialorder %v561_v27, 0.0 }
 0x11a   : > { %1063 = vst.msk [vmem:[%s1578_s29 + $0xa8] sm:$0xf] %vm1020_vm1, %v1300_v28  ;;  %v1298_v34 = vpack.c.bf16 %v820_v32, %v820_v32  ;;  %v749_v36 = vmul.f32 0.2, %v561_v27  ;;  %v1277_v37 = vpack.c.bf16 %v799_v35, %v799_v35  ;;  %v823_v38 = vsel %vm727_vm9, %v665_v23, %v775_v33 }
 0x11b   : > { %1037 = vst.msk [vmem:[%s1578_s29 + $0x40] sm:$0xf] %vm1020_vm1, %v1274_v31  ;;  %v1301_v41 = vpack.c.bf16 %v823_v38, %v823_v38  ;;  %v678_v43 = vadd.f32 %v1382_v3, %v1567_v26  ;;  %v574_v44 = vadd.f32 %v1567_v26, %v573_v4  ;;  %vm725_vm11 = vcmp.ge.f32.partialorder %v657_v39, 0.0 }
 0x11c   : > { %1061 = vst.msk [vmem:[%s1578_s29 + $0xa0] sm:$0xf] %vm1020_vm1, %v1298_v34  ;;  %v797_v42 = vsel %vm701_vm10, %v561_v27, %v749_v36  ;;  %1040 = vst.msk [vmem:[%s1578_s29 + $0x4c] sm:$0xf] %vm1020_vm1, %v1277_v37  ;;  %v773_v46 = vmul.f32 0.2, %v657_v39  ;;  %v670_v51 = vadd.f32 %v1567_v26, %v669_v9  ;;  %v585_v52 = vadd.f32 %v1359_v10, %v1567_v26 }
 0x11d   : > { %v1275_v45 = vpack.c.bf16 %v797_v42, %v797_v42  ;;  %vm706_vm12 = vcmp.ge.f32.partialorder %v582_v40, 0.0  ;;  %1064 = vst.msk [vmem:[%s1578_s29 + $0xac] sm:$0xf] %vm1020_vm1, %v1301_v41  ;;  %v754_v47 = vmul.f32 0.2, %v582_v40  ;;  %vm730_vm13 = vcmp.ge.f32.partialorder %v678_v43, 0.0 }
 0x11e   : > { %v778_v48 = vmul.f32 0.2, %v678_v43  ;;  %vm704_vm14 = vcmp.ge.f32.partialorder %v574_v44, 0.0  ;;  %v821_v49 = vsel %vm725_vm11, %v657_v39, %v773_v46  ;;  %v752_v50 = vmul.f32 0.2, %v574_v44 }
 0x11f   : > { %1038 = vst.msk [vmem:[%s1578_s29 + $0x44] sm:$0xf] %vm1020_vm1, %v1275_v45  ;;  %v1299_v53 = vpack.c.bf16 %v821_v49, %v821_v49  ;;  %v802_v54 = vsel %vm706_vm12, %v582_v40, %v754_v47  ;;  %v681_v56 = vadd.f32 %v1383_v15, %v1567_v26  ;;  %vm728_vm15 = vcmp.ge.f32.partialorder %v670_v51, 0.0 }
 0x120   : > { %v826_v55 = vsel %vm730_vm13, %v678_v43, %v778_v48  ;;  %v1280_v57 = vpack.c.bf16 %v802_v54, %v802_v54  ;;  %v800_v59 = vsel %vm704_vm14, %v574_v44, %v752_v50  ;;  %v776_v61 = vmul.f32 0.2, %v670_v51 }
 0x121   : > { %v1304_v58 = vpack.c.bf16 %v826_v55, %v826_v55  ;;  %1062 = vst.msk [vmem:[%s1578_s29 + $0xa4] sm:$0xf] %vm1020_vm1, %v1299_v53  ;;  %v1278_v60 = vpack.c.bf16 %v800_v59, %v800_v59  ;;  %vm707_vm0 = vcmp.ge.f32.partialorder %v585_v52, 0.0  ;;  %v755_v62 = vmul.f32 0.2, %v585_v52 }
 0x122   : > { %1043 = vst.msk [vmem:[%s1578_s29 + $0x58] sm:$0xf] %vm1020_vm1, %v1280_v57  ;;  %vm731_vm2 = vcmp.ge.f32.partialorder %v681_v56, 0.0  ;;  %v779_v63 = vmul.f32 0.2, %v681_v56  ;;  %v577_v0 = vadd.f32 %v1567_v26, %v1674_v16  ;;  %v673_v1 = vadd.f32 %v1567_v26, %v1679_v20 }
 0x123   : > { %1067 = vst.msk [vmem:[%s1578_s29 + $0xb8] sm:$0xf] %vm1020_vm1, %v1304_v58  ;;  %1041 = vst.msk [vmem:[%s1578_s29 + $0x50] sm:$0xf] %vm1020_vm1, %v1278_v60  ;;  %v824_v2 = vsel %vm728_vm15, %v670_v51, %v776_v61  ;;  %v803_v3 = vsel %vm707_vm0, %v585_v52, %v755_v62 }
 0x124   : > { %v1302_v4 = vpack.c.bf16 %v824_v2, %v824_v2  ;;  %v1281_v5 = vpack.c.bf16 %v803_v3, %v803_v3  ;;  %v827_v6 = vsel %vm731_vm2, %v681_v56, %v779_v63  ;;  %vm705_vm3 = vcmp.ge.f32.partialorder %v577_v0, 0.0 }
 0x125   : > { %v1305_v7 = vpack.c.bf16 %v827_v6, %v827_v6  ;;  %v753_v8 = vmul.f32 0.2, %v577_v0  ;;  %vm729_vm4 = vcmp.ge.f32.partialorder %v673_v1, 0.0  ;;  %v777_v9 = vmul.f32 0.2, %v673_v1 }
 0x126   : > { %1065 = vst.msk [vmem:[%s1578_s29 + $0xb0] sm:$0xf] %vm1020_vm1, %v1302_v4  ;;  %1044 = vst.msk [vmem:[%s1578_s29 + $0x5c] sm:$0xf] %vm1020_vm1, %v1281_v5 }
 0x127   : > { %1068 = vst.msk [vmem:[%s1578_s29 + $0xbc] sm:$0xf] %vm1020_vm1, %v1305_v7  ;;  %v801_v26 = vsel %vm705_vm3, %v577_v0, %v753_v8  ;;  %v825_v10 = vsel %vm729_vm4, %v673_v1, %v777_v9 }
 0x128   : > { %v1279_v11 = vpack.c.bf16 %v801_v26, %v801_v26  ;;  %v1303_v12 = vpack.c.bf16 %v825_v10, %v825_v10 }
 0x12a   : > { %1042 = vst.msk [vmem:[%s1578_s29 + $0x54] sm:$0xf] %vm1020_vm1, %v1279_v11  ;;  %1066 = vst.msk [vmem:[%s1578_s29 + $0xb4] sm:$0xf] %vm1020_vm1, %v1303_v12 }
 0x12b PF: > { %s13_s14 = sadd.s32 1, %s1462_s14   ;;  %s1745_s12 = smov %s1458_s13 }
 0x12c   : > { %p10_p5 = scmp.ge.s32.totalorder %s13_s14, 4   ;;  %s1746_s13 = smov %s1748_s15 }
 0x12e   :  { %12 = sbr.rel (!%p10_p5) target bundleno = 2 (0x2), region = 62 }

// kernel: unet_discriminator_sn.11
= control target key start
LH: loop header
LB: loop body
LE: loop exit
PB: predicated region body
PF: predicated region fallthrough
CT: control target
= control target key end

     0   :  { %s1411_s9 = smov 0   ;;  %s1413_s10 = smov 0   ;;  %s1602_s0 = inlined_call_operand.vmem [shape: bf16[2,144,256], index: 0, kind: input, shape index: {}]   ;;  %s1603_s1 = inlined_call_operand.vmem [shape: bf16[2,256,64], index: 1, kind: input, shape index: {}]   ;;  %s1604_s2 = inlined_call_operand.vmem [shape: bf16[2,128,64], index: 2, kind: output, shape index: {}]  }
   0x1   :  { %s1415_s11 = smov 0  }
   0x2 LB: > { %s24_s12 = sadd.s32 1, %s1390_s10  ;;  %p1025_p0 = scmp.ge.s32.totalorder %s1394_s11, 1  ;;  %s1394_s11 = sphi %s1415_s11, %s12_s11   ;;  %s1390_s10 = sphi %s1413_s10, %s1606_s10   ;;  %s1386_s9 = sphi %s1411_s9, %s1605_s9  }
   0x3   : > { %p26_p1 = scmp.ge.s32.totalorder %s24_s12, 2  ;;  %p126_p2 = scmp.lt.s32.totalorder %s1394_s11, 3 }
   0x5   : > { %s1608_s12 = smov (%p26_p1, %s24_s12), 0  ;;  %p127_p3 = pnand %p1025_p0, %p126_p2 }
   0x6   : > { %v1313_v0 = vld [vmem:[%s1603_s1 + $0xc0] sm:$0xff] (!%p127_p3)   ;;  %v1317_v4 = vld [vmem:[%s1603_s1 + $0xc8] sm:$0xff] (!%p127_p3)   ;;  %v1321_v8 = vld [vmem:[%s1603_s1 + $0xd0] sm:$0xff] (!%p127_p3)   ;;  %p152_p4 = scmp.lt.s32.totalorder (!%p127_p3), %s1386_s9, 1  ;;  %vm923_vm1 = vcmask (!%p127_p3), 519168  }
   0x7   : > { %130 = sbr.rel (%p127_p3) target bundleno = 322 (0x142), region = 28  ;;  %v1314_v1 = vld [vmem:[%s1603_s1 + $0x40] sm:$0xff] (!%p127_p3)   ;;  %1160 = vmatprep.subr.bf16.mxu0 (!%p127_p3), %v1313_v0  ;;  %v1318_v5 = vld [vmem:[%s1603_s1 + $0x48] sm:$0xff] (!%p127_p3)   ;;  %v1322_v9 = vld [vmem:[%s1603_s1 + $0x50] sm:$0xff] (!%p127_p3)  }
   0x8   : > { %v1315_v2 = vld [vmem:[%s1603_s1 + $0x80] sm:$0xff] (!%p127_p3)   ;;  %1224 = vmatprep.subr.bf16.mxu1 (!%p127_p3), %v1314_v1  ;;  %v1319_v6 = vld [vmem:[%s1603_s1 + $0x88] sm:$0xff] (!%p127_p3)   ;;  %v1323_v10 = vld [vmem:[%s1603_s1 + $0x90] sm:$0xff] (!%p127_p3)  }
   0x9   : > { %v1316_v3 = vld [vmem:[%s1603_s1] sm:$0xff] (!%p127_p3)   ;;  %1161 = vmatpush3.bf16.msra.mxu0 (!%p127_p3), %v1315_v2  ;;  %v1320_v7 = vld [vmem:[%s1603_s1 + $0x8] sm:$0xff] (!%p127_p3)   ;;  %v1324_v11 = vld [vmem:[%s1603_s1 + $0x10] sm:$0xff] (!%p127_p3)  }
   0xa   : > { %1225 = vmatpush3.bf16.msra.mxu1 (!%p127_p3), %v1316_v3  ;;  %1162 = vmatprep.subr.bf16.mxu0 (!%p127_p3), %v1317_v4  ;;  %v1325_v12 = vld [vmem:[%s1603_s1 + $0xd8] sm:$0xff] (!%p127_p3)   ;;  %v1329_v16 = vld [vmem:[%s1603_s1 + $0xe0] sm:$0xff] (!%p127_p3)   ;;  %v1333_v20 = vld [vmem:[%s1603_s1 + $0xe8] sm:$0xff] (!%p127_p3)  }
   0xb   : > { %1226 = vmatprep.subr.bf16.mxu1 (!%p127_p3), %v1318_v5  ;;  %v1326_v13 = vld [vmem:[%s1603_s1 + $0x58] sm:$0xff] (!%p127_p3)   ;;  %v1330_v17 = vld [vmem:[%s1603_s1 + $0x60] sm:$0xff] (!%p127_p3)   ;;  %v1334_v21 = vld [vmem:[%s1603_s1 + $0x68] sm:$0xff] (!%p127_p3)  }
   0xc   : > { %v1327_v14 = vld [vmem:[%s1603_s1 + $0x98] sm:$0xff] (!%p127_p3)   ;;  %v1331_v18 = vld [vmem:[%s1603_s1 + $0xa0] sm:$0xff] (!%p127_p3)   ;;  %v1335_v22 = vld [vmem:[%s1603_s1 + $0xa8] sm:$0xff] (!%p127_p3)  }
   0xd   : > { %1163 = vmatpush3.bf16.msra.mxu0 (!%p127_p3), %v1319_v6  ;;  %v1328_v15 = vld [vmem:[%s1603_s1 + $0x18] sm:$0xff] (!%p127_p3)   ;;  %v1332_v19 = vld [vmem:[%s1603_s1 + $0x20] sm:$0xff] (!%p127_p3)   ;;  %v1336_v23 = vld [vmem:[%s1603_s1 + $0x28] sm:$0xff] (!%p127_p3)  }
   0xe   : > { %1227 = vmatpush3.bf16.msra.mxu1 %v1320_v7  ;;  %1164 = vmatprep.subr.bf16.mxu0 %v1321_v8  ;;  %s1610_s9 = smov (!%p152_p4, %s1386_s9), 1  ;;  %v1337_v24 = vld [vmem:[%s1603_s1 + $0xf0] sm:$0xff]   ;;  %v1341_v28 = vld [vmem:[%s1603_s1 + $0xf8] sm:$0xff]  }
   0xf   : > { %1228 = vmatprep.subr.bf16.mxu1 %v1322_v9  ;;  %v1338_v25 = vld [vmem:[%s1603_s1 + $0x70] sm:$0xff]   ;;  %s1288_s17 = smul.u32 144, %s1610_s9  ;;  %v1342_v29 = vld [vmem:[%s1603_s1 + $0x78] sm:$0xff]   ;;  %s1143_s5 = sshll.u32 %s1610_s9, 6 }
  0x10   : > { %v1339_v26 = vld [vmem:[%s1603_s1 + $0xb0] sm:$0xff]   ;;  %v1343_v30 = vld [vmem:[%s1603_s1 + $0xb8] sm:$0xff]   ;;  %s1559_s8 = scalar_lea.vmem %s1604_s2, %s1143_s5 }
  0x11   : > { %1165 = vmatpush3.bf16.msra.mxu0 %v1323_v10  ;;  %v1340_v27 = vld [vmem:[%s1603_s1 + $0x30] sm:$0xff]   ;;  %s1529_s28 = scalar_lea.vmem %s1602_s0, %s1288_s17  ;;  %v1344_v31 = vld [vmem:[%s1603_s1 + $0x38] sm:$0xff]  }
  0x12   : > { %1229 = vmatpush3.bf16.msra.mxu1 %v1324_v11  ;;  %1166 = vmatprep.subr.bf16.mxu0 %v1325_v12  ;;  %v1345_v32 = vld [vmem:[%s1529_s28 + $0x10] ss:$8 sps:$4 sm:$0xff]   ;;  %v1347_v33 = vld [vmem:[%s1529_s28 + $0x14] ss:$8 sps:$4 sm:$0xff]   ;;  %v1348_v34 = vld [vmem:[%s1529_s28] ss:$8 sps:$4 sm:$0xff]  }
  0x13   : > { %1230 = vmatprep.subr.bf16.mxu1 %v1326_v13  ;;  %v1350_v35 = vld [vmem:[%s1529_s28 + $0x4] ss:$8 sps:$4 sm:$0xff]   ;;  %473 = vmatprep.mubr.bf16.mxu0 %v1347_v33  ;;  %v1353_v37 = vld [vmem:[%s1529_s28 + $0x20] ss:$8 sps:$4 sm:$0xff]   ;;  %v1354_v38 = vld [vmem:[%s1529_s28 + $0x34] ss:$8 sps:$4 sm:$0xff]  }
  0x14   : > { %v1351_v36 = vld [vmem:[%s1529_s28 + $0x24] ss:$8 sps:$4 sm:$0xff]   ;;  %746 = vmatprep.mubr.bf16.mxu1 %v1350_v35  ;;  %v1356_v39 = vld [vmem:[%s1529_s28 + $0x30] ss:$8 sps:$4 sm:$0xff]   ;;  %v1359_v41 = vld [vmem:[%s1529_s28 + $0x40] ss:$8 sps:$4 sm:$0xff]  }
  0x15   : > { %1167 = vmatpush3.bf16.msra.mxu0 %v1327_v14  ;;  %v1357_v40 = vld [vmem:[%s1529_s28 + $0x44] ss:$8 sps:$4 sm:$0xff]   ;;  %v1360_v42 = vld [vmem:[%s1529_s28 + $0x54] ss:$8 sps:$4 sm:$0xff]   ;;  %v1362_v43 = vld [vmem:[%s1529_s28 + $0x50] ss:$8 sps:$4 sm:$0xff]  }
  0x16   : > { %1231 = vmatpush3.bf16.msra.mxu1 %v1328_v15  ;;  %1168 = vmatprep.subr.bf16.mxu0 %v1329_v16  ;;  %v1363_v44 = vld [vmem:[%s1529_s28 + $0x64] ss:$8 sps:$4 sm:$0xff]   ;;  %v1365_v45 = vld [vmem:[%s1529_s28 + $0x60] ss:$8 sps:$4 sm:$0xff]   ;;  %v1366_v46 = vld [vmem:[%s1529_s28 + $0x74] ss:$8 sps:$4 sm:$0xff]  }
  0x17   : > { %1232 = vmatprep.subr.bf16.mxu1 %v1330_v17  ;;  %v1368_v47 = vld [vmem:[%s1529_s28 + $0x70] ss:$8 sps:$4 sm:$0xff]   ;;  %v1369_v48 = vld [vmem:[%s1529_s28 + $0x84] ss:$8 sps:$4 sm:$0xff]   ;;  %v1371_v49 = vld [vmem:[%s1529_s28 + $0x80] ss:$8 sps:$4 sm:$0xff]  }
  0x19   : > { %1169 = vmatpush3.bf16.msra.mxu0 %v1331_v18 }
  0x1a   : > { %1233 = vmatpush3.bf16.msra.mxu1 %v1332_v19  ;;  %1170 = vmatprep.subr.bf16.mxu0 %v1333_v20 }
  0x1b   : > { %1234 = vmatprep.subr.bf16.mxu1 %v1334_v21 }
  0x1d   : > { %1171 = vmatpush3.bf16.msra.mxu0 %v1335_v22 }
  0x1e   : > { %1235 = vmatpush3.bf16.msra.mxu1 %v1336_v23  ;;  %1172 = vmatprep.subr.bf16.mxu0 %v1337_v24 }
  0x1f   : > { %1236 = vmatprep.subr.bf16.mxu1 %v1338_v25 }
  0x21   : > { %1173 = vmatpush3.bf16.msra.mxu0 %v1339_v26 }
  0x22   : > { %1237 = vmatpush3.bf16.msra.mxu1 %v1340_v27  ;;  %1174 = vmatprep.subr.bf16.mxu0 %v1341_v28 }
  0x23   : > { %1238 = vmatprep.subr.bf16.mxu1 %v1342_v29 }
  0x25   : > { %1175 = vmatpush3.bf16.msra.mxu0 %v1343_v30 }
  0x26   : > { %1239 = vmatpush3.bf16.msra.mxu1 %v1344_v31 }
  0x28   : > { %474 = vmatmul.mubr.bf16.vlgmr.msra.gmra.mrb[0].mxu0 %v1345_v32 }
  0x29   : > { %747 = vmatmul.mubr.bf16.vlgmr.msra.gmra.mrb[0].mxu1 %v1348_v34  ;;  %481 = vmatprep.mubr.bf16.mxu0 %v1351_v36 }
  0x2a   : > { %754 = vmatprep.mubr.bf16.mxu1 %v1347_v33 }
  0x30   : > { %482 = vmatmul.mubr.bf16.gmra.mrb[4].mxu0 %v1353_v37 }
  0x31   : > { %755 = vmatmul.mubr.bf16.gmra.mrb[4].mxu1 %v1345_v32  ;;  %489 = vmatprep.mubr.bf16.mxu0 %v1354_v38 }
  0x32   : > { %762 = vmatprep.mubr.bf16.mxu1 %v1351_v36 }
  0x38   : > { %490 = vmatmul.mubr.bf16.gmra.mrb[8].mxu0 %v1356_v39 }
  0x39   : > { %763 = vmatmul.mubr.bf16.gmra.mrb[8].mxu1 %v1353_v37  ;;  %497 = vmatprep.mubr.bf16.mxu0 %v1357_v40 }
  0x3a   : > { %770 = vmatprep.mubr.bf16.mxu1 %v1354_v38 }
  0x40   : > { %498 = vmatmul.mubr.bf16.gmra.mrb[12].mxu0 %v1359_v41 }
  0x41   : > { %771 = vmatmul.mubr.bf16.gmra.mrb[12].mxu1 %v1356_v39  ;;  %505 = vmatprep.mubr.bf16.mxu0 %v1360_v42 }
  0x42   : > { %778 = vmatprep.mubr.bf16.mxu1 %v1357_v40 }
  0x48   : > { %506 = vmatmul.mubr.bf16.gmra.mrb[16].mxu0 %v1362_v43 }
  0x49   : > { %779 = vmatmul.mubr.bf16.gmra.mrb[16].mxu1 %v1359_v41  ;;  %513 = vmatprep.mubr.bf16.mxu0 %v1363_v44 }
  0x4a   : > { %786 = vmatprep.mubr.bf16.mxu1 %v1360_v42 }
  0x50   : > { %514 = vmatmul.mubr.bf16.gmra.mrb[20].mxu0 %v1365_v45 }
  0x51   : > { %787 = vmatmul.mubr.bf16.gmra.mrb[20].mxu1 %v1362_v43  ;;  %521 = vmatprep.mubr.bf16.mxu0 %v1366_v46 }
  0x52   : > { %794 = vmatprep.mubr.bf16.mxu1 %v1363_v44 }
  0x58   : > { %522 = vmatmul.mubr.bf16.gmra.mrb[24].mxu0 %v1368_v47 }
  0x59   : > { %795 = vmatmul.mubr.bf16.gmra.mrb[24].mxu1 %v1365_v45  ;;  %529 = vmatprep.mubr.bf16.mxu0 %v1369_v48 }
  0x5a   : > { %802 = vmatprep.mubr.bf16.mxu1 %v1366_v46 }
  0x60   : > { %530 = vmatmul.mubr.bf16.gmra.mrb[28].mxu0 %v1371_v49 }
  0x61   : > { %803 = vmatmul.mubr.bf16.gmra.mrb[28].mxu1 %v1368_v47 }
  0xfb   : > { %v1176_v50 = vpop.f32.mrb[0].mxu0 }
  0xfc   : > { %v1240_v51 = vpop.f32.mrb[0].mxu1  ;;  %v1177_v52 = vpop.f32.mrb[1].mxu0 }
  0xfd   : > { %v1178_v53 = vadd.f32 %v1177_v52, %v1176_v50  ;;  %v1241_v54 = vpop.f32.mrb[1].mxu1  ;;  %v1179_v55 = vpop.f32.mrb[2].mxu0 }
  0xfe   : > { %v1242_v56 = vadd.f32 %v1241_v54, %v1240_v51  ;;  %v1243_v57 = vpop.f32.mrb[2].mxu1  ;;  %v1180_v58 = vpop.f32.mrb[3].mxu0 }
  0xff   : > { %v1181_v59 = vadd.f32 %v1180_v58, %v1179_v55  ;;  %v1244_v60 = vpop.f32.mrb[3].mxu1 }
 0x100   : > { %v749_v61 = vadd.f32 %v1242_v56, %v1178_v53  ;;  %v1245_v62 = vadd.f32 %v1244_v60, %v1243_v57 }
 0x102   : > { %vm811_vm0 = vcmp.ge.f32.partialorder %v749_v61, 0.0  ;;  %v827_v63 = vmul.f32 0.2, %v749_v61  ;;  %v752_v0 = vadd.f32 %v1245_v62, %v1181_v59 }
 0x103   : > { %v1182_v1 = vpop.f32.mrb[4].mxu0 }
 0x104   : > { %v843_v2 = vsel %vm811_vm0, %v749_v61, %v827_v63  ;;  %vm812_vm2 = vcmp.ge.f32.partialorder %v752_v0, 0.0  ;;  %v828_v3 = vmul.f32 0.2, %v752_v0  ;;  %v1246_v4 = vpop.f32.mrb[4].mxu1  ;;  %v1183_v5 = vpop.f32.mrb[5].mxu0 }
 0x105   : > { %v1144_v6 = vpack.c.bf16 %v843_v2, %v843_v2  ;;  %v1184_v7 = vadd.f32 %v1183_v5, %v1182_v1  ;;  %v1247_v8 = vpop.f32.mrb[5].mxu1  ;;  %v1185_v9 = vpop.f32.mrb[6].mxu0 }
 0x106   : > { %v844_v10 = vsel %vm812_vm2, %v752_v0, %v828_v3  ;;  %v1248_v11 = vadd.f32 %v1247_v8, %v1246_v4  ;;  %v1249_v12 = vpop.f32.mrb[6].mxu1  ;;  %v1186_v13 = vpop.f32.mrb[7].mxu0 }
 0x107   : > { %924 = vst.msk [vmem:[%s1559_s8] sm:$0xf] %vm923_vm1, %v1144_v6  ;;  %v1145_v14 = vpack.c.bf16 %v844_v10, %v844_v10  ;;  %v1187_v15 = vadd.f32 %v1186_v13, %v1185_v9  ;;  %v1250_v16 = vpop.f32.mrb[7].mxu1 }
 0x108   : > { %v757_v17 = vadd.f32 %v1248_v11, %v1184_v7  ;;  %v1251_v18 = vadd.f32 %v1250_v16, %v1249_v12 }
 0x109   : > { %925 = vst.msk [vmem:[%s1559_s8 + $0x4] sm:$0xf] %vm923_vm1, %v1145_v14 }
 0x10a   : > { %vm813_vm3 = vcmp.ge.f32.partialorder %v757_v17, 0.0  ;;  %v829_v19 = vmul.f32 0.2, %v757_v17  ;;  %v760_v20 = vadd.f32 %v1251_v18, %v1187_v15 }
 0x10b   : > { %v1188_v21 = vpop.f32.mrb[8].mxu0 }
 0x10c   : > { %v845_v22 = vsel %vm813_vm3, %v757_v17, %v829_v19  ;;  %vm814_vm4 = vcmp.ge.f32.partialorder %v760_v20, 0.0  ;;  %v830_v23 = vmul.f32 0.2, %v760_v20  ;;  %v1252_v24 = vpop.f32.mrb[8].mxu1  ;;  %v1189_v25 = vpop.f32.mrb[9].mxu0 }
 0x10d   : > { %v1146_v26 = vpack.c.bf16 %v845_v22, %v845_v22  ;;  %v1190_v27 = vadd.f32 %v1189_v25, %v1188_v21  ;;  %v1253_v28 = vpop.f32.mrb[9].mxu1  ;;  %v1191_v29 = vpop.f32.mrb[10].mxu0 }
 0x10e   : > { %v846_v30 = vsel %vm814_vm4, %v760_v20, %v830_v23  ;;  %v1254_v31 = vadd.f32 %v1253_v28, %v1252_v24  ;;  %v1255_v32 = vpop.f32.mrb[10].mxu1  ;;  %v1192_v33 = vpop.f32.mrb[11].mxu0 }
 0x10f   : > { %926 = vst.msk [vmem:[%s1559_s8 + $0x8] sm:$0xf] %vm923_vm1, %v1146_v26  ;;  %v1147_v34 = vpack.c.bf16 %v846_v30, %v846_v30  ;;  %v1193_v35 = vadd.f32 %v1192_v33, %v1191_v29  ;;  %v1256_v36 = vpop.f32.mrb[11].mxu1 }
 0x110   : > { %v765_v37 = vadd.f32 %v1254_v31, %v1190_v27  ;;  %v1257_v38 = vadd.f32 %v1256_v36, %v1255_v32 }
 0x111   : > { %927 = vst.msk [vmem:[%s1559_s8 + $0xc] sm:$0xf] %vm923_vm1, %v1147_v34 }
 0x112   : > { %vm815_vm5 = vcmp.ge.f32.partialorder %v765_v37, 0.0  ;;  %v831_v39 = vmul.f32 0.2, %v765_v37  ;;  %v768_v40 = vadd.f32 %v1257_v38, %v1193_v35 }
 0x113   : > { %v1194_v41 = vpop.f32.mrb[12].mxu0 }
 0x114   : > { %v847_v42 = vsel %vm815_vm5, %v765_v37, %v831_v39  ;;  %vm816_vm6 = vcmp.ge.f32.partialorder %v768_v40, 0.0  ;;  %v832_v43 = vmul.f32 0.2, %v768_v40  ;;  %v1258_v44 = vpop.f32.mrb[12].mxu1  ;;  %v1195_v45 = vpop.f32.mrb[13].mxu0 }
 0x115   : > { %v1148_v46 = vpack.c.bf16 %v847_v42, %v847_v42  ;;  %v1196_v47 = vadd.f32 %v1195_v45, %v1194_v41  ;;  %v1259_v48 = vpop.f32.mrb[13].mxu1  ;;  %v1197_v49 = vpop.f32.mrb[14].mxu0 }
 0x116   : > { %v848_v50 = vsel %vm816_vm6, %v768_v40, %v832_v43  ;;  %v1260_v51 = vadd.f32 %v1259_v48, %v1258_v44  ;;  %v1261_v52 = vpop.f32.mrb[14].mxu1  ;;  %v1198_v53 = vpop.f32.mrb[15].mxu0 }
 0x117   : > { %928 = vst.msk [vmem:[%s1559_s8 + $0x10] sm:$0xf] %vm923_vm1, %v1148_v46  ;;  %v1149_v54 = vpack.c.bf16 %v848_v50, %v848_v50  ;;  %v1199_v55 = vadd.f32 %v1198_v53, %v1197_v49  ;;  %v1262_v56 = vpop.f32.mrb[15].mxu1 }
 0x118   : > { %v773_v57 = vadd.f32 %v1260_v51, %v1196_v47  ;;  %v1263_v58 = vadd.f32 %v1262_v56, %v1261_v52 }
 0x119   : > { %929 = vst.msk [vmem:[%s1559_s8 + $0x14] sm:$0xf] %vm923_vm1, %v1149_v54 }
 0x11a   : > { %vm817_vm7 = vcmp.ge.f32.partialorder %v773_v57, 0.0  ;;  %v833_v59 = vmul.f32 0.2, %v773_v57  ;;  %v776_v60 = vadd.f32 %v1263_v58, %v1199_v55 }
 0x11b   : > { %v1200_v61 = vpop.f32.mrb[16].mxu0 }
 0x11c   : > { %v849_v62 = vsel %vm817_vm7, %v773_v57, %v833_v59  ;;  %vm818_vm8 = vcmp.ge.f32.partialorder %v776_v60, 0.0  ;;  %v834_v63 = vmul.f32 0.2, %v776_v60  ;;  %v1264_v0 = vpop.f32.mrb[16].mxu1  ;;  %v1201_v1 = vpop.f32.mrb[17].mxu0 }
 0x11d   : > { %v1150_v2 = vpack.c.bf16 %v849_v62, %v849_v62  ;;  %v1202_v3 = vadd.f32 %v1201_v1, %v1200_v61  ;;  %v1265_v4 = vpop.f32.mrb[17].mxu1  ;;  %v1203_v5 = vpop.f32.mrb[18].mxu0 }
 0x11e   : > { %v850_v6 = vsel %vm818_vm8, %v776_v60, %v834_v63  ;;  %v1266_v7 = vadd.f32 %v1265_v4, %v1264_v0  ;;  %v1267_v8 = vpop.f32.mrb[18].mxu1  ;;  %v1204_v9 = vpop.f32.mrb[19].mxu0 }
 0x11f   : > { %930 = vst.msk [vmem:[%s1559_s8 + $0x18] sm:$0xf] %vm923_vm1, %v1150_v2  ;;  %v1151_v10 = vpack.c.bf16 %v850_v6, %v850_v6  ;;  %v1205_v11 = vadd.f32 %v1204_v9, %v1203_v5  ;;  %v1268_v12 = vpop.f32.mrb[19].mxu1 }
 0x120   : > { %v781_v13 = vadd.f32 %v1266_v7, %v1202_v3  ;;  %v1269_v14 = vadd.f32 %v1268_v12, %v1267_v8 }
 0x121   : > { %931 = vst.msk [vmem:[%s1559_s8 + $0x1c] sm:$0xf] %vm923_vm1, %v1151_v10 }
 0x122   : > { %vm819_vm9 = vcmp.ge.f32.partialorder %v781_v13, 0.0  ;;  %v835_v15 = vmul.f32 0.2, %v781_v13  ;;  %v784_v16 = vadd.f32 %v1269_v14, %v1205_v11 }
 0x123   : > { %v1206_v17 = vpop.f32.mrb[20].mxu0 }
 0x124   : > { %v851_v18 = vsel %vm819_vm9, %v781_v13, %v835_v15  ;;  %vm820_vm10 = vcmp.ge.f32.partialorder %v784_v16, 0.0  ;;  %v836_v19 = vmul.f32 0.2, %v784_v16  ;;  %v1270_v20 = vpop.f32.mrb[20].mxu1  ;;  %v1207_v21 = vpop.f32.mrb[21].mxu0 }
 0x125   : > { %v1152_v22 = vpack.c.bf16 %v851_v18, %v851_v18  ;;  %v1208_v23 = vadd.f32 %v1207_v21, %v1206_v17  ;;  %v1271_v24 = vpop.f32.mrb[21].mxu1  ;;  %v1209_v25 = vpop.f32.mrb[22].mxu0 }
 0x126   : > { %v852_v26 = vsel %vm820_vm10, %v784_v16, %v836_v19  ;;  %v1272_v27 = vadd.f32 %v1271_v24, %v1270_v20  ;;  %v1273_v28 = vpop.f32.mrb[22].mxu1  ;;  %v1210_v29 = vpop.f32.mrb[23].mxu0 }
 0x127   : > { %932 = vst.msk [vmem:[%s1559_s8 + $0x20] sm:$0xf] %vm923_vm1, %v1152_v22  ;;  %v1153_v30 = vpack.c.bf16 %v852_v26, %v852_v26  ;;  %v1211_v31 = vadd.f32 %v1210_v29, %v1209_v25  ;;  %v1274_v32 = vpop.f32.mrb[23].mxu1 }
 0x128   : > { %v789_v33 = vadd.f32 %v1272_v27, %v1208_v23  ;;  %v1275_v34 = vadd.f32 %v1274_v32, %v1273_v28 }
 0x129   : > { %933 = vst.msk [vmem:[%s1559_s8 + $0x24] sm:$0xf] %vm923_vm1, %v1153_v30 }
 0x12a   : > { %vm821_vm11 = vcmp.ge.f32.partialorder %v789_v33, 0.0  ;;  %v837_v35 = vmul.f32 0.2, %v789_v33  ;;  %v792_v36 = vadd.f32 %v1275_v34, %v1211_v31 }
 0x12b   : > { %v1212_v37 = vpop.f32.mrb[24].mxu0 }
 0x12c   : > { %v853_v38 = vsel %vm821_vm11, %v789_v33, %v837_v35  ;;  %vm822_vm12 = vcmp.ge.f32.partialorder %v792_v36, 0.0  ;;  %v838_v39 = vmul.f32 0.2, %v792_v36  ;;  %v1276_v40 = vpop.f32.mrb[24].mxu1  ;;  %v1213_v41 = vpop.f32.mrb[25].mxu0 }
 0x12d   : > { %v1154_v42 = vpack.c.bf16 %v853_v38, %v853_v38  ;;  %v1214_v43 = vadd.f32 %v1213_v41, %v1212_v37  ;;  %v1277_v44 = vpop.f32.mrb[25].mxu1  ;;  %v1215_v45 = vpop.f32.mrb[26].mxu0 }
 0x12e   : > { %v854_v46 = vsel %vm822_vm12, %v792_v36, %v838_v39  ;;  %v1278_v47 = vadd.f32 %v1277_v44, %v1276_v40  ;;  %v1279_v48 = vpop.f32.mrb[26].mxu1  ;;  %v1216_v49 = vpop.f32.mrb[27].mxu0 }
 0x12f   : > { %934 = vst.msk [vmem:[%s1559_s8 + $0x28] sm:$0xf] %vm923_vm1, %v1154_v42  ;;  %v1155_v50 = vpack.c.bf16 %v854_v46, %v854_v46  ;;  %v1217_v51 = vadd.f32 %v1216_v49, %v1215_v45  ;;  %v1280_v52 = vpop.f32.mrb[27].mxu1 }
 0x130   : > { %v797_v53 = vadd.f32 %v1278_v47, %v1214_v43  ;;  %v1281_v54 = vadd.f32 %v1280_v52, %v1279_v48 }
 0x131   : > { %935 = vst.msk [vmem:[%s1559_s8 + $0x2c] sm:$0xf] %vm923_vm1, %v1155_v50 }
 0x132   : > { %vm823_vm13 = vcmp.ge.f32.partialorder %v797_v53, 0.0  ;;  %v839_v55 = vmul.f32 0.2, %v797_v53  ;;  %v800_v56 = vadd.f32 %v1281_v54, %v1217_v51 }
 0x133   : > { %v1218_v57 = vpop.f32.mrb[28].mxu0 }
 0x134   : > { %v855_v58 = vsel %vm823_vm13, %v797_v53, %v839_v55  ;;  %vm824_vm14 = vcmp.ge.f32.partialorder %v800_v56, 0.0  ;;  %v840_v59 = vmul.f32 0.2, %v800_v56  ;;  %v1282_v60 = vpop.f32.mrb[28].mxu1  ;;  %v1219_v61 = vpop.f32.mrb[29].mxu0 }
 0x135   : > { %v1156_v62 = vpack.c.bf16 %v855_v58, %v855_v58  ;;  %v1220_v63 = vadd.f32 %v1219_v61, %v1218_v57  ;;  %v1283_v0 = vpop.f32.mrb[29].mxu1  ;;  %v1221_v1 = vpop.f32.mrb[30].mxu0 }
 0x136   : > { %v856_v2 = vsel %vm824_vm14, %v800_v56, %v840_v59  ;;  %v1284_v3 = vadd.f32 %v1283_v0, %v1282_v60  ;;  %v1285_v4 = vpop.f32.mrb[30].mxu1  ;;  %v1222_v5 = vpop.f32.mrb[31].mxu0 }
 0x137   : > { %936 = vst.msk [vmem:[%s1559_s8 + $0x30] sm:$0xf] %vm923_vm1, %v1156_v62  ;;  %v1157_v6 = vpack.c.bf16 %v856_v2, %v856_v2  ;;  %v1223_v7 = vadd.f32 %v1222_v5, %v1221_v1  ;;  %v1286_v8 = vpop.f32.mrb[31].mxu1 }
 0x138   : > { %v805_v9 = vadd.f32 %v1284_v3, %v1220_v63  ;;  %v1287_v10 = vadd.f32 %v1286_v8, %v1285_v4 }
 0x139   : > { %937 = vst.msk [vmem:[%s1559_s8 + $0x34] sm:$0xf] %vm923_vm1, %v1157_v6 }
 0x13a   : > { %vm825_vm15 = vcmp.ge.f32.partialorder %v805_v9, 0.0  ;;  %v841_v11 = vmul.f32 0.2, %v805_v9  ;;  %v808_v12 = vadd.f32 %v1287_v10, %v1223_v7 }
 0x13c   : > { %v857_v13 = vsel %vm825_vm15, %v805_v9, %v841_v11  ;;  %vm826_vm0 = vcmp.ge.f32.partialorder %v808_v12, 0.0  ;;  %v842_v14 = vmul.f32 0.2, %v808_v12 }
 0x13d   : > { %v1158_v15 = vpack.c.bf16 %v857_v13, %v857_v13 }
 0x13e   : > { %v858_v16 = vsel %vm826_vm0, %v808_v12, %v842_v14 }
 0x13f   : > { %938 = vst.msk [vmem:[%s1559_s8 + $0x38] sm:$0xf] %vm923_vm1, %v1158_v15  ;;  %v1159_v17 = vpack.c.bf16 %v858_v16, %v858_v16 }
 0x141   : > { %939 = vst.msk [vmem:[%s1559_s8 + $0x3c] sm:$0xf] %vm923_vm1, %v1159_v17 }
 0x142 PF: > { %s12_s11 = sadd.s32 1, %s1394_s11   ;;  %s1605_s9 = smov %s1390_s10 }
 0x143   : > { %p9_p5 = scmp.ge.s32.totalorder %s12_s11, 4   ;;  %s1606_s10 = smov %s1608_s12 }
 0x145   :  { %11 = sbr.rel (!%p9_p5) target bundleno = 2 (0x2), region = 59 }

// kernel: unet_discriminator_sn.12
= control target key start
LH: loop header
LB: loop body
LE: loop exit
PB: predicated region body
PF: predicated region fallthrough
CT: control target
= control target key end

     0   :  { %s1516_s9 = smov 0   ;;  %s1518_s10 = smov 0   ;;  %s1785_s0 = inlined_call_operand.vmem [shape: bf16[2,40,512], index: 0, kind: input, shape index: {}]   ;;  %s1786_s1 = inlined_call_operand.vmem [shape: bf16[2,512,128], index: 1, kind: input, shape index: {}]   ;;  %s1787_s2 = inlined_call_operand.vmem [shape: bf16[2,32,128], index: 2, kind: output, shape index: {}]  }
   0x1   :  { %s1520_s11 = smov 0  }
   0x2 LB: > { %s24_s12 = sadd.s32 1, %s1495_s10  ;;  %p1090_p0 = scmp.ge.s32.totalorder %s1499_s11, 1  ;;  %s1499_s11 = sphi %s1520_s11, %s12_s11   ;;  %s1495_s10 = sphi %s1518_s10, %s1789_s10   ;;  %s1491_s9 = sphi %s1516_s9, %s1788_s9  }
   0x3   : > { %p26_p1 = scmp.ge.s32.totalorder %s24_s12, 2  ;;  %p126_p2 = scmp.lt.s32.totalorder %s1499_s11, 3 }
   0x5   : > { %s1791_s12 = smov (%p26_p1, %s24_s12), 0  ;;  %p127_p3 = pnand %p1090_p0, %p126_p2 }
   0x6   : > { %v1397_v0 = vld [vmem:[%s1786_s1 + $0x140] sm:$0xff] (!%p127_p3)   ;;  %v1401_v4 = vld [vmem:[%s1786_s1 + $0x148] sm:$0xff] (!%p127_p3)   ;;  %v1405_v8 = vld [vmem:[%s1786_s1 + $0x150] sm:$0xff] (!%p127_p3)   ;;  %p152_p4 = scmp.lt.s32.totalorder (!%p127_p3), %s1491_s9, 1 }
   0x7   : > { %130 = sbr.rel (%p127_p3) target bundleno = 307 (0x133), region = 28  ;;  %v1398_v1 = vld [vmem:[%s1786_s1 + $0x1c0] sm:$0xff] (!%p127_p3)   ;;  %1260 = vmatprep.subr.bf16.mxu0 (!%p127_p3), %v1397_v0  ;;  %v1402_v5 = vld [vmem:[%s1786_s1 + $0x1c8] sm:$0xff] (!%p127_p3)   ;;  %v1406_v9 = vld [vmem:[%s1786_s1 + $0x1d0] sm:$0xff] (!%p127_p3)  }
   0x8   : > { %v1399_v2 = vld [vmem:[%s1786_s1 + $0x100] sm:$0xff] (!%p127_p3)   ;;  %1288 = vmatprep.subr.bf16.mxu1 (!%p127_p3), %v1398_v1  ;;  %v1403_v6 = vld [vmem:[%s1786_s1 + $0x108] sm:$0xff] (!%p127_p3)   ;;  %v1407_v10 = vld [vmem:[%s1786_s1 + $0x110] sm:$0xff] (!%p127_p3)  }
   0x9   : > { %v1400_v3 = vld [vmem:[%s1786_s1 + $0x180] sm:$0xff] (!%p127_p3)   ;;  %1261 = vmatpush3.bf16.msra.mxu0 (!%p127_p3), %v1399_v2  ;;  %v1404_v7 = vld [vmem:[%s1786_s1 + $0x188] sm:$0xff] (!%p127_p3)   ;;  %v1408_v11 = vld [vmem:[%s1786_s1 + $0x190] sm:$0xff] (!%p127_p3)  }
   0xa   : > { %1289 = vmatpush3.bf16.msra.mxu1 (!%p127_p3), %v1400_v3  ;;  %1262 = vmatprep.subr.bf16.mxu0 (!%p127_p3), %v1401_v4  ;;  %v1409_v12 = vld [vmem:[%s1786_s1 + $0x158] sm:$0xff] (!%p127_p3)   ;;  %v1413_v16 = vld [vmem:[%s1786_s1 + $0x160] sm:$0xff] (!%p127_p3)   ;;  %v1417_v20 = vld [vmem:[%s1786_s1 + $0x168] sm:$0xff] (!%p127_p3)  }
   0xb   : > { %1290 = vmatprep.subr.bf16.mxu1 (!%p127_p3), %v1402_v5  ;;  %v1410_v13 = vld [vmem:[%s1786_s1 + $0x1d8] sm:$0xff] (!%p127_p3)   ;;  %v1414_v17 = vld [vmem:[%s1786_s1 + $0x1e0] sm:$0xff] (!%p127_p3)   ;;  %v1418_v21 = vld [vmem:[%s1786_s1 + $0x1e8] sm:$0xff] (!%p127_p3)  }
   0xc   : > { %v1411_v14 = vld [vmem:[%s1786_s1 + $0x118] sm:$0xff] (!%p127_p3)   ;;  %v1415_v18 = vld [vmem:[%s1786_s1 + $0x120] sm:$0xff] (!%p127_p3)   ;;  %v1419_v22 = vld [vmem:[%s1786_s1 + $0x128] sm:$0xff] (!%p127_p3)  }
   0xd   : > { %1263 = vmatpush3.bf16.msra.mxu0 (!%p127_p3), %v1403_v6  ;;  %v1412_v15 = vld [vmem:[%s1786_s1 + $0x198] sm:$0xff] (!%p127_p3)   ;;  %v1416_v19 = vld [vmem:[%s1786_s1 + $0x1a0] sm:$0xff] (!%p127_p3)   ;;  %v1420_v23 = vld [vmem:[%s1786_s1 + $0x1a8] sm:$0xff] (!%p127_p3)  }
   0xe   : > { %1291 = vmatpush3.bf16.msra.mxu1 %v1404_v7  ;;  %1264 = vmatprep.subr.bf16.mxu0 %v1405_v8  ;;  %s1793_s9 = smov (!%p152_p4, %s1491_s9), 1  ;;  %v1421_v24 = vld [vmem:[%s1786_s1 + $0x170] sm:$0xff]   ;;  %v1425_v28 = vld [vmem:[%s1786_s1 + $0x178] sm:$0xff]   ;;  %v1433_v40 = vld [vmem:[%s1786_s1 + $0x40] sm:$0xff]  }
   0xf   : > { %1292 = vmatprep.subr.bf16.mxu1 %v1406_v9  ;;  %v1422_v25 = vld [vmem:[%s1786_s1 + $0x1f0] sm:$0xff]   ;;  %s1372_s17 = smul.u32 80, %s1793_s9  ;;  %v1426_v29 = vld [vmem:[%s1786_s1 + $0x1f8] sm:$0xff]   ;;  %v1434_v41 = vld [vmem:[%s1786_s1 + $0xc0] sm:$0xff]  }
  0x10   : > { %v1423_v26 = vld [vmem:[%s1786_s1 + $0x130] sm:$0xff]   ;;  %v1427_v30 = vld [vmem:[%s1786_s1 + $0x138] sm:$0xff]   ;;  %v1435_v42 = vld [vmem:[%s1786_s1] sm:$0xff]  }
  0x11   : > { %1265 = vmatpush3.bf16.msra.mxu0 %v1407_v10  ;;  %v1424_v27 = vld [vmem:[%s1786_s1 + $0x1b0] sm:$0xff]   ;;  %s1634_s28 = scalar_lea.vmem %s1785_s0, %s1372_s17  ;;  %v1428_v31 = vld [vmem:[%s1786_s1 + $0x1b8] sm:$0xff]   ;;  %v1436_v43 = vld [vmem:[%s1786_s1 + $0x80] sm:$0xff]  }
  0x12   : > { %1293 = vmatpush3.bf16.msra.mxu1 %v1408_v11  ;;  %1266 = vmatprep.subr.bf16.mxu0 %v1409_v12  ;;  %v1643_v32 = vld [vmem:[%s1634_s28 + $0x10] sm:$0xff]  ;;  %v1646_v33 = vld [vmem:[%s1634_s28 + $0x20] sm:$0xff]  ;;  %v1649_v34 = vld [vmem:[%s1634_s28 + $0x18] sm:$0xff] }
  0x13   : > { %1294 = vmatprep.subr.bf16.mxu1 %v1410_v13  ;;  %v1158_v35 = vcombine.low %v1643_v32, %v1646_v33  ;;  %v1159_v36 = vcombine.high %v1643_v32, %v1646_v33  ;;  %v1656_v37 = vld [vmem:[%s1634_s28 + $0x28] sm:$0xff]  ;;  %v1441_v48 = vld [vmem:[%s1786_s1 + $0x50] sm:$0xff]   ;;  %v1445_v52 = vld [vmem:[%s1786_s1 + $0x58] sm:$0xff]  }
  0x14   : > { %v1160_v38 = vcombine.low %v1649_v34, %v1656_v37  ;;  %v1161_v39 = vcombine.high %v1649_v34, %v1656_v37  ;;  %v1437_v44 = vld [vmem:[%s1786_s1 + $0x48] sm:$0xff]   ;;  %v1442_v49 = vld [vmem:[%s1786_s1 + $0xd0] sm:$0xff]   ;;  %v1446_v53 = vld [vmem:[%s1786_s1 + $0xd8] sm:$0xff]  }
  0x15   : > { %1267 = vmatpush3.bf16.msra.mxu0 %v1411_v14  ;;  %577 = vmatprep.mubr.bf16.mxu0 %v1159_v36  ;;  %v1438_v45 = vld [vmem:[%s1786_s1 + $0xc8] sm:$0xff]   ;;  %v1443_v50 = vld [vmem:[%s1786_s1 + $0x10] sm:$0xff]   ;;  %v1447_v54 = vld [vmem:[%s1786_s1 + $0x18] sm:$0xff]  }
  0x16   : > { %1295 = vmatpush3.bf16.msra.mxu1 %v1412_v15  ;;  %1268 = vmatprep.subr.bf16.mxu0 %v1413_v16  ;;  %v1439_v46 = vld [vmem:[%s1786_s1 + $0x8] sm:$0xff]   ;;  %v1444_v51 = vld [vmem:[%s1786_s1 + $0x90] sm:$0xff]   ;;  %v1448_v55 = vld [vmem:[%s1786_s1 + $0x98] sm:$0xff]  }
  0x17   : > { %1296 = vmatprep.subr.bf16.mxu1 %v1414_v17  ;;  %626 = vmatprep.mubr.bf16.mxu1 %v1161_v39  ;;  %v1440_v47 = vld [vmem:[%s1786_s1 + $0x88] sm:$0xff]   ;;  %v1449_v56 = vld [vmem:[%s1786_s1 + $0x60] sm:$0xff]   ;;  %v244_v60 = vld [vmem:[%s1634_s28 + $0x30] sm:$0xff] }
  0x18   : > { %v1450_v57 = vld [vmem:[%s1786_s1 + $0xe0] sm:$0xff]   ;;  %v245_v63 = vld [vmem:[%s1634_s28 + $0x38] sm:$0xff]  ;;  %v247_v0 = vld [vmem:[%s1634_s28 + $0x48] sm:$0xff] }
  0x19   : > { %1269 = vmatpush3.bf16.msra.mxu0 %v1415_v18  ;;  %v1451_v58 = vld [vmem:[%s1786_s1 + $0x20] sm:$0xff]   ;;  %v1165_v2 = vcombine.high %v245_v63, %v247_v0  ;;  %v1455_v3 = vld [vmem:[%s1786_s1 + $0x68] sm:$0xff]   ;;  %v1164_v4 = vcombine.low %v245_v63, %v247_v0  ;;  %v1461_v8 = vld [vmem:[%s1786_s1 + $0x70] sm:$0xff]  }
  0x1a   : > { %1297 = vmatpush3.bf16.msra.mxu1 %v1416_v19  ;;  %1270 = vmatprep.subr.bf16.mxu0 %v1417_v20  ;;  %v1452_v59 = vld [vmem:[%s1786_s1 + $0xa0] sm:$0xff]   ;;  %v1456_v5 = vld [vmem:[%s1786_s1 + $0xe8] sm:$0xff]   ;;  %v1462_v9 = vld [vmem:[%s1786_s1 + $0xf0] sm:$0xff]   ;;  %v1203_v20 = vcombine.high %v1646_v33, %v244_v60 }
  0x1b   : > { %1298 = vmatprep.subr.bf16.mxu1 %v1418_v21  ;;  %v246_v61 = vld [vmem:[%s1634_s28 + $0x40] sm:$0xff]  ;;  %v1459_v6 = vld [vmem:[%s1786_s1 + $0x28] sm:$0xff]   ;;  %v1463_v10 = vld [vmem:[%s1786_s1 + $0x30] sm:$0xff]  }
  0x1c   : > { %v1163_v62 = vcombine.high %v244_v60, %v246_v61  ;;  %v1162_v1 = vcombine.low %v244_v60, %v246_v61  ;;  %v1460_v7 = vld [vmem:[%s1786_s1 + $0xa8] sm:$0xff]   ;;  %v1464_v11 = vld [vmem:[%s1786_s1 + $0xb0] sm:$0xff]   ;;  %v1465_v12 = vld [vmem:[%s1786_s1 + $0x78] sm:$0xff]  }
  0x1d   : > { %1271 = vmatpush3.bf16.msra.mxu0 %v1419_v22  ;;  %v1466_v13 = vld [vmem:[%s1786_s1 + $0xf8] sm:$0xff]   ;;  %v168_v16 = vld [vmem:[%s1634_s28] sm:$0xff]  ;;  %v169_v19 = vld [vmem:[%s1634_s28 + $0x8] sm:$0xff]  ;;  %s1244_s28 = sshll.u32 %s1793_s9, 4 }
  0x1e   : > { %1299 = vmatpush3.bf16.msra.mxu1 %v1420_v23  ;;  %1272 = vmatprep.subr.bf16.mxu0 %v1421_v24  ;;  %v1467_v14 = vld [vmem:[%s1786_s1 + $0x38] sm:$0xff]   ;;  %v1198_v17 = vcombine.low %v168_v16, %v1643_v32  ;;  %v1199_v18 = vcombine.high %v168_v16, %v1643_v32  ;;  %v1200_v21 = vcombine.low %v169_v19, %v1649_v34  ;;  %s165_s30 = scalar_lea.vmem %s1787_s2, %s1244_s28 }
  0x1f   : > { %1300 = vmatprep.subr.bf16.mxu1 %v1422_v25  ;;  %v1468_v15 = vld [vmem:[%s1786_s1 + $0xb8] sm:$0xff]   ;;  %v1201_v22 = vcombine.high %v169_v19, %v1649_v34  ;;  %v1205_v23 = vcombine.high %v1656_v37, %v245_v63  ;;  %v1202_v24 = vcombine.low %v1646_v33, %v244_v60  ;;  %v1204_v25 = vcombine.low %v1656_v37, %v245_v63 }
  0x21   : > { %1273 = vmatpush3.bf16.msra.mxu0 %v1423_v26 }
  0x22   : > { %1301 = vmatpush3.bf16.msra.mxu1 %v1424_v27  ;;  %1274 = vmatprep.subr.bf16.mxu0 %v1425_v28 }
  0x23   : > { %1302 = vmatprep.subr.bf16.mxu1 %v1426_v29 }
  0x25   : > { %1275 = vmatpush3.bf16.msra.mxu0 %v1427_v30 }
  0x26   : > { %1303 = vmatpush3.bf16.msra.mxu1 %v1428_v31  ;;  %1316 = vmatprep.subr.bf16.mxu0 %v1433_v40 }
  0x27   : > { %1344 = vmatprep.subr.bf16.mxu1 %v1434_v41 }
  0x28   : > { %578 = vmatmul.mubr.bf16.vlgmr.msra.gmra.mrb[0].mxu0 %v1158_v35 }
  0x29   : > { %627 = vmatmul.mubr.bf16.vlgmr.msra.gmra.mrb[0].mxu1 %v1160_v38  ;;  %1317 = vmatpush3.bf16.msra.mxu0 %v1435_v42 }
  0x2a   : > { %1345 = vmatpush3.bf16.msra.mxu1 %v1436_v43  ;;  %1318 = vmatprep.subr.bf16.mxu0 %v1437_v44 }
  0x2b   : > { %1346 = vmatprep.subr.bf16.mxu1 %v1438_v45  ;;  %585 = vmatprep.mubr.bf16.mxu0 %v1163_v62 }
  0x2c   : > { %634 = vmatprep.mubr.bf16.mxu1 %v1165_v2 }
  0x2d   : > { %1319 = vmatpush3.bf16.msra.mxu0 %v1439_v46 }
  0x2e   : > { %1347 = vmatpush3.bf16.msra.mxu1 %v1440_v47  ;;  %1320 = vmatprep.subr.bf16.mxu0 %v1441_v48 }
  0x2f   : > { %1348 = vmatprep.subr.bf16.mxu1 %v1442_v49 }
  0x30   : > { %586 = vmatmul.mubr.bf16.gmra.mrb[4].mxu0 %v1162_v1 }
  0x31   : > { %1321 = vmatpush3.bf16.msra.mxu0 %v1443_v50  ;;  %635 = vmatmul.mubr.bf16.gmra.mrb[4].mxu1 %v1164_v4 }
  0x32   : > { %1349 = vmatpush3.bf16.msra.mxu1 %v1444_v51  ;;  %1322 = vmatprep.subr.bf16.mxu0 %v1445_v52 }
  0x33   : > { %1350 = vmatprep.subr.bf16.mxu1 %v1446_v53  ;;  %907 = vmatprep.mubr.bf16.mxu0 %v1199_v18 }
  0x34   : > { %956 = vmatprep.mubr.bf16.mxu1 %v1201_v22 }
  0x35   : > { %1323 = vmatpush3.bf16.msra.mxu0 %v1447_v54 }
  0x36   : > { %1351 = vmatpush3.bf16.msra.mxu1 %v1448_v55  ;;  %1324 = vmatprep.subr.bf16.mxu0 %v1449_v56 }
  0x37   : > { %1352 = vmatprep.subr.bf16.mxu1 %v1450_v57 }
  0x39   : > { %1325 = vmatpush3.bf16.msra.mxu0 %v1451_v58 }
  0x3a   : > { %1353 = vmatpush3.bf16.msra.mxu1 %v1452_v59  ;;  %1326 = vmatprep.subr.bf16.mxu0 %v1455_v3 }
  0x3b   : > { %1354 = vmatprep.subr.bf16.mxu1 %v1456_v5 }
  0x3d   : > { %1327 = vmatpush3.bf16.msra.mxu0 %v1459_v6 }
  0x3e   : > { %1355 = vmatpush3.bf16.msra.mxu1 %v1460_v7  ;;  %1328 = vmatprep.subr.bf16.mxu0 %v1461_v8 }
  0x3f   : > { %1356 = vmatprep.subr.bf16.mxu1 %v1462_v9 }
  0x41   : > { %1329 = vmatpush3.bf16.msra.mxu0 %v1463_v10 }
  0x42   : > { %1357 = vmatpush3.bf16.msra.mxu1 %v1464_v11  ;;  %1330 = vmatprep.subr.bf16.mxu0 %v1465_v12 }
  0x43   : > { %1358 = vmatprep.subr.bf16.mxu1 %v1466_v13 }
  0x45   : > { %1331 = vmatpush3.bf16.msra.mxu0 %v1467_v14 }
  0x46   : > { %1359 = vmatpush3.bf16.msra.mxu1 %v1468_v15 }
  0x48   : > { %908 = vmatmul.mubr.bf16.vlgmr.msra.gmra.mrb[8].mxu0 %v1198_v17 }
  0x49   : > { %957 = vmatmul.mubr.bf16.vlgmr.msra.gmra.mrb[8].mxu1 %v1200_v21  ;;  %915 = vmatprep.mubr.bf16.mxu0 %v1203_v20 }
  0x4a   : > { %964 = vmatprep.mubr.bf16.mxu1 %v1205_v23 }
  0x50   : > { %916 = vmatmul.mubr.bf16.gmra.mrb[12].mxu0 %v1202_v24 }
  0x51   : > { %965 = vmatmul.mubr.bf16.gmra.mrb[12].mxu1 %v1204_v25 }
  0xfb   : > { %v1276_v26 = vpop.f32.mrb[0].mxu0 }
  0xfc   : > { %v1304_v27 = vpop.f32.mrb[0].mxu1  ;;  %v1277_v28 = vpop.f32.mrb[1].mxu0 }
  0xfd   : > { %v1278_v29 = vadd.f32 %v1277_v28, %v1276_v26  ;;  %v1305_v30 = vpop.f32.mrb[1].mxu1  ;;  %v1279_v31 = vpop.f32.mrb[2].mxu0 }
  0xfe   : > { %v1306_v32 = vadd.f32 %v1305_v30, %v1304_v27  ;;  %v1307_v34 = vpop.f32.mrb[2].mxu1  ;;  %v1280_v35 = vpop.f32.mrb[3].mxu0 }
  0xff   : > { %v1281_v36 = vadd.f32 %v1280_v35, %v1279_v31  ;;  %v1308_v38 = vpop.f32.mrb[3].mxu1 }
 0x100   : > { %v629_v39 = vadd.f32 %v1306_v32, %v1278_v29  ;;  %v1309_v40 = vadd.f32 %v1308_v38, %v1307_v34 }
 0x102   : > { %v632_v41 = vadd.f32 %v1309_v40, %v1281_v36 }
 0x103   : > { %v1282_v42 = vpop.f32.mrb[4].mxu0 }
 0x104   : > { %v1310_v33 = vpop.f32.mrb[4].mxu1  ;;  %v1283_v43 = vpop.f32.mrb[5].mxu0 }
 0x105   : > { %v1284_v37 = vadd.f32 %v1283_v43, %v1282_v42  ;;  %v1311_v44 = vpop.f32.mrb[5].mxu1  ;;  %v1285_v45 = vpop.f32.mrb[6].mxu0 }
 0x106   : > { %v1312_v46 = vadd.f32 %v1311_v44, %v1310_v33  ;;  %v1313_v47 = vpop.f32.mrb[6].mxu1  ;;  %v1286_v48 = vpop.f32.mrb[7].mxu0 }
 0x107   : > { %v1287_v49 = vadd.f32 %v1286_v48, %v1285_v45  ;;  %v1314_v50 = vpop.f32.mrb[7].mxu1 }
 0x108   : > { %v637_v51 = vadd.f32 %v1312_v46, %v1284_v37  ;;  %v1315_v52 = vadd.f32 %v1314_v50, %v1313_v47 }
 0x10a   : > { %v640_v53 = vadd.f32 %v1315_v52, %v1287_v49 }
 0x11b   : > { %v1332_v54 = vpop.f32.mrb[8].mxu0 }
 0x11c   : > { %v1360_v55 = vpop.f32.mrb[8].mxu1  ;;  %v1333_v56 = vpop.f32.mrb[9].mxu0 }
 0x11d   : > { %v1334_v57 = vadd.f32 %v1333_v56, %v1332_v54  ;;  %v1361_v58 = vpop.f32.mrb[9].mxu1  ;;  %v1335_v59 = vpop.f32.mrb[10].mxu0 }
 0x11e   : > { %v1362_v60 = vadd.f32 %v1361_v58, %v1360_v55  ;;  %v1363_v61 = vpop.f32.mrb[10].mxu1  ;;  %v1336_v62 = vpop.f32.mrb[11].mxu0 }
 0x11f   : > { %v910_v63 = vadd.f32 %v1334_v57, %v629_v39  ;;  %v1337_v0 = vadd.f32 %v1336_v62, %v1335_v59  ;;  %v1364_v1 = vpop.f32.mrb[11].mxu1 }
 0x120   : > { %v1365_v2 = vadd.f32 %v1364_v1, %v1363_v61 }
 0x121   : > { %v959_v3 = vadd.f32 %v1362_v60, %v910_v63  ;;  %v913_v4 = vadd.f32 %v1337_v0, %v632_v41 }
 0x123   : > { %v977_v5 = vmul.f32 0.2, %v959_v3  ;;  %v962_v6 = vadd.f32 %v1365_v2, %v913_v4  ;;  %v1338_v7 = vpop.f32.mrb[12].mxu0  ;;  %vm973_vm0 = vcmp.ge.f32.partialorder %v959_v3, 0.0 }
 0x124   : > { %v1366_v8 = vpop.f32.mrb[12].mxu1  ;;  %v1339_v9 = vpop.f32.mrb[13].mxu0 }
 0x125   : > { %vm974_vm1 = vcmp.ge.f32.partialorder %v962_v6, 0.0  ;;  %v978_v10 = vmul.f32 0.2, %v962_v6  ;;  %v1340_v11 = vadd.f32 %v1339_v9, %v1338_v7  ;;  %v1367_v12 = vpop.f32.mrb[13].mxu1  ;;  %v1341_v13 = vpop.f32.mrb[14].mxu0  ;;  %v981_v17 = vsel %vm973_vm0, %v959_v3, %v977_v5 }
 0x126   : > { %v1368_v14 = vadd.f32 %v1367_v12, %v1366_v8  ;;  %v1369_v15 = vpop.f32.mrb[14].mxu1  ;;  %v1342_v16 = vpop.f32.mrb[15].mxu0 }
 0x127   : > { %v982_v18 = vsel %vm974_vm1, %v962_v6, %v978_v10  ;;  %v918_v19 = vadd.f32 %v1340_v11, %v637_v51  ;;  %v1343_v20 = vadd.f32 %v1342_v16, %v1341_v13  ;;  %v1370_v21 = vpop.f32.mrb[15].mxu1 }
 0x128   : > { %v1252_v22 = vpack.c.bf16 %v982_v18, %v981_v17  ;;  %v1371_v23 = vadd.f32 %v1370_v21, %v1369_v15 }
 0x129   : > { %v967_v24 = vadd.f32 %v1368_v14, %v918_v19  ;;  %v921_v25 = vadd.f32 %v1343_v20, %v640_v53 }
 0x12a   : > { %1253 = vst [vmem:[%s165_s30] sm:$0xff] %v1252_v22  }
 0x12b   : > { %v979_v26 = vmul.f32 0.2, %v967_v24  ;;  %v970_v27 = vadd.f32 %v1371_v23, %v921_v25  ;;  %vm975_vm2 = vcmp.ge.f32.partialorder %v967_v24, 0.0 }
 0x12d   : > { %vm976_vm3 = vcmp.ge.f32.partialorder %v970_v27, 0.0  ;;  %v980_v28 = vmul.f32 0.2, %v970_v27  ;;  %v983_v29 = vsel %vm975_vm2, %v967_v24, %v979_v26 }
 0x12f   : > { %v984_v30 = vsel %vm976_vm3, %v970_v27, %v980_v28 }
 0x130   : > { %v1257_v31 = vpack.c.bf16 %v984_v30, %v983_v29 }
 0x132   : > { %1259 = vst [vmem:[%s165_s30 + $0x8] sm:$0xff] %v1257_v31  }
 0x133 PF: > { %s12_s11 = sadd.s32 1, %s1499_s11   ;;  %s1788_s9 = smov %s1495_s10 }
 0x134   : > { %p9_p5 = scmp.ge.s32.totalorder %s12_s11, 4   ;;  %s1789_s10 = smov %s1791_s12 }
 0x136   :  { %11 = sbr.rel (!%p9_p5) target bundleno = 2 (0x2), region = 59 }

// kernel: unet_discriminator_sn.13
= control target key start
LH: loop header
LB: loop body
LE: loop exit
PB: predicated region body
PF: predicated region fallthrough
CT: control target
= control target key end

     0   :  { %s3150_s9 = smov 0   ;;  %s3152_s10 = smov 0   ;;  %s4015_s0 = inlined_call_operand.vmem [shape: bf16[2,24,1024], index: 0, kind: input, shape index: {}]   ;;  %s4016_s1 = inlined_call_operand.vmem [shape: bf16[2,1024,256], index: 1, kind: input, shape index: {}]   ;;  %s4017_s2 = inlined_call_operand.vmem [shape: bf16[2,16,256], index: 2, kind: output, shape index: {}]  }
   0x1   :  { %s3154_s11 = smov 0  }
   0x2 LB: > { %s24_s12 = sadd.s32 1, %s3129_s10  ;;  %p2263_p0 = scmp.ge.s32.totalorder %s3133_s11, 1  ;;  %s3133_s11 = sphi %s3154_s11, %s12_s11   ;;  %s3129_s10 = sphi %s3152_s10, %s4019_s10   ;;  %s3125_s9 = sphi %s3150_s9, %s4018_s9  }
   0x3   : > { %p26_p1 = scmp.ge.s32.totalorder %s24_s12, 2  ;;  %p126_p2 = scmp.lt.s32.totalorder %s3133_s11, 3 }
   0x5   : > { %s4021_s12 = smov (%p26_p1, %s24_s12), 0  ;;  %p127_p3 = pnand %p2263_p0, %p126_p2 }
   0x6   : > { %v2727_v0 = vld [vmem:[%s4016_s1 + $0x404] ss:$8 sps:$4 sm:$0xff] (!%p127_p3)   ;;  %v2731_v2 = vld [vmem:[%s4016_s1 + $0x400] ss:$8 sps:$4 sm:$0xff] (!%p127_p3)   ;;  %v2733_v4 = vld [vmem:[%s4016_s1 + $0x414] ss:$8 sps:$4 sm:$0xff] (!%p127_p3)  }
   0x7   : > { %130 = sbr.rel (%p127_p3) target bundleno = 487 (0x1e7), region = 28  ;;  %v2729_v1 = vld [vmem:[%s4016_s1 + $0x4] ss:$8 sps:$4 sm:$0xff] (!%p127_p3)   ;;  %1122 = vmatprep.subr.bf16.mxu1 (!%p127_p3), %v2727_v0  ;;  %v2732_v3 = vld [vmem:[%s4016_s1] ss:$8 sps:$4 sm:$0xff] (!%p127_p3)   ;;  %p153_p4 = scmp.lt.s32.totalorder (!%p127_p3), %s3125_s9, 1 }
   0x8   : > { %1974 = vmatprep.subr.bf16.mxu0 (!%p127_p3), %v2729_v1  ;;  %1123 = vmatpush1.bf16.msra.mxu1 (!%p127_p3), %v2731_v2  ;;  %v2735_v5 = vld [vmem:[%s4016_s1 + $0x14] ss:$8 sps:$4 sm:$0xff] (!%p127_p3)   ;;  %v2737_v6 = vld [vmem:[%s4016_s1 + $0x410] ss:$8 sps:$4 sm:$0xff] (!%p127_p3)   ;;  %v2739_v8 = vld [vmem:[%s4016_s1 + $0x424] ss:$8 sps:$4 sm:$0xff] (!%p127_p3)  }
   0x9   : > { %1975 = vmatpush1.bf16.msra.mxu0 (!%p127_p3), %v2732_v3  ;;  %1124 = vmatprep.subr.bf16.mxu1 (!%p127_p3), %v2733_v4  ;;  %v2738_v7 = vld [vmem:[%s4016_s1 + $0x10] ss:$8 sps:$4 sm:$0xff] (!%p127_p3)   ;;  %v2741_v9 = vld [vmem:[%s4016_s1 + $0x24] ss:$8 sps:$4 sm:$0xff] (!%p127_p3)   ;;  %v2743_v10 = vld [vmem:[%s4016_s1 + $0x420] ss:$8 sps:$4 sm:$0xff] (!%p127_p3)  }
   0xa   : > { %1976 = vmatprep.subr.bf16.mxu0 (!%p127_p3), %v2735_v5  ;;  %v2744_v11 = vld [vmem:[%s4016_s1 + $0x20] ss:$8 sps:$4 sm:$0xff] (!%p127_p3)   ;;  %v2745_v12 = vld [vmem:[%s4016_s1 + $0x434] ss:$8 sps:$4 sm:$0xff] (!%p127_p3)   ;;  %v2749_v14 = vld [vmem:[%s4016_s1 + $0x430] ss:$8 sps:$4 sm:$0xff] (!%p127_p3)  }
   0xb   : > { %v2747_v13 = vld [vmem:[%s4016_s1 + $0x34] ss:$8 sps:$4 sm:$0xff] (!%p127_p3)   ;;  %v2750_v15 = vld [vmem:[%s4016_s1 + $0x30] ss:$8 sps:$4 sm:$0xff] (!%p127_p3)   ;;  %v2751_v16 = vld [vmem:[%s4016_s1 + $0x444] ss:$8 sps:$4 sm:$0xff] (!%p127_p3)  }
   0xc   : > { %1125 = vmatpush1.bf16.msra.mxu1 (!%p127_p3), %v2737_v6  ;;  %v2753_v17 = vld [vmem:[%s4016_s1 + $0x44] ss:$8 sps:$4 sm:$0xff] (!%p127_p3)   ;;  %v2755_v18 = vld [vmem:[%s4016_s1 + $0x440] ss:$8 sps:$4 sm:$0xff] (!%p127_p3)   ;;  %v2757_v20 = vld [vmem:[%s4016_s1 + $0x454] ss:$8 sps:$4 sm:$0xff] (!%p127_p3)  }
   0xd   : > { %1977 = vmatpush1.bf16.msra.mxu0 (!%p127_p3), %v2738_v7  ;;  %1126 = vmatprep.subr.bf16.mxu1 (!%p127_p3), %v2739_v8  ;;  %v2756_v19 = vld [vmem:[%s4016_s1 + $0x40] ss:$8 sps:$4 sm:$0xff] (!%p127_p3)   ;;  %v2759_v21 = vld [vmem:[%s4016_s1 + $0x54] ss:$8 sps:$4 sm:$0xff] (!%p127_p3)   ;;  %v2761_v22 = vld [vmem:[%s4016_s1 + $0x450] ss:$8 sps:$4 sm:$0xff] (!%p127_p3)  }
   0xe   : > { %1978 = vmatprep.subr.bf16.mxu0 %v2741_v9  ;;  %v2762_v23 = vld [vmem:[%s4016_s1 + $0x50] ss:$8 sps:$4 sm:$0xff]   ;;  %v2763_v24 = vld [vmem:[%s4016_s1 + $0x464] ss:$8 sps:$4 sm:$0xff]   ;;  %v2767_v26 = vld [vmem:[%s4016_s1 + $0x460] ss:$8 sps:$4 sm:$0xff]  }
   0xf   : > { %v2765_v25 = vld [vmem:[%s4016_s1 + $0x64] ss:$8 sps:$4 sm:$0xff]   ;;  %v2768_v27 = vld [vmem:[%s4016_s1 + $0x60] ss:$8 sps:$4 sm:$0xff]   ;;  %v2769_v28 = vld [vmem:[%s4016_s1 + $0x474] ss:$8 sps:$4 sm:$0xff]  }
  0x10   : > { %1127 = vmatpush1.bf16.msra.mxu1 %v2743_v10  ;;  %v2771_v29 = vld [vmem:[%s4016_s1 + $0x74] ss:$8 sps:$4 sm:$0xff]   ;;  %v2773_v30 = vld [vmem:[%s4016_s1 + $0x470] ss:$8 sps:$4 sm:$0xff]   ;;  %v2775_v32 = vld [vmem:[%s4016_s1 + $0x484] ss:$8 sps:$4 sm:$0xff]  }
  0x11   : > { %1979 = vmatpush1.bf16.msra.mxu0 %v2744_v11  ;;  %1128 = vmatprep.subr.bf16.mxu1 %v2745_v12  ;;  %v2774_v31 = vld [vmem:[%s4016_s1 + $0x70] ss:$8 sps:$4 sm:$0xff]   ;;  %v2777_v33 = vld [vmem:[%s4016_s1 + $0x84] ss:$8 sps:$4 sm:$0xff]   ;;  %v2779_v34 = vld [vmem:[%s4016_s1 + $0x480] ss:$8 sps:$4 sm:$0xff]  }
  0x12   : > { %1980 = vmatprep.subr.bf16.mxu0 %v2747_v13  ;;  %v2780_v35 = vld [vmem:[%s4016_s1 + $0x80] ss:$8 sps:$4 sm:$0xff]   ;;  %s4023_s9 = smov (!%p153_p4, %s3125_s9), 1  ;;  %v2781_v36 = vld [vmem:[%s4016_s1 + $0x494] ss:$8 sps:$4 sm:$0xff]  }
  0x13   : > { %v2783_v37 = vld [vmem:[%s4016_s1 + $0x94] ss:$8 sps:$4 sm:$0xff]   ;;  %v2785_v38 = vld [vmem:[%s4016_s1 + $0x490] ss:$8 sps:$4 sm:$0xff]   ;;  %s2702_s19 = smul.u32 96, %s4023_s9  ;;  %s2671_s14 = sshll.u32 %s4023_s9, 4 }
  0x14   : > { %1129 = vmatpush1.bf16.msra.mxu1 %v2749_v14  ;;  %v2786_v39 = vld [vmem:[%s4016_s1 + $0x90] ss:$8 sps:$4 sm:$0xff]   ;;  %v2787_v40 = vld [vmem:[%s4016_s1 + $0x4a4] ss:$8 sps:$4 sm:$0xff]   ;;  %v2791_v42 = vld [vmem:[%s4016_s1 + $0x4a0] ss:$8 sps:$4 sm:$0xff]   ;;  %s167_s17 = scalar_lea.vmem %s4017_s2, %s2671_s14 }
  0x15   : > { %1981 = vmatpush1.bf16.msra.mxu0 %v2750_v15  ;;  %1130 = vmatprep.subr.bf16.mxu1 %v2751_v16  ;;  %v2789_v41 = vld [vmem:[%s4016_s1 + $0xa4] ss:$8 sps:$4 sm:$0xff]   ;;  %v2792_v43 = vld [vmem:[%s4016_s1 + $0xa0] ss:$8 sps:$4 sm:$0xff]   ;;  %s3310_s4 = scalar_lea.vmem %s4015_s0, %s2702_s19  ;;  %v2793_v44 = vld [vmem:[%s4016_s1 + $0x4b4] ss:$8 sps:$4 sm:$0xff]  }
  0x16   : > { %1982 = vmatprep.subr.bf16.mxu0 %v2753_v17  ;;  %v2795_v45 = vld [vmem:[%s4016_s1 + $0xb4] ss:$8 sps:$4 sm:$0xff]   ;;  %v2797_v46 = vld [vmem:[%s4016_s1 + $0x4b0] ss:$8 sps:$4 sm:$0xff]   ;;  %v305_v47 = vld [vmem:[%s3310_s4 + $0x20] sm:$0xff] }
  0x17   : > { %v309_v48 = vld [vmem:[%s3310_s4 + $0x40] sm:$0xff]  ;;  %v2798_v49 = vld [vmem:[%s4016_s1 + $0xb0] ss:$8 sps:$4 sm:$0xff]   ;;  %v2805_v57 = vld [vmem:[%s4016_s1 + $0x4d4] ss:$8 sps:$4 sm:$0xff]  }
  0x18   : > { %1131 = vmatpush1.bf16.msra.mxu1 %v2755_v18  ;;  %v2799_v50 = vld [vmem:[%s4016_s1 + $0x4c4] ss:$8 sps:$4 sm:$0xff]   ;;  %v2396_v51 = vcombine.high %v305_v47, %v309_v48  ;;  %v2803_v55 = vld [vmem:[%s4016_s1 + $0x4c0] ss:$8 sps:$4 sm:$0xff]   ;;  %v2807_v58 = vld [vmem:[%s4016_s1 + $0xd4] ss:$8 sps:$4 sm:$0xff]   ;;  %v2395_v7 = vcombine.low %v305_v47, %v309_v48 }
  0x19   : > { %1983 = vmatpush1.bf16.msra.mxu0 %v2756_v19  ;;  %1132 = vmatprep.subr.bf16.mxu1 %v2757_v20  ;;  %v169_v52 = vld [vmem:[%s3310_s4] sm:$0xff]  ;;  %v2809_v59 = vld [vmem:[%s4016_s1 + $0x4d0] ss:$8 sps:$4 sm:$0xff]   ;;  %v2817_v1 = vld [vmem:[%s4016_s1 + $0x4f4] ss:$8 sps:$4 sm:$0xff]  }
  0x1a   : > { %1984 = vmatprep.subr.bf16.mxu0 %v2759_v21  ;;  %v2801_v53 = vld [vmem:[%s4016_s1 + $0xc4] ss:$8 sps:$4 sm:$0xff]   ;;  %v2532_v54 = vcombine.high %v169_v52, %v305_v47  ;;  %1154 = vmatprep.mubr.bf16.mxu1 %v2396_v51  ;;  %v2804_v56 = vld [vmem:[%s4016_s1 + $0xc0] ss:$8 sps:$4 sm:$0xff]   ;;  %v2810_v60 = vld [vmem:[%s4016_s1 + $0xd0] ss:$8 sps:$4 sm:$0xff]   ;;  %v2531_v9 = vcombine.low %v169_v52, %v305_v47 }
  0x1b   : > { %v2811_v61 = vld [vmem:[%s4016_s1 + $0x4e4] ss:$8 sps:$4 sm:$0xff]   ;;  %v2815_v63 = vld [vmem:[%s4016_s1 + $0x4e0] ss:$8 sps:$4 sm:$0xff]   ;;  %v2819_v2 = vld [vmem:[%s4016_s1 + $0xf4] ss:$8 sps:$4 sm:$0xff]  }
  0x1c   : > { %1133 = vmatpush1.bf16.msra.mxu1 %v2761_v22  ;;  %2006 = vmatprep.mubr.bf16.mxu0 %v2532_v54  ;;  %v2813_v62 = vld [vmem:[%s4016_s1 + $0xe4] ss:$8 sps:$4 sm:$0xff]   ;;  %v2816_v0 = vld [vmem:[%s4016_s1 + $0xe0] ss:$8 sps:$4 sm:$0xff]   ;;  %v2821_v3 = vld [vmem:[%s4016_s1 + $0x4f0] ss:$8 sps:$4 sm:$0xff]  }
  0x1d   : > { %1985 = vmatpush1.bf16.msra.mxu0 %v2762_v23  ;;  %1134 = vmatprep.subr.bf16.mxu1 %v2763_v24  ;;  %v2822_v4 = vld [vmem:[%s4016_s1 + $0xf0] ss:$8 sps:$4 sm:$0xff]   ;;  %v2825_v5 = vld [vmem:[%s4016_s1 + $0x504] ss:$8 sps:$4 sm:$0xff]   ;;  %v2823_v8 = vld [vmem:[%s4016_s1 + $0x500] ss:$8 sps:$4 sm:$0xff]  }
  0x1e   : > { %1986 = vmatprep.subr.bf16.mxu0 %v2765_v25  ;;  %v2828_v6 = vld [vmem:[%s4016_s1 + $0x104] ss:$8 sps:$4 sm:$0xff]   ;;  %v2826_v10 = vld [vmem:[%s4016_s1 + $0x100] ss:$8 sps:$4 sm:$0xff]   ;;  %v2831_v11 = vld [vmem:[%s4016_s1 + $0x514] ss:$8 sps:$4 sm:$0xff]  }
  0x1f   : > { %v2834_v12 = vld [vmem:[%s4016_s1 + $0x114] ss:$8 sps:$4 sm:$0xff]   ;;  %v2829_v13 = vld [vmem:[%s4016_s1 + $0x510] ss:$8 sps:$4 sm:$0xff]   ;;  %v2837_v15 = vld [vmem:[%s4016_s1 + $0x524] ss:$8 sps:$4 sm:$0xff]  }
  0x20   : > { %1135 = vmatpush1.bf16.msra.mxu1 %v2767_v26  ;;  %v2832_v14 = vld [vmem:[%s4016_s1 + $0x110] ss:$8 sps:$4 sm:$0xff]   ;;  %v2840_v16 = vld [vmem:[%s4016_s1 + $0x124] ss:$8 sps:$4 sm:$0xff]   ;;  %v2835_v17 = vld [vmem:[%s4016_s1 + $0x520] ss:$8 sps:$4 sm:$0xff]  }
  0x21   : > { %1987 = vmatpush1.bf16.msra.mxu0 %v2768_v27  ;;  %1136 = vmatprep.subr.bf16.mxu1 %v2769_v28  ;;  %v2838_v18 = vld [vmem:[%s4016_s1 + $0x120] ss:$8 sps:$4 sm:$0xff]   ;;  %v2843_v19 = vld [vmem:[%s4016_s1 + $0x534] ss:$8 sps:$4 sm:$0xff]   ;;  %v2841_v21 = vld [vmem:[%s4016_s1 + $0x530] ss:$8 sps:$4 sm:$0xff]  }
  0x22   : > { %1988 = vmatprep.subr.bf16.mxu0 %v2771_v29  ;;  %v2846_v20 = vld [vmem:[%s4016_s1 + $0x134] ss:$8 sps:$4 sm:$0xff]   ;;  %v2844_v22 = vld [vmem:[%s4016_s1 + $0x130] ss:$8 sps:$4 sm:$0xff]   ;;  %v2849_v23 = vld [vmem:[%s4016_s1 + $0x544] ss:$8 sps:$4 sm:$0xff]  }
  0x23   : > { %v2852_v24 = vld [vmem:[%s4016_s1 + $0x144] ss:$8 sps:$4 sm:$0xff]   ;;  %v2847_v25 = vld [vmem:[%s4016_s1 + $0x540] ss:$8 sps:$4 sm:$0xff]   ;;  %v2855_v27 = vld [vmem:[%s4016_s1 + $0x554] ss:$8 sps:$4 sm:$0xff]  }
  0x24   : > { %1137 = vmatpush1.bf16.msra.mxu1 %v2773_v30  ;;  %v2850_v26 = vld [vmem:[%s4016_s1 + $0x140] ss:$8 sps:$4 sm:$0xff]   ;;  %v2858_v28 = vld [vmem:[%s4016_s1 + $0x154] ss:$8 sps:$4 sm:$0xff]   ;;  %v2853_v29 = vld [vmem:[%s4016_s1 + $0x550] ss:$8 sps:$4 sm:$0xff]  }
  0x25   : > { %1989 = vmatpush1.bf16.msra.mxu0 %v2774_v31  ;;  %1138 = vmatprep.subr.bf16.mxu1 %v2775_v32  ;;  %v2856_v30 = vld [vmem:[%s4016_s1 + $0x150] ss:$8 sps:$4 sm:$0xff]   ;;  %v2861_v31 = vld [vmem:[%s4016_s1 + $0x564] ss:$8 sps:$4 sm:$0xff]   ;;  %v2874_v47 = vld [vmem:[%s4016_s1 + $0x180] ss:$8 sps:$4 sm:$0xff]  }
  0x26   : > { %1990 = vmatprep.subr.bf16.mxu0 %v2777_v33  ;;  %v2864_v32 = vld [vmem:[%s4016_s1 + $0x164] ss:$8 sps:$4 sm:$0xff]   ;;  %v2879_v48 = vld [vmem:[%s4016_s1 + $0x594] ss:$8 sps:$4 sm:$0xff]   ;;  %v2880_v51 = vld [vmem:[%s4016_s1 + $0x190] ss:$8 sps:$4 sm:$0xff]  }
  0x27   : > { %v3454_v33 = vld [vmem:[%s3310_s4 + $0x28] sm:$0xff] }
  0x28   : > { %1139 = vmatpush1.bf16.msra.mxu1 %v2779_v34  ;;  %v3457_v34 = vld [vmem:[%s3310_s4 + $0x48] sm:$0xff] }
  0x29   : > { %1991 = vmatpush1.bf16.msra.mxu0 %v2780_v35  ;;  %1140 = vmatprep.subr.bf16.mxu1 %v2781_v36  ;;  %v2859_v35 = vld [vmem:[%s4016_s1 + $0x560] ss:$8 sps:$4 sm:$0xff]   ;;  %v2398_v36 = vcombine.high %v3454_v33, %v3457_v34  ;;  %v2885_v52 = vld [vmem:[%s4016_s1 + $0x5a4] ss:$8 sps:$4 sm:$0xff]  }
  0x2a   : > { %1992 = vmatprep.subr.bf16.mxu0 %v2783_v37  ;;  %v2862_v37 = vld [vmem:[%s4016_s1 + $0x160] ss:$8 sps:$4 sm:$0xff]  }
  0x2b   : > { %v2883_v54 = vld [vmem:[%s4016_s1 + $0x5a0] ss:$8 sps:$4 sm:$0xff]  }
  0x2c   : > { %1141 = vmatpush1.bf16.msra.mxu1 %v2785_v38  ;;  %v3468_v38 = vld [vmem:[%s3310_s4 + $0x8] sm:$0xff] }
  0x2d   : > { %1993 = vmatpush1.bf16.msra.mxu0 %v2786_v39  ;;  %1142 = vmatprep.subr.bf16.mxu1 %v2787_v40  ;;  %v2867_v39 = vld [vmem:[%s4016_s1 + $0x574] ss:$8 sps:$4 sm:$0xff]  }
  0x2e   : > { %1994 = vmatprep.subr.bf16.mxu0 %v2789_v41  ;;  %v2870_v40 = vld [vmem:[%s4016_s1 + $0x174] ss:$8 sps:$4 sm:$0xff]   ;;  %v2534_v41 = vcombine.high %v3468_v38, %v3454_v33 }
  0x30   : > { %1143 = vmatpush1.bf16.msra.mxu1 %v2791_v42  ;;  %v2865_v42 = vld [vmem:[%s4016_s1 + $0x570] ss:$8 sps:$4 sm:$0xff]  }
  0x31   : > { %1995 = vmatpush1.bf16.msra.mxu0 %v2792_v43  ;;  %1144 = vmatprep.subr.bf16.mxu1 %v2793_v44  ;;  %v2868_v43 = vld [vmem:[%s4016_s1 + $0x170] ss:$8 sps:$4 sm:$0xff]   ;;  %v2873_v44 = vld [vmem:[%s4016_s1 + $0x584] ss:$8 sps:$4 sm:$0xff]  }
  0x32   : > { %1996 = vmatprep.subr.bf16.mxu0 %v2795_v45  ;;  %v2876_v45 = vld [vmem:[%s4016_s1 + $0x184] ss:$8 sps:$4 sm:$0xff]  }
  0x34   : > { %1145 = vmatpush1.bf16.msra.mxu1 %v2797_v46  ;;  %v2871_v46 = vld [vmem:[%s4016_s1 + $0x580] ss:$8 sps:$4 sm:$0xff]  }
  0x35   : > { %1997 = vmatpush1.bf16.msra.mxu0 %v2798_v49  ;;  %1146 = vmatprep.subr.bf16.mxu1 %v2799_v50  ;;  %v2882_v49 = vld [vmem:[%s4016_s1 + $0x194] ss:$8 sps:$4 sm:$0xff]   ;;  %v2877_v50 = vld [vmem:[%s4016_s1 + $0x590] ss:$8 sps:$4 sm:$0xff]  }
  0x36   : > { %1998 = vmatprep.subr.bf16.mxu0 %v2801_v53  ;;  %v2888_v53 = vld [vmem:[%s4016_s1 + $0x1a4] ss:$8 sps:$4 sm:$0xff]  }
  0x38   : > { %1147 = vmatpush1.bf16.msra.mxu1 %v2803_v55  ;;  %v2886_v55 = vld [vmem:[%s4016_s1 + $0x1a0] ss:$8 sps:$4 sm:$0xff]  }
  0x39   : > { %1999 = vmatpush1.bf16.msra.mxu0 %v2804_v56  ;;  %1148 = vmatprep.subr.bf16.mxu1 %v2805_v57  ;;  %v2891_v56 = vld [vmem:[%s4016_s1 + $0x5b4] ss:$8 sps:$4 sm:$0xff]  }
  0x3a   : > { %2000 = vmatprep.subr.bf16.mxu0 %v2807_v58  ;;  %v2894_v57 = vld [vmem:[%s4016_s1 + $0x1b4] ss:$8 sps:$4 sm:$0xff]   ;;  %v2889_v58 = vld [vmem:[%s4016_s1 + $0x5b0] ss:$8 sps:$4 sm:$0xff]  }
  0x3c   : > { %1149 = vmatpush1.bf16.msra.mxu1 %v2809_v59  ;;  %v2892_v59 = vld [vmem:[%s4016_s1 + $0x1b0] ss:$8 sps:$4 sm:$0xff]  }
  0x3d   : > { %2001 = vmatpush1.bf16.msra.mxu0 %v2810_v60  ;;  %1150 = vmatprep.subr.bf16.mxu1 %v2811_v61  ;;  %v2897_v60 = vld [vmem:[%s4016_s1 + $0x5c4] ss:$8 sps:$4 sm:$0xff]  }
  0x3e   : > { %2002 = vmatprep.subr.bf16.mxu0 %v2813_v62  ;;  %v2900_v61 = vld [vmem:[%s4016_s1 + $0x1c4] ss:$8 sps:$4 sm:$0xff]   ;;  %v2895_v62 = vld [vmem:[%s4016_s1 + $0x5c0] ss:$8 sps:$4 sm:$0xff]  }
  0x40   : > { %1151 = vmatpush1.bf16.msra.mxu1 %v2815_v63  ;;  %v2898_v63 = vld [vmem:[%s4016_s1 + $0x1c0] ss:$8 sps:$4 sm:$0xff]  }
  0x41   : > { %2003 = vmatpush1.bf16.msra.mxu0 %v2816_v0  ;;  %1152 = vmatprep.subr.bf16.mxu1 %v2817_v1  ;;  %v2903_v0 = vld [vmem:[%s4016_s1 + $0x5d4] ss:$8 sps:$4 sm:$0xff]  }
  0x42   : > { %2004 = vmatprep.subr.bf16.mxu0 %v2819_v2  ;;  %v2906_v1 = vld [vmem:[%s4016_s1 + $0x1d4] ss:$8 sps:$4 sm:$0xff]   ;;  %v2901_v2 = vld [vmem:[%s4016_s1 + $0x5d0] ss:$8 sps:$4 sm:$0xff]  }
  0x44   : > { %1153 = vmatpush1.bf16.msra.mxu1 %v2821_v3  ;;  %v2904_v3 = vld [vmem:[%s4016_s1 + $0x1d0] ss:$8 sps:$4 sm:$0xff]  }
  0x45   : > { %2005 = vmatpush1.bf16.msra.mxu0 %v2822_v4  ;;  %1165 = vmatprep.subr.bf16.mxu1 %v2825_v5  ;;  %v2909_v4 = vld [vmem:[%s4016_s1 + $0x5e4] ss:$8 sps:$4 sm:$0xff]  }
  0x46   : > { %2017 = vmatprep.subr.bf16.mxu0 %v2828_v6  ;;  %v2912_v5 = vld [vmem:[%s4016_s1 + $0x1e4] ss:$8 sps:$4 sm:$0xff]   ;;  %v2907_v6 = vld [vmem:[%s4016_s1 + $0x5e0] ss:$8 sps:$4 sm:$0xff]  }
  0x47   : > { %1155 = vmatmul.mubr.bf16.vlgmr.msra.gmra.mrb[0].mxu1 %v2395_v7  ;;  %v2910_v7 = vld [vmem:[%s4016_s1 + $0x1e0] ss:$8 sps:$4 sm:$0xff]  }
  0x48   : > { %2007 = vmatmul.mubr.bf16.vlgmr.msra.gmra.mrb[0].mxu0 %v2531_v9  ;;  %1166 = vmatpush1.bf16.msra.mxu1 %v2823_v8  ;;  %v2915_v8 = vld [vmem:[%s4016_s1 + $0x5f4] ss:$8 sps:$4 sm:$0xff]  }
  0x49   : > { %2018 = vmatpush1.bf16.msra.mxu0 %v2826_v10  ;;  %1167 = vmatprep.subr.bf16.mxu1 %v2831_v11  ;;  %v2918_v9 = vld [vmem:[%s4016_s1 + $0x1f4] ss:$8 sps:$4 sm:$0xff]   ;;  %v2913_v10 = vld [vmem:[%s4016_s1 + $0x5f0] ss:$8 sps:$4 sm:$0xff]  }
  0x4a   : > { %2019 = vmatprep.subr.bf16.mxu0 %v2834_v12  ;;  %1197 = vmatprep.mubr.bf16.mxu1 %v2398_v36  ;;  %v2916_v11 = vld [vmem:[%s4016_s1 + $0x1f0] ss:$8 sps:$4 sm:$0xff]   ;;  %v2921_v12 = vld [vmem:[%s4016_s1 + $0x604] ss:$8 sps:$4 sm:$0xff]  }
  0x4b   : > { %2049 = vmatprep.mubr.bf16.mxu0 %v2534_v41  ;;  %v2948_v36 = vld [vmem:[%s4016_s1 + $0x244] ss:$8 sps:$4 sm:$0xff]   ;;  %v2949_v41 = vld [vmem:[%s4016_s1 + $0x650] ss:$8 sps:$4 sm:$0xff]  }
  0x4c   : > { %1168 = vmatpush1.bf16.msra.mxu1 %v2829_v13  ;;  %v2924_v13 = vld [vmem:[%s4016_s1 + $0x204] ss:$8 sps:$4 sm:$0xff]  }
  0x4d   : > { %2020 = vmatpush1.bf16.msra.mxu0 %v2832_v14  ;;  %1169 = vmatprep.subr.bf16.mxu1 %v2837_v15  ;;  %v2397_v14 = vcombine.low %v3454_v33, %v3457_v34  ;;  %v2533_v15 = vcombine.low %v3468_v38, %v3454_v33  ;;  %v2937_v33 = vld [vmem:[%s4016_s1 + $0x630] ss:$8 sps:$4 sm:$0xff]   ;;  %v2946_v38 = vld [vmem:[%s4016_s1 + $0x240] ss:$8 sps:$4 sm:$0xff]  }
  0x4e   : > { %2021 = vmatprep.subr.bf16.mxu0 %v2840_v16  ;;  %v2919_v16 = vld [vmem:[%s4016_s1 + $0x600] ss:$8 sps:$4 sm:$0xff]   ;;  %v2940_v34 = vld [vmem:[%s4016_s1 + $0x230] ss:$8 sps:$4 sm:$0xff]  }
  0x50   : > { %1170 = vmatpush1.bf16.msra.mxu1 %v2835_v17  ;;  %v2922_v17 = vld [vmem:[%s4016_s1 + $0x200] ss:$8 sps:$4 sm:$0xff]  }
  0x51   : > { %2022 = vmatpush1.bf16.msra.mxu0 %v2838_v18  ;;  %1171 = vmatprep.subr.bf16.mxu1 %v2843_v19  ;;  %v2927_v18 = vld [vmem:[%s4016_s1 + $0x614] ss:$8 sps:$4 sm:$0xff]  }
  0x52   : > { %2023 = vmatprep.subr.bf16.mxu0 %v2846_v20  ;;  %v2930_v19 = vld [vmem:[%s4016_s1 + $0x214] ss:$8 sps:$4 sm:$0xff]  }
  0x53   : > { %v3603_v20 = vld [vmem:[%s3310_s4 + $0x30] sm:$0xff] }
  0x54   : > { %1172 = vmatpush1.bf16.msra.mxu1 %v2841_v21  ;;  %v3606_v21 = vld [vmem:[%s3310_s4 + $0x50] sm:$0xff] }
  0x55   : > { %2024 = vmatpush1.bf16.msra.mxu0 %v2844_v22  ;;  %1173 = vmatprep.subr.bf16.mxu1 %v2849_v23  ;;  %v2925_v22 = vld [vmem:[%s4016_s1 + $0x610] ss:$8 sps:$4 sm:$0xff]  }
  0x56   : > { %2025 = vmatprep.subr.bf16.mxu0 %v2852_v24  ;;  %v2928_v23 = vld [vmem:[%s4016_s1 + $0x210] ss:$8 sps:$4 sm:$0xff]   ;;  %v2400_v24 = vcombine.high %v3603_v20, %v3606_v21 }
  0x58   : > { %1174 = vmatpush1.bf16.msra.mxu1 %v2847_v25  ;;  %v3617_v25 = vld [vmem:[%s3310_s4 + $0x10] sm:$0xff] }
  0x59   : > { %2026 = vmatpush1.bf16.msra.mxu0 %v2850_v26  ;;  %1175 = vmatprep.subr.bf16.mxu1 %v2855_v27  ;;  %v2933_v26 = vld [vmem:[%s4016_s1 + $0x624] ss:$8 sps:$4 sm:$0xff]  }
  0x5a   : > { %2027 = vmatprep.subr.bf16.mxu0 %v2858_v28  ;;  %v2936_v27 = vld [vmem:[%s4016_s1 + $0x224] ss:$8 sps:$4 sm:$0xff]   ;;  %v2536_v28 = vcombine.high %v3617_v25, %v3603_v20 }
  0x5c   : > { %1176 = vmatpush1.bf16.msra.mxu1 %v2853_v29  ;;  %v2931_v29 = vld [vmem:[%s4016_s1 + $0x620] ss:$8 sps:$4 sm:$0xff]  }
  0x5d   : > { %2028 = vmatpush1.bf16.msra.mxu0 %v2856_v30  ;;  %1177 = vmatprep.subr.bf16.mxu1 %v2861_v31  ;;  %v2934_v30 = vld [vmem:[%s4016_s1 + $0x220] ss:$8 sps:$4 sm:$0xff]   ;;  %v2939_v31 = vld [vmem:[%s4016_s1 + $0x634] ss:$8 sps:$4 sm:$0xff]  }
  0x5e   : > { %2029 = vmatprep.subr.bf16.mxu0 %v2864_v32  ;;  %v2942_v32 = vld [vmem:[%s4016_s1 + $0x234] ss:$8 sps:$4 sm:$0xff]  }
  0x60   : > { %1178 = vmatpush1.bf16.msra.mxu1 %v2859_v35  ;;  %v2945_v35 = vld [vmem:[%s4016_s1 + $0x644] ss:$8 sps:$4 sm:$0xff]  }
  0x61   : > { %2030 = vmatpush1.bf16.msra.mxu0 %v2862_v37  ;;  %1179 = vmatprep.subr.bf16.mxu1 %v2867_v39  ;;  %v2943_v37 = vld [vmem:[%s4016_s1 + $0x640] ss:$8 sps:$4 sm:$0xff]   ;;  %v2951_v39 = vld [vmem:[%s4016_s1 + $0x654] ss:$8 sps:$4 sm:$0xff]  }
  0x62   : > { %2031 = vmatprep.subr.bf16.mxu0 %v2870_v40  ;;  %v2954_v40 = vld [vmem:[%s4016_s1 + $0x254] ss:$8 sps:$4 sm:$0xff]  }
  0x64   : > { %1180 = vmatpush1.bf16.msra.mxu1 %v2865_v42  ;;  %v2952_v42 = vld [vmem:[%s4016_s1 + $0x250] ss:$8 sps:$4 sm:$0xff]  }
  0x65   : > { %2032 = vmatpush1.bf16.msra.mxu0 %v2868_v43  ;;  %1181 = vmatprep.subr.bf16.mxu1 %v2873_v44  ;;  %v2957_v43 = vld [vmem:[%s4016_s1 + $0x664] ss:$8 sps:$4 sm:$0xff]  }
  0x66   : > { %2033 = vmatprep.subr.bf16.mxu0 %v2876_v45  ;;  %v2960_v44 = vld [vmem:[%s4016_s1 + $0x264] ss:$8 sps:$4 sm:$0xff]   ;;  %v2955_v45 = vld [vmem:[%s4016_s1 + $0x660] ss:$8 sps:$4 sm:$0xff]  }
  0x68   : > { %1182 = vmatpush1.bf16.msra.mxu1 %v2871_v46  ;;  %v2958_v46 = vld [vmem:[%s4016_s1 + $0x260] ss:$8 sps:$4 sm:$0xff]  }
  0x69   : > { %2034 = vmatpush1.bf16.msra.mxu0 %v2874_v47  ;;  %1183 = vmatprep.subr.bf16.mxu1 %v2879_v48  ;;  %v2963_v47 = vld [vmem:[%s4016_s1 + $0x674] ss:$8 sps:$4 sm:$0xff]  }
  0x6a   : > { %2035 = vmatprep.subr.bf16.mxu0 %v2882_v49  ;;  %v2966_v48 = vld [vmem:[%s4016_s1 + $0x274] ss:$8 sps:$4 sm:$0xff]   ;;  %v2961_v49 = vld [vmem:[%s4016_s1 + $0x670] ss:$8 sps:$4 sm:$0xff]  }
  0x6c   : > { %1184 = vmatpush1.bf16.msra.mxu1 %v2877_v50  ;;  %v2964_v50 = vld [vmem:[%s4016_s1 + $0x270] ss:$8 sps:$4 sm:$0xff]  }
  0x6d   : > { %2036 = vmatpush1.bf16.msra.mxu0 %v2880_v51  ;;  %1185 = vmatprep.subr.bf16.mxu1 %v2885_v52  ;;  %v2969_v51 = vld [vmem:[%s4016_s1 + $0x684] ss:$8 sps:$4 sm:$0xff]  }
  0x6e   : > { %2037 = vmatprep.subr.bf16.mxu0 %v2888_v53  ;;  %v2972_v52 = vld [vmem:[%s4016_s1 + $0x284] ss:$8 sps:$4 sm:$0xff]   ;;  %v2967_v53 = vld [vmem:[%s4016_s1 + $0x680] ss:$8 sps:$4 sm:$0xff]  }
  0x70   : > { %1186 = vmatpush1.bf16.msra.mxu1 %v2883_v54  ;;  %v2970_v54 = vld [vmem:[%s4016_s1 + $0x280] ss:$8 sps:$4 sm:$0xff]  }
  0x71   : > { %2038 = vmatpush1.bf16.msra.mxu0 %v2886_v55  ;;  %1187 = vmatprep.subr.bf16.mxu1 %v2891_v56  ;;  %v2975_v55 = vld [vmem:[%s4016_s1 + $0x694] ss:$8 sps:$4 sm:$0xff]  }
  0x72   : > { %2039 = vmatprep.subr.bf16.mxu0 %v2894_v57  ;;  %v2978_v56 = vld [vmem:[%s4016_s1 + $0x294] ss:$8 sps:$4 sm:$0xff]   ;;  %v2973_v57 = vld [vmem:[%s4016_s1 + $0x690] ss:$8 sps:$4 sm:$0xff]  }
  0x74   : > { %1188 = vmatpush1.bf16.msra.mxu1 %v2889_v58  ;;  %v2976_v58 = vld [vmem:[%s4016_s1 + $0x290] ss:$8 sps:$4 sm:$0xff]  }
  0x75   : > { %2040 = vmatpush1.bf16.msra.mxu0 %v2892_v59  ;;  %1189 = vmatprep.subr.bf16.mxu1 %v2897_v60  ;;  %v2981_v59 = vld [vmem:[%s4016_s1 + $0x6a4] ss:$8 sps:$4 sm:$0xff]  }
  0x76   : > { %2041 = vmatprep.subr.bf16.mxu0 %v2900_v61  ;;  %v2984_v60 = vld [vmem:[%s4016_s1 + $0x2a4] ss:$8 sps:$4 sm:$0xff]   ;;  %v2979_v61 = vld [vmem:[%s4016_s1 + $0x6a0] ss:$8 sps:$4 sm:$0xff]  }
  0x78   : > { %1190 = vmatpush1.bf16.msra.mxu1 %v2895_v62  ;;  %v2982_v62 = vld [vmem:[%s4016_s1 + $0x2a0] ss:$8 sps:$4 sm:$0xff]  }
  0x79   : > { %2042 = vmatpush1.bf16.msra.mxu0 %v2898_v63  ;;  %1191 = vmatprep.subr.bf16.mxu1 %v2903_v0  ;;  %v2987_v63 = vld [vmem:[%s4016_s1 + $0x6b4] ss:$8 sps:$4 sm:$0xff]  }
  0x7a   : > { %2043 = vmatprep.subr.bf16.mxu0 %v2906_v1  ;;  %v2990_v0 = vld [vmem:[%s4016_s1 + $0x2b4] ss:$8 sps:$4 sm:$0xff]   ;;  %v2985_v1 = vld [vmem:[%s4016_s1 + $0x6b0] ss:$8 sps:$4 sm:$0xff]  }
  0x7c   : > { %1192 = vmatpush1.bf16.msra.mxu1 %v2901_v2  ;;  %v2988_v2 = vld [vmem:[%s4016_s1 + $0x2b0] ss:$8 sps:$4 sm:$0xff]  }
  0x7d   : > { %2044 = vmatpush1.bf16.msra.mxu0 %v2904_v3  ;;  %1193 = vmatprep.subr.bf16.mxu1 %v2909_v4  ;;  %v2993_v3 = vld [vmem:[%s4016_s1 + $0x6c4] ss:$8 sps:$4 sm:$0xff]  }
  0x7e   : > { %2045 = vmatprep.subr.bf16.mxu0 %v2912_v5  ;;  %v2996_v4 = vld [vmem:[%s4016_s1 + $0x2c4] ss:$8 sps:$4 sm:$0xff]   ;;  %v2991_v5 = vld [vmem:[%s4016_s1 + $0x6c0] ss:$8 sps:$4 sm:$0xff]  }
  0x80   : > { %1194 = vmatpush1.bf16.msra.mxu1 %v2907_v6  ;;  %v2994_v6 = vld [vmem:[%s4016_s1 + $0x2c0] ss:$8 sps:$4 sm:$0xff]  }
  0x81   : > { %2046 = vmatpush1.bf16.msra.mxu0 %v2910_v7  ;;  %1195 = vmatprep.subr.bf16.mxu1 %v2915_v8  ;;  %v2999_v7 = vld [vmem:[%s4016_s1 + $0x6d4] ss:$8 sps:$4 sm:$0xff]  }
  0x82   : > { %2047 = vmatprep.subr.bf16.mxu0 %v2918_v9  ;;  %v3002_v8 = vld [vmem:[%s4016_s1 + $0x2d4] ss:$8 sps:$4 sm:$0xff]   ;;  %v2997_v9 = vld [vmem:[%s4016_s1 + $0x6d0] ss:$8 sps:$4 sm:$0xff]  }
  0x84   : > { %1196 = vmatpush1.bf16.msra.mxu1 %v2913_v10  ;;  %v3000_v10 = vld [vmem:[%s4016_s1 + $0x2d0] ss:$8 sps:$4 sm:$0xff]  }
  0x85   : > { %2048 = vmatpush1.bf16.msra.mxu0 %v2916_v11  ;;  %1208 = vmatprep.subr.bf16.mxu1 %v2921_v12  ;;  %v3005_v11 = vld [vmem:[%s4016_s1 + $0x6e4] ss:$8 sps:$4 sm:$0xff]  }
  0x86   : > { %2060 = vmatprep.subr.bf16.mxu0 %v2924_v13  ;;  %v3008_v12 = vld [vmem:[%s4016_s1 + $0x2e4] ss:$8 sps:$4 sm:$0xff]   ;;  %v3003_v13 = vld [vmem:[%s4016_s1 + $0x6e0] ss:$8 sps:$4 sm:$0xff]  }
  0x87   : > { %1198 = vmatmul.mubr.bf16.vlgmr.msra.gmra.mrb[0].mxu1 %v2397_v14  ;;  %v3006_v14 = vld [vmem:[%s4016_s1 + $0x2e0] ss:$8 sps:$4 sm:$0xff]  }
  0x88   : > { %2050 = vmatmul.mubr.bf16.vlgmr.msra.gmra.mrb[0].mxu0 %v2533_v15  ;;  %1209 = vmatpush1.bf16.msra.mxu1 %v2919_v16  ;;  %v3011_v15 = vld [vmem:[%s4016_s1 + $0x6f4] ss:$8 sps:$4 sm:$0xff]  }
  0x89   : > { %2061 = vmatpush1.bf16.msra.mxu0 %v2922_v17  ;;  %1210 = vmatprep.subr.bf16.mxu1 %v2927_v18  ;;  %v3014_v16 = vld [vmem:[%s4016_s1 + $0x2f4] ss:$8 sps:$4 sm:$0xff]   ;;  %v3009_v17 = vld [vmem:[%s4016_s1 + $0x6f0] ss:$8 sps:$4 sm:$0xff]  }
  0x8a   : > { %2062 = vmatprep.subr.bf16.mxu0 %v2930_v19  ;;  %1240 = vmatprep.mubr.bf16.mxu1 %v2400_v24  ;;  %v3012_v18 = vld [vmem:[%s4016_s1 + $0x2f0] ss:$8 sps:$4 sm:$0xff]   ;;  %v3017_v19 = vld [vmem:[%s4016_s1 + $0x704] ss:$8 sps:$4 sm:$0xff]   ;;  %v2535_v24 = vcombine.low %v3617_v25, %v3603_v20 }
  0x8b   : > { %2092 = vmatprep.mubr.bf16.mxu0 %v2536_v28  ;;  %v3806_v28 = vld [vmem:[%s3310_s4 + $0x18] sm:$0xff] }
  0x8c   : > { %1211 = vmatpush1.bf16.msra.mxu1 %v2925_v22  ;;  %v3020_v22 = vld [vmem:[%s4016_s1 + $0x304] ss:$8 sps:$4 sm:$0xff]  }
  0x8d   : > { %2063 = vmatpush1.bf16.msra.mxu0 %v2928_v23  ;;  %1212 = vmatprep.subr.bf16.mxu1 %v2933_v26  ;;  %v2399_v23 = vcombine.low %v3603_v20, %v3606_v21  ;;  %v3800_v26 = vld [vmem:[%s3310_s4 + $0x38] sm:$0xff] }
  0x8e   : > { %2064 = vmatprep.subr.bf16.mxu0 %v2936_v27  ;;  %v3803_v27 = vld [vmem:[%s3310_s4 + $0x58] sm:$0xff] }
  0x8f   : > { %v3023_v20 = vld [vmem:[%s4016_s1 + $0x714] ss:$8 sps:$4 sm:$0xff]   ;;  %v2402_v25 = vcombine.high %v3800_v26, %v3803_v27 }
  0x90   : > { %1213 = vmatpush1.bf16.msra.mxu1 %v2931_v29  ;;  %v3015_v29 = vld [vmem:[%s4016_s1 + $0x700] ss:$8 sps:$4 sm:$0xff]   ;;  %v3026_v21 = vld [vmem:[%s4016_s1 + $0x314] ss:$8 sps:$4 sm:$0xff]  }
  0x91   : > { %2065 = vmatpush1.bf16.msra.mxu0 %v2934_v30  ;;  %1214 = vmatprep.subr.bf16.mxu1 %v2939_v31  ;;  %v3018_v30 = vld [vmem:[%s4016_s1 + $0x300] ss:$8 sps:$4 sm:$0xff]   ;;  %v2538_v31 = vcombine.high %v3806_v28, %v3800_v26 }
  0x92   : > { %2066 = vmatprep.subr.bf16.mxu0 %v2942_v32  ;;  %v3021_v32 = vld [vmem:[%s4016_s1 + $0x710] ss:$8 sps:$4 sm:$0xff]  }
  0x94   : > { %1215 = vmatpush1.bf16.msra.mxu1 %v2937_v33  ;;  %v3024_v33 = vld [vmem:[%s4016_s1 + $0x310] ss:$8 sps:$4 sm:$0xff]  }
  0x95   : > { %2067 = vmatpush1.bf16.msra.mxu0 %v2940_v34  ;;  %1216 = vmatprep.subr.bf16.mxu1 %v2945_v35  ;;  %v3029_v34 = vld [vmem:[%s4016_s1 + $0x724] ss:$8 sps:$4 sm:$0xff]  }
  0x96   : > { %2068 = vmatprep.subr.bf16.mxu0 %v2948_v36  ;;  %v3032_v35 = vld [vmem:[%s4016_s1 + $0x324] ss:$8 sps:$4 sm:$0xff]   ;;  %v3027_v36 = vld [vmem:[%s4016_s1 + $0x720] ss:$8 sps:$4 sm:$0xff]  }
  0x98   : > { %1217 = vmatpush1.bf16.msra.mxu1 %v2943_v37  ;;  %v3030_v37 = vld [vmem:[%s4016_s1 + $0x320] ss:$8 sps:$4 sm:$0xff]  }
  0x99   : > { %2069 = vmatpush1.bf16.msra.mxu0 %v2946_v38  ;;  %1218 = vmatprep.subr.bf16.mxu1 %v2951_v39  ;;  %v3035_v38 = vld [vmem:[%s4016_s1 + $0x734] ss:$8 sps:$4 sm:$0xff]  }
  0x9a   : > { %2070 = vmatprep.subr.bf16.mxu0 %v2954_v40  ;;  %v3038_v39 = vld [vmem:[%s4016_s1 + $0x334] ss:$8 sps:$4 sm:$0xff]   ;;  %v3033_v40 = vld [vmem:[%s4016_s1 + $0x730] ss:$8 sps:$4 sm:$0xff]  }
  0x9c   : > { %1219 = vmatpush1.bf16.msra.mxu1 %v2949_v41  ;;  %v3036_v41 = vld [vmem:[%s4016_s1 + $0x330] ss:$8 sps:$4 sm:$0xff]  }
  0x9d   : > { %2071 = vmatpush1.bf16.msra.mxu0 %v2952_v42  ;;  %1220 = vmatprep.subr.bf16.mxu1 %v2957_v43  ;;  %v3041_v42 = vld [vmem:[%s4016_s1 + $0x744] ss:$8 sps:$4 sm:$0xff]  }
  0x9e   : > { %2072 = vmatprep.subr.bf16.mxu0 %v2960_v44  ;;  %v3044_v43 = vld [vmem:[%s4016_s1 + $0x344] ss:$8 sps:$4 sm:$0xff]   ;;  %v3039_v44 = vld [vmem:[%s4016_s1 + $0x740] ss:$8 sps:$4 sm:$0xff]  }
  0xa0   : > { %1221 = vmatpush1.bf16.msra.mxu1 %v2955_v45  ;;  %v3042_v45 = vld [vmem:[%s4016_s1 + $0x340] ss:$8 sps:$4 sm:$0xff]  }
  0xa1   : > { %2073 = vmatpush1.bf16.msra.mxu0 %v2958_v46  ;;  %1222 = vmatprep.subr.bf16.mxu1 %v2963_v47  ;;  %v3047_v46 = vld [vmem:[%s4016_s1 + $0x754] ss:$8 sps:$4 sm:$0xff]  }
  0xa2   : > { %2074 = vmatprep.subr.bf16.mxu0 %v2966_v48  ;;  %v3050_v47 = vld [vmem:[%s4016_s1 + $0x354] ss:$8 sps:$4 sm:$0xff]   ;;  %v3045_v48 = vld [vmem:[%s4016_s1 + $0x750] ss:$8 sps:$4 sm:$0xff]  }
  0xa4   : > { %1223 = vmatpush1.bf16.msra.mxu1 %v2961_v49  ;;  %v3048_v49 = vld [vmem:[%s4016_s1 + $0x350] ss:$8 sps:$4 sm:$0xff]  }
  0xa5   : > { %2075 = vmatpush1.bf16.msra.mxu0 %v2964_v50  ;;  %1224 = vmatprep.subr.bf16.mxu1 %v2969_v51  ;;  %v3053_v50 = vld [vmem:[%s4016_s1 + $0x764] ss:$8 sps:$4 sm:$0xff]  }
  0xa6   : > { %2076 = vmatprep.subr.bf16.mxu0 %v2972_v52  ;;  %v3056_v51 = vld [vmem:[%s4016_s1 + $0x364] ss:$8 sps:$4 sm:$0xff]   ;;  %v3051_v52 = vld [vmem:[%s4016_s1 + $0x760] ss:$8 sps:$4 sm:$0xff]  }
  0xa8   : > { %1225 = vmatpush1.bf16.msra.mxu1 %v2967_v53  ;;  %v3054_v53 = vld [vmem:[%s4016_s1 + $0x360] ss:$8 sps:$4 sm:$0xff]  }
  0xa9   : > { %2077 = vmatpush1.bf16.msra.mxu0 %v2970_v54  ;;  %1226 = vmatprep.subr.bf16.mxu1 %v2975_v55  ;;  %v3059_v54 = vld [vmem:[%s4016_s1 + $0x774] ss:$8 sps:$4 sm:$0xff]  }
  0xaa   : > { %2078 = vmatprep.subr.bf16.mxu0 %v2978_v56  ;;  %v3062_v55 = vld [vmem:[%s4016_s1 + $0x374] ss:$8 sps:$4 sm:$0xff]   ;;  %v3057_v56 = vld [vmem:[%s4016_s1 + $0x770] ss:$8 sps:$4 sm:$0xff]  }
  0xac   : > { %1227 = vmatpush1.bf16.msra.mxu1 %v2973_v57  ;;  %v3060_v57 = vld [vmem:[%s4016_s1 + $0x370] ss:$8 sps:$4 sm:$0xff]  }
  0xad   : > { %2079 = vmatpush1.bf16.msra.mxu0 %v2976_v58  ;;  %1228 = vmatprep.subr.bf16.mxu1 %v2981_v59  ;;  %v3065_v58 = vld [vmem:[%s4016_s1 + $0x784] ss:$8 sps:$4 sm:$0xff]  }
  0xae   : > { %2080 = vmatprep.subr.bf16.mxu0 %v2984_v60  ;;  %v3068_v59 = vld [vmem:[%s4016_s1 + $0x384] ss:$8 sps:$4 sm:$0xff]   ;;  %v3063_v60 = vld [vmem:[%s4016_s1 + $0x780] ss:$8 sps:$4 sm:$0xff]  }
  0xb0   : > { %1229 = vmatpush1.bf16.msra.mxu1 %v2979_v61  ;;  %v3066_v61 = vld [vmem:[%s4016_s1 + $0x380] ss:$8 sps:$4 sm:$0xff]  }
  0xb1   : > { %2081 = vmatpush1.bf16.msra.mxu0 %v2982_v62  ;;  %1230 = vmatprep.subr.bf16.mxu1 %v2987_v63  ;;  %v3071_v62 = vld [vmem:[%s4016_s1 + $0x794] ss:$8 sps:$4 sm:$0xff]  }
  0xb2   : > { %2082 = vmatprep.subr.bf16.mxu0 %v2990_v0  ;;  %v3074_v63 = vld [vmem:[%s4016_s1 + $0x394] ss:$8 sps:$4 sm:$0xff]   ;;  %v3069_v0 = vld [vmem:[%s4016_s1 + $0x790] ss:$8 sps:$4 sm:$0xff]  }
  0xb4   : > { %1231 = vmatpush1.bf16.msra.mxu1 %v2985_v1  ;;  %v3072_v1 = vld [vmem:[%s4016_s1 + $0x390] ss:$8 sps:$4 sm:$0xff]  }
  0xb5   : > { %2083 = vmatpush1.bf16.msra.mxu0 %v2988_v2  ;;  %1232 = vmatprep.subr.bf16.mxu1 %v2993_v3  ;;  %v3077_v2 = vld [vmem:[%s4016_s1 + $0x7a4] ss:$8 sps:$4 sm:$0xff]  }
  0xb6   : > { %2084 = vmatprep.subr.bf16.mxu0 %v2996_v4  ;;  %v3080_v3 = vld [vmem:[%s4016_s1 + $0x3a4] ss:$8 sps:$4 sm:$0xff]   ;;  %v3075_v4 = vld [vmem:[%s4016_s1 + $0x7a0] ss:$8 sps:$4 sm:$0xff]  }
  0xb8   : > { %1233 = vmatpush1.bf16.msra.mxu1 %v2991_v5  ;;  %v3078_v5 = vld [vmem:[%s4016_s1 + $0x3a0] ss:$8 sps:$4 sm:$0xff]  }
  0xb9   : > { %2085 = vmatpush1.bf16.msra.mxu0 %v2994_v6  ;;  %1234 = vmatprep.subr.bf16.mxu1 %v2999_v7  ;;  %v3083_v6 = vld [vmem:[%s4016_s1 + $0x7b4] ss:$8 sps:$4 sm:$0xff]  }
  0xba   : > { %2086 = vmatprep.subr.bf16.mxu0 %v3002_v8  ;;  %v3086_v7 = vld [vmem:[%s4016_s1 + $0x3b4] ss:$8 sps:$4 sm:$0xff]   ;;  %v3081_v8 = vld [vmem:[%s4016_s1 + $0x7b0] ss:$8 sps:$4 sm:$0xff]  }
  0xbc   : > { %1235 = vmatpush1.bf16.msra.mxu1 %v2997_v9  ;;  %v3084_v9 = vld [vmem:[%s4016_s1 + $0x3b0] ss:$8 sps:$4 sm:$0xff]  }
  0xbd   : > { %2087 = vmatpush1.bf16.msra.mxu0 %v3000_v10  ;;  %1236 = vmatprep.subr.bf16.mxu1 %v3005_v11  ;;  %v3089_v10 = vld [vmem:[%s4016_s1 + $0x7c4] ss:$8 sps:$4 sm:$0xff]  }
  0xbe   : > { %2088 = vmatprep.subr.bf16.mxu0 %v3008_v12  ;;  %v3092_v11 = vld [vmem:[%s4016_s1 + $0x3c4] ss:$8 sps:$4 sm:$0xff]   ;;  %v3087_v12 = vld [vmem:[%s4016_s1 + $0x7c0] ss:$8 sps:$4 sm:$0xff]  }
  0xc0   : > { %1237 = vmatpush1.bf16.msra.mxu1 %v3003_v13  ;;  %v3090_v13 = vld [vmem:[%s4016_s1 + $0x3c0] ss:$8 sps:$4 sm:$0xff]  }
  0xc1   : > { %2089 = vmatpush1.bf16.msra.mxu0 %v3006_v14  ;;  %1238 = vmatprep.subr.bf16.mxu1 %v3011_v15  ;;  %v3095_v14 = vld [vmem:[%s4016_s1 + $0x7d4] ss:$8 sps:$4 sm:$0xff]  }
  0xc2   : > { %2090 = vmatprep.subr.bf16.mxu0 %v3014_v16  ;;  %v3098_v15 = vld [vmem:[%s4016_s1 + $0x3d4] ss:$8 sps:$4 sm:$0xff]   ;;  %v3093_v16 = vld [vmem:[%s4016_s1 + $0x7d0] ss:$8 sps:$4 sm:$0xff]  }
  0xc4   : > { %1239 = vmatpush1.bf16.msra.mxu1 %v3009_v17  ;;  %v3096_v17 = vld [vmem:[%s4016_s1 + $0x3d0] ss:$8 sps:$4 sm:$0xff]  }
  0xc5   : > { %2091 = vmatpush1.bf16.msra.mxu0 %v3012_v18  ;;  %1251 = vmatprep.subr.bf16.mxu1 %v3017_v19  ;;  %v3101_v18 = vld [vmem:[%s4016_s1 + $0x7e4] ss:$8 sps:$4 sm:$0xff]  }
  0xc6   : > { %2103 = vmatprep.subr.bf16.mxu0 %v3020_v22  ;;  %v3104_v19 = vld [vmem:[%s4016_s1 + $0x3e4] ss:$8 sps:$4 sm:$0xff]   ;;  %v3099_v22 = vld [vmem:[%s4016_s1 + $0x7e0] ss:$8 sps:$4 sm:$0xff]  }
  0xc7   : > { %1241 = vmatmul.mubr.bf16.vlgmr.msra.gmra.mrb[0].mxu1 %v2399_v23  ;;  %v3102_v23 = vld [vmem:[%s4016_s1 + $0x3e0] ss:$8 sps:$4 sm:$0xff]  }
  0xc8   : > { %2093 = vmatmul.mubr.bf16.vlgmr.msra.gmra.mrb[0].mxu0 %v2535_v24  ;;  %1252 = vmatpush1.bf16.msra.mxu1 %v3015_v29  ;;  %v3107_v24 = vld [vmem:[%s4016_s1 + $0x7f4] ss:$8 sps:$4 sm:$0xff]  }
  0xc9   : > { %2104 = vmatpush1.bf16.msra.mxu0 %v3018_v30  ;;  %1253 = vmatprep.subr.bf16.mxu1 %v3023_v20  ;;  %v3110_v29 = vld [vmem:[%s4016_s1 + $0x3f4] ss:$8 sps:$4 sm:$0xff]   ;;  %v3105_v30 = vld [vmem:[%s4016_s1 + $0x7f0] ss:$8 sps:$4 sm:$0xff]  }
  0xca   : > { %2105 = vmatprep.subr.bf16.mxu0 %v3026_v21  ;;  %1283 = vmatprep.mubr.bf16.mxu1 %v2402_v25  ;;  %v3108_v20 = vld [vmem:[%s4016_s1 + $0x3f0] ss:$8 sps:$4 sm:$0xff]   ;;  %v2401_v21 = vcombine.low %v3800_v26, %v3803_v27  ;;  %v2537_v25 = vcombine.low %v3806_v28, %v3800_v26 }
  0xcb   : > { %2135 = vmatprep.mubr.bf16.mxu0 %v2538_v31 }
  0xcc   : > { %1254 = vmatpush1.bf16.msra.mxu1 %v3021_v32 }
  0xcd   : > { %2106 = vmatpush1.bf16.msra.mxu0 %v3024_v33  ;;  %1255 = vmatprep.subr.bf16.mxu1 %v3029_v34 }
  0xce   : > { %2107 = vmatprep.subr.bf16.mxu0 %v3032_v35 }
  0xd0   : > { %1256 = vmatpush1.bf16.msra.mxu1 %v3027_v36 }
  0xd1   : > { %2108 = vmatpush1.bf16.msra.mxu0 %v3030_v37  ;;  %1257 = vmatprep.subr.bf16.mxu1 %v3035_v38 }
  0xd2   : > { %2109 = vmatprep.subr.bf16.mxu0 %v3038_v39 }
  0xd4   : > { %1258 = vmatpush1.bf16.msra.mxu1 %v3033_v40 }
  0xd5   : > { %2110 = vmatpush1.bf16.msra.mxu0 %v3036_v41  ;;  %1259 = vmatprep.subr.bf16.mxu1 %v3041_v42 }
  0xd6   : > { %2111 = vmatprep.subr.bf16.mxu0 %v3044_v43 }
  0xd8   : > { %1260 = vmatpush1.bf16.msra.mxu1 %v3039_v44 }
  0xd9   : > { %2112 = vmatpush1.bf16.msra.mxu0 %v3042_v45  ;;  %1261 = vmatprep.subr.bf16.mxu1 %v3047_v46 }
  0xda   : > { %2113 = vmatprep.subr.bf16.mxu0 %v3050_v47 }
  0xdc   : > { %1262 = vmatpush1.bf16.msra.mxu1 %v3045_v48 }
  0xdd   : > { %2114 = vmatpush1.bf16.msra.mxu0 %v3048_v49  ;;  %1263 = vmatprep.subr.bf16.mxu1 %v3053_v50 }
  0xde   : > { %2115 = vmatprep.subr.bf16.mxu0 %v3056_v51 }
  0xe0   : > { %1264 = vmatpush1.bf16.msra.mxu1 %v3051_v52 }
  0xe1   : > { %2116 = vmatpush1.bf16.msra.mxu0 %v3054_v53  ;;  %1265 = vmatprep.subr.bf16.mxu1 %v3059_v54 }
  0xe2   : > { %2117 = vmatprep.subr.bf16.mxu0 %v3062_v55 }
  0xe4   : > { %1266 = vmatpush1.bf16.msra.mxu1 %v3057_v56 }
  0xe5   : > { %2118 = vmatpush1.bf16.msra.mxu0 %v3060_v57  ;;  %1267 = vmatprep.subr.bf16.mxu1 %v3065_v58 }
  0xe6   : > { %2119 = vmatprep.subr.bf16.mxu0 %v3068_v59 }
  0xe8   : > { %1268 = vmatpush1.bf16.msra.mxu1 %v3063_v60 }
  0xe9   : > { %2120 = vmatpush1.bf16.msra.mxu0 %v3066_v61  ;;  %1269 = vmatprep.subr.bf16.mxu1 %v3071_v62 }
  0xea   : > { %2121 = vmatprep.subr.bf16.mxu0 %v3074_v63 }
  0xec   : > { %1270 = vmatpush1.bf16.msra.mxu1 %v3069_v0 }
  0xed   : > { %2122 = vmatpush1.bf16.msra.mxu0 %v3072_v1  ;;  %1271 = vmatprep.subr.bf16.mxu1 %v3077_v2 }
  0xee   : > { %2123 = vmatprep.subr.bf16.mxu0 %v3080_v3 }
  0xf0   : > { %1272 = vmatpush1.bf16.msra.mxu1 %v3075_v4 }
  0xf1   : > { %2124 = vmatpush1.bf16.msra.mxu0 %v3078_v5  ;;  %1273 = vmatprep.subr.bf16.mxu1 %v3083_v6 }
  0xf2   : > { %2125 = vmatprep.subr.bf16.mxu0 %v3086_v7 }
  0xf4   : > { %1274 = vmatpush1.bf16.msra.mxu1 %v3081_v8 }
  0xf5   : > { %2126 = vmatpush1.bf16.msra.mxu0 %v3084_v9  ;;  %1275 = vmatprep.subr.bf16.mxu1 %v3089_v10 }
  0xf6   : > { %2127 = vmatprep.subr.bf16.mxu0 %v3092_v11 }
  0xf8   : > { %1276 = vmatpush1.bf16.msra.mxu1 %v3087_v12 }
  0xf9   : > { %2128 = vmatpush1.bf16.msra.mxu0 %v3090_v13  ;;  %1277 = vmatprep.subr.bf16.mxu1 %v3095_v14 }
  0xfa   : > { %2129 = vmatprep.subr.bf16.mxu0 %v3098_v15 }
  0xfc   : > { %1278 = vmatpush1.bf16.msra.mxu1 %v3093_v16 }
  0xfd   : > { %2130 = vmatpush1.bf16.msra.mxu0 %v3096_v17  ;;  %1279 = vmatprep.subr.bf16.mxu1 %v3101_v18 }
  0xfe   : > { %2131 = vmatprep.subr.bf16.mxu0 %v3104_v19 }
 0x100   : > { %1280 = vmatpush1.bf16.msra.mxu1 %v3099_v22 }
 0x101   : > { %2132 = vmatpush1.bf16.msra.mxu0 %v3102_v23  ;;  %1281 = vmatprep.subr.bf16.mxu1 %v3107_v24 }
 0x102   : > { %2133 = vmatprep.subr.bf16.mxu0 %v3110_v29 }
 0x104   : > { %1282 = vmatpush1.bf16.msra.mxu1 %v3105_v30 }
 0x105   : > { %2134 = vmatpush1.bf16.msra.mxu0 %v3108_v20 }
 0x107   : > { %1284 = vmatmul.mubr.bf16.vlgmr.msra.gmra.mrb[0].mxu1 %v2401_v21 }
 0x108   : > { %2136 = vmatmul.mubr.bf16.vlgmr.msra.gmra.mrb[0].mxu0 %v2537_v25 }
 0x1da   : > { %v1285_v31 = vpop.f32.mrb[0].mxu1 }
 0x1db   : > { %v2137_v32 = vpop.f32.mrb[0].mxu0  ;;  %v1287_v34 = vpop.f32.mrb[1].mxu1 }
 0x1dc   : > { %v2674_v33 = vadd.f32 %v2137_v32, %v1285_v31  ;;  %v2139_v35 = vpop.f32.mrb[1].mxu0  ;;  %v1289_v37 = vpop.f32.mrb[2].mxu1 }
 0x1dd   : > { %v2675_v36 = vadd.f32 %v2139_v35, %v1287_v34  ;;  %v2141_v38 = vpop.f32.mrb[2].mxu0  ;;  %v1291_v40 = vpop.f32.mrb[3].mxu1 }
 0x1de   : > { %vm2146_vm0 = vcmp.ge.f32.partialorder %v2674_v33, 0.0  ;;  %v2150_v39 = vmul.f32 0.2, %v2674_v33  ;;  %v2676_v27 = vadd.f32 %v2141_v38, %v1289_v37  ;;  %v2143_v41 = vpop.f32.mrb[3].mxu0 }
 0x1df   : > { %vm2147_vm1 = vcmp.ge.f32.partialorder %v2675_v36, 0.0  ;;  %v2151_v26 = vmul.f32 0.2, %v2675_v36  ;;  %v2677_v28 = vadd.f32 %v2143_v41, %v1291_v40 }
 0x1e0   : > { %v2154_v42 = vsel %vm2146_vm0, %v2674_v33, %v2150_v39  ;;  %vm2148_vm2 = vcmp.ge.f32.partialorder %v2676_v27, 0.0  ;;  %v2152_v43 = vmul.f32 0.2, %v2676_v27 }
 0x1e1   : > { %v2155_v44 = vsel %vm2147_vm1, %v2675_v36, %v2151_v26  ;;  %vm2149_vm3 = vcmp.ge.f32.partialorder %v2677_v28, 0.0  ;;  %v2153_v45 = vmul.f32 0.2, %v2677_v28 }
 0x1e2   : > { %v2672_v46 = vpack.c.bf16 %v2155_v44, %v2154_v42  ;;  %v2156_v47 = vsel %vm2148_vm2, %v2676_v27, %v2152_v43 }
 0x1e3   : > { %v2157_v48 = vsel %vm2149_vm3, %v2677_v28, %v2153_v45 }
 0x1e4   : > { %2170 = vst [vmem:[%s167_s17] sm:$0xff] %v2672_v46  ;;  %v2673_v49 = vpack.c.bf16 %v2157_v48, %v2156_v47 }
 0x1e6   : > { %2171 = vst [vmem:[%s167_s17 + $0x8] sm:$0xff] %v2673_v49 }
 0x1e7 PF: > { %s12_s11 = sadd.s32 1, %s3133_s11   ;;  %s4018_s9 = smov %s3129_s10 }
 0x1e8   : > { %p9_p5 = scmp.ge.s32.totalorder %s12_s11, 4   ;;  %s4019_s10 = smov %s4021_s12 }
 0x1ea   :  { %11 = sbr.rel (!%p9_p5) target bundleno = 2 (0x2), region = 59 }

// kernel: unet_discriminator_sn.14
= control target key start
LH: loop header
LB: loop body
LE: loop exit
PB: predicated region body
PF: predicated region fallthrough
CT: control target
= control target key end

     0   :  { %s3078_s12 = smov 0   ;;  %s3080_s13 = smov 0   ;;  %s3672_s0 = inlined_call_operand.vmem [shape: bf16[2,48,768], index: 0, kind: input, shape index: {}]   ;;  %s3673_s1 = inlined_call_operand.vmem [shape: bf16[3,768,128], index: 1, kind: input, shape index: {}]   ;;  %s3674_s2 = inlined_call_operand.vmem [shape: bf16[2,32,128], index: 2, kind: input, shape index: {}]   ;;  %s3675_s3 = inlined_call_operand.vmem [shape: bf16[2,32,128], index: 3, kind: output, shape index: {}]  }
   0x1   :  { %s3082_s14 = smov 0  }
   0x2 LB: > { %s25_s15 = sadd.s32 1, %s3052_s13  ;;  %p2157_p0 = scmp.ge.s32.totalorder %s3056_s14, 1  ;;  %s3056_s14 = sphi %s3082_s14, %s13_s14   ;;  %s3052_s13 = sphi %s3080_s13, %s3677_s13   ;;  %s3048_s12 = sphi %s3078_s12, %s3676_s12  }
   0x3   : > { %p27_p1 = scmp.ge.s32.totalorder %s25_s15, 2  ;;  %p168_p2 = scmp.lt.s32.totalorder %s3056_s14, 3 }
   0x5   : > { %s3679_s15 = smov (%p27_p1, %s25_s15), 0  ;;  %p169_p3 = pnand %p2157_p0, %p168_p2 }
   0x6   : > { %v2860_v0 = vld [vmem:[%s3673_s1 + $0x1c0] sm:$0xff] (!%p169_p3)   ;;  %v2864_v4 = vld [vmem:[%s3673_s1 + $0x1c8] sm:$0xff] (!%p169_p3)   ;;  %v2868_v8 = vld [vmem:[%s3673_s1 + $0x1d0] sm:$0xff] (!%p169_p3)   ;;  %p205_p4 = scmp.lt.s32.totalorder (!%p169_p3), %s3048_s12, 1 }
   0x7   : > { %172 = sbr.rel (%p169_p3) target bundleno = 399 (0x18f), region = 32  ;;  %v2861_v1 = vld [vmem:[%s3673_s1 + $0x240] sm:$0xff] (!%p169_p3)   ;;  %2567 = vmatprep.subr.bf16.mxu0 (!%p169_p3), %v2860_v0  ;;  %v2865_v5 = vld [vmem:[%s3673_s1 + $0x248] sm:$0xff] (!%p169_p3)   ;;  %v2869_v9 = vld [vmem:[%s3673_s1 + $0x250] sm:$0xff] (!%p169_p3)  }
   0x8   : > { %v2862_v2 = vld [vmem:[%s3673_s1 + $0x180] sm:$0xff] (!%p169_p3)   ;;  %2595 = vmatprep.subr.bf16.mxu1 (!%p169_p3), %v2861_v1  ;;  %v2866_v6 = vld [vmem:[%s3673_s1 + $0x188] sm:$0xff] (!%p169_p3)   ;;  %v2870_v10 = vld [vmem:[%s3673_s1 + $0x190] sm:$0xff] (!%p169_p3)  }
   0x9   : > { %v2863_v3 = vld [vmem:[%s3673_s1 + $0x200] sm:$0xff] (!%p169_p3)   ;;  %2568 = vmatpush3.bf16.msra.mxu0 (!%p169_p3), %v2862_v2  ;;  %v2867_v7 = vld [vmem:[%s3673_s1 + $0x208] sm:$0xff] (!%p169_p3)   ;;  %v2871_v11 = vld [vmem:[%s3673_s1 + $0x210] sm:$0xff] (!%p169_p3)  }
   0xa   : > { %2596 = vmatpush3.bf16.msra.mxu1 (!%p169_p3), %v2863_v3  ;;  %2569 = vmatprep.subr.bf16.mxu0 (!%p169_p3), %v2864_v4  ;;  %v2872_v12 = vld [vmem:[%s3673_s1 + $0x1d8] sm:$0xff] (!%p169_p3)   ;;  %v2876_v16 = vld [vmem:[%s3673_s1 + $0x1e0] sm:$0xff] (!%p169_p3)   ;;  %v2880_v20 = vld [vmem:[%s3673_s1 + $0x1e8] sm:$0xff] (!%p169_p3)  }
   0xb   : > { %2597 = vmatprep.subr.bf16.mxu1 (!%p169_p3), %v2865_v5  ;;  %v2873_v13 = vld [vmem:[%s3673_s1 + $0x258] sm:$0xff] (!%p169_p3)   ;;  %v2877_v17 = vld [vmem:[%s3673_s1 + $0x260] sm:$0xff] (!%p169_p3)   ;;  %v2881_v21 = vld [vmem:[%s3673_s1 + $0x268] sm:$0xff] (!%p169_p3)  }
   0xc   : > { %v2874_v14 = vld [vmem:[%s3673_s1 + $0x198] sm:$0xff] (!%p169_p3)   ;;  %v2878_v18 = vld [vmem:[%s3673_s1 + $0x1a0] sm:$0xff] (!%p169_p3)   ;;  %v2882_v22 = vld [vmem:[%s3673_s1 + $0x1a8] sm:$0xff] (!%p169_p3)  }
   0xd   : > { %2570 = vmatpush3.bf16.msra.mxu0 (!%p169_p3), %v2866_v6  ;;  %v2875_v15 = vld [vmem:[%s3673_s1 + $0x218] sm:$0xff] (!%p169_p3)   ;;  %v2879_v19 = vld [vmem:[%s3673_s1 + $0x220] sm:$0xff] (!%p169_p3)   ;;  %v2883_v23 = vld [vmem:[%s3673_s1 + $0x228] sm:$0xff] (!%p169_p3)  }
   0xe   : > { %2598 = vmatpush3.bf16.msra.mxu1 %v2867_v7  ;;  %2571 = vmatprep.subr.bf16.mxu0 %v2868_v8  ;;  %s3681_s12 = smov (!%p205_p4, %s3048_s12), 1  ;;  %v2884_v24 = vld [vmem:[%s3673_s1 + $0x1f0] sm:$0xff]   ;;  %v2888_v28 = vld [vmem:[%s3673_s1 + $0x1f8] sm:$0xff]   ;;  %v2896_v40 = vld [vmem:[%s3673_s1 + $0x2c0] sm:$0xff]  }
   0xf   : > { %2599 = vmatprep.subr.bf16.mxu1 %v2869_v9  ;;  %v2885_v25 = vld [vmem:[%s3673_s1 + $0x270] sm:$0xff]   ;;  %s2835_s22 = smul.u32 144, %s3681_s12  ;;  %v2889_v29 = vld [vmem:[%s3673_s1 + $0x278] sm:$0xff]   ;;  %v2897_v41 = vld [vmem:[%s3673_s1 + $0x40] sm:$0xff]   ;;  %s2541_s18 = sshll.u32 %s3681_s12, 4 }
  0x10   : > { %v2886_v26 = vld [vmem:[%s3673_s1 + $0x1b0] sm:$0xff]   ;;  %v2890_v30 = vld [vmem:[%s3673_s1 + $0x1b8] sm:$0xff]   ;;  %v2898_v42 = vld [vmem:[%s3673_s1 + $0x280] sm:$0xff]   ;;  %s218_s21 = scalar_lea.vmem %s3674_s2, %s2541_s18  ;;  %s228_s24 = scalar_lea.vmem %s3675_s3, %s2541_s18 }
  0x11   : > { %2572 = vmatpush3.bf16.msra.mxu0 %v2870_v10  ;;  %v2887_v27 = vld [vmem:[%s3673_s1 + $0x230] sm:$0xff]   ;;  %s3196_s6 = scalar_lea.vmem %s3672_s0, %s2835_s22  ;;  %v2891_v31 = vld [vmem:[%s3673_s1 + $0x238] sm:$0xff]   ;;  %v2899_v43 = vld [vmem:[%s3673_s1] sm:$0xff]  }
  0x12   : > { %2600 = vmatpush3.bf16.msra.mxu1 %v2871_v11  ;;  %2573 = vmatprep.subr.bf16.mxu0 %v2872_v12  ;;  %v3205_v32 = vld [vmem:[%s3196_s6 + $0x18] sm:$0xff]  ;;  %v3208_v33 = vld [vmem:[%s3196_s6 + $0x30] sm:$0xff]  ;;  %v3211_v34 = vld [vmem:[%s3196_s6 + $0x20] sm:$0xff] }
  0x13   : > { %2601 = vmatprep.subr.bf16.mxu1 %v2873_v13  ;;  %v2260_v35 = vcombine.high %v3205_v32, %v3208_v33  ;;  %v3216_v36 = vld [vmem:[%s3196_s6 + $0x38] sm:$0xff]  ;;  %v2259_v37 = vcombine.low %v3205_v32, %v3208_v33  ;;  %v2900_v44 = vld [vmem:[%s3673_s1 + $0x2c8] sm:$0xff]   ;;  %v2904_v48 = vld [vmem:[%s3673_s1 + $0x2d0] sm:$0xff]  }
  0x14   : > { %v2262_v38 = vcombine.high %v3211_v34, %v3216_v36  ;;  %v2261_v39 = vcombine.low %v3211_v34, %v3216_v36  ;;  %v2901_v45 = vld [vmem:[%s3673_s1 + $0x48] sm:$0xff]   ;;  %v2905_v49 = vld [vmem:[%s3673_s1 + $0x50] sm:$0xff]   ;;  %v2908_v52 = vld [vmem:[%s3673_s1 + $0x2d8] sm:$0xff]  }
  0x15   : > { %2574 = vmatpush3.bf16.msra.mxu0 %v2874_v14  ;;  %819 = vmatprep.mubr.bf16.mxu0 %v2260_v35  ;;  %v2902_v46 = vld [vmem:[%s3673_s1 + $0x288] sm:$0xff]   ;;  %v2906_v50 = vld [vmem:[%s3673_s1 + $0x290] sm:$0xff]   ;;  %v2909_v53 = vld [vmem:[%s3673_s1 + $0x58] sm:$0xff]  }
  0x16   : > { %2602 = vmatpush3.bf16.msra.mxu1 %v2875_v15  ;;  %2575 = vmatprep.subr.bf16.mxu0 %v2876_v16  ;;  %v2903_v47 = vld [vmem:[%s3673_s1 + $0x8] sm:$0xff]   ;;  %v2907_v51 = vld [vmem:[%s3673_s1 + $0x10] sm:$0xff]   ;;  %v2910_v54 = vld [vmem:[%s3673_s1 + $0x298] sm:$0xff]  }
  0x17   : > { %2603 = vmatprep.subr.bf16.mxu1 %v2877_v17  ;;  %868 = vmatprep.mubr.bf16.mxu1 %v2262_v38  ;;  %v2911_v55 = vld [vmem:[%s3673_s1 + $0x18] sm:$0xff]   ;;  %v2912_v56 = vld [vmem:[%s3673_s1 + $0x2e0] sm:$0xff]   ;;  %v2916_v60 = vld [vmem:[%s3673_s1 + $0x2e8] sm:$0xff]  }
  0x18   : > { %v2913_v57 = vld [vmem:[%s3673_s1 + $0x60] sm:$0xff]   ;;  %v2917_v61 = vld [vmem:[%s3673_s1 + $0x68] sm:$0xff]   ;;  %v3299_v1 = vld [vmem:[%s3196_s6 + $0x50] sm:$0xff] }
  0x19   : > { %2576 = vmatpush3.bf16.msra.mxu0 %v2878_v18  ;;  %v2914_v58 = vld [vmem:[%s3673_s1 + $0x2a0] sm:$0xff]   ;;  %v3291_v62 = vld [vmem:[%s3196_s6 + $0x48] sm:$0xff]  ;;  %v2924_v8 = vld [vmem:[%s3673_s1 + $0x2f0] sm:$0xff]  }
  0x1a   : > { %2604 = vmatpush3.bf16.msra.mxu1 %v2879_v19  ;;  %2577 = vmatprep.subr.bf16.mxu0 %v2880_v20  ;;  %v2915_v59 = vld [vmem:[%s3673_s1 + $0x20] sm:$0xff]   ;;  %v3302_v2 = vld [vmem:[%s3196_s6 + $0x68] sm:$0xff]  ;;  %v2925_v9 = vld [vmem:[%s3673_s1 + $0x70] sm:$0xff]  }
  0x1b   : > { %2605 = vmatprep.subr.bf16.mxu1 %v2881_v21  ;;  %v3294_v63 = vld [vmem:[%s3196_s6 + $0x60] sm:$0xff]  ;;  %v2268_v4 = vcombine.high %v3299_v1, %v3302_v2  ;;  %v2920_v5 = vld [vmem:[%s3673_s1 + $0x2a8] sm:$0xff]   ;;  %v2267_v6 = vcombine.low %v3299_v1, %v3302_v2  ;;  %v2926_v10 = vld [vmem:[%s3673_s1 + $0x2b0] sm:$0xff]  }
  0x1c   : > { %v2266_v0 = vcombine.high %v3291_v62, %v3294_v63  ;;  %v2265_v3 = vcombine.low %v3291_v62, %v3294_v63  ;;  %v2921_v7 = vld [vmem:[%s3673_s1 + $0x28] sm:$0xff]   ;;  %v2927_v11 = vld [vmem:[%s3673_s1 + $0x30] sm:$0xff]   ;;  %v2928_v12 = vld [vmem:[%s3673_s1 + $0x2f8] sm:$0xff]  }
  0x1d   : > { %2578 = vmatpush3.bf16.msra.mxu0 %v2882_v22  ;;  %v2929_v13 = vld [vmem:[%s3673_s1 + $0x78] sm:$0xff]   ;;  %v3341_v16 = vld [vmem:[%s3196_s6 + $0x28] sm:$0xff]  ;;  %v3344_v17 = vld [vmem:[%s3196_s6 + $0x40] sm:$0xff] }
  0x1e   : > { %2606 = vmatpush3.bf16.msra.mxu1 %v2883_v23  ;;  %2579 = vmatprep.subr.bf16.mxu0 %v2884_v24  ;;  %v2930_v14 = vld [vmem:[%s3673_s1 + $0x2b8] sm:$0xff]   ;;  %v231_v18 = vld [vmem:[%s3196_s6] sm:$0xff]  ;;  %v2264_v19 = vcombine.high %v3341_v16, %v3344_v17  ;;  %v2263_v22 = vcombine.low %v3341_v16, %v3344_v17  ;;  %v3386_v35 = vld [vmem:[%s3196_s6 + $0x70] sm:$0xff] }
  0x1f   : > { %2607 = vmatprep.subr.bf16.mxu1 %v2885_v25  ;;  %v2931_v15 = vld [vmem:[%s3673_s1 + $0x38] sm:$0xff]   ;;  %v2319_v20 = vcombine.low %v231_v18, %v3205_v32  ;;  %v2320_v21 = vcombine.high %v231_v18, %v3205_v32  ;;  %v2936_v23 = vld [vmem:[%s3673_s1 + $0xc0] sm:$0xff]   ;;  %v2327_v18 = vcombine.low %v3216_v36, %v3299_v1 }
  0x20   : > { %v2937_v24 = vld [vmem:[%s3673_s1 + $0x140] sm:$0xff]   ;;  %v3383_v32 = vld [vmem:[%s3196_s6 + $0x58] sm:$0xff] }
  0x21   : > { %2580 = vmatpush3.bf16.msra.mxu0 %v2886_v26  ;;  %v2938_v25 = vld [vmem:[%s3673_s1 + $0x80] sm:$0xff]   ;;  %v3364_v26 = vcombine.high %v3208_v33, %v3291_v62  ;;  %v2269_v38 = vcombine.low %v3383_v32, %v3386_v35 }
  0x22   : > { %2608 = vmatpush3.bf16.msra.mxu1 %v2887_v27  ;;  %2581 = vmatprep.subr.bf16.mxu0 %v2888_v28  ;;  %v2939_v27 = vld [vmem:[%s3673_s1 + $0x100] sm:$0xff]   ;;  %v2940_v28 = vld [vmem:[%s3673_s1 + $0xc8] sm:$0xff]  }
  0x23   : > { %2609 = vmatprep.subr.bf16.mxu1 %v2889_v29  ;;  %v2941_v29 = vld [vmem:[%s3673_s1 + $0x148] sm:$0xff]  }
  0x25   : > { %2582 = vmatpush3.bf16.msra.mxu0 %v2890_v30  ;;  %v2942_v30 = vld [vmem:[%s3673_s1 + $0x88] sm:$0xff]  }
  0x26   : > { %2610 = vmatpush3.bf16.msra.mxu1 %v2891_v31  ;;  %2623 = vmatprep.subr.bf16.mxu0 %v2896_v40  ;;  %v2943_v31 = vld [vmem:[%s3673_s1 + $0x108] sm:$0xff]   ;;  %v3397_v40 = vcombine.low %v3208_v33, %v3291_v62  ;;  %v2952_v33 = vld [vmem:[%s3673_s1 + $0xd8] sm:$0xff]  }
  0x27   : > { %2651 = vmatprep.subr.bf16.mxu1 %v2897_v41  ;;  %v2947_v41 = vld [vmem:[%s3673_s1 + $0x150] sm:$0xff]   ;;  %v2971_v62 = vld [vmem:[%s3673_s1 + $0x138] sm:$0xff]  }
  0x28   : > { %820 = vmatmul.mubr.bf16.vlgmr.msra.gmra.mrb[0].mxu0 %v2259_v37  ;;  %v2270_v37 = vcombine.high %v3383_v32, %v3386_v35 }
  0x29   : > { %869 = vmatmul.mubr.bf16.vlgmr.msra.gmra.mrb[0].mxu1 %v2261_v39  ;;  %2624 = vmatpush3.bf16.msra.mxu0 %v2898_v42  ;;  %v2946_v39 = vld [vmem:[%s3673_s1 + $0xd0] sm:$0xff]  }
  0x2a   : > { %2652 = vmatpush3.bf16.msra.mxu1 %v2899_v43  ;;  %2625 = vmatprep.subr.bf16.mxu0 %v2900_v44  ;;  %v2949_v42 = vld [vmem:[%s3673_s1 + $0x90] sm:$0xff]   ;;  %v2953_v44 = vld [vmem:[%s3673_s1 + $0x158] sm:$0xff]  }
  0x2b   : > { %2653 = vmatprep.subr.bf16.mxu1 %v2901_v45  ;;  %827 = vmatprep.mubr.bf16.mxu0 %v2266_v0  ;;  %v2950_v43 = vld [vmem:[%s3673_s1 + $0x110] sm:$0xff]   ;;  %v2954_v45 = vld [vmem:[%s3673_s1 + $0x98] sm:$0xff]   ;;  %v232_v0 = vld [vmem:[%s3196_s6 + $0x8] sm:$0xff] }
  0x2c   : > { %876 = vmatprep.mubr.bf16.mxu1 %v2268_v4  ;;  %v2321_v4 = vcombine.low %v232_v0, %v3211_v34 }
  0x2d   : > { %2626 = vmatpush3.bf16.msra.mxu0 %v2902_v46  ;;  %v2955_v46 = vld [vmem:[%s3673_s1 + $0x118] sm:$0xff]  }
  0x2e   : > { %2654 = vmatpush3.bf16.msra.mxu1 %v2903_v47  ;;  %2627 = vmatprep.subr.bf16.mxu0 %v2904_v48  ;;  %v2956_v47 = vld [vmem:[%s3673_s1 + $0xe0] sm:$0xff]  }
  0x2f   : > { %2655 = vmatprep.subr.bf16.mxu1 %v2905_v49  ;;  %v2957_v48 = vld [vmem:[%s3673_s1 + $0x160] sm:$0xff]  }
  0x30   : > { %828 = vmatmul.mubr.bf16.gmra.mrb[4].mxu0 %v2265_v3  ;;  %v2958_v49 = vld [vmem:[%s3673_s1 + $0xa0] sm:$0xff]   ;;  %v233_v3 = vld [vmem:[%s3196_s6 + $0x10] sm:$0xff] }
  0x31   : > { %2628 = vmatpush3.bf16.msra.mxu0 %v2906_v50  ;;  %877 = vmatmul.mubr.bf16.gmra.mrb[4].mxu1 %v2267_v6  ;;  %v2959_v50 = vld [vmem:[%s3673_s1 + $0x120] sm:$0xff]   ;;  %v2323_v6 = vcombine.low %v233_v3, %v3341_v16 }
  0x32   : > { %2656 = vmatpush3.bf16.msra.mxu1 %v2907_v51  ;;  %2629 = vmatprep.subr.bf16.mxu0 %v2908_v52  ;;  %v2960_v51 = vld [vmem:[%s3673_s1 + $0xe8] sm:$0xff]  }
  0x33   : > { %2657 = vmatprep.subr.bf16.mxu1 %v2909_v53  ;;  %917 = vmatprep.mubr.bf16.mxu0 %v2264_v19  ;;  %v2961_v52 = vld [vmem:[%s3673_s1 + $0x168] sm:$0xff]   ;;  %v2986_v19 = vld [vmem:[%s3673_s1 + $0x350] sm:$0xff]  }
  0x34   : > { %1287 = vmatprep.mubr.bf16.mxu1 %v2320_v21  ;;  %v2962_v53 = vld [vmem:[%s3673_s1 + $0xa8] sm:$0xff]   ;;  %v2987_v21 = vld [vmem:[%s3673_s1 + $0x3d0] sm:$0xff]  }
  0x35   : > { %2630 = vmatpush3.bf16.msra.mxu0 %v2910_v54  ;;  %v2963_v54 = vld [vmem:[%s3673_s1 + $0x128] sm:$0xff]  }
  0x36   : > { %2658 = vmatpush3.bf16.msra.mxu1 %v2911_v55  ;;  %2631 = vmatprep.subr.bf16.mxu0 %v2912_v56  ;;  %v2964_v55 = vld [vmem:[%s3673_s1 + $0xf0] sm:$0xff]  }
  0x37   : > { %2659 = vmatprep.subr.bf16.mxu1 %v2913_v57  ;;  %v2965_v56 = vld [vmem:[%s3673_s1 + $0x170] sm:$0xff]  }
  0x38   : > { %v2966_v57 = vld [vmem:[%s3673_s1 + $0xb0] sm:$0xff]  }
  0x39   : > { %2632 = vmatpush3.bf16.msra.mxu0 %v2914_v58  ;;  %v2967_v58 = vld [vmem:[%s3673_s1 + $0x130] sm:$0xff]  }
  0x3a   : > { %2660 = vmatpush3.bf16.msra.mxu1 %v2915_v59  ;;  %2633 = vmatprep.subr.bf16.mxu0 %v2916_v60  ;;  %v2968_v59 = vld [vmem:[%s3673_s1 + $0xf8] sm:$0xff]  }
  0x3b   : > { %2661 = vmatprep.subr.bf16.mxu1 %v2917_v61  ;;  %v2969_v60 = vld [vmem:[%s3673_s1 + $0x178] sm:$0xff]  }
  0x3c   : > { %v2970_v61 = vld [vmem:[%s3673_s1 + $0xb8] sm:$0xff]  }
  0x3d   : > { %2634 = vmatpush3.bf16.msra.mxu0 %v2920_v5  ;;  %v2322_v5 = vcombine.high %v232_v0, %v3211_v34  ;;  %v2328_v34 = vcombine.high %v3216_v36, %v3299_v1  ;;  %v2989_v36 = vld [vmem:[%s3673_s1 + $0x310] sm:$0xff]  }
  0x3e   : > { %2662 = vmatpush3.bf16.msra.mxu1 %v2921_v7  ;;  %2635 = vmatprep.subr.bf16.mxu0 %v2924_v8  ;;  %v2324_v7 = vcombine.high %v233_v3, %v3341_v16  ;;  %v2976_v8 = vld [vmem:[%s3673_s1 + $0x340] sm:$0xff]   ;;  %v2983_v16 = vld [vmem:[%s3673_s1 + $0x388] sm:$0xff]   ;;  %v2990_v1 = vld [vmem:[%s3673_s1 + $0x390] sm:$0xff]  }
  0x3f   : > { %2663 = vmatprep.subr.bf16.mxu1 %v2925_v9  ;;  %v2977_v9 = vld [vmem:[%s3673_s1 + $0x3c0] sm:$0xff]   ;;  %v3029_v0 = vld [vmem:[%s3673_s1 + $0x430] sm:$0xff]   ;;  %v3030_v3 = vld [vmem:[%s3673_s1 + $0x478] sm:$0xff]  }
  0x41   : > { %2636 = vmatpush3.bf16.msra.mxu0 %v2926_v10  ;;  %v2978_v10 = vld [vmem:[%s3673_s1 + $0x300] sm:$0xff]  }
  0x42   : > { %2664 = vmatpush3.bf16.msra.mxu1 %v2927_v11  ;;  %2637 = vmatprep.subr.bf16.mxu0 %v2928_v12  ;;  %v2979_v11 = vld [vmem:[%s3673_s1 + $0x380] sm:$0xff]   ;;  %v3491_v12 = vcombine.high %v3344_v17, %v3383_v32 }
  0x43   : > { %2665 = vmatprep.subr.bf16.mxu1 %v2929_v13  ;;  %v2980_v13 = vld [vmem:[%s3673_s1 + $0x348] sm:$0xff]  }
  0x45   : > { %2638 = vmatpush3.bf16.msra.mxu0 %v2930_v14  ;;  %v2981_v14 = vld [vmem:[%s3673_s1 + $0x3c8] sm:$0xff]  }
  0x46   : > { %2666 = vmatpush3.bf16.msra.mxu1 %v2931_v15  ;;  %2679 = vmatprep.subr.bf16.mxu0 %v2936_v23  ;;  %v2982_v15 = vld [vmem:[%s3673_s1 + $0x308] sm:$0xff]   ;;  %v2994_v23 = vld [vmem:[%s3673_s1 + $0x318] sm:$0xff]  }
  0x47   : > { %2707 = vmatprep.subr.bf16.mxu1 %v2937_v24  ;;  %v2995_v24 = vld [vmem:[%s3673_s1 + $0x398] sm:$0xff]  }
  0x48   : > { %918 = vmatmul.mubr.bf16.vlgmr.msra.gmra.mrb[8].mxu0 %v2263_v22  ;;  %v2993_v22 = vld [vmem:[%s3673_s1 + $0x3d8] sm:$0xff]  }
  0x49   : > { %1288 = vmatmul.mubr.bf16.vlgmr.msra.gmra.mrb[8].mxu1 %v2319_v20  ;;  %2680 = vmatpush3.bf16.msra.mxu0 %v2938_v25  ;;  %v3513_v20 = vcombine.low %v3344_v17, %v3383_v32  ;;  %v2992_v17 = vld [vmem:[%s3673_s1 + $0x358] sm:$0xff]   ;;  %v2996_v25 = vld [vmem:[%s3673_s1 + $0x360] sm:$0xff]   ;;  %v3003_v32 = vld [vmem:[%s3673_s1 + $0x3a8] sm:$0xff]  }
  0x4a   : > { %2708 = vmatpush3.bf16.msra.mxu1 %v2939_v27  ;;  %2681 = vmatprep.subr.bf16.mxu0 %v2940_v28  ;;  %v2998_v27 = vld [vmem:[%s3673_s1 + $0x320] sm:$0xff]  }
  0x4b   : > { %1295 = vmatprep.mubr.bf16.mxu1 %v3364_v26  ;;  %2709 = vmatprep.subr.bf16.mxu1 %v2941_v29  ;;  %v2999_v28 = vld [vmem:[%s3673_s1 + $0x3a0] sm:$0xff]   ;;  %v3000_v29 = vld [vmem:[%s3673_s1 + $0x368] sm:$0xff]  }
  0x4c   : > { %925 = vmatprep.mubr.bf16.mxu0 %v2270_v37  ;;  %v3004_v37 = vld [vmem:[%s3673_s1 + $0x370] sm:$0xff]  }
  0x4d   : > { %2682 = vmatpush3.bf16.msra.mxu0 %v2942_v30  ;;  %v3001_v30 = vld [vmem:[%s3673_s1 + $0x3e8] sm:$0xff]  }
  0x4e   : > { %2710 = vmatpush3.bf16.msra.mxu1 %v2943_v31  ;;  %2683 = vmatprep.subr.bf16.mxu0 %v2946_v39  ;;  %v3002_v31 = vld [vmem:[%s3673_s1 + $0x328] sm:$0xff]   ;;  %v3006_v39 = vld [vmem:[%s3673_s1 + $0x330] sm:$0xff]  }
  0x4f   : > { %2711 = vmatprep.subr.bf16.mxu1 %v2947_v41  ;;  %v3007_v41 = vld [vmem:[%s3673_s1 + $0x3b0] sm:$0xff]  }
  0x50   : > { %926 = vmatmul.mubr.bf16.gmra.mrb[12].mxu0 %v2269_v38  ;;  %v3005_v38 = vld [vmem:[%s3673_s1 + $0x3f0] sm:$0xff]  }
  0x51   : > { %2684 = vmatpush3.bf16.msra.mxu0 %v2949_v42  ;;  %1296 = vmatmul.mubr.bf16.gmra.mrb[12].mxu1 %v3397_v40  ;;  %v3008_v42 = vld [vmem:[%s3673_s1 + $0x378] sm:$0xff]  }
  0x52   : > { %2712 = vmatpush3.bf16.msra.mxu1 %v2950_v43  ;;  %2685 = vmatprep.subr.bf16.mxu0 %v2952_v33  ;;  %v3009_v43 = vld [vmem:[%s3673_s1 + $0x3f8] sm:$0xff]  }
  0x53   : > { %2713 = vmatprep.subr.bf16.mxu1 %v2953_v44  ;;  %1336 = vmatprep.mubr.bf16.mxu0 %v2322_v5  ;;  %v3010_v33 = vld [vmem:[%s3673_s1 + $0x338] sm:$0xff]  }
  0x54   : > { %1385 = vmatprep.mubr.bf16.mxu1 %v2324_v7  ;;  %v3011_v44 = vld [vmem:[%s3673_s1 + $0x3b8] sm:$0xff]  }
  0x55   : > { %2686 = vmatpush3.bf16.msra.mxu0 %v2954_v45  ;;  %v3012_v45 = vld [vmem:[%s3673_s1 + $0x440] sm:$0xff]  }
  0x56   : > { %2714 = vmatpush3.bf16.msra.mxu1 %v2955_v46  ;;  %2687 = vmatprep.subr.bf16.mxu0 %v2956_v47  ;;  %v3013_v46 = vld [vmem:[%s3673_s1 + $0x400] sm:$0xff]   ;;  %v3014_v47 = vld [vmem:[%s3673_s1 + $0x448] sm:$0xff]  }
  0x57   : > { %2715 = vmatprep.subr.bf16.mxu1 %v2957_v48  ;;  %v3015_v48 = vld [vmem:[%s3673_s1 + $0x408] sm:$0xff]  }
  0x59   : > { %2688 = vmatpush3.bf16.msra.mxu0 %v2958_v49  ;;  %v3016_v49 = vld [vmem:[%s3673_s1 + $0x450] sm:$0xff]  }
  0x5a   : > { %2716 = vmatpush3.bf16.msra.mxu1 %v2959_v50  ;;  %2689 = vmatprep.subr.bf16.mxu0 %v2960_v51  ;;  %v3017_v50 = vld [vmem:[%s3673_s1 + $0x410] sm:$0xff]   ;;  %v1411_v51 = vld [vmem:[%s3196_s6 + $0x78] sm:$0xff] }
  0x5b   : > { %2717 = vmatprep.subr.bf16.mxu1 %v2961_v52  ;;  %v1412_v52 = vld [vmem:[%s3196_s6 + $0x80] sm:$0xff] }
  0x5d   : > { %2690 = vmatpush3.bf16.msra.mxu0 %v2962_v53  ;;  %v2482_v53 = vcombine.high %v3294_v63, %v1411_v51 }
  0x5e   : > { %2718 = vmatpush3.bf16.msra.mxu1 %v2963_v54  ;;  %2691 = vmatprep.subr.bf16.mxu0 %v2964_v55  ;;  %v2484_v54 = vcombine.high %v3302_v2, %v1412_v52  ;;  %v2481_v55 = vcombine.low %v3294_v63, %v1411_v51  ;;  %v3021_v63 = vld [vmem:[%s3673_s1 + $0x420] sm:$0xff]  }
  0x5f   : > { %2719 = vmatprep.subr.bf16.mxu1 %v2965_v56  ;;  %v2483_v56 = vcombine.low %v3302_v2, %v1412_v52 }
  0x61   : > { %2692 = vmatpush3.bf16.msra.mxu0 %v2966_v57  ;;  %v3019_v57 = vld [vmem:[%s3673_s1 + $0x418] sm:$0xff]  }
  0x62   : > { %2720 = vmatpush3.bf16.msra.mxu1 %v2967_v58  ;;  %2693 = vmatprep.subr.bf16.mxu0 %v2968_v59  ;;  %v3020_v58 = vld [vmem:[%s3673_s1 + $0x460] sm:$0xff]   ;;  %v1413_v59 = vld [vmem:[%s3196_s6 + $0x88] sm:$0xff] }
  0x63   : > { %2721 = vmatprep.subr.bf16.mxu1 %v2969_v60  ;;  %v2486_v2 = vcombine.high %v3386_v35, %v1413_v59  ;;  %v3024_v60 = vld [vmem:[%s3673_s1 + $0x468] sm:$0xff]   ;;  %v2485_v5 = vcombine.low %v3386_v35, %v1413_v59 }
  0x65   : > { %2694 = vmatpush3.bf16.msra.mxu0 %v2970_v61  ;;  %v3027_v61 = vld [vmem:[%s3673_s1 + $0x428] sm:$0xff]  }
  0x66   : > { %2722 = vmatpush3.bf16.msra.mxu1 %v2971_v62  ;;  %2735 = vmatprep.subr.bf16.mxu0 %v2976_v8  ;;  %v3028_v62 = vld [vmem:[%s3673_s1 + $0x470] sm:$0xff]  }
  0x67   : > { %2763 = vmatprep.subr.bf16.mxu1 %v2977_v9 }
  0x68   : > { %1337 = vmatmul.mubr.bf16.vlgmr.msra.gmra.mrb[16].mxu0 %v2321_v4  ;;  %v3031_v4 = vld [vmem:[%s3673_s1 + $0x438] sm:$0xff]  }
  0x69   : > { %1386 = vmatmul.mubr.bf16.vlgmr.msra.gmra.mrb[16].mxu1 %v2323_v6  ;;  %2736 = vmatpush3.bf16.msra.mxu0 %v2978_v10 }
  0x6a   : > { %2764 = vmatpush3.bf16.msra.mxu1 %v2979_v11  ;;  %2737 = vmatprep.subr.bf16.mxu0 %v2980_v13 }
  0x6b   : > { %1344 = vmatprep.mubr.bf16.mxu0 %v2328_v34  ;;  %2765 = vmatprep.subr.bf16.mxu1 %v2981_v14 }
  0x6c   : > { %1393 = vmatprep.mubr.bf16.mxu1 %v3491_v12 }
  0x6d   : > { %2738 = vmatpush3.bf16.msra.mxu0 %v2982_v15 }
  0x6e   : > { %2766 = vmatpush3.bf16.msra.mxu1 %v2983_v16  ;;  %2739 = vmatprep.subr.bf16.mxu0 %v2986_v19 }
  0x6f   : > { %2767 = vmatprep.subr.bf16.mxu1 %v2987_v21 }
  0x70   : > { %1345 = vmatmul.mubr.bf16.gmra.mrb[20].mxu0 %v2327_v18 }
  0x71   : > { %1394 = vmatmul.mubr.bf16.gmra.mrb[20].mxu1 %v3513_v20  ;;  %1891 = vmatprep.mubr.bf16.mxu0 %v3364_v26  ;;  %v2997_v26 = vld [vmem:[%s3673_s1 + $0x3e0] sm:$0xff]  }
  0x72   : > { %2740 = vmatpush3.bf16.msra.mxu0 %v2989_v36  ;;  %2768 = vmatpush3.bf16.msra.mxu1 %v2990_v1 }
  0x73   : > { %2741 = vmatprep.subr.bf16.mxu0 %v2992_v17  ;;  %1940 = vmatprep.mubr.bf16.mxu1 %v2328_v34 }
  0x74   : > { %2769 = vmatprep.subr.bf16.mxu1 %v2993_v22 }
  0x76   : > { %2742 = vmatpush3.bf16.msra.mxu0 %v2994_v23  ;;  %2770 = vmatpush3.bf16.msra.mxu1 %v2995_v24 }
  0x77   : > { %2743 = vmatprep.subr.bf16.mxu0 %v2996_v25  ;;  %2771 = vmatprep.subr.bf16.mxu1 %v2997_v26 }
  0x7a   : > { %2744 = vmatpush3.bf16.msra.mxu0 %v2998_v27  ;;  %2772 = vmatpush3.bf16.msra.mxu1 %v2999_v28 }
  0x7b   : > { %2745 = vmatprep.subr.bf16.mxu0 %v3000_v29  ;;  %2773 = vmatprep.subr.bf16.mxu1 %v3001_v30 }
  0x7e   : > { %2746 = vmatpush3.bf16.msra.mxu0 %v3002_v31  ;;  %2774 = vmatpush3.bf16.msra.mxu1 %v3003_v32 }
  0x7f   : > { %2747 = vmatprep.subr.bf16.mxu0 %v3004_v37  ;;  %2775 = vmatprep.subr.bf16.mxu1 %v3005_v38 }
  0x82   : > { %2748 = vmatpush3.bf16.msra.mxu0 %v3006_v39  ;;  %2776 = vmatpush3.bf16.msra.mxu1 %v3007_v41 }
  0x83   : > { %2749 = vmatprep.subr.bf16.mxu0 %v3008_v42  ;;  %2777 = vmatprep.subr.bf16.mxu1 %v3009_v43 }
  0x86   : > { %2750 = vmatpush3.bf16.msra.mxu0 %v3010_v33  ;;  %2778 = vmatpush3.bf16.msra.mxu1 %v3011_v44 }
  0x87   : > { %2791 = vmatprep.subr.bf16.mxu0 %v3012_v45  ;;  %2819 = vmatprep.subr.bf16.mxu1 %v3012_v45 }
  0x89   : > { %1892 = vmatmul.mubr.bf16.vlgmr.msra.gmra.mrb[24].mxu0 %v3397_v40  ;;  %1941 = vmatmul.mubr.bf16.vlgmr.msra.gmra.mrb[24].mxu1 %v2327_v18  ;;  %v3018_v40 = vld [vmem:[%s3673_s1 + $0x458] sm:$0xff]  }
  0x8a   : > { %2792 = vmatpush3.bf16.msra.mxu0 %v3013_v46  ;;  %2827 = vmatpush3.bf16.msra.mxu1 %v3013_v46 }
  0x8b   : > { %2793 = vmatprep.subr.bf16.mxu0 %v3014_v47  ;;  %2820 = vmatprep.subr.bf16.mxu1 %v3014_v47 }
  0x8c   : > { %1899 = vmatprep.mubr.bf16.mxu0 %v2482_v53  ;;  %1948 = vmatprep.mubr.bf16.mxu1 %v2484_v54 }
  0x8e   : > { %2794 = vmatpush3.bf16.msra.mxu0 %v3015_v48  ;;  %2828 = vmatpush3.bf16.msra.mxu1 %v3015_v48 }
  0x8f   : > { %2795 = vmatprep.subr.bf16.mxu0 %v3016_v49  ;;  %2821 = vmatprep.subr.bf16.mxu1 %v3016_v49 }
  0x91   : > { %1900 = vmatmul.mubr.bf16.gmra.mrb[28].mxu0 %v2481_v55  ;;  %1949 = vmatmul.mubr.bf16.gmra.mrb[28].mxu1 %v2483_v56 }
  0x92   : > { %2796 = vmatpush3.bf16.msra.mxu0 %v3017_v50  ;;  %2829 = vmatpush3.bf16.msra.mxu1 %v3017_v50 }
  0x93   : > { %2797 = vmatprep.subr.bf16.mxu0 %v3018_v40  ;;  %2822 = vmatprep.subr.bf16.mxu1 %v3018_v40 }
  0x94   : > { %1989 = vmatprep.mubr.bf16.mxu0 %v3491_v12  ;;  %1997 = vmatprep.mubr.bf16.mxu1 %v2486_v2 }
  0x96   : > { %2798 = vmatpush3.bf16.msra.mxu0 %v3019_v57  ;;  %2830 = vmatpush3.bf16.msra.mxu1 %v3019_v57 }
  0x97   : > { %2799 = vmatprep.subr.bf16.mxu0 %v3020_v58  ;;  %2823 = vmatprep.subr.bf16.mxu1 %v3020_v58 }
  0x9a   : > { %2800 = vmatpush3.bf16.msra.mxu0 %v3021_v63  ;;  %2831 = vmatpush3.bf16.msra.mxu1 %v3021_v63 }
  0x9b   : > { %2801 = vmatprep.subr.bf16.mxu0 %v3024_v60  ;;  %2824 = vmatprep.subr.bf16.mxu1 %v3024_v60 }
  0x9e   : > { %2802 = vmatpush3.bf16.msra.mxu0 %v3027_v61  ;;  %2832 = vmatpush3.bf16.msra.mxu1 %v3027_v61 }
  0x9f   : > { %2803 = vmatprep.subr.bf16.mxu0 %v3028_v62  ;;  %2825 = vmatprep.subr.bf16.mxu1 %v3028_v62 }
  0xa2   : > { %2804 = vmatpush3.bf16.msra.mxu0 %v3029_v0  ;;  %2833 = vmatpush3.bf16.msra.mxu1 %v3029_v0 }
  0xa3   : > { %2805 = vmatprep.subr.bf16.mxu0 %v3030_v3  ;;  %2826 = vmatprep.subr.bf16.mxu1 %v3030_v3 }
  0xa6   : > { %2806 = vmatpush3.bf16.msra.mxu0 %v3031_v4  ;;  %2834 = vmatpush3.bf16.msra.mxu1 %v3031_v4 }
  0xa9   : > { %1990 = vmatmul.mubr.bf16.vlgmr.msra.gmra.mrb[32].mxu0 %v3513_v20  ;;  %1998 = vmatmul.mubr.bf16.vlgmr.msra.gmra.mrb[32].mxu1 %v2485_v5 }
  0xfb   : > { %v2583_v6 = vpop.f32.mrb[0].mxu0 }
  0xfc   : > { %v2611_v7 = vpop.f32.mrb[0].mxu1  ;;  %v2584_v8 = vpop.f32.mrb[1].mxu0 }
  0xfd   : > { %v2585_v9 = vadd.f32 %v2584_v8, %v2583_v6  ;;  %v2612_v10 = vpop.f32.mrb[1].mxu1  ;;  %v2586_v34 = vpop.f32.mrb[2].mxu0 }
  0xfe   : > { %v2613_v11 = vadd.f32 %v2612_v10, %v2611_v7  ;;  %v2614_v12 = vpop.f32.mrb[2].mxu1  ;;  %v2587_v13 = vpop.f32.mrb[3].mxu0 }
  0xff   : > { %v2588_v14 = vadd.f32 %v2587_v13, %v2586_v34  ;;  %v2615_v15 = vpop.f32.mrb[3].mxu1 }
 0x100   : > { %v871_v16 = vadd.f32 %v2613_v11, %v2585_v9  ;;  %v2616_v18 = vadd.f32 %v2615_v15, %v2614_v12 }
 0x102   : > { %v874_v19 = vadd.f32 %v2616_v18, %v2588_v14 }
 0x103   : > { %v2589_v35 = vpop.f32.mrb[4].mxu0 }
 0x104   : > { %v2617_v21 = vpop.f32.mrb[4].mxu1  ;;  %v2590_v36 = vpop.f32.mrb[5].mxu0 }
 0x105   : > { %v2591_v1 = vadd.f32 %v2590_v36, %v2589_v35  ;;  %v2618_v20 = vpop.f32.mrb[5].mxu1  ;;  %v2592_v17 = vpop.f32.mrb[6].mxu0 }
 0x106   : > { %v2619_v22 = vadd.f32 %v2618_v20, %v2617_v21  ;;  %v2620_v23 = vpop.f32.mrb[6].mxu1  ;;  %v2593_v24 = vpop.f32.mrb[7].mxu0 }
 0x107   : > { %v2594_v25 = vadd.f32 %v2593_v24, %v2592_v17  ;;  %v2621_v26 = vpop.f32.mrb[7].mxu1 }
 0x108   : > { %v879_v27 = vadd.f32 %v2619_v22, %v2591_v1  ;;  %v2622_v28 = vadd.f32 %v2621_v26, %v2620_v23 }
 0x10a   : > { %v882_v29 = vadd.f32 %v2622_v28, %v2594_v25 }
 0x11b   : > { %v2639_v30 = vpop.f32.mrb[8].mxu0 }
 0x11c   : > { %v2667_v31 = vpop.f32.mrb[8].mxu1  ;;  %v2640_v32 = vpop.f32.mrb[9].mxu0 }
 0x11d   : > { %v2668_v37 = vpop.f32.mrb[9].mxu1  ;;  %v2641_v38 = vadd.f32 %v2640_v32, %v2639_v30  ;;  %v2642_v41 = vpop.f32.mrb[10].mxu0 }
 0x11e   : > { %v2669_v39 = vadd.f32 %v2668_v37, %v2667_v31  ;;  %v2670_v42 = vpop.f32.mrb[10].mxu1  ;;  %v2643_v43 = vpop.f32.mrb[11].mxu0 }
 0x11f   : > { %v2671_v33 = vpop.f32.mrb[11].mxu1  ;;  %v920_v44 = vadd.f32 %v2641_v38, %v871_v16  ;;  %v2644_v45 = vadd.f32 %v2643_v43, %v2642_v41 }
 0x120   : > { %v2672_v46 = vadd.f32 %v2671_v33, %v2670_v42 }
 0x121   : > { %v1290_v47 = vadd.f32 %v2669_v39, %v920_v44  ;;  %v923_v48 = vadd.f32 %v2644_v45, %v874_v19 }
 0x123   : > { %v1293_v49 = vadd.f32 %v2672_v46, %v923_v48  ;;  %v2645_v50 = vpop.f32.mrb[12].mxu0 }
 0x124   : > { %v2646_v40 = vpop.f32.mrb[13].mxu0  ;;  %v2673_v51 = vpop.f32.mrb[12].mxu1 }
 0x125   : > { %v2647_v52 = vadd.f32 %v2646_v40, %v2645_v50  ;;  %v2648_v53 = vpop.f32.mrb[14].mxu0  ;;  %v2674_v54 = vpop.f32.mrb[13].mxu1 }
 0x126   : > { %v2649_v55 = vpop.f32.mrb[15].mxu0  ;;  %v2675_v56 = vadd.f32 %v2674_v54, %v2673_v51  ;;  %v2676_v57 = vpop.f32.mrb[14].mxu1 }
 0x127   : > { %v928_v58 = vadd.f32 %v2647_v52, %v879_v27  ;;  %v2650_v59 = vadd.f32 %v2649_v55, %v2648_v53  ;;  %v2677_v63 = vpop.f32.mrb[15].mxu1 }
 0x128   : > { %v2678_v2 = vadd.f32 %v2677_v63, %v2676_v57 }
 0x129   : > { %v931_v60 = vadd.f32 %v2650_v59, %v882_v29  ;;  %v1298_v61 = vadd.f32 %v2675_v56, %v928_v58 }
 0x12b   : > { %v1301_v62 = vadd.f32 %v2678_v2, %v931_v60 }
 0x13b   : > { %v2695_v0 = vpop.f32.mrb[16].mxu0 }
 0x13c   : > { %v2723_v3 = vpop.f32.mrb[16].mxu1  ;;  %v2696_v4 = vpop.f32.mrb[17].mxu0 }
 0x13d   : > { %v2697_v5 = vadd.f32 %v2696_v4, %v2695_v0  ;;  %v2724_v6 = vpop.f32.mrb[17].mxu1  ;;  %v2698_v7 = vpop.f32.mrb[18].mxu0 }
 0x13e   : > { %v2725_v8 = vadd.f32 %v2724_v6, %v2723_v3  ;;  %v2726_v9 = vpop.f32.mrb[18].mxu1  ;;  %v2699_v10 = vpop.f32.mrb[19].mxu0 }
 0x13f   : > { %v1339_v34 = vadd.f32 %v2697_v5, %v1290_v47  ;;  %v2700_v11 = vadd.f32 %v2699_v10, %v2698_v7  ;;  %v2727_v12 = vpop.f32.mrb[19].mxu1 }
 0x140   : > { %v2728_v13 = vadd.f32 %v2727_v12, %v2726_v9 }
 0x141   : > { %v3646_v14 = vadd.f32 %v2725_v8, %v1339_v34  ;;  %v1342_v15 = vadd.f32 %v2700_v11, %v1293_v49 }
 0x143   : > { %v3648_v16 = vadd.f32 %v2728_v13, %v1342_v15  ;;  %v2701_v18 = vpop.f32.mrb[20].mxu0 }
 0x144   : > { %v2702_v19 = vpop.f32.mrb[21].mxu0  ;;  %v2729_v35 = vpop.f32.mrb[20].mxu1 }
 0x145   : > { %v2703_v21 = vadd.f32 %v2702_v19, %v2701_v18  ;;  %v2704_v36 = vpop.f32.mrb[22].mxu0  ;;  %v2730_v1 = vpop.f32.mrb[21].mxu1  ;;  %v2548_v18 = vld [vmem:[%s218_s21] sm:$0xff]   ;;  %v2565_v19 = vld [vmem:[%s218_s21 + $0x8] sm:$0xff]  }
 0x146   : > { %v2705_v20 = vpop.f32.mrb[23].mxu0  ;;  %v2731_v17 = vadd.f32 %v2730_v1, %v2729_v35  ;;  %v2732_v22 = vpop.f32.mrb[22].mxu1 }
 0x147   : > { %v1347_v23 = vadd.f32 %v2703_v21, %v1298_v61  ;;  %v2706_v24 = vadd.f32 %v2705_v20, %v2704_v36  ;;  %v2733_v25 = vpop.f32.mrb[23].mxu1  ;;  %v2549_v20 = vunpack.c.l.bf16 %v2548_v18 }
 0x148   : > { %v2734_v26 = vadd.f32 %v2733_v25, %v2732_v22  ;;  %v2550_v22 = vunpack.c.h.bf16 %v2548_v18 }
 0x149   : > { %v1350_v27 = vadd.f32 %v2706_v24, %v1301_v62  ;;  %v1396_v28 = vadd.f32 %v2731_v17, %v1347_v23  ;;  %v2553_v17 = vunpack.c.l.bf16 %v2565_v19 }
 0x14b   : > { %v1399_v29 = vadd.f32 %v2734_v26, %v1350_v27 }
 0x15c   : > { %v2751_v30 = vpop.f32.mrb[24].mxu0  ;;  %v2779_v31 = vpop.f32.mrb[24].mxu1 }
 0x15d   : > { %v2752_v32 = vpop.f32.mrb[25].mxu0  ;;  %v2780_v37 = vpop.f32.mrb[25].mxu1 }
 0x15e   : > { %v2753_v38 = vadd.f32 %v2752_v32, %v2751_v30  ;;  %v2781_v39 = vadd.f32 %v2780_v37, %v2779_v31  ;;  %v2754_v41 = vpop.f32.mrb[26].mxu0  ;;  %v2782_v42 = vpop.f32.mrb[26].mxu1 }
 0x15f   : > { %v2755_v43 = vpop.f32.mrb[27].mxu0  ;;  %v2783_v33 = vpop.f32.mrb[27].mxu1 }
 0x160   : > { %v1943_v44 = vadd.f32 %v2781_v39, %v2753_v38  ;;  %v2756_v45 = vadd.f32 %v2755_v43, %v2754_v41  ;;  %v2784_v46 = vadd.f32 %v2783_v33, %v2782_v42 }
 0x162   : > { %v1946_v47 = vadd.f32 %v2784_v46, %v2756_v45 }
 0x164   : > { %v2757_v48 = vpop.f32.mrb[28].mxu0  ;;  %v2785_v49 = vpop.f32.mrb[28].mxu1 }
 0x165   : > { %v2758_v50 = vpop.f32.mrb[29].mxu0  ;;  %v2786_v40 = vpop.f32.mrb[29].mxu1 }
 0x166   : > { %v2759_v51 = vadd.f32 %v2758_v50, %v2757_v48  ;;  %v2787_v52 = vadd.f32 %v2786_v40, %v2785_v49  ;;  %v2760_v53 = vpop.f32.mrb[30].mxu0  ;;  %v2788_v54 = vpop.f32.mrb[30].mxu1 }
 0x167   : > { %v2761_v55 = vpop.f32.mrb[31].mxu0  ;;  %v2789_v56 = vpop.f32.mrb[31].mxu1 }
 0x168   : > { %v1951_v57 = vadd.f32 %v2787_v52, %v2759_v51  ;;  %v2762_v58 = vadd.f32 %v2761_v55, %v2760_v53  ;;  %v2790_v59 = vadd.f32 %v2789_v56, %v2788_v54 }
 0x16a   : > { %v1954_v63 = vadd.f32 %v2790_v59, %v2762_v58 }
 0x17c   : > { %v2807_v2 = vpop.f32.mrb[32].mxu0  ;;  %v2813_v60 = vpop.f32.mrb[32].mxu1 }
 0x17d   : > { %v2808_v61 = vpop.f32.mrb[33].mxu0  ;;  %v2814_v62 = vpop.f32.mrb[33].mxu1 }
 0x17e   : > { %v2809_v0 = vadd.f32 %v2808_v61, %v2807_v2  ;;  %v2815_v3 = vadd.f32 %v2814_v62, %v2813_v60  ;;  %v2810_v4 = vpop.f32.mrb[34].mxu0  ;;  %v2816_v5 = vpop.f32.mrb[34].mxu1 }
 0x17f   : > { %v2811_v6 = vpop.f32.mrb[35].mxu0  ;;  %v2817_v7 = vpop.f32.mrb[35].mxu1 }
 0x180   : > { %v1992_v8 = vadd.f32 %v2809_v0, %v1943_v44  ;;  %v2000_v9 = vadd.f32 %v2815_v3, %v1951_v57  ;;  %v2812_v10 = vadd.f32 %v2811_v6, %v2810_v4  ;;  %v2818_v34 = vadd.f32 %v2817_v7, %v2816_v5 }
 0x182   : > { %v2006_v11 = vadd.f32 %v1992_v8, %v3646_v14  ;;  %v2008_v12 = vadd.f32 %v2000_v9, %v1396_v28  ;;  %v1995_v13 = vadd.f32 %v2812_v10, %v1946_v47  ;;  %v2003_v15 = vadd.f32 %v2818_v34, %v1954_v63 }
 0x183   : > { %v2554_v14 = vunpack.c.h.bf16 %v2565_v19 }
 0x184   : > { %vm2010_vm0 = vcmp.ge.f32.partialorder %v2006_v11, 0.0  ;;  %v2014_v35 = vmul.f32 0.2, %v2006_v11  ;;  %v2016_v21 = vmul.f32 0.2, %v2008_v12  ;;  %vm2012_vm1 = vcmp.ge.f32.partialorder %v2008_v12, 0.0 }
 0x185   : > { %v2007_v36 = vadd.f32 %v1995_v13, %v3648_v16  ;;  %v2009_v1 = vadd.f32 %v2003_v15, %v1399_v29 }
 0x186   : > { %v2018_v23 = vsel %vm2010_vm0, %v2006_v11, %v2014_v35  ;;  %v2020_v25 = vsel %vm2012_vm1, %v2008_v12, %v2016_v21 }
 0x187   : > { %vm2011_vm2 = vcmp.ge.f32.partialorder %v2007_v36, 0.0  ;;  %v2015_v24 = vmul.f32 0.2, %v2007_v36  ;;  %vm2013_vm3 = vcmp.ge.f32.partialorder %v2009_v1, 0.0  ;;  %v2017_v26 = vmul.f32 0.2, %v2009_v1 }
 0x188   : > { %v2030_v28 = vadd.f32 %v2549_v20, %v2018_v23  ;;  %v2032_v32 = vadd.f32 %v2553_v17, %v2020_v25 }
 0x189   : > { %v2019_v27 = vsel %vm2011_vm2, %v2007_v36, %v2015_v24  ;;  %v2021_v31 = vsel %vm2013_vm3, %v2009_v1, %v2017_v26 }
 0x18a   : > { %v2031_v30 = vadd.f32 %v2550_v22, %v2019_v27  ;;  %v2033_v16 = vadd.f32 %v2554_v14, %v2021_v31 }
 0x18c   : > { %v2558_v29 = vpack.c.bf16 %v2031_v30, %v2030_v28  ;;  %v2563_v37 = vpack.c.bf16 %v2033_v16, %v2032_v32 }
 0x18e   : > { %2559 = vst [vmem:[%s228_s24] sm:$0xff] %v2558_v29   ;;  %2566 = vst [vmem:[%s228_s24 + $0x8] sm:$0xff] %v2563_v37  }
 0x18f PF: > { %s13_s14 = sadd.s32 1, %s3056_s14   ;;  %s3676_s12 = smov %s3052_s13 }
 0x190   : > { %p10_p5 = scmp.ge.s32.totalorder %s13_s14, 4   ;;  %s3677_s13 = smov %s3679_s15 }
 0x192   :  { %12 = sbr.rel (!%p10_p5) target bundleno = 2 (0x2), region = 67 }

// kernel: unet_discriminator_sn.15
= control target key start
LH: loop header
LB: loop body
LE: loop exit
PB: predicated region body
PF: predicated region fallthrough
CT: control target
= control target key end

     0   :  { %s2947_s12 = smov 0   ;;  %s2949_s13 = smov 0   ;;  %s3538_s0 = inlined_call_operand.vmem [shape: bf16[2,160,384], index: 0, kind: input, shape index: {}]   ;;  %s3539_s1 = inlined_call_operand.vmem [shape: bf16[3,384,64], index: 1, kind: input, shape index: {}]   ;;  %s3540_s2 = inlined_call_operand.vmem [shape: bf16[2,128,64], index: 2, kind: input, shape index: {}]   ;;  %s3541_s3 = inlined_call_operand.vmem [shape: bf16[2,128,64], index: 3, kind: output, shape index: {}]  }
   0x1   :  { %s2951_s14 = smov 0  }
   0x2 LB: > { %s25_s15 = sadd.s32 1, %s2921_s13  ;;  %p2027_p0 = scmp.ge.s32.totalorder %s2925_s14, 1  ;;  %s2925_s14 = sphi %s2951_s14, %s13_s14   ;;  %s2921_s13 = sphi %s2949_s13, %s3543_s13   ;;  %s2917_s12 = sphi %s2947_s12, %s3542_s12  }
   0x3   : > { %p27_p1 = scmp.ge.s32.totalorder %s25_s15, 2  ;;  %p168_p2 = scmp.lt.s32.totalorder %s2925_s14, 3 }
   0x5   : > { %s3545_s15 = smov (%p27_p1, %s25_s15), 0  ;;  %p169_p3 = pnand %p2027_p0, %p168_p2 }
   0x6   : > { %v2784_v0 = vld [vmem:[%s3539_s1 + $0x100] sm:$0xff] (!%p169_p3)   ;;  %v2787_v3 = vld [vmem:[%s3539_s1 + $0x108] sm:$0xff] (!%p169_p3)   ;;  %v2790_v6 = vld [vmem:[%s3539_s1 + $0x110] sm:$0xff] (!%p169_p3)   ;;  %p205_p4 = scmp.lt.s32.totalorder (!%p169_p3), %s2917_s12, 1  ;;  %vm1907_vm0 = vcmask (!%p169_p3), 519168  }
   0x7   : > { %172 = sbr.rel (%p169_p3) target bundleno = 410 (0x19a), region = 32  ;;  %v2785_v1 = vld [vmem:[%s3539_s1 + $0x140] sm:$0xff] (!%p169_p3)   ;;  %2327 = vmatprep.subr.bf16.mxu0 (!%p169_p3), %v2784_v0  ;;  %v2788_v4 = vld [vmem:[%s3539_s1 + $0x148] sm:$0xff] (!%p169_p3)   ;;  %v2791_v7 = vld [vmem:[%s3539_s1 + $0x150] sm:$0xff] (!%p169_p3)  }
   0x8   : > { %v2786_v2 = vld [vmem:[%s3539_s1 + $0xc0] sm:$0xff] (!%p169_p3)   ;;  %2567 = vmatprep.subr.bf16.mxu1 (!%p169_p3), %v2785_v1  ;;  %v2789_v5 = vld [vmem:[%s3539_s1 + $0xc8] sm:$0xff] (!%p169_p3)   ;;  %v2792_v8 = vld [vmem:[%s3539_s1 + $0xd0] sm:$0xff] (!%p169_p3)  }
   0x9   : > { %2328 = vmatpush3.bf16.msra.mxu0 (!%p169_p3), %v2786_v2  ;;  %2568 = vmatpush3.bf16.msra.mxu1 (!%p169_p3), %v2785_v1  ;;  %v2793_v9 = vld [vmem:[%s3539_s1 + $0x118] sm:$0xff] (!%p169_p3)   ;;  %v2796_v12 = vld [vmem:[%s3539_s1 + $0x120] sm:$0xff] (!%p169_p3)   ;;  %v2799_v15 = vld [vmem:[%s3539_s1 + $0x128] sm:$0xff] (!%p169_p3)  }
   0xa   : > { %2329 = vmatprep.subr.bf16.mxu0 (!%p169_p3), %v2787_v3  ;;  %2569 = vmatprep.subr.bf16.mxu1 (!%p169_p3), %v2788_v4  ;;  %v2794_v10 = vld [vmem:[%s3539_s1 + $0x158] sm:$0xff] (!%p169_p3)   ;;  %v2797_v13 = vld [vmem:[%s3539_s1 + $0x160] sm:$0xff] (!%p169_p3)   ;;  %v2800_v16 = vld [vmem:[%s3539_s1 + $0x168] sm:$0xff] (!%p169_p3)  }
   0xb   : > { %v2795_v11 = vld [vmem:[%s3539_s1 + $0xd8] sm:$0xff] (!%p169_p3)   ;;  %v2798_v14 = vld [vmem:[%s3539_s1 + $0xe0] sm:$0xff] (!%p169_p3)   ;;  %v2801_v17 = vld [vmem:[%s3539_s1 + $0xe8] sm:$0xff] (!%p169_p3)  }
   0xc   : > { %v2802_v18 = vld [vmem:[%s3539_s1 + $0x130] sm:$0xff] (!%p169_p3)   ;;  %v2805_v21 = vld [vmem:[%s3539_s1 + $0x138] sm:$0xff] (!%p169_p3)   ;;  %v2813_v26 = vld [vmem:[%s3539_s1 + $0x40] sm:$0xff] (!%p169_p3)  }
   0xd   : > { %2330 = vmatpush3.bf16.msra.mxu0 (!%p169_p3), %v2789_v5  ;;  %2570 = vmatpush3.bf16.msra.mxu1 (!%p169_p3), %v2788_v4  ;;  %v2803_v19 = vld [vmem:[%s3539_s1 + $0x170] sm:$0xff] (!%p169_p3)   ;;  %v2806_v22 = vld [vmem:[%s3539_s1 + $0x178] sm:$0xff] (!%p169_p3)   ;;  %v2814_v28 = vld [vmem:[%s3539_s1 + $0x1c0] sm:$0xff] (!%p169_p3)  }
   0xe   : > { %2331 = vmatprep.subr.bf16.mxu0 %v2790_v6  ;;  %2571 = vmatprep.subr.bf16.mxu1 %v2791_v7  ;;  %s3547_s12 = smov (!%p205_p4, %s2917_s12), 1  ;;  %v2804_v20 = vld [vmem:[%s3539_s1 + $0xf0] sm:$0xff]   ;;  %v2807_v25 = vld [vmem:[%s3539_s1 + $0xf8] sm:$0xff]   ;;  %v2815_v30 = vld [vmem:[%s3539_s1] sm:$0xff]  }
   0xf   : > { %s2759_s27 = smul.u32 240, %s3547_s12  ;;  %v2816_v31 = vld [vmem:[%s3539_s1 + $0x180] sm:$0xff]   ;;  %v2817_v32 = vld [vmem:[%s3539_s1 + $0x48] sm:$0xff]   ;;  %v2824_v38 = vld [vmem:[%s3539_s1 + $0x50] sm:$0xff]  }
  0x10   : > { %v2818_v35 = vld [vmem:[%s3539_s1 + $0x8] sm:$0xff]   ;;  %v2826_v40 = vld [vmem:[%s3539_s1 + $0x10] sm:$0xff]   ;;  %v2828_v42 = vld [vmem:[%s3539_s1 + $0x58] sm:$0xff]  }
  0x11   : > { %2332 = vmatpush3.bf16.msra.mxu0 %v2792_v8  ;;  %2572 = vmatpush3.bf16.msra.mxu1 %v2791_v7  ;;  %s3038_s11 = scalar_lea.vmem %s3538_s0, %s2759_s27  ;;  %v2825_v39 = vld [vmem:[%s3539_s1 + $0x1c8] sm:$0xff]   ;;  %v2829_v44 = vld [vmem:[%s3539_s1 + $0x18] sm:$0xff]   ;;  %v2835_v48 = vld [vmem:[%s3539_s1 + $0x60] sm:$0xff]  }
  0x12   : > { %2333 = vmatprep.subr.bf16.mxu0 %v2793_v9  ;;  %2573 = vmatprep.subr.bf16.mxu1 %v2794_v10  ;;  %v3047_v23 = vld [vmem:[%s3038_s11 + $0x1c] ss:$12 sps:$4 sm:$0xff]   ;;  %v3050_v24 = vld [vmem:[%s3038_s11 + $0x20] ss:$12 sps:$4 sm:$0xff]   ;;  %v3060_v27 = vld [vmem:[%s3038_s11 + $0x18] ss:$12 sps:$4 sm:$0xff]  }
  0x13   : > { %668 = vmatprep.mubr.bf16.mxu0 %v3047_v23  ;;  %2583 = vmatprep.mubr.bf16.mxu1 %v3050_v24  ;;  %v3067_v29 = vld [vmem:[%s3038_s11 + $0x38] ss:$12 sps:$4 sm:$0xff]   ;;  %v3079_v33 = vld [vmem:[%s3038_s11 + $0x34] ss:$12 sps:$4 sm:$0xff]   ;;  %v3084_v34 = vld [vmem:[%s3038_s11 + $0x50] ss:$12 sps:$4 sm:$0xff]  }
  0x14   : > { %v3091_v36 = vld [vmem:[%s3038_s11 + $0x30] ss:$12 sps:$4 sm:$0xff]   ;;  %v3094_v37 = vld [vmem:[%s3038_s11 + $0x68] ss:$12 sps:$4 sm:$0xff]   ;;  %v3115_v43 = vld [vmem:[%s3038_s11 + $0x4c] ss:$12 sps:$4 sm:$0xff]  }
  0x15   : > { %2334 = vmatpush3.bf16.msra.mxu0 %v2795_v11  ;;  %2574 = vmatpush3.bf16.msra.mxu1 %v2794_v10  ;;  %v2827_v41 = vld [vmem:[%s3539_s1 + $0x188] sm:$0xff]   ;;  %v3128_v47 = vld [vmem:[%s3038_s11 + $0x98] ss:$12 sps:$4 sm:$0xff]   ;;  %v2836_v49 = vld [vmem:[%s3539_s1 + $0x1d0] sm:$0xff]  }
  0x16   : > { %2335 = vmatprep.subr.bf16.mxu0 %v2796_v12  ;;  %2575 = vmatprep.subr.bf16.mxu1 %v2797_v13  ;;  %v3121_v45 = vld [vmem:[%s3038_s11 + $0x80] ss:$12 sps:$4 sm:$0xff]   ;;  %v3125_v46 = vld [vmem:[%s3038_s11 + $0x48] ss:$12 sps:$4 sm:$0xff]   ;;  %v3152_v54 = vld [vmem:[%s3038_s11 + $0x64] ss:$12 sps:$4 sm:$0xff]  }
  0x17   : > { %v2837_v50 = vld [vmem:[%s3539_s1 + $0x20] sm:$0xff]   ;;  %v2838_v51 = vld [vmem:[%s3539_s1 + $0x190] sm:$0xff]   ;;  %v2839_v52 = vld [vmem:[%s3539_s1 + $0x68] sm:$0xff]  }
  0x18   : > { %v2840_v53 = vld [vmem:[%s3539_s1 + $0x28] sm:$0xff]   ;;  %v3155_v55 = vld [vmem:[%s3038_s11 + $0xb0] ss:$12 sps:$4 sm:$0xff]   ;;  %v3188_v3 = vld [vmem:[%s3038_s11 + $0x78] ss:$12 sps:$4 sm:$0xff]  }
  0x19   : > { %2336 = vmatpush3.bf16.msra.mxu0 %v2798_v14  ;;  %2576 = vmatpush3.bf16.msra.mxu1 %v2797_v13  ;;  %v3159_v56 = vld [vmem:[%s3038_s11 + $0x60] ss:$12 sps:$4 sm:$0xff]   ;;  %v2845_v57 = vld [vmem:[%s3038_s11 + $0xc8] ss:$12 sps:$4 sm:$0xff]   ;;  %v2847_v59 = vld [vmem:[%s3539_s1 + $0x1d8] sm:$0xff]  }
  0x1a   : > { %2337 = vmatprep.subr.bf16.mxu0 %v2799_v15  ;;  %2577 = vmatprep.subr.bf16.mxu1 %v2800_v16  ;;  %v2846_v58 = vld [vmem:[%s3539_s1 + $0x70] sm:$0xff]   ;;  %v2849_v61 = vld [vmem:[%s3539_s1 + $0x198] sm:$0xff]   ;;  %v2854_v1 = vld [vmem:[%s3038_s11] ss:$12 sps:$4 sm:$0xff]  }
  0x1b   : > { %v2848_v60 = vld [vmem:[%s3539_s1 + $0x30] sm:$0xff]   ;;  %v2850_v62 = vld [vmem:[%s3539_s1 + $0x78] sm:$0xff]   ;;  %v2858_v4 = vld [vmem:[%s3539_s1 + $0x80] sm:$0xff]  }
  0x1c   : > { %v2851_v63 = vld [vmem:[%s3539_s1 + $0x38] sm:$0xff]   ;;  %v2856_v2 = vld [vmem:[%s3038_s11 + $0x4] ss:$12 sps:$4 sm:$0xff]   ;;  %v3202_v7 = vld [vmem:[%s3038_s11 + $0x94] ss:$12 sps:$4 sm:$0xff]  }
  0x1d   : > { %2338 = vmatpush3.bf16.msra.mxu0 %v2801_v17  ;;  %2578 = vmatpush3.bf16.msra.mxu1 %v2800_v16  ;;  %v3183_v0 = vld [vmem:[%s3038_s11 + $0x7c] ss:$12 sps:$4 sm:$0xff]   ;;  %v2859_v5 = vld [vmem:[%s3539_s1 + $0x1e0] sm:$0xff]   ;;  %v3219_v12 = vld [vmem:[%s3038_s11 + $0xac] ss:$12 sps:$4 sm:$0xff]  }
  0x1e   : > { %2339 = vmatprep.subr.bf16.mxu0 %v2802_v18  ;;  %2579 = vmatprep.subr.bf16.mxu1 %v2803_v19  ;;  %v2860_v6 = vld [vmem:[%s3539_s1 + $0x1a0] sm:$0xff]   ;;  %v3206_v8 = vld [vmem:[%s3038_s11 + $0x90] ss:$12 sps:$4 sm:$0xff]   ;;  %v2864_v9 = vld [vmem:[%s3539_s1 + $0x88] sm:$0xff]  }
  0x1f   : > { %v2865_v10 = vld [vmem:[%s3539_s1 + $0x1e8] sm:$0xff]   ;;  %v2870_v13 = vld [vmem:[%s3539_s1 + $0x90] sm:$0xff]   ;;  %v2876_v17 = vld [vmem:[%s3539_s1 + $0x98] sm:$0xff]  }
  0x20   : > { %v2866_v11 = vld [vmem:[%s3539_s1 + $0x1a8] sm:$0xff]   ;;  %v2871_v14 = vld [vmem:[%s3539_s1 + $0x1f0] sm:$0xff]  }
  0x21   : > { %2340 = vmatpush3.bf16.msra.mxu0 %v2804_v20  ;;  %2580 = vmatpush3.bf16.msra.mxu1 %v2803_v19  ;;  %v2872_v15 = vld [vmem:[%s3539_s1 + $0x1b0] sm:$0xff]   ;;  %v2877_v19 = vld [vmem:[%s3539_s1 + $0x1f8] sm:$0xff]  }
  0x22   : > { %2341 = vmatprep.subr.bf16.mxu0 %v2805_v21  ;;  %2581 = vmatprep.subr.bf16.mxu1 %v2806_v22  ;;  %v3235_v16 = vld [vmem:[%s3038_s11 + $0xa8] ss:$12 sps:$4 sm:$0xff]   ;;  %v3241_v18 = vld [vmem:[%s3038_s11 + $0xc4] ss:$12 sps:$4 sm:$0xff]   ;;  %v2878_v20 = vld [vmem:[%s3539_s1 + $0x1b8] sm:$0xff]  }
  0x23   : > { %v2879_v21 = vld [vmem:[%s3539_s1 + $0xa0] sm:$0xff]  }
  0x25   : > { %2342 = vmatpush3.bf16.msra.mxu0 %v2807_v25  ;;  %2582 = vmatpush3.bf16.msra.mxu1 %v2806_v22  ;;  %v3255_v22 = vld [vmem:[%s3539_s1 + $0x200] sm:$0xff]  }
  0x26   : > { %2407 = vmatprep.subr.bf16.mxu1 %v2813_v26  ;;  %2487 = vmatprep.subr.bf16.mxu0 %v2814_v28  ;;  %v3266_v25 = vld [vmem:[%s3038_s11 + $0xc0] ss:$12 sps:$4 sm:$0xff]   ;;  %v2883_v26 = vld [vmem:[%s3539_s1 + $0xb0] sm:$0xff]  }
  0x27   : > { %v2882_v28 = vld [vmem:[%s3539_s1 + $0x208] sm:$0xff]  }
  0x28   : > { %669 = vmatmul.mubr.bf16.vlgmr.msra.gmra.mrb[0].mxu0 %v3060_v27  ;;  %2584 = vmatmul.mubr.bf16.vlgmr.msra.gmra.mrb[0].mxu1 %v3067_v29 }
  0x29   : > { %2408 = vmatpush3.bf16.msra.mxu1 %v2815_v30  ;;  %2488 = vmatpush3.bf16.msra.mxu0 %v2816_v31  ;;  %v2884_v30 = vld [vmem:[%s3539_s1 + $0x210] sm:$0xff]   ;;  %v2886_v31 = vld [vmem:[%s3539_s1 + $0x218] sm:$0xff]  }
  0x2a   : > { %2409 = vmatprep.subr.bf16.mxu1 %v2817_v32  ;;  %676 = vmatprep.mubr.bf16.mxu0 %v3079_v33  ;;  %v2888_v32 = vld [vmem:[%s3539_s1 + $0x220] sm:$0xff]  }
  0x2b   : > { %2587 = vmatprep.mubr.bf16.mxu1 %v3084_v34  ;;  %2489 = vmatprep.subr.bf16.mxu0 %v2825_v39  ;;  %v2897_v39 = vld [vmem:[%s3038_s11 + $0x50] ss:$12 sps:$4 sm:$0xff]  }
  0x2d   : > { %2410 = vmatpush3.bf16.msra.mxu1 %v2818_v35  ;;  %2490 = vmatpush3.bf16.msra.mxu0 %v2827_v41  ;;  %v2890_v35 = vld [vmem:[%s3539_s1 + $0x230] sm:$0xff]  }
  0x2e   : > { %2411 = vmatprep.subr.bf16.mxu1 %v2824_v38  ;;  %2491 = vmatprep.subr.bf16.mxu0 %v2836_v49  ;;  %v2894_v38 = vld [vmem:[%s3539_s1 + $0x238] sm:$0xff]   ;;  %v2899_v41 = vld [vmem:[%s3038_s11 + $0x68] ss:$12 sps:$4 sm:$0xff]  }
  0x30   : > { %677 = vmatmul.mubr.bf16.gmra.mrb[4].mxu0 %v3091_v36  ;;  %2588 = vmatmul.mubr.bf16.gmra.mrb[4].mxu1 %v3094_v37 }
  0x31   : > { %2412 = vmatpush3.bf16.msra.mxu1 %v2826_v40  ;;  %684 = vmatprep.mubr.bf16.mxu0 %v3115_v43  ;;  %v2898_v40 = vld [vmem:[%s3038_s11 + $0xb0] ss:$12 sps:$4 sm:$0xff]  }
  0x32   : > { %2413 = vmatprep.subr.bf16.mxu1 %v2828_v42  ;;  %2591 = vmatprep.mubr.bf16.mxu1 %v3121_v45  ;;  %v2900_v42 = vld [vmem:[%s3038_s11 + $0xc8] ss:$12 sps:$4 sm:$0xff]  }
  0x33   : > { %2492 = vmatpush3.bf16.msra.mxu0 %v2838_v51 }
  0x34   : > { %2493 = vmatprep.subr.bf16.mxu0 %v2847_v59 }
  0x35   : > { %2414 = vmatpush3.bf16.msra.mxu1 %v2829_v44  ;;  %v2902_v44 = vld [vmem:[%s3038_s11 + $0xe0] ss:$12 sps:$4 sm:$0xff]  }
  0x36   : > { %2415 = vmatprep.subr.bf16.mxu1 %v2835_v48 }
  0x37   : > { %2494 = vmatpush3.bf16.msra.mxu0 %v2849_v61 }
  0x38   : > { %685 = vmatmul.mubr.bf16.gmra.mrb[8].mxu0 %v3125_v46  ;;  %2592 = vmatmul.mubr.bf16.gmra.mrb[8].mxu1 %v3128_v47 }
  0x39   : > { %2416 = vmatpush3.bf16.msra.mxu1 %v2837_v50  ;;  %692 = vmatprep.mubr.bf16.mxu0 %v3152_v54 }
  0x3a   : > { %2417 = vmatprep.subr.bf16.mxu1 %v2839_v52  ;;  %2595 = vmatprep.mubr.bf16.mxu1 %v3155_v55 }
  0x3b   : > { %2495 = vmatprep.subr.bf16.mxu0 %v2859_v5 }
  0x3c   : > { %2496 = vmatpush3.bf16.msra.mxu0 %v2860_v6 }
  0x3d   : > { %2418 = vmatpush3.bf16.msra.mxu1 %v2840_v53  ;;  %2497 = vmatprep.subr.bf16.mxu0 %v2865_v10 }
  0x3e   : > { %2419 = vmatprep.subr.bf16.mxu1 %v2846_v58 }
  0x40   : > { %693 = vmatmul.mubr.bf16.gmra.mrb[12].mxu0 %v3159_v56  ;;  %2596 = vmatmul.mubr.bf16.gmra.mrb[12].mxu1 %v2845_v57 }
  0x41   : > { %2420 = vmatpush3.bf16.msra.mxu1 %v2848_v60  ;;  %700 = vmatprep.mubr.bf16.mxu0 %v3183_v0 }
  0x42   : > { %2421 = vmatprep.subr.bf16.mxu1 %v2850_v62  ;;  %1022 = vmatprep.mubr.bf16.mxu1 %v2856_v2 }
  0x43   : > { %2498 = vmatpush3.bf16.msra.mxu0 %v2866_v11 }
  0x44   : > { %2499 = vmatprep.subr.bf16.mxu0 %v2871_v14 }
  0x45   : > { %2422 = vmatpush3.bf16.msra.mxu1 %v2851_v63 }
  0x46   : > { %2599 = vmatprep.subr.bf16.mxu1 %v2858_v4 }
  0x47   : > { %2500 = vmatpush3.bf16.msra.mxu0 %v2872_v15 }
  0x48   : > { %701 = vmatmul.mubr.bf16.gmra.mrb[16].mxu0 %v3188_v3  ;;  %1023 = vmatmul.mubr.bf16.vlgmr.msra.gmra.mrb[16].mxu1 %v2854_v1 }
  0x49   : > { %2600 = vmatpush3.bf16.msra.mxu1 %v2858_v4  ;;  %708 = vmatprep.mubr.bf16.mxu0 %v3202_v7 }
  0x4a   : > { %1030 = vmatprep.mubr.bf16.mxu1 %v3047_v23  ;;  %2601 = vmatprep.subr.bf16.mxu1 %v2864_v9  ;;  %v2881_v23 = vld [vmem:[%s3539_s1 + $0xa8] sm:$0xff]  }
  0x4b   : > { %2501 = vmatprep.subr.bf16.mxu0 %v2877_v19 }
  0x4c   : > { %2502 = vmatpush3.bf16.msra.mxu0 %v2878_v20 }
  0x4d   : > { %2602 = vmatpush3.bf16.msra.mxu1 %v2864_v9  ;;  %2631 = vmatprep.subr.bf16.mxu0 %v3255_v22 }
  0x4e   : > { %2603 = vmatprep.subr.bf16.mxu1 %v2870_v13 }
  0x50   : > { %709 = vmatmul.mubr.bf16.gmra.mrb[20].mxu0 %v3206_v8  ;;  %1031 = vmatmul.mubr.bf16.gmra.mrb[20].mxu1 %v3060_v27  ;;  %v2885_v27 = vld [vmem:[%s3539_s1 + $0xb8] sm:$0xff]  }
  0x51   : > { %716 = vmatprep.mubr.bf16.mxu0 %v3219_v12  ;;  %1038 = vmatprep.mubr.bf16.mxu1 %v3079_v33 }
  0x52   : > { %2604 = vmatpush3.bf16.msra.mxu1 %v2870_v13 }
  0x53   : > { %2605 = vmatprep.subr.bf16.mxu1 %v2876_v17 }
  0x56   : > { %2606 = vmatpush3.bf16.msra.mxu1 %v2876_v17 }
  0x57   : > { %2607 = vmatprep.subr.bf16.mxu1 %v2879_v21 }
  0x58   : > { %717 = vmatmul.mubr.bf16.gmra.mrb[24].mxu0 %v3235_v16  ;;  %1039 = vmatmul.mubr.bf16.gmra.mrb[24].mxu1 %v3091_v36 }
  0x59   : > { %724 = vmatprep.mubr.bf16.mxu0 %v3241_v18  ;;  %1046 = vmatprep.mubr.bf16.mxu1 %v3115_v43 }
  0x5a   : > { %2608 = vmatpush3.bf16.msra.mxu1 %v2879_v21 }
  0x5b   : > { %2609 = vmatprep.subr.bf16.mxu1 %v2881_v23 }
  0x5e   : > { %2610 = vmatpush3.bf16.msra.mxu1 %v2881_v23 }
  0x5f   : > { %2611 = vmatprep.subr.bf16.mxu1 %v2883_v26 }
  0x60   : > { %725 = vmatmul.mubr.bf16.gmra.mrb[28].mxu0 %v3266_v25  ;;  %1047 = vmatmul.mubr.bf16.gmra.mrb[28].mxu1 %v3125_v46 }
  0x61   : > { %1054 = vmatprep.mubr.bf16.mxu1 %v3152_v54  ;;  %1569 = vmatprep.mubr.bf16.mxu0 %v3079_v33  ;;  %v2889_v33 = vld [vmem:[%s3539_s1 + $0x228] sm:$0xff]  }
  0x62   : > { %2612 = vmatpush3.bf16.msra.mxu1 %v2883_v26 }
  0x63   : > { %2613 = vmatprep.subr.bf16.mxu1 %v2885_v27 }
  0x66   : > { %2614 = vmatpush3.bf16.msra.mxu1 %v2885_v27 }
  0x67   : > { %2663 = vmatprep.subr.bf16.mxu1 %v3255_v22 }
  0x68   : > { %1055 = vmatmul.mubr.bf16.gmra.mrb[32].mxu1 %v3159_v56  ;;  %1570 = vmatmul.mubr.bf16.vlgmr.msra.gmra.mrb[32].mxu0 %v3091_v36  ;;  %v2887_v36 = vld [vmem:[%s3038_s11 + $0x8] ss:$12 sps:$4 sm:$0xff]  }
  0x69   : > { %2632 = vmatpush3.bf16.msra.mxu0 %v3255_v22  ;;  %1062 = vmatprep.mubr.bf16.mxu1 %v3183_v0 }
  0x6a   : > { %1577 = vmatprep.mubr.bf16.mxu0 %v3115_v43  ;;  %2633 = vmatprep.subr.bf16.mxu0 %v2882_v28  ;;  %v2901_v43 = vld [vmem:[%s3038_s11 + $0x80] ss:$12 sps:$4 sm:$0xff]  }
  0x6d   : > { %2634 = vmatpush3.bf16.msra.mxu0 %v2882_v28 }
  0x6e   : > { %2635 = vmatprep.subr.bf16.mxu0 %v2884_v30 }
  0x70   : > { %1063 = vmatmul.mubr.bf16.gmra.mrb[36].mxu1 %v3188_v3  ;;  %1578 = vmatmul.mubr.bf16.gmra.mrb[36].mxu0 %v3125_v46 }
  0x71   : > { %1070 = vmatprep.mubr.bf16.mxu1 %v3202_v7  ;;  %1585 = vmatprep.mubr.bf16.mxu0 %v3152_v54 }
  0x72   : > { %2636 = vmatpush3.bf16.msra.mxu0 %v2884_v30 }
  0x73   : > { %2637 = vmatprep.subr.bf16.mxu0 %v2886_v31 }
  0x76   : > { %2638 = vmatpush3.bf16.msra.mxu0 %v2886_v31 }
  0x77   : > { %2639 = vmatprep.subr.bf16.mxu0 %v2888_v32 }
  0x78   : > { %1071 = vmatmul.mubr.bf16.gmra.mrb[40].mxu1 %v3206_v8  ;;  %1586 = vmatmul.mubr.bf16.gmra.mrb[40].mxu0 %v3159_v56 }
  0x79   : > { %1078 = vmatprep.mubr.bf16.mxu1 %v3219_v12  ;;  %1593 = vmatprep.mubr.bf16.mxu0 %v3183_v0 }
  0x7a   : > { %2640 = vmatpush3.bf16.msra.mxu0 %v2888_v32 }
  0x7b   : > { %2641 = vmatprep.subr.bf16.mxu0 %v2889_v33 }
  0x7e   : > { %2642 = vmatpush3.bf16.msra.mxu0 %v2889_v33 }
  0x7f   : > { %2643 = vmatprep.subr.bf16.mxu0 %v2890_v35 }
  0x80   : > { %1079 = vmatmul.mubr.bf16.gmra.mrb[44].mxu1 %v3235_v16  ;;  %1594 = vmatmul.mubr.bf16.gmra.mrb[44].mxu0 %v3188_v3 }
  0x81   : > { %2615 = vmatprep.mubr.bf16.mxu1 %v2887_v36  ;;  %1601 = vmatprep.mubr.bf16.mxu0 %v3202_v7 }
  0x82   : > { %2644 = vmatpush3.bf16.msra.mxu0 %v2890_v35 }
  0x83   : > { %2645 = vmatprep.subr.bf16.mxu0 %v2894_v38 }
  0x86   : > { %2646 = vmatpush3.bf16.msra.mxu0 %v2894_v38 }
  0x88   : > { %2616 = vmatmul.mubr.bf16.vlgmr.msra.gmra.mrb[0].mxu1 %v3050_v24  ;;  %1602 = vmatmul.mubr.bf16.gmra.mrb[48].mxu0 %v3206_v8  ;;  %v2891_v24 = vld [vmem:[%s3038_s11 + $0xdc] ss:$12 sps:$4 sm:$0xff]  }
  0x89   : > { %2671 = vmatpush3.bf16.msra.mxu1 %v3255_v22  ;;  %2619 = vmatprep.mubr.bf16.mxu1 %v3067_v29  ;;  %v2893_v29 = vld [vmem:[%s3038_s11 + $0xd8] ss:$12 sps:$4 sm:$0xff]  }
  0x8a   : > { %2664 = vmatprep.subr.bf16.mxu1 %v2882_v28  ;;  %1609 = vmatprep.mubr.bf16.mxu0 %v3219_v12 }
  0x8d   : > { %2672 = vmatpush3.bf16.msra.mxu1 %v2882_v28 }
  0x8e   : > { %2665 = vmatprep.subr.bf16.mxu1 %v2884_v30 }
  0x90   : > { %2620 = vmatmul.mubr.bf16.gmra.mrb[4].mxu1 %v3084_v34  ;;  %1610 = vmatmul.mubr.bf16.gmra.mrb[52].mxu0 %v3235_v16  ;;  %v2895_v34 = vld [vmem:[%s3038_s11 + $0x38] ss:$12 sps:$4 sm:$0xff]  }
  0x91   : > { %2673 = vmatpush3.bf16.msra.mxu1 %v2884_v30  ;;  %2623 = vmatprep.mubr.bf16.mxu1 %v3094_v37  ;;  %v2896_v37 = vld [vmem:[%s3038_s11 + $0x98] ss:$12 sps:$4 sm:$0xff]   ;;  %s2270_s11 = sshll.u32 %s3547_s12, 6 }
  0x92   : > { %2666 = vmatprep.subr.bf16.mxu1 %v2886_v31  ;;  %1617 = vmatprep.mubr.bf16.mxu0 %v3241_v18  ;;  %s218_s5 = scalar_lea.vmem %s3540_s2, %s2270_s11  ;;  %s3463_s8 = scalar_lea.vmem %s3541_s3, %s2270_s11 }
  0x95   : > { %2674 = vmatpush3.bf16.msra.mxu1 %v2886_v31 }
  0x96   : > { %2667 = vmatprep.subr.bf16.mxu1 %v2888_v32 }
  0x98   : > { %2624 = vmatmul.mubr.bf16.gmra.mrb[8].mxu1 %v3121_v45  ;;  %1618 = vmatmul.mubr.bf16.gmra.mrb[56].mxu0 %v3266_v25 }
  0x99   : > { %2675 = vmatpush3.bf16.msra.mxu1 %v2888_v32  ;;  %2627 = vmatprep.mubr.bf16.mxu1 %v3128_v47 }
  0x9a   : > { %2668 = vmatprep.subr.bf16.mxu1 %v2889_v33  ;;  %1625 = vmatprep.mubr.bf16.mxu0 %v2891_v24 }
  0x9d   : > { %2676 = vmatpush3.bf16.msra.mxu1 %v2889_v33 }
  0x9e   : > { %2669 = vmatprep.subr.bf16.mxu1 %v2890_v35 }
  0xa0   : > { %2628 = vmatmul.mubr.bf16.gmra.mrb[12].mxu1 %v3155_v55  ;;  %1626 = vmatmul.mubr.bf16.gmra.mrb[60].mxu0 %v2893_v29 }
  0xa1   : > { %2677 = vmatpush3.bf16.msra.mxu1 %v2890_v35  ;;  %2647 = vmatprep.mubr.bf16.mxu0 %v2895_v34 }
  0xa2   : > { %2670 = vmatprep.subr.bf16.mxu1 %v2894_v38  ;;  %2655 = vmatprep.mubr.bf16.mxu1 %v2896_v37 }
  0xa5   : > { %2678 = vmatpush3.bf16.msra.mxu1 %v2894_v38 }
  0xa8   : > { %2648 = vmatmul.mubr.bf16.vlgmr.msra.gmra.mrb[64].mxu0 %v2897_v39  ;;  %2656 = vmatmul.mubr.bf16.vlgmr.msra.gmra.mrb[8].mxu1 %v2898_v40 }
  0xa9   : > { %2651 = vmatprep.mubr.bf16.mxu0 %v2899_v41  ;;  %2659 = vmatprep.mubr.bf16.mxu1 %v2900_v42 }
  0xb0   : > { %2652 = vmatmul.mubr.bf16.gmra.mrb[68].mxu0 %v2901_v43  ;;  %2660 = vmatmul.mubr.bf16.gmra.mrb[12].mxu1 %v2902_v44 }
  0xfb   : > { %v2343_v45 = vpop.f32.mrb[0].mxu0 }
  0xfc   : > { %v2344_v46 = vpop.f32.mrb[1].mxu0 }
  0xfd   : > { %v2345_v47 = vadd.f32 %v2344_v46, %v2343_v45  ;;  %v2346_v48 = vpop.f32.mrb[2].mxu0 }
  0xfe   : > { %v2347_v49 = vpop.f32.mrb[3].mxu0 }
  0xff   : > { %v2348_v50 = vadd.f32 %v2347_v49, %v2346_v48 }
 0x103   : > { %v2349_v51 = vpop.f32.mrb[4].mxu0 }
 0x104   : > { %v2350_v52 = vpop.f32.mrb[5].mxu0 }
 0x105   : > { %v2351_v53 = vadd.f32 %v2350_v52, %v2349_v51  ;;  %v2352_v54 = vpop.f32.mrb[6].mxu0 }
 0x106   : > { %v2353_v55 = vpop.f32.mrb[7].mxu0 }
 0x107   : > { %v2354_v56 = vadd.f32 %v2353_v55, %v2352_v54 }
 0x10b   : > { %v2355_v57 = vpop.f32.mrb[8].mxu0 }
 0x10c   : > { %v2356_v58 = vpop.f32.mrb[9].mxu0 }
 0x10d   : > { %v2357_v59 = vadd.f32 %v2356_v58, %v2355_v57  ;;  %v2358_v60 = vpop.f32.mrb[10].mxu0 }
 0x10e   : > { %v2359_v61 = vpop.f32.mrb[11].mxu0 }
 0x10f   : > { %v2360_v62 = vadd.f32 %v2359_v61, %v2358_v60 }
 0x113   : > { %v2361_v63 = vpop.f32.mrb[12].mxu0 }
 0x114   : > { %v2362_v0 = vpop.f32.mrb[13].mxu0 }
 0x115   : > { %v2363_v1 = vadd.f32 %v2362_v0, %v2361_v63  ;;  %v2364_v2 = vpop.f32.mrb[14].mxu0 }
 0x116   : > { %v2365_v3 = vpop.f32.mrb[15].mxu0 }
 0x117   : > { %v2366_v4 = vadd.f32 %v2365_v3, %v2364_v2 }
 0x11b   : > { %v2367_v5 = vpop.f32.mrb[16].mxu0  ;;  %v2423_v6 = vpop.f32.mrb[16].mxu1 }
 0x11c   : > { %v2368_v7 = vpop.f32.mrb[17].mxu0  ;;  %v2424_v8 = vpop.f32.mrb[17].mxu1 }
 0x11d   : > { %v2369_v9 = vadd.f32 %v2368_v7, %v2367_v5  ;;  %v2425_v10 = vadd.f32 %v2424_v8, %v2423_v6  ;;  %v2370_v11 = vpop.f32.mrb[18].mxu0  ;;  %v2426_v12 = vpop.f32.mrb[18].mxu1 }
 0x11e   : > { %v2371_v13 = vpop.f32.mrb[19].mxu0  ;;  %v2427_v14 = vpop.f32.mrb[19].mxu1 }
 0x11f   : > { %v2372_v15 = vadd.f32 %v2371_v13, %v2370_v11  ;;  %v2428_v16 = vadd.f32 %v2427_v14, %v2426_v12  ;;  %v3340_v17 = vadd.f32 %v2425_v10, %v2345_v47 }
 0x121   : > { %v3342_v18 = vadd.f32 %v2428_v16, %v2348_v50 }
 0x123   : > { %v2373_v19 = vpop.f32.mrb[20].mxu0  ;;  %v2429_v20 = vpop.f32.mrb[20].mxu1 }
 0x124   : > { %v2374_v21 = vpop.f32.mrb[21].mxu0  ;;  %v2430_v22 = vpop.f32.mrb[21].mxu1 }
 0x125   : > { %v2375_v23 = vadd.f32 %v2374_v21, %v2373_v19  ;;  %v2431_v25 = vadd.f32 %v2430_v22, %v2429_v20  ;;  %v2376_v26 = vpop.f32.mrb[22].mxu0  ;;  %v2432_v27 = vpop.f32.mrb[22].mxu1 }
 0x126   : > { %v2377_v28 = vpop.f32.mrb[23].mxu0  ;;  %v2433_v30 = vpop.f32.mrb[23].mxu1 }
 0x127   : > { %v2378_v31 = vadd.f32 %v2377_v28, %v2376_v26  ;;  %v2434_v32 = vadd.f32 %v2433_v30, %v2432_v27  ;;  %v3344_v33 = vadd.f32 %v2431_v25, %v2351_v53 }
 0x129   : > { %v3346_v35 = vadd.f32 %v2434_v32, %v2354_v56 }
 0x12b   : > { %v2379_v36 = vpop.f32.mrb[24].mxu0  ;;  %v2435_v38 = vpop.f32.mrb[24].mxu1 }
 0x12c   : > { %v2380_v24 = vpop.f32.mrb[25].mxu0  ;;  %v2436_v29 = vpop.f32.mrb[25].mxu1 }
 0x12d   : > { %v2381_v34 = vadd.f32 %v2380_v24, %v2379_v36  ;;  %v2437_v37 = vadd.f32 %v2436_v29, %v2435_v38  ;;  %v2382_v39 = vpop.f32.mrb[26].mxu0  ;;  %v2438_v40 = vpop.f32.mrb[26].mxu1 }
 0x12e   : > { %v2383_v41 = vpop.f32.mrb[27].mxu0  ;;  %v2439_v42 = vpop.f32.mrb[27].mxu1 }
 0x12f   : > { %v2384_v43 = vadd.f32 %v2383_v41, %v2382_v39  ;;  %v2440_v44 = vadd.f32 %v2439_v42, %v2438_v40  ;;  %v3348_v45 = vadd.f32 %v2437_v37, %v2357_v59 }
 0x131   : > { %v3350_v46 = vadd.f32 %v2440_v44, %v2360_v62 }
 0x133   : > { %v2385_v47 = vpop.f32.mrb[28].mxu0  ;;  %v2441_v48 = vpop.f32.mrb[28].mxu1 }
 0x134   : > { %v2386_v49 = vpop.f32.mrb[29].mxu0  ;;  %v2442_v50 = vpop.f32.mrb[29].mxu1 }
 0x135   : > { %v2387_v51 = vadd.f32 %v2386_v49, %v2385_v47  ;;  %v2443_v52 = vadd.f32 %v2442_v50, %v2441_v48  ;;  %v2388_v53 = vpop.f32.mrb[30].mxu0  ;;  %v2444_v54 = vpop.f32.mrb[30].mxu1 }
 0x136   : > { %v2389_v55 = vpop.f32.mrb[31].mxu0  ;;  %v2445_v56 = vpop.f32.mrb[31].mxu1 }
 0x137   : > { %v2390_v57 = vadd.f32 %v2389_v55, %v2388_v53  ;;  %v2446_v58 = vadd.f32 %v2445_v56, %v2444_v54  ;;  %v3352_v60 = vadd.f32 %v2443_v52, %v2363_v1 }
 0x139   : > { %v3354_v61 = vadd.f32 %v2446_v58, %v2366_v4 }
 0x13b   : > { %v2447_v59 = vpop.f32.mrb[32].mxu1  ;;  %v2503_v63 = vpop.f32.mrb[32].mxu0 }
 0x13c   : > { %v2448_v62 = vpop.f32.mrb[33].mxu1  ;;  %v2504_v0 = vpop.f32.mrb[33].mxu0 }
 0x13d   : > { %v2449_v2 = vadd.f32 %v2448_v62, %v2447_v59  ;;  %v3356_v3 = vadd.f32 %v2504_v0, %v2503_v63  ;;  %v2450_v5 = vpop.f32.mrb[34].mxu1  ;;  %v2506_v6 = vpop.f32.mrb[34].mxu0 }
 0x13e   : > { %v2451_v7 = vpop.f32.mrb[35].mxu1  ;;  %v2507_v8 = vpop.f32.mrb[35].mxu0 }
 0x13f   : > { %v2714_v10 = vadd.f32 %v2449_v2, %v2369_v9  ;;  %v2452_v11 = vadd.f32 %v2451_v7, %v2450_v5  ;;  %v2508_v12 = vadd.f32 %v2507_v8, %v2506_v6 }
 0x141   : > { %v2720_v13 = vadd.f32 %v2452_v11, %v2372_v15 }
 0x143   : > { %v2453_v14 = vpop.f32.mrb[36].mxu1  ;;  %v2509_v1 = vpop.f32.mrb[36].mxu0 }
 0x144   : > { %v2454_v16 = vpop.f32.mrb[37].mxu1  ;;  %v2510_v4 = vpop.f32.mrb[37].mxu0 }
 0x145   : > { %v2455_v19 = vadd.f32 %v2454_v16, %v2453_v14  ;;  %v2511_v20 = vadd.f32 %v2510_v4, %v2509_v1  ;;  %v2456_v21 = vpop.f32.mrb[38].mxu1  ;;  %v2512_v22 = vpop.f32.mrb[38].mxu0 }
 0x146   : > { %v2457_v25 = vpop.f32.mrb[39].mxu1  ;;  %v2513_v26 = vpop.f32.mrb[39].mxu0 }
 0x147   : > { %v3358_v27 = vadd.f32 %v2455_v19, %v2375_v23  ;;  %v2458_v28 = vadd.f32 %v2457_v25, %v2456_v21  ;;  %v2514_v30 = vadd.f32 %v2513_v26, %v2512_v22 }
 0x149   : > { %v3360_v32 = vadd.f32 %v2458_v28, %v2378_v31 }
 0x14b   : > { %v2459_v9 = vpop.f32.mrb[40].mxu1  ;;  %v2515_v36 = vpop.f32.mrb[40].mxu0 }
 0x14c   : > { %v2460_v38 = vpop.f32.mrb[41].mxu1  ;;  %v2516_v15 = vpop.f32.mrb[41].mxu0 }
 0x14d   : > { %v2461_v24 = vadd.f32 %v2460_v38, %v2459_v9  ;;  %v2517_v29 = vadd.f32 %v2516_v15, %v2515_v36  ;;  %v2462_v37 = vpop.f32.mrb[42].mxu1  ;;  %v2518_v39 = vpop.f32.mrb[42].mxu0 }
 0x14e   : > { %v2463_v40 = vpop.f32.mrb[43].mxu1  ;;  %v2519_v41 = vpop.f32.mrb[43].mxu0 }
 0x14f   : > { %v3362_v42 = vadd.f32 %v2461_v24, %v2381_v34  ;;  %v2464_v44 = vadd.f32 %v2463_v40, %v2462_v37  ;;  %v2520_v47 = vadd.f32 %v2519_v41, %v2518_v39 }
 0x151   : > { %v3364_v23 = vadd.f32 %v2464_v44, %v2384_v43 }
 0x153   : > { %v2465_v48 = vpop.f32.mrb[44].mxu1  ;;  %v2521_v49 = vpop.f32.mrb[44].mxu0 }
 0x154   : > { %v2466_v31 = vpop.f32.mrb[45].mxu1  ;;  %v2522_v50 = vpop.f32.mrb[45].mxu0 }
 0x155   : > { %v2467_v52 = vadd.f32 %v2466_v31, %v2465_v48  ;;  %v2523_v53 = vadd.f32 %v2522_v50, %v2521_v49  ;;  %v2468_v54 = vpop.f32.mrb[46].mxu1  ;;  %v2524_v55 = vpop.f32.mrb[46].mxu0 }
 0x156   : > { %v2469_v56 = vpop.f32.mrb[47].mxu1  ;;  %v2525_v58 = vpop.f32.mrb[47].mxu0 }
 0x157   : > { %v3366_v59 = vadd.f32 %v2467_v52, %v2387_v51  ;;  %v2470_v63 = vadd.f32 %v2469_v56, %v2468_v54  ;;  %v2526_v62 = vadd.f32 %v2525_v58, %v2524_v55  ;;  %v3415_v52 = vld [vmem:[%s218_s5 + $0x8] sm:$0xff]   ;;  %v3419_v55 = vld [vmem:[%s218_s5] sm:$0xff]   ;;  %v3423_v56 = vld [vmem:[%s218_s5 + $0x18] sm:$0xff]  }
 0x158   : > { %v3417_v54 = vld [vmem:[%s218_s5 + $0x28] sm:$0xff]  }
 0x159   : > { %v3368_v34 = vadd.f32 %v2470_v63, %v2390_v57  ;;  %v2294_v63 = vunpack.c.l.bf16 %v3415_v52 }
 0x15b   : > { %v2617_v0 = vpop.f32.mrb[0].mxu1  ;;  %v2527_v2 = vpop.f32.mrb[48].mxu0 }
 0x15c   : > { %v2680_v43 = vadd.f32 %v3344_v33, %v2617_v0  ;;  %v1121_v5 = vpop.f32.mrb[1].mxu1  ;;  %v2528_v6 = vpop.f32.mrb[49].mxu0  ;;  %v3431_v0 = vld [vmem:[%s218_s5 + $0x10] sm:$0xff]  }
 0x15d   : > { %v2684_v7 = vadd.f32 %v3340_v17, %v1121_v5  ;;  %v2529_v8 = vadd.f32 %v2528_v6, %v2527_v2  ;;  %v2618_v11 = vpop.f32.mrb[2].mxu1  ;;  %v2530_v14 = vpop.f32.mrb[50].mxu0  ;;  %v3433_v2 = vld [vmem:[%s218_s5 + $0x30] sm:$0xff]   ;;  %v2290_v5 = vunpack.c.l.bf16 %v3419_v55 }
 0x15e   : > { %v2688_v1 = vadd.f32 %v3346_v35, %v2618_v11  ;;  %v1124_v16 = vpop.f32.mrb[3].mxu1  ;;  %v2531_v51 = vpop.f32.mrb[51].mxu0  ;;  %v3373_v4 = vadd.f32 %v2680_v43, %v2511_v20  ;;  %v2310_v43 = vunpack.c.l.bf16 %v3417_v54  ;;  %v2291_v11 = vunpack.c.h.bf16 %v3419_v55 }
 0x15f   : > { %v2692_v57 = vadd.f32 %v3342_v18, %v1124_v16  ;;  %v2532_v19 = vadd.f32 %v2531_v51, %v2530_v14  ;;  %v3377_v21 = vadd.f32 %v2684_v7, %v3356_v3  ;;  %v3379_v33 = vadd.f32 %v2714_v10, %v2529_v8 }
 0x160   : > { %v3381_v22 = vadd.f32 %v2688_v1, %v2514_v30  ;;  %v2311_v8 = vunpack.c.h.bf16 %v3417_v54  ;;  %v2302_v51 = vunpack.c.l.bf16 %v3423_v56 }
 0x161   : > { %v3383_v17 = vadd.f32 %v2692_v57, %v2508_v12  ;;  %v3385_v25 = vadd.f32 %v2720_v13, %v2532_v19  ;;  %v2298_v19 = vunpack.c.l.bf16 %v3431_v0 }
 0x163   : > { %v2621_v26 = vpop.f32.mrb[4].mxu1  ;;  %v2533_v35 = vpop.f32.mrb[52].mxu0 }
 0x164   : > { %v2696_v28 = vadd.f32 %v3352_v60, %v2621_v26  ;;  %v1137_v20 = vpop.f32.mrb[5].mxu1  ;;  %v2534_v9 = vpop.f32.mrb[53].mxu0 }
 0x165   : > { %v2700_v18 = vadd.f32 %v3348_v45, %v1137_v20  ;;  %v2535_v36 = vadd.f32 %v2534_v9, %v2533_v35  ;;  %v2622_v38 = vpop.f32.mrb[6].mxu1  ;;  %v2536_v3 = vpop.f32.mrb[54].mxu0  ;;  %v2303_v9 = vunpack.c.h.bf16 %v3423_v56 }
 0x166   : > { %v2704_v10 = vadd.f32 %v3354_v61, %v2622_v38  ;;  %v1140_v15 = vpop.f32.mrb[7].mxu1  ;;  %v2537_v30 = vpop.f32.mrb[55].mxu0  ;;  %v3390_v12 = vadd.f32 %v2696_v28, %v2523_v53 }
 0x167   : > { %v2708_v13 = vadd.f32 %v3350_v46, %v1140_v15  ;;  %v2538_v24 = vadd.f32 %v2537_v30, %v2536_v3  ;;  %v2712_v60 = vadd.f32 %v3358_v27, %v2535_v36  ;;  %v3394_v37 = vadd.f32 %v2700_v18, %v2517_v29 }
 0x168   : > { %v3396_v39 = vadd.f32 %v2704_v10, %v2526_v62  ;;  %v3429_v62 = vld [vmem:[%s218_s5 + $0x38] sm:$0xff]   ;;  %v2299_v15 = vunpack.c.h.bf16 %v3431_v0  ;;  %v2315_v30 = vunpack.c.h.bf16 %v3433_v2 }
 0x169   : > { %v3399_v45 = vadd.f32 %v3360_v32, %v2538_v24  ;;  %v3401_v40 = vadd.f32 %v2708_v13, %v2520_v47  ;;  %v2318_v57 = vunpack.c.l.bf16 %v3429_v62  ;;  %v2319_v18 = vunpack.c.h.bf16 %v3429_v62 }
 0x16b   : > { %v2539_v61 = vpop.f32.mrb[56].mxu0 }
 0x16c   : > { %v2540_v41 = vpop.f32.mrb[57].mxu0 }
 0x16d   : > { %v2541_v44 = vadd.f32 %v2540_v41, %v2539_v61  ;;  %v2542_v48 = vpop.f32.mrb[58].mxu0 }
 0x16e   : > { %v2543_v49 = vpop.f32.mrb[59].mxu0 }
 0x16f   : > { %v2544_v31 = vadd.f32 %v2543_v49, %v2542_v48  ;;  %v3405_v46 = vadd.f32 %v3362_v42, %v2541_v44  ;;  %v3421_v42 = vld [vmem:[%s218_s5 + $0x20] sm:$0xff]  }
 0x170   : > { %v2306_v6 = vunpack.c.l.bf16 %v3421_v42  ;;  %v2307_v14 = vunpack.c.h.bf16 %v3421_v42 }
 0x171   : > { %v3408_v27 = vadd.f32 %v3364_v23, %v2544_v31 }
 0x173   : > { %v2545_v32 = vpop.f32.mrb[60].mxu0 }
 0x174   : > { %v2546_v29 = vpop.f32.mrb[61].mxu0 }
 0x175   : > { %v2547_v47 = vadd.f32 %v2546_v29, %v2545_v32  ;;  %v2548_v50 = vpop.f32.mrb[62].mxu0 }
 0x176   : > { %v2549_v53 = vpop.f32.mrb[63].mxu0 }
 0x177   : > { %v2550_v23 = vadd.f32 %v2549_v53, %v2548_v50  ;;  %v3426_v58 = vadd.f32 %v3366_v59, %v2547_v47  ;;  %v2295_v59 = vunpack.c.h.bf16 %v3415_v52 }
 0x179   : > { %v3439_v7 = vadd.f32 %v3368_v34, %v2550_v23  ;;  %v2314_v34 = vunpack.c.l.bf16 %v3433_v2 }
 0x17b   : > { %v2649_v1 = vpop.f32.mrb[64].mxu0  ;;  %v2657_v16 = vpop.f32.mrb[8].mxu1 }
 0x17c   : > { %v2682_v26 = vadd.f32 %v3373_v4, %v2649_v1  ;;  %v2713_v35 = vadd.f32 %v2712_v60, %v2657_v16  ;;  %v1668_v28 = vpop.f32.mrb[65].mxu0  ;;  %v1700_v20 = vpop.f32.mrb[9].mxu1 }
 0x17d   : > { %v2686_v36 = vadd.f32 %v3377_v21, %v1668_v28  ;;  %v2716_v38 = vadd.f32 %v3379_v33, %v1700_v20  ;;  %v2650_v3 = vpop.f32.mrb[66].mxu0  ;;  %v2658_v10 = vpop.f32.mrb[10].mxu1 }
 0x17e   : > { %vm1749_vm1 = vcmp.ge.f32.partialorder %v2682_v26, 0.0  ;;  %v1765_v13 = vmul.f32 0.2, %v2682_v26  ;;  %vm1757_vm2 = vcmp.ge.f32.partialorder %v2713_v35, 0.0  ;;  %v1773_v4 = vmul.f32 0.2, %v2713_v35 }
 0x17f   : > { %vm1747_vm3 = vcmp.ge.f32.partialorder %v2686_v36, 0.0  ;;  %v1763_v24 = vmul.f32 0.2, %v2686_v36  ;;  %vm1755_vm4 = vcmp.ge.f32.partialorder %v2716_v38, 0.0  ;;  %v1771_v60 = vmul.f32 0.2, %v2716_v38 }
 0x180   : > { %v1781_v61 = vsel %vm1749_vm1, %v2682_v26, %v1765_v13  ;;  %v1789_v41 = vsel %vm1757_vm2, %v2713_v35, %v1773_v4  ;;  %v2690_v21 = vadd.f32 %v3381_v22, %v2650_v3  ;;  %v2719_v33 = vadd.f32 %v3399_v45, %v2658_v10  ;;  %v1671_v44 = vpop.f32.mrb[67].mxu0  ;;  %v1703_v48 = vpop.f32.mrb[11].mxu1 }
 0x181   : > { %v1829_v49 = vadd.f32 %v2294_v63, %v1781_v61  ;;  %v1837_v31 = vadd.f32 %v2310_v43, %v1789_v41  ;;  %v1779_v32 = vsel %vm1747_vm3, %v2686_v36, %v1763_v24  ;;  %v1787_v29 = vsel %vm1755_vm4, %v2716_v38, %v1771_v60 }
 0x182   : > { %v1827_v47 = vadd.f32 %v2290_v5, %v1779_v32  ;;  %v1835_v50 = vadd.f32 %v2306_v6, %v1787_v29  ;;  %vm1750_vm5 = vcmp.ge.f32.partialorder %v2690_v21, 0.0  ;;  %v1766_v22 = vmul.f32 0.2, %v2690_v21 }
 0x183   : > { %v2274_v52 = vpack.c.bf16 %v1829_v49, %v1829_v49  ;;  %v2282_v45 = vpack.c.bf16 %v1837_v31, %v1837_v31  ;;  %vm1758_vm6 = vcmp.ge.f32.partialorder %v2719_v33, 0.0  ;;  %v1774_v53 = vmul.f32 0.2, %v2719_v33  ;;  %v2653_v23 = vpop.f32.mrb[68].mxu0  ;;  %v2661_v63 = vpop.f32.mrb[12].mxu1 }
 0x184   : > { %v2272_v43 = vpack.c.bf16 %v1827_v47, %v1827_v47  ;;  %v2280_v1 = vpack.c.bf16 %v1835_v50, %v1835_v50  ;;  %v1782_v16 = vsel %vm1750_vm5, %v2690_v21, %v1766_v22  ;;  %v2694_v26 = vadd.f32 %v3383_v17, %v1671_v44  ;;  %v1684_v35 = vpop.f32.mrb[69].mxu0  ;;  %v1716_v5 = vpop.f32.mrb[13].mxu1 }
 0x185   : > { %1910 = vst.msk [vmem:[%s3463_s8 + $0x8] sm:$0xf] %vm1907_vm0, %v2274_v52  ;;  %1918 = vst.msk [vmem:[%s3463_s8 + $0x28] sm:$0xf] %vm1907_vm0, %v2282_v45  ;;  %v1830_v6 = vadd.f32 %v2295_v59, %v1782_v16  ;;  %v1790_v28 = vsel %vm1758_vm6, %v2719_v33, %v1774_v53  ;;  %v2722_v20 = vadd.f32 %v3385_v25, %v1703_v48  ;;  %v2654_v38 = vpop.f32.mrb[70].mxu0  ;;  %v2662_v3 = vpop.f32.mrb[14].mxu1 }
 0x186   : > { %v2698_v36 = vadd.f32 %v3390_v12, %v2653_v23  ;;  %1908 = vst.msk [vmem:[%s3463_s8] sm:$0xf] %vm1907_vm0, %v2272_v43  ;;  %1916 = vst.msk [vmem:[%s3463_s8 + $0x20] sm:$0xf] %vm1907_vm0, %v2280_v1  ;;  %v1838_v17 = vadd.f32 %v2311_v8, %v1790_v28  ;;  %vm1748_vm7 = vcmp.ge.f32.partialorder %v2694_v26, 0.0  ;;  %v2725_v13 = vadd.f32 %v3426_v58, %v2661_v63  ;;  %v1687_v59 = vpop.f32.mrb[71].mxu0 }
 0x187   : > { %v1764_v10 = vmul.f32 0.2, %v2694_v26  ;;  %v1719_v4 = vpop.f32.mrb[15].mxu1  ;;  %v2275_v25 = vpack.c.bf16 %v1830_v6, %v1830_v6  ;;  %vm1756_vm8 = vcmp.ge.f32.partialorder %v2722_v20, 0.0  ;;  %v1772_v12 = vmul.f32 0.2, %v2722_v20 }
 0x188   : > { %vm1753_vm9 = vcmp.ge.f32.partialorder %v2698_v36, 0.0  ;;  %v2283_v24 = vpack.c.bf16 %v1838_v17, %v1838_v17  ;;  %v1769_v61 = vmul.f32 0.2, %v2698_v36  ;;  %vm1761_vm10 = vcmp.ge.f32.partialorder %v2725_v13, 0.0 }
 0x189   : > { %v1780_v60 = vsel %vm1748_vm7, %v2694_v26, %v1764_v10  ;;  %1911 = vst.msk [vmem:[%s3463_s8 + $0xc] sm:$0xf] %vm1907_vm0, %v2275_v25  ;;  %v1788_v8 = vsel %vm1756_vm8, %v2722_v20, %v1772_v12  ;;  %v1777_v41 = vmul.f32 0.2, %v2725_v13  ;;  %v2702_v58 = vadd.f32 %v3394_v37, %v1684_v35 }
 0x18a   : > { %v1828_v54 = vadd.f32 %v2291_v11, %v1780_v60  ;;  %1919 = vst.msk [vmem:[%s3463_s8 + $0x2c] sm:$0xf] %vm1907_vm0, %v2283_v24  ;;  %v1836_v21 = vadd.f32 %v2307_v14, %v1788_v8  ;;  %v1785_v33 = vsel %vm1753_vm9, %v2698_v36, %v1769_v61  ;;  %v2728_v44 = vadd.f32 %v3405_v46, %v1716_v5 }
 0x18b   : > { %v2706_v48 = vadd.f32 %v3396_v39, %v2654_v38  ;;  %v1833_v55 = vadd.f32 %v2302_v51, %v1785_v33  ;;  %v1793_v11 = vsel %vm1761_vm10, %v2725_v13, %v1777_v41  ;;  %vm1751_vm11 = vcmp.ge.f32.partialorder %v2702_v58, 0.0 }
 0x18c   : > { %v2273_v49 = vpack.c.bf16 %v1828_v54, %v1828_v54  ;;  %v2281_v31 = vpack.c.bf16 %v1836_v21, %v1836_v21  ;;  %v1841_v37 = vadd.f32 %v2318_v57, %v1793_v11  ;;  %v1767_v32 = vmul.f32 0.2, %v2702_v58 }
 0x18d   : > { %vm1759_vm12 = vcmp.ge.f32.partialorder %v2728_v44, 0.0  ;;  %v2278_v42 = vpack.c.bf16 %v1833_v55, %v1833_v55  ;;  %v1775_v46 = vmul.f32 0.2, %v2728_v44  ;;  %vm1754_vm13 = vcmp.ge.f32.partialorder %v2706_v48, 0.0 }
 0x18e   : > { %1909 = vst.msk [vmem:[%s3463_s8 + $0x4] sm:$0xf] %vm1907_vm0, %v2273_v49  ;;  %v1770_v39 = vmul.f32 0.2, %v2706_v48  ;;  %1917 = vst.msk [vmem:[%s3463_s8 + $0x24] sm:$0xf] %vm1907_vm0, %v2281_v31  ;;  %v2286_v14 = vpack.c.bf16 %v1841_v37, %v1841_v37  ;;  %v1783_v51 = vsel %vm1751_vm11, %v2702_v58, %v1767_v32  ;;  %v2731_v29 = vadd.f32 %v3439_v7, %v2662_v3 }
 0x18f   : > { %v2710_v47 = vadd.f32 %v3401_v40, %v1687_v59  ;;  %1914 = vst.msk [vmem:[%s3463_s8 + $0x18] sm:$0xf] %vm1907_vm0, %v2278_v42  ;;  %v1831_v57 = vadd.f32 %v2298_v19, %v1783_v51  ;;  %v1791_v50 = vsel %vm1759_vm12, %v2728_v44, %v1775_v46  ;;  %v2734_v52 = vadd.f32 %v3408_v27, %v1719_v4 }
 0x190   : > { %v1786_v22 = vsel %vm1754_vm13, %v2706_v48, %v1770_v39  ;;  %1922 = vst.msk [vmem:[%s3463_s8 + $0x38] sm:$0xf] %vm1907_vm0, %v2286_v14  ;;  %v1839_v45 = vadd.f32 %v2314_v34, %v1791_v50  ;;  %vm1762_vm14 = vcmp.ge.f32.partialorder %v2731_v29, 0.0  ;;  %v1778_v7 = vmul.f32 0.2, %v2731_v29 }
 0x191   : > { %v1834_v40 = vadd.f32 %v2303_v9, %v1786_v22  ;;  %v2276_v53 = vpack.c.bf16 %v1831_v57, %v1831_v57  ;;  %vm1752_vm15 = vcmp.ge.f32.partialorder %v2710_v47, 0.0  ;;  %v1768_v19 = vmul.f32 0.2, %v2710_v47 }
 0x192   : > { %vm1760_vm1 = vcmp.ge.f32.partialorder %v2734_v52, 0.0  ;;  %v2284_v23 = vpack.c.bf16 %v1839_v45, %v1839_v45  ;;  %v1794_v63 = vsel %vm1762_vm14, %v2731_v29, %v1778_v7  ;;  %v1776_v43 = vmul.f32 0.2, %v2734_v52 }
 0x193   : > { %v2279_v27 = vpack.c.bf16 %v1834_v40, %v1834_v40  ;;  %1912 = vst.msk [vmem:[%s3463_s8 + $0x10] sm:$0xf] %vm1907_vm0, %v2276_v53  ;;  %v1842_v56 = vadd.f32 %v2319_v18, %v1794_v63  ;;  %v1784_v34 = vsel %vm1752_vm15, %v2710_v47, %v1768_v19 }
 0x194   : > { %1920 = vst.msk [vmem:[%s3463_s8 + $0x30] sm:$0xf] %vm1907_vm0, %v2284_v23  ;;  %v1832_v9 = vadd.f32 %v2299_v15, %v1784_v34  ;;  %v1792_v1 = vsel %vm1760_vm1, %v2734_v52, %v1776_v43 }
 0x195   : > { %1915 = vst.msk [vmem:[%s3463_s8 + $0x1c] sm:$0xf] %vm1907_vm0, %v2279_v27  ;;  %v2287_v16 = vpack.c.bf16 %v1842_v56, %v1842_v56  ;;  %v1840_v26 = vadd.f32 %v2315_v30, %v1792_v1 }
 0x196   : > { %v2277_v35 = vpack.c.bf16 %v1832_v9, %v1832_v9 }
 0x197   : > { %1923 = vst.msk [vmem:[%s3463_s8 + $0x3c] sm:$0xf] %vm1907_vm0, %v2287_v16  ;;  %v2285_v5 = vpack.c.bf16 %v1840_v26, %v1840_v26 }
 0x198   : > { %1913 = vst.msk [vmem:[%s3463_s8 + $0x14] sm:$0xf] %vm1907_vm0, %v2277_v35 }
 0x199   : > { %1921 = vst.msk [vmem:[%s3463_s8 + $0x34] sm:$0xf] %vm1907_vm0, %v2285_v5 }
 0x19a PF: > { %s13_s14 = sadd.s32 1, %s2925_s14   ;;  %s3542_s12 = smov %s2921_s13 }
 0x19b   : > { %p10_p5 = scmp.ge.s32.totalorder %s13_s14, 4   ;;  %s3543_s13 = smov %s3545_s15 }
 0x19d   :  { %12 = sbr.rel (!%p10_p5) target bundleno = 2 (0x2), region = 67 }

// kernel: unet_discriminator_sn.16
= control target key start
LH: loop header
LB: loop body
LE: loop exit
PB: predicated region body
PF: predicated region fallthrough
CT: control target
= control target key end

     0   :  { %s3606_s12 = smov 0   ;;  %s3608_s13 = smov 0   ;;  %s4466_s0 = inlined_call_operand.vmem [shape: bf16[2,432,192], index: 0, kind: input, shape index: {}]   ;;  %s4467_s1 = inlined_call_operand.vmem [shape: bf16[3,192,32], index: 1, kind: input, shape index: {}]   ;;  %s4468_s2 = inlined_call_operand.vmem [shape: bf16[2,384,32], index: 2, kind: input, shape index: {}]   ;;  %s4469_s3 = inlined_call_operand.vmem [shape: bf16[2,384,32], index: 3, kind: output, shape index: {}]  }
   0x1   :  { %s3610_s14 = smov 0  }
   0x2 LB: > { %s25_s15 = sadd.s32 1, %s3579_s13  ;;  %p2705_p0 = scmp.ge.s32.totalorder %s3583_s14, 1  ;;  %s3583_s14 = sphi %s3610_s14, %s13_s14   ;;  %s3579_s13 = sphi %s3608_s13, %s4471_s13   ;;  %s3575_s12 = sphi %s3606_s12, %s4470_s12  }
   0x3   : > { %p27_p1 = scmp.ge.s32.totalorder %s25_s15, 2  ;;  %p168_p2 = scmp.lt.s32.totalorder %s3583_s14, 3 }
   0x5   : > { %s4473_s15 = smov (%p27_p1, %s25_s15), 0  ;;  %p169_p3 = pnand %p2705_p0, %p168_p2 }
   0x6   : > { %v3421_v0 = vld [vmem:[%s4467_s1 + $0x60] sm:$0xff] (!%p169_p3)   ;;  %v3585_v1 = vmov (!%p169_p3), 0   ;;  %v3423_v3 = vld [vmem:[%s4467_s1 + $0x68] sm:$0xff] (!%p169_p3)   ;;  %v3425_v5 = vld [vmem:[%s4467_s1 + $0x70] sm:$0xff] (!%p169_p3)   ;;  %p205_p4 = scmp.lt.s32.totalorder (!%p169_p3), %s3575_s12, 1  ;;  %vm619_vm0 = vcmask (!%p169_p3), 523264  }
   0x7   : > { %172 = sbr.rel (%p169_p3) target bundleno = 559 (0x22f), region = 32  ;;  %692 = vmatprep.subr.bf16.mxu1 (!%p169_p3), %v3585_v1  ;;  %1142 = vmatprep.subr.bf16.mxu0 (!%p169_p3), %v3585_v1  ;;  %v3634_v2 = vld [vmem:[%s4467_s1] sm:$0xff] (!%p169_p3)   ;;  %v3644_v4 = vld [vmem:[%s4467_s1 + $0x8] sm:$0xff] (!%p169_p3)   ;;  %v3655_v6 = vld [vmem:[%s4467_s1 + $0x10] sm:$0xff] (!%p169_p3)   ;;  %vm2553_vm3 = vcmask (!%p169_p3), 257024  }
   0x8   : > { %693 = vmatpush1.bf16.msra.mxu1 (!%p169_p3), %v3421_v0  ;;  %1143 = vmatpush1.bf16.msra.mxu0 (!%p169_p3), %v3634_v2  ;;  %v3427_v7 = vld [vmem:[%s4467_s1 + $0x78] sm:$0xff] (!%p169_p3)   ;;  %v3429_v9 = vld [vmem:[%s4467_s1 + $0x80] sm:$0xff] (!%p169_p3)   ;;  %v3431_v11 = vld [vmem:[%s4467_s1 + $0x88] sm:$0xff] (!%p169_p3)  }
   0x9   : > { %694 = vmatprep.subr.bf16.mxu1 (!%p169_p3), %v3585_v1  ;;  %1144 = vmatprep.subr.bf16.mxu0 (!%p169_p3), %v3585_v1  ;;  %v3667_v8 = vld [vmem:[%s4467_s1 + $0x18] sm:$0xff] (!%p169_p3)   ;;  %v3681_v10 = vld [vmem:[%s4467_s1 + $0x20] sm:$0xff] (!%p169_p3)   ;;  %v3693_v12 = vld [vmem:[%s4467_s1 + $0x28] sm:$0xff] (!%p169_p3)  }
   0xa   : > { %v3433_v13 = vld [vmem:[%s4467_s1 + $0x90] sm:$0xff] (!%p169_p3)   ;;  %v3435_v19 = vld [vmem:[%s4467_s1 + $0x98] sm:$0xff] (!%p169_p3)   ;;  %v3437_v21 = vld [vmem:[%s4467_s1 + $0xa0] sm:$0xff] (!%p169_p3)  }
   0xb   : > { %v3709_v14 = vld [vmem:[%s4467_s1 + $0x30] sm:$0xff] (!%p169_p3)   ;;  %v3729_v20 = vld [vmem:[%s4467_s1 + $0x38] sm:$0xff] (!%p169_p3)   ;;  %v3742_v22 = vld [vmem:[%s4467_s1 + $0x40] sm:$0xff] (!%p169_p3)  }
   0xc   : > { %695 = vmatpush1.bf16.msra.mxu1 (!%p169_p3), %v3423_v3  ;;  %1145 = vmatpush1.bf16.msra.mxu0 (!%p169_p3), %v3644_v4  ;;  %v3439_v23 = vld [vmem:[%s4467_s1 + $0xa8] sm:$0xff] (!%p169_p3)   ;;  %v3441_v25 = vld [vmem:[%s4467_s1 + $0xb0] sm:$0xff] (!%p169_p3)   ;;  %v3443_v27 = vld [vmem:[%s4467_s1 + $0xb8] sm:$0xff] (!%p169_p3)  }
   0xd   : > { %696 = vmatprep.subr.bf16.mxu1 (!%p169_p3), %v3585_v1  ;;  %1146 = vmatprep.subr.bf16.mxu0 (!%p169_p3), %v3585_v1  ;;  %v3753_v24 = vld [vmem:[%s4467_s1 + $0x48] sm:$0xff] (!%p169_p3)   ;;  %v3764_v26 = vld [vmem:[%s4467_s1 + $0x50] sm:$0xff] (!%p169_p3)   ;;  %v3775_v28 = vld [vmem:[%s4467_s1 + $0x58] sm:$0xff] (!%p169_p3)  }
   0xe   : > { %s4475_s12 = smov (!%p205_p4, %s3575_s12), 1  ;;  %v3450_v34 = vld [vmem:[%s4467_s1 + $0xc0] sm:$0xff]   ;;  %v3455_v37 = vld [vmem:[%s4467_s1 + $0xc8] sm:$0xff]   ;;  %v3460_v44 = vld [vmem:[%s4467_s1 + $0xd0] sm:$0xff]  }
   0xf   : > { %s3394_s9 = smul.u32 432, %s4475_s12  ;;  %v3465_v47 = vld [vmem:[%s4467_s1 + $0xd8] sm:$0xff]   ;;  %v3470_v52 = vld [vmem:[%s4467_s1 + $0xe0] sm:$0xff]   ;;  %v3475_v55 = vld [vmem:[%s4467_s1 + $0xe8] sm:$0xff]  }
  0x10   : > { %697 = vmatpush1.bf16.msra.mxu1 %v3425_v5  ;;  %1147 = vmatpush1.bf16.msra.mxu0 %v3655_v6  ;;  %v3480_v60 = vld [vmem:[%s4467_s1 + $0xf0] sm:$0xff]   ;;  %v3485_v63 = vld [vmem:[%s4467_s1 + $0xf8] sm:$0xff]   ;;  %v3490_v5 = vld [vmem:[%s4467_s1 + $0x100] sm:$0xff]   ;;  %s3395_s25 = smul.u32 192, %s4475_s12 }
  0x11   : > { %698 = vmatprep.subr.bf16.mxu1 %v3585_v1  ;;  %1148 = vmatprep.subr.bf16.mxu0 %v3585_v1  ;;  %s3699_s20 = scalar_lea.vmem %s4466_s0, %s3394_s9 }
  0x12   : > { %v3713_v15 = vld [vmem:[%s3699_s20 + $0x18] sm:$0xff]  ;;  %v3716_v16 = vld [vmem:[%s3699_s20 + $0x20] sm:$0xff]  ;;  %v236_v29 = vld [vmem:[%s3699_s20 + $0x28] sm:$0xff]  ;;  %s4306_s27 = scalar_lea.vmem %s4468_s2, %s3395_s25  ;;  %s4314_s29 = scalar_lea.vmem %s4469_s3, %s3395_s25 }
  0x13   : > { %v2734_v17 = vcombine.high %v3713_v15, %v3716_v16  ;;  %v3448_v18 = vld [vmem:[%s3699_s20 + $0x4] ss:$8 sps:$4 sm:$0xff]   ;;  %v3780_v30 = vld [vmem:[%s3699_s20 + $0x30] sm:$0xff]  ;;  %v2733_v31 = vcombine.low %v3713_v15, %v3716_v16  ;;  %v3446_v33 = vld [vmem:[%s3699_s20] ss:$8 sps:$4 sm:$0xff]   ;;  %v2822_v43 = vcombine.high %v3716_v16, %v236_v29  ;;  %v2821_v49 = vcombine.low %v3716_v16, %v236_v29 }
  0x14   : > { %699 = vmatpush1.bf16.msra.mxu1 %v3427_v7  ;;  %1149 = vmatpush1.bf16.msra.mxu0 %v3667_v8  ;;  %v233_v32 = vld [vmem:[%s3699_s20 + $0x10] sm:$0xff]  ;;  %v2736_v35 = vcombine.high %v236_v29, %v3780_v30  ;;  %v238_v38 = vld [vmem:[%s3699_s20 + $0x38] sm:$0xff]  ;;  %v3801_v39 = vld [vmem:[%s3699_s20 + $0x40] sm:$0xff]  ;;  %v2735_v40 = vcombine.low %v236_v29, %v3780_v30 }
  0x15   : > { %700 = vmatprep.subr.bf16.mxu1 %v3585_v1  ;;  %1150 = vmatprep.subr.bf16.mxu0 %v3585_v1  ;;  %v2820_v36 = vcombine.high %v233_v32, %v3713_v15  ;;  %v2819_v41 = vcombine.low %v233_v32, %v3713_v15  ;;  %v2738_v42 = vcombine.high %v238_v38, %v3801_v39  ;;  %v240_v45 = vld [vmem:[%s3699_s20 + $0x48] sm:$0xff]  ;;  %v3820_v46 = vld [vmem:[%s3699_s20 + $0x50] sm:$0xff]  ;;  %v242_v53 = vld [vmem:[%s3699_s20 + $0x58] sm:$0xff] }
  0x16   : > { %2793 = vmatprep.mubr.msk.bf16.mxu1 %vm619_vm0, %v2734_v17  ;;  %2877 = vmatprep.mubr.msk.bf16.mxu0 %vm619_vm0, %v3448_v18  ;;  %v2737_v48 = vcombine.low %v238_v38, %v3801_v39  ;;  %v2740_v50 = vcombine.high %v240_v45, %v3820_v46  ;;  %v3832_v51 = vcombine.high %v3780_v30, %v238_v38  ;;  %v3845_v54 = vld [vmem:[%s3699_s20 + $0x60] sm:$0xff]  ;;  %v244_v61 = vld [vmem:[%s3699_s20 + $0x68] sm:$0xff]  ;;  %v3873_v62 = vld [vmem:[%s3699_s20 + $0x70] sm:$0xff] }
  0x17   : > { %v2739_v56 = vcombine.low %v240_v45, %v3820_v46  ;;  %v3855_v57 = vcombine.low %v3780_v30, %v238_v38  ;;  %v2742_v58 = vcombine.high %v242_v53, %v3845_v54  ;;  %v3859_v59 = vcombine.high %v3801_v39, %v240_v45  ;;  %v3898_v7 = vld [vmem:[%s3699_s20 + $0xc8] sm:$0xff]  ;;  %v3500_v16 = vld [vmem:[%s4467_s1 + $0x110] sm:$0xff]   ;;  %v250_v32 = vld [vmem:[%s3699_s20 + $0x98] sm:$0xff] }
  0x18   : > { %701 = vmatpush1.bf16.msra.mxu1 %v3429_v9  ;;  %1151 = vmatpush1.bf16.msra.mxu0 %v3681_v10  ;;  %v2741_v0 = vcombine.low %v242_v53, %v3845_v54  ;;  %v2744_v3 = vcombine.high %v244_v61, %v3873_v62  ;;  %v246_v9 = vld [vmem:[%s3699_s20 + $0x78] sm:$0xff]  ;;  %v3922_v15 = vcombine.high %v3845_v54, %v244_v61  ;;  %v3934_v18 = vld [vmem:[%s3699_s20 + $0xd0] sm:$0xff]  ;;  %v252_v38 = vld [vmem:[%s3699_s20 + $0xa8] sm:$0xff] }
  0x19   : > { %702 = vmatprep.subr.bf16.mxu1 %v3585_v1  ;;  %1152 = vmatprep.subr.bf16.mxu0 %v3585_v1  ;;  %v3960_v29 = vcombine.high %v3873_v62, %v246_v9 }
  0x1c   : > { %703 = vmatpush1.bf16.msra.mxu1 %v3431_v11  ;;  %1153 = vmatpush1.bf16.msra.mxu0 %v3693_v12  ;;  %v3495_v11 = vld [vmem:[%s4467_s1 + $0x108] sm:$0xff]  }
  0x1d   : > { %704 = vmatprep.subr.bf16.mxu1 %v3585_v1  ;;  %1154 = vmatprep.subr.bf16.mxu0 %v3585_v1 }
  0x20   : > { %705 = vmatpush1.bf16.msra.mxu1 %v3433_v13  ;;  %1155 = vmatpush1.bf16.msra.mxu0 %v3709_v14  ;;  %v3919_v13 = vcombine.low %v3820_v46, %v242_v53 }
  0x21   : > { %706 = vmatprep.subr.bf16.mxu1 %v3585_v1  ;;  %1156 = vmatprep.subr.bf16.mxu0 %v3585_v1 }
  0x24   : > { %707 = vmatpush1.bf16.msra.mxu1 %v3435_v19  ;;  %1157 = vmatpush1.bf16.msra.mxu0 %v3729_v20  ;;  %v3937_v19 = vld [vmem:[%s3699_s20 + $0xd8] sm:$0xff] }
  0x25   : > { %708 = vmatprep.subr.bf16.mxu1 %v3585_v1  ;;  %1158 = vmatprep.subr.bf16.mxu0 %v3585_v1  ;;  %v3964_v30 = vcombine.low %v3934_v18, %v3937_v19 }
  0x28   : > { %709 = vmatpush1.bf16.msra.mxu1 %v3437_v21  ;;  %1159 = vmatpush1.bf16.msra.mxu0 %v3742_v22  ;;  %v248_v21 = vld [vmem:[%s3699_s20 + $0x88] sm:$0xff] }
  0x29   : > { %710 = vmatprep.subr.bf16.mxu1 %v3585_v1  ;;  %1160 = vmatprep.subr.bf16.mxu0 %v3585_v1 }
  0x2c   : > { %711 = vmatpush1.bf16.msra.mxu1 %v3439_v23  ;;  %1161 = vmatpush1.bf16.msra.mxu0 %v3753_v24  ;;  %v3505_v23 = vld [vmem:[%s4467_s1 + $0x118] sm:$0xff]  }
  0x2d   : > { %712 = vmatprep.subr.bf16.mxu1 %v3585_v1  ;;  %1162 = vmatprep.subr.bf16.mxu0 %v3585_v1 }
  0x30   : > { %713 = vmatpush1.bf16.msra.mxu1 %v3441_v25  ;;  %1163 = vmatpush1.bf16.msra.mxu0 %v3764_v26  ;;  %v3957_v25 = vcombine.low %v3845_v54, %v244_v61  ;;  %v2755_v54 = vcombine.low %v3898_v7, %v3934_v18 }
  0x31   : > { %714 = vmatprep.subr.bf16.mxu1 %v3585_v1  ;;  %1164 = vmatprep.subr.bf16.mxu0 %v3585_v1 }
  0x34   : > { %715 = vmatpush1.bf16.msra.mxu1 %v3443_v27  ;;  %1165 = vmatpush1.bf16.msra.mxu0 %v3775_v28 }
  0x35   : > { %3226 = vmatprep.subr.bf16.mxu1 %v3585_v1  ;;  %1800 = vmatprep.subr.bf16.mxu0 %v3585_v1 }
  0x37   : > { %725 = vmatmul.mubr.bf16.vlgmr.msra.gmra.mrb[0].mxu1 %v2733_v31  ;;  %1175 = vmatmul.mubr.bf16.vlgmr.msra.gmra.mrb[0].mxu0 %v3446_v33  ;;  %v260_v31 = vld [vmem:[%s3699_s20 + $0xe8] sm:$0xff]  ;;  %v251_v33 = vld [vmem:[%s3699_s20 + $0xa0] sm:$0xff] }
  0x38   : > { %3238 = vmatpush1.bf16.msra.mxu1 %v3634_v2  ;;  %1801 = vmatpush1.bf16.msra.mxu0 %v3450_v34  ;;  %v3883_v2 = vcombine.low %v3801_v39, %v240_v45  ;;  %v253_v39 = vld [vmem:[%s3699_s20 + $0xb0] sm:$0xff] }
  0x39   : > { %2794 = vmatprep.mubr.msk.bf16.mxu1 %vm619_vm0, %v2736_v35  ;;  %2878 = vmatprep.mubr.msk.bf16.mxu0 %vm619_vm0, %v2820_v36  ;;  %v3978_v35 = vcombine.low %v3873_v62, %v246_v9  ;;  %v2751_v45 = vcombine.low %v252_v38, %v253_v39 }
  0x3a   : > { %1802 = vmatprep.subr.bf16.mxu0 %v3585_v1  ;;  %3227 = vmatprep.subr.bf16.mxu1 %v3585_v1 }
  0x3c   : > { %3239 = vmatpush1.bf16.msra.mxu1 %v3644_v4  ;;  %1803 = vmatpush1.bf16.msra.mxu0 %v3455_v37  ;;  %v3887_v4 = vcombine.high %v3820_v46, %v242_v53 }
  0x3d   : > { %3228 = vmatprep.subr.bf16.mxu1 %v3585_v1  ;;  %1804 = vmatprep.subr.bf16.mxu0 %v3585_v1 }
  0x3f   : > { %733 = vmatmul.mubr.bf16.gmra.mrb[4].mxu1 %v2735_v40  ;;  %1183 = vmatmul.mubr.bf16.gmra.mrb[4].mxu0 %v2819_v41  ;;  %v2749_v40 = vcombine.low %v250_v32, %v251_v33 }
  0x40   : > { %2795 = vmatprep.mubr.msk.bf16.mxu1 %vm619_vm0, %v2738_v42  ;;  %2879 = vmatprep.mubr.msk.bf16.mxu0 %vm619_vm0, %v2822_v43  ;;  %v2752_v42 = vcombine.high %v252_v38, %v253_v39 }
  0x41   : > { %1805 = vmatpush1.bf16.msra.mxu0 %v3460_v44  ;;  %3240 = vmatpush1.bf16.msra.mxu1 %v3655_v6  ;;  %v3895_v6 = vld [vmem:[%s3699_s20 + $0xc0] sm:$0xff]  ;;  %v254_v44 = vld [vmem:[%s3699_s20 + $0xb8] sm:$0xff] }
  0x42   : > { %1806 = vmatprep.subr.bf16.mxu0 %v3585_v1  ;;  %3229 = vmatprep.subr.bf16.mxu1 %v3585_v1  ;;  %v3931_v17 = vcombine.low %v3895_v6, %v3898_v7  ;;  %v4013_v53 = vcombine.high %v253_v39, %v254_v44 }
  0x45   : > { %1807 = vmatpush1.bf16.msra.mxu0 %v3465_v47  ;;  %3241 = vmatpush1.bf16.msra.mxu1 %v3667_v8  ;;  %v3905_v8 = vcombine.high %v3895_v6, %v3898_v7  ;;  %v2754_v47 = vcombine.high %v254_v44, %v3895_v6 }
  0x46   : > { %1808 = vmatprep.subr.bf16.mxu0 %v3585_v1  ;;  %3230 = vmatprep.subr.bf16.mxu1 %v3585_v1 }
  0x47   : > { %741 = vmatmul.mubr.bf16.gmra.mrb[8].mxu1 %v2737_v48  ;;  %1191 = vmatmul.mubr.bf16.gmra.mrb[8].mxu0 %v2821_v49  ;;  %v4002_v48 = vcombine.high %v251_v33, %v252_v38  ;;  %v2753_v49 = vcombine.low %v254_v44, %v3895_v6 }
  0x48   : > { %2796 = vmatprep.mubr.msk.bf16.mxu1 %vm619_vm0, %v2740_v50  ;;  %2880 = vmatprep.mubr.msk.bf16.mxu0 %vm619_vm0, %v3832_v51  ;;  %v4009_v50 = vcombine.low %v251_v33, %v252_v38  ;;  %v4166_v38 = vld [vmem:[%s3699_s20 + $0x190] sm:$0xff] }
  0x49   : > { %1809 = vmatpush1.bf16.msra.mxu0 %v3470_v52  ;;  %3242 = vmatpush1.bf16.msra.mxu1 %v3681_v10  ;;  %v247_v10 = vld [vmem:[%s3699_s20 + $0x80] sm:$0xff]  ;;  %v2756_v52 = vcombine.high %v3898_v7, %v3934_v18 }
  0x4a   : > { %1810 = vmatprep.subr.bf16.mxu0 %v3585_v1  ;;  %3231 = vmatprep.subr.bf16.mxu1 %v3585_v1  ;;  %v3980_v36 = vcombine.high %v247_v10, %v248_v21  ;;  %v3990_v41 = vcombine.low %v247_v10, %v248_v21 }
  0x4d   : > { %1811 = vmatpush1.bf16.msra.mxu0 %v3475_v55  ;;  %3243 = vmatpush1.bf16.msra.mxu1 %v3693_v12  ;;  %v2743_v12 = vcombine.low %v244_v61, %v3873_v62  ;;  %v4021_v55 = vcombine.low %v253_v39, %v254_v44  ;;  %v4038_v62 = vld [vmem:[%s3699_s20 + $0xf8] sm:$0xff] }
  0x4e   : > { %1812 = vmatprep.subr.bf16.mxu0 %v3585_v1  ;;  %3232 = vmatprep.subr.bf16.mxu1 %v3585_v1 }
  0x4f   : > { %749 = vmatmul.mubr.bf16.gmra.mrb[12].mxu1 %v2739_v56  ;;  %1199 = vmatmul.mubr.bf16.gmra.mrb[12].mxu0 %v3855_v57 }
  0x50   : > { %2797 = vmatprep.mubr.msk.bf16.mxu1 %vm619_vm0, %v2742_v58  ;;  %2881 = vmatprep.mubr.msk.bf16.mxu0 %vm619_vm0, %v3859_v59  ;;  %v4029_v58 = vld [vmem:[%s3699_s20 + $0xf0] sm:$0xff] }
  0x51   : > { %1813 = vmatpush1.bf16.msra.mxu0 %v3480_v60  ;;  %3244 = vmatpush1.bf16.msra.mxu1 %v3709_v14  ;;  %v2746_v14 = vcombine.high %v246_v9, %v247_v10  ;;  %v2760_v61 = vcombine.high %v260_v31, %v4029_v58 }
  0x52   : > { %1814 = vmatprep.subr.bf16.mxu0 %v3585_v1  ;;  %3233 = vmatprep.subr.bf16.mxu1 %v3585_v1 }
  0x55   : > { %1815 = vmatpush1.bf16.msra.mxu0 %v3485_v63  ;;  %3245 = vmatpush1.bf16.msra.mxu1 %v3729_v20  ;;  %v3944_v20 = vcombine.high %v3934_v18, %v3937_v19  ;;  %v2759_v63 = vcombine.low %v260_v31, %v4029_v58  ;;  %v4107_v18 = vld [vmem:[%s3699_s20 + $0x148] sm:$0xff] }
  0x56   : > { %1816 = vmatprep.subr.bf16.mxu0 %v3585_v1  ;;  %3234 = vmatprep.subr.bf16.mxu1 %v3585_v1 }
  0x57   : > { %757 = vmatmul.mubr.bf16.gmra.mrb[16].mxu1 %v2741_v0  ;;  %1207 = vmatmul.mubr.bf16.gmra.mrb[16].mxu0 %v3883_v2 }
  0x58   : > { %2798 = vmatprep.mubr.msk.bf16.mxu1 %vm619_vm0, %v2744_v3  ;;  %2882 = vmatprep.mubr.msk.bf16.mxu0 %vm619_vm0, %v3887_v4 }
  0x59   : > { %1817 = vmatpush1.bf16.msra.mxu0 %v3490_v5  ;;  %3246 = vmatpush1.bf16.msra.mxu1 %v3742_v22  ;;  %v249_v22 = vld [vmem:[%s3699_s20 + $0x90] sm:$0xff] }
  0x5a   : > { %1818 = vmatprep.subr.bf16.mxu0 %v3585_v1  ;;  %3235 = vmatprep.subr.bf16.mxu1 %v3585_v1  ;;  %v2748_v27 = vcombine.high %v248_v21, %v249_v22  ;;  %v2747_v34 = vcombine.low %v248_v21, %v249_v22  ;;  %v3992_v43 = vcombine.high %v249_v22, %v250_v32 }
  0x5b   : > { %v3999_v46 = vcombine.low %v249_v22, %v250_v32 }
  0x5d   : > { %1819 = vmatpush1.bf16.msra.mxu0 %v3495_v11  ;;  %3247 = vmatpush1.bf16.msra.mxu1 %v3753_v24  ;;  %v2745_v24 = vcombine.low %v246_v9, %v247_v10  ;;  %v4079_v9 = vld [vmem:[%s3699_s20 + $0x128] sm:$0xff]  ;;  %v4082_v10 = vld [vmem:[%s3699_s20 + $0x130] sm:$0xff] }
  0x5e   : > { %1820 = vmatprep.subr.bf16.mxu0 %v3585_v1  ;;  %3236 = vmatprep.subr.bf16.mxu1 %v3585_v1 }
  0x5f   : > { %765 = vmatmul.mubr.bf16.gmra.mrb[20].mxu1 %v2743_v12  ;;  %1215 = vmatmul.mubr.bf16.gmra.mrb[20].mxu0 %v3919_v13  ;;  %v2768_v12 = vcombine.high %v4079_v9, %v4082_v10 }
  0x60   : > { %2799 = vmatprep.mubr.msk.bf16.mxu1 %vm619_vm0, %v2746_v14  ;;  %2883 = vmatprep.mubr.msk.bf16.mxu0 %vm619_vm0, %v3922_v15  ;;  %v4096_v14 = vld [vmem:[%s3699_s20 + $0x140] sm:$0xff] }
  0x61   : > { %1821 = vmatpush1.bf16.msra.mxu0 %v3500_v16  ;;  %3248 = vmatpush1.bf16.msra.mxu1 %v3764_v26  ;;  %v259_v26 = vld [vmem:[%s3699_s20 + $0xe0] sm:$0xff] }
  0x62   : > { %1822 = vmatprep.subr.bf16.mxu0 %v3585_v1  ;;  %3237 = vmatprep.subr.bf16.mxu1 %v3585_v1  ;;  %v3971_v1 = vcombine.high %v259_v26, %v260_v31  ;;  %v3982_v37 = vcombine.low %v259_v26, %v260_v31  ;;  %v2758_v56 = vcombine.high %v3937_v19, %v259_v26 }
  0x63   : > { %v2757_v60 = vcombine.low %v3937_v19, %v259_v26  ;;  %v4110_v19 = vld [vmem:[%s3699_s20 + $0x150] sm:$0xff] }
  0x64   : > { %v2772_v22 = vcombine.high %v4107_v18, %v4110_v19  ;;  %v4138_v26 = vld [vmem:[%s3699_s20 + $0x170] sm:$0xff] }
  0x65   : > { %1823 = vmatpush1.bf16.msra.mxu0 %v3505_v23  ;;  %3249 = vmatpush1.bf16.msra.mxu1 %v3775_v28  ;;  %v2750_v28 = vcombine.high %v250_v32, %v251_v33  ;;  %v4121_v23 = vld [vmem:[%s3699_s20 + $0x158] sm:$0xff] }
  0x66   : > { %v4149_v33 = vld [vmem:[%s3699_s20 + $0x178] sm:$0xff] }
  0x67   : > { %773 = vmatmul.mubr.bf16.gmra.mrb[24].mxu1 %v2745_v24  ;;  %1223 = vmatmul.mubr.bf16.gmra.mrb[24].mxu0 %v3957_v25  ;;  %v4124_v24 = vld [vmem:[%s3699_s20 + $0x160] sm:$0xff] }
  0x68   : > { %2800 = vmatprep.mubr.msk.bf16.mxu1 %vm619_vm0, %v2748_v27  ;;  %2884 = vmatprep.mubr.msk.bf16.mxu0 %vm619_vm0, %v3960_v29  ;;  %v2774_v27 = vcombine.high %v4121_v23, %v4124_v24  ;;  %v2773_v31 = vcombine.low %v4121_v23, %v4124_v24 }
  0x6f   : > { %781 = vmatmul.mubr.bf16.gmra.mrb[28].mxu1 %v2747_v34  ;;  %1231 = vmatmul.mubr.bf16.gmra.mrb[28].mxu0 %v3978_v35  ;;  %v4152_v34 = vld [vmem:[%s3699_s20 + $0x180] sm:$0xff] }
  0x70   : > { %2801 = vmatprep.mubr.msk.bf16.mxu1 %vm619_vm0, %v2750_v28  ;;  %2885 = vmatprep.mubr.msk.bf16.mxu0 %vm619_vm0, %v3980_v36  ;;  %v2778_v28 = vcombine.high %v4149_v33, %v4152_v34  ;;  %v2777_v39 = vcombine.low %v4149_v33, %v4152_v34 }
  0x77   : > { %789 = vmatmul.mubr.bf16.gmra.mrb[32].mxu1 %v2749_v40  ;;  %1239 = vmatmul.mubr.bf16.gmra.mrb[32].mxu0 %v3990_v41 }
  0x78   : > { %2802 = vmatprep.mubr.msk.bf16.mxu1 %vm619_vm0, %v2752_v42  ;;  %2886 = vmatprep.mubr.msk.bf16.mxu0 %vm619_vm0, %v3992_v43  ;;  %v2950_v42 = vcombine.high %v4029_v58, %v4038_v62 }
  0x7f   : > { %797 = vmatmul.mubr.bf16.gmra.mrb[36].mxu1 %v2751_v45  ;;  %1247 = vmatmul.mubr.bf16.gmra.mrb[36].mxu0 %v3999_v46 }
  0x80   : > { %2803 = vmatprep.mubr.msk.bf16.mxu1 %vm619_vm0, %v2754_v47  ;;  %2887 = vmatprep.mubr.msk.bf16.mxu0 %vm619_vm0, %v4002_v48 }
  0x87   : > { %805 = vmatmul.mubr.bf16.gmra.mrb[40].mxu1 %v2753_v49  ;;  %1255 = vmatmul.mubr.bf16.gmra.mrb[40].mxu0 %v4009_v50 }
  0x88   : > { %2804 = vmatprep.mubr.msk.bf16.mxu1 %vm619_vm0, %v2756_v52  ;;  %2888 = vmatprep.mubr.msk.bf16.mxu0 %vm619_vm0, %v4013_v53 }
  0x8f   : > { %813 = vmatmul.mubr.bf16.gmra.mrb[44].mxu1 %v2755_v54  ;;  %1263 = vmatmul.mubr.bf16.gmra.mrb[44].mxu0 %v4021_v55 }
  0x90   : > { %2805 = vmatprep.mubr.msk.bf16.mxu1 %vm619_vm0, %v2758_v56  ;;  %2985 = vmatprep.mubr.msk.bf16.mxu0 %vm619_vm0, %v3832_v51  ;;  %v4041_v51 = vld [vmem:[%s3699_s20 + $0x100] sm:$0xff] }
  0x91   : > { %v2762_v0 = vcombine.high %v4038_v62, %v4041_v51  ;;  %v2761_v3 = vcombine.low %v4038_v62, %v4041_v51 }
  0x97   : > { %821 = vmatmul.mubr.bf16.gmra.mrb[48].mxu1 %v2757_v60  ;;  %1833 = vmatmul.mubr.bf16.vlgmr.msra.gmra.mrb[0].mxu0 %v3855_v57  ;;  %v4051_v57 = vld [vmem:[%s3699_s20 + $0x108] sm:$0xff] }
  0x98   : > { %2806 = vmatprep.mubr.msk.bf16.mxu1 %vm619_vm0, %v2760_v61  ;;  %2986 = vmatprep.mubr.msk.bf16.mxu0 %vm619_vm0, %v3859_v59  ;;  %v4054_v59 = vld [vmem:[%s3699_s20 + $0x110] sm:$0xff]  ;;  %v2952_v44 = vcombine.high %v4041_v51, %v4051_v57  ;;  %v2951_v45 = vcombine.low %v4041_v51, %v4051_v57  ;;  %v2959_v61 = vcombine.low %v4096_v14, %v4107_v18 }
  0x99   : > { %v2764_v5 = vcombine.high %v4051_v57, %v4054_v59  ;;  %v2763_v6 = vcombine.low %v4051_v57, %v4054_v59  ;;  %v2962_v51 = vcombine.high %v4110_v19, %v4121_v23 }
  0x9f   : > { %829 = vmatmul.mubr.bf16.gmra.mrb[52].mxu1 %v2759_v63  ;;  %1841 = vmatmul.mubr.bf16.gmra.mrb[4].mxu0 %v3883_v2  ;;  %v4065_v2 = vld [vmem:[%s3699_s20 + $0x118] sm:$0xff] }
  0xa0   : > { %2807 = vmatprep.mubr.msk.bf16.mxu1 %vm619_vm0, %v2762_v0  ;;  %2987 = vmatprep.mubr.msk.bf16.mxu0 %vm619_vm0, %v3887_v4  ;;  %v4068_v4 = vld [vmem:[%s3699_s20 + $0x120] sm:$0xff] }
  0xa1   : > { %v2766_v7 = vcombine.high %v4065_v2, %v4068_v4  ;;  %v2765_v11 = vcombine.low %v4065_v2, %v4068_v4 }
  0xa7   : > { %837 = vmatmul.mubr.bf16.gmra.mrb[56].mxu1 %v2761_v3  ;;  %1849 = vmatmul.mubr.bf16.gmra.mrb[8].mxu0 %v3919_v13  ;;  %v4093_v13 = vld [vmem:[%s3699_s20 + $0x138] sm:$0xff] }
  0xa8   : > { %2808 = vmatprep.mubr.msk.bf16.mxu1 %vm619_vm0, %v2764_v5  ;;  %2988 = vmatprep.mubr.msk.bf16.mxu0 %vm619_vm0, %v3922_v15  ;;  %v2767_v15 = vcombine.low %v4079_v9, %v4082_v10  ;;  %v2770_v16 = vcombine.high %v4093_v13, %v4096_v14  ;;  %v2769_v21 = vcombine.low %v4093_v13, %v4096_v14 }
  0xa9   : > { %v2958_v49 = vcombine.high %v4082_v10, %v4093_v13 }
  0xaf   : > { %845 = vmatmul.mubr.bf16.gmra.mrb[60].mxu1 %v2763_v6  ;;  %1857 = vmatmul.mubr.bf16.gmra.mrb[12].mxu0 %v3957_v25  ;;  %v2771_v25 = vcombine.low %v4107_v18, %v4110_v19 }
  0xb0   : > { %2809 = vmatprep.mubr.msk.bf16.mxu1 %vm619_vm0, %v2766_v7  ;;  %2989 = vmatprep.mubr.msk.bf16.mxu0 %vm619_vm0, %v3960_v29  ;;  %v4135_v29 = vld [vmem:[%s3699_s20 + $0x168] sm:$0xff] }
  0xb1   : > { %v2776_v32 = vcombine.high %v4135_v29, %v4138_v26  ;;  %v2964_v5 = vcombine.high %v4124_v24, %v4135_v29  ;;  %v2963_v7 = vcombine.low %v4124_v24, %v4135_v29 }
  0xb7   : > { %853 = vmatmul.mubr.bf16.gmra.mrb[64].mxu1 %v2765_v11  ;;  %1865 = vmatmul.mubr.bf16.gmra.mrb[16].mxu0 %v3978_v35  ;;  %v2775_v35 = vcombine.low %v4135_v29, %v4138_v26 }
  0xb8   : > { %2810 = vmatprep.mubr.msk.bf16.mxu1 %vm619_vm0, %v2768_v12  ;;  %2990 = vmatprep.mubr.msk.bf16.mxu0 %vm619_vm0, %v3980_v36  ;;  %v4163_v36 = vld [vmem:[%s3699_s20 + $0x188] sm:$0xff] }
  0xb9   : > { %v2780_v40 = vcombine.high %v4163_v36, %v4166_v38 }
  0xbf   : > { %861 = vmatmul.mubr.bf16.gmra.mrb[68].mxu1 %v2767_v15  ;;  %1873 = vmatmul.mubr.bf16.gmra.mrb[20].mxu0 %v3990_v41  ;;  %v2779_v41 = vcombine.low %v4163_v36, %v4166_v38 }
  0xc0   : > { %2811 = vmatprep.mubr.msk.bf16.mxu1 %vm619_vm0, %v2770_v16  ;;  %2991 = vmatprep.mubr.msk.bf16.mxu0 %vm619_vm0, %v3992_v43  ;;  %v2949_v43 = vcombine.low %v4029_v58, %v4038_v62  ;;  %v2968_v16 = vcombine.high %v4152_v34, %v4163_v36 }
  0xc7   : > { %869 = vmatmul.mubr.bf16.gmra.mrb[72].mxu1 %v2769_v21  ;;  %1881 = vmatmul.mubr.bf16.gmra.mrb[24].mxu0 %v3999_v46 }
  0xc8   : > { %2812 = vmatprep.mubr.msk.bf16.mxu1 %vm619_vm0, %v2772_v22  ;;  %2992 = vmatprep.mubr.msk.bf16.mxu0 %vm619_vm0, %v4002_v48 }
  0xcf   : > { %877 = vmatmul.mubr.bf16.gmra.mrb[76].mxu1 %v2771_v25  ;;  %1889 = vmatmul.mubr.bf16.gmra.mrb[28].mxu0 %v4009_v50 }
  0xd0   : > { %2813 = vmatprep.mubr.msk.bf16.mxu1 %vm619_vm0, %v2774_v27  ;;  %2993 = vmatprep.mubr.msk.bf16.mxu0 %vm619_vm0, %v4013_v53  ;;  %v2957_v53 = vcombine.low %v4082_v10, %v4093_v13  ;;  %v2966_v10 = vcombine.high %v4138_v26, %v4149_v33 }
  0xd7   : > { %885 = vmatmul.mubr.bf16.gmra.mrb[80].mxu1 %v2773_v31  ;;  %1897 = vmatmul.mubr.bf16.gmra.mrb[32].mxu0 %v4021_v55  ;;  %v2960_v55 = vcombine.high %v4096_v14, %v4107_v18  ;;  %v2965_v14 = vcombine.low %v4138_v26, %v4149_v33  ;;  %v3558_v33 = vld [vmem:[%s3699_s20 + $0x1a4] ss:$8 sps:$4 sm:$0xff]  }
  0xd8   : > { %2814 = vmatprep.mubr.msk.bf16.mxu1 %vm619_vm0, %v2776_v32  ;;  %2994 = vmatprep.mubr.msk.bf16.mxu0 %vm619_vm0, %v3905_v8 }
  0xdf   : > { %893 = vmatmul.mubr.bf16.gmra.mrb[84].mxu1 %v2775_v35  ;;  %1905 = vmatmul.mubr.bf16.gmra.mrb[36].mxu0 %v3931_v17 }
  0xe0   : > { %2815 = vmatprep.mubr.msk.bf16.mxu1 %vm619_vm0, %v2778_v28  ;;  %2995 = vmatprep.mubr.msk.bf16.mxu0 %vm619_vm0, %v3944_v20 }
  0xe7   : > { %901 = vmatmul.mubr.bf16.gmra.mrb[88].mxu1 %v2777_v39  ;;  %1913 = vmatmul.mubr.bf16.gmra.mrb[40].mxu0 %v3964_v30 }
  0xe8   : > { %2816 = vmatprep.mubr.msk.bf16.mxu1 %vm619_vm0, %v2780_v40  ;;  %2996 = vmatprep.mubr.msk.bf16.mxu0 %vm619_vm0, %v3971_v1 }
  0xef   : > { %909 = vmatmul.mubr.bf16.gmra.mrb[92].mxu1 %v2779_v41  ;;  %1921 = vmatmul.mubr.bf16.gmra.mrb[44].mxu0 %v3982_v37 }
  0xf0   : > { %2889 = vmatprep.mubr.msk.bf16.mxu1 %vm619_vm0, %v3905_v8  ;;  %2997 = vmatprep.mubr.msk.bf16.mxu0 %vm619_vm0, %v2950_v42  ;;  %v2954_v8 = vcombine.high %v4054_v59, %v4065_v2 }
  0xf7   : > { %1271 = vmatmul.mubr.bf16.vlgmr.msra.gmra.mrb[48].mxu1 %v3931_v17  ;;  %1929 = vmatmul.mubr.bf16.gmra.mrb[48].mxu0 %v2949_v43  ;;  %v2953_v17 = vcombine.low %v4054_v59, %v4065_v2  ;;  %v2961_v59 = vcombine.low %v4110_v19, %v4121_v23  ;;  %v1412_v19 = vld [vmem:[%s3699_s20 + $0x198] sm:$0xff]  ;;  %v2967_v23 = vcombine.low %v4152_v34, %v4163_v36  ;;  %v3560_v36 = vld [vmem:[%s3699_s20 + $0x1a0] ss:$8 sps:$4 sm:$0xff]  }
  0xf8   : > { %2890 = vmatprep.mubr.msk.bf16.mxu1 %vm619_vm0, %v3944_v20  ;;  %2998 = vmatprep.mubr.msk.bf16.mxu0 %vm619_vm0, %v2952_v44  ;;  %v2956_v20 = vcombine.high %v4068_v4, %v4079_v9  ;;  %v2970_v25 = vcombine.high %v4166_v38, %v1412_v19  ;;  %v2969_v31 = vcombine.low %v4166_v38, %v1412_v19 }
  0xff   : > { %1279 = vmatmul.mubr.bf16.gmra.mrb[52].mxu1 %v3964_v30  ;;  %1937 = vmatmul.mubr.bf16.gmra.mrb[52].mxu0 %v2951_v45 }
 0x100   : > { %2891 = vmatprep.mubr.msk.bf16.mxu1 %vm619_vm0, %v3971_v1  ;;  %2999 = vmatprep.mubr.msk.bf16.mxu0 %vm619_vm0, %v2954_v8  ;;  %v2955_v1 = vcombine.low %v4068_v4, %v4079_v9 }
 0x107   : > { %1287 = vmatmul.mubr.bf16.gmra.mrb[56].mxu1 %v3982_v37  ;;  %1945 = vmatmul.mubr.bf16.gmra.mrb[56].mxu0 %v2953_v17 }
 0x108   : > { %2892 = vmatprep.mubr.msk.bf16.mxu1 %vm619_vm0, %v2950_v42  ;;  %3000 = vmatprep.mubr.msk.bf16.mxu0 %vm619_vm0, %v2956_v20 }
 0x10a   : > { %v4207_v30 = vpop.f32.mrb[0].mxu1 }
 0x10b   : > { %v728_v46 = vpop.f32.mrb[1].mxu1 }
 0x10c   : > { %v4209_v47 = vpop.f32.mrb[2].mxu1 }
 0x10d   : > { %v731_v48 = vpop.f32.mrb[3].mxu1 }
 0x10e   : > { %v3108_v48 = vld [vmem:[%s4306_s27] sm:$0xff]  }
 0x10f   : > { %1295 = vmatmul.mubr.bf16.gmra.mrb[60].mxu1 %v2949_v43  ;;  %1953 = vmatmul.mubr.bf16.gmra.mrb[60].mxu0 %v2955_v1 }
 0x110   : > { %2893 = vmatprep.mubr.msk.bf16.mxu1 %vm619_vm0, %v2952_v44  ;;  %3001 = vmatprep.mubr.msk.bf16.mxu0 %vm619_vm0, %v2958_v49 }
 0x112   : > { %v4217_v37 = vpop.f32.mrb[4].mxu1 }
 0x113   : > { %v736_v50 = vpop.f32.mrb[5].mxu1 }
 0x114   : > { %v4219_v52 = vpop.f32.mrb[6].mxu1 }
 0x115   : > { %v739_v54 = vpop.f32.mrb[7].mxu1 }
 0x116   : > { %v3109_v54 = vunpack.c.l.bf16 %v3108_v48 }
 0x117   : > { %1303 = vmatmul.mubr.bf16.gmra.mrb[64].mxu1 %v2951_v45  ;;  %1961 = vmatmul.mubr.bf16.gmra.mrb[64].mxu0 %v2957_v53 }
 0x118   : > { %2894 = vmatprep.mubr.msk.bf16.mxu1 %vm619_vm0, %v2954_v8  ;;  %3002 = vmatprep.mubr.msk.bf16.mxu0 %vm619_vm0, %v2960_v55 }
 0x11a   : > { %v4227_v56 = vpop.f32.mrb[8].mxu1 }
 0x11b   : > { %v744_v58 = vpop.f32.mrb[9].mxu1 }
 0x11c   : > { %v4229_v60 = vpop.f32.mrb[10].mxu1 }
 0x11d   : > { %v747_v62 = vpop.f32.mrb[11].mxu1 }
 0x11f   : > { %1311 = vmatmul.mubr.bf16.gmra.mrb[68].mxu1 %v2953_v17  ;;  %1969 = vmatmul.mubr.bf16.gmra.mrb[68].mxu0 %v2959_v61 }
 0x120   : > { %2895 = vmatprep.mubr.msk.bf16.mxu1 %vm619_vm0, %v2956_v20  ;;  %3003 = vmatprep.mubr.msk.bf16.mxu0 %vm619_vm0, %v2962_v51 }
 0x122   : > { %v4237_v63 = vpop.f32.mrb[12].mxu1 }
 0x123   : > { %v752_v0 = vpop.f32.mrb[13].mxu1 }
 0x124   : > { %v4239_v57 = vpop.f32.mrb[14].mxu1 }
 0x125   : > { %v755_v3 = vpop.f32.mrb[15].mxu1 }
 0x127   : > { %1319 = vmatmul.mubr.bf16.gmra.mrb[72].mxu1 %v2955_v1  ;;  %1977 = vmatmul.mubr.bf16.gmra.mrb[72].mxu0 %v2961_v59 }
 0x128   : > { %2896 = vmatprep.mubr.msk.bf16.mxu1 %vm619_vm0, %v2958_v49  ;;  %3004 = vmatprep.mubr.msk.bf16.mxu0 %vm619_vm0, %v2964_v5 }
 0x12a   : > { %v4247_v2 = vpop.f32.mrb[16].mxu1 }
 0x12b   : > { %v760_v4 = vpop.f32.mrb[17].mxu1 }
 0x12c   : > { %v4249_v6 = vpop.f32.mrb[18].mxu1 }
 0x12d   : > { %v763_v9 = vpop.f32.mrb[19].mxu1 }
 0x12f   : > { %1327 = vmatmul.mubr.bf16.gmra.mrb[76].mxu1 %v2957_v53  ;;  %1985 = vmatmul.mubr.bf16.gmra.mrb[76].mxu0 %v2963_v7 }
 0x130   : > { %2897 = vmatprep.mubr.msk.bf16.mxu1 %vm619_vm0, %v2960_v55  ;;  %3005 = vmatprep.mubr.msk.bf16.mxu0 %vm619_vm0, %v2966_v10 }
 0x132   : > { %v4257_v11 = vpop.f32.mrb[20].mxu1 }
 0x133   : > { %v768_v12 = vpop.f32.mrb[21].mxu1 }
 0x134   : > { %v4259_v13 = vpop.f32.mrb[22].mxu1 }
 0x135   : > { %v771_v15 = vpop.f32.mrb[23].mxu1 }
 0x137   : > { %1335 = vmatmul.mubr.bf16.gmra.mrb[80].mxu1 %v2959_v61  ;;  %1993 = vmatmul.mubr.bf16.gmra.mrb[80].mxu0 %v2965_v14 }
 0x138   : > { %2898 = vmatprep.mubr.msk.bf16.mxu1 %vm619_vm0, %v2962_v51  ;;  %3006 = vmatprep.mubr.msk.bf16.mxu0 %vm619_vm0, %v2968_v16  ;;  %v3110_v51 = vunpack.c.h.bf16 %v3108_v48 }
 0x13a   : > { %v4267_v18 = vpop.f32.mrb[24].mxu1 }
 0x13b   : > { %v776_v21 = vpop.f32.mrb[25].mxu1 }
 0x13c   : > { %v4270_v22 = vpop.f32.mrb[26].mxu1 }
 0x13d   : > { %v779_v24 = vpop.f32.mrb[27].mxu1 }
 0x13f   : > { %1343 = vmatmul.mubr.bf16.gmra.mrb[84].mxu1 %v2961_v59  ;;  %2001 = vmatmul.mubr.bf16.gmra.mrb[84].mxu0 %v2967_v23 }
 0x140   : > { %2899 = vmatprep.mubr.msk.bf16.mxu1 %vm619_vm0, %v2964_v5  ;;  %3007 = vmatprep.mubr.msk.bf16.mxu0 %vm619_vm0, %v2970_v25  ;;  %v3203_v5 = vld [vmem:[%s4306_s27 + $0x8] sm:$0xff]  }
 0x141   : > { %v3114_v23 = vunpack.c.h.bf16 %v3203_v5 }
 0x142   : > { %v4277_v27 = vpop.f32.mrb[28].mxu1 }
 0x143   : > { %v784_v29 = vpop.f32.mrb[29].mxu1 }
 0x144   : > { %v4279_v26 = vpop.f32.mrb[30].mxu1 }
 0x145   : > { %v787_v32 = vpop.f32.mrb[31].mxu1 }
 0x147   : > { %1351 = vmatmul.mubr.bf16.gmra.mrb[88].mxu1 %v2963_v7  ;;  %2009 = vmatmul.mubr.bf16.gmra.mrb[88].mxu0 %v2969_v31  ;;  %v3204_v31 = vld [vmem:[%s4306_s27 + $0x10] sm:$0xff]  }
 0x148   : > { %2900 = vmatprep.mubr.msk.bf16.mxu1 %vm619_vm0, %v2966_v10  ;;  %3008 = vmatprep.mubr.msk.bf16.mxu0 %vm619_vm0, %v3558_v33 }
 0x14a   : > { %v4285_v34 = vpop.f32.mrb[32].mxu1 }
 0x14b   : > { %v792_v35 = vpop.f32.mrb[33].mxu1 }
 0x14c   : > { %v4287_v28 = vpop.f32.mrb[34].mxu1 }
 0x14d   : > { %v795_v39 = vpop.f32.mrb[35].mxu1 }
 0x14f   : > { %1359 = vmatmul.mubr.bf16.gmra.mrb[92].mxu1 %v2965_v14  ;;  %2017 = vmatmul.mubr.bf16.gmra.mrb[92].mxu0 %v3560_v36  ;;  %v3113_v14 = vunpack.c.l.bf16 %v3203_v5 }
 0x152   : > { %v4290_v40 = vpop.f32.mrb[36].mxu1 }
 0x153   : > { %v800_v38 = vpop.f32.mrb[37].mxu1 }
 0x154   : > { %v4292_v41 = vpop.f32.mrb[38].mxu1  ;;  %v3117_v38 = vunpack.c.l.bf16 %v3204_v31 }
 0x155   : > { %v803_v42 = vpop.f32.mrb[39].mxu1 }
 0x15a   : > { %v4294_v43 = vpop.f32.mrb[40].mxu1 }
 0x15b   : > { %v808_v44 = vpop.f32.mrb[41].mxu1 }
 0x15c   : > { %v4296_v45 = vpop.f32.mrb[42].mxu1 }
 0x15d   : > { %v811_v8 = vpop.f32.mrb[43].mxu1 }
 0x162   : > { %v4298_v17 = vpop.f32.mrb[44].mxu1 }
 0x163   : > { %v816_v20 = vpop.f32.mrb[45].mxu1 }
 0x164   : > { %v4301_v46 = vpop.f32.mrb[46].mxu1 }
 0x165   : > { %v819_v1 = vpop.f32.mrb[47].mxu1 }
 0x166   : > { %v3118_v1 = vunpack.c.h.bf16 %v3204_v31 }
 0x16a   : > { %v1834_v49 = vpop.f32.mrb[0].mxu0 }
 0x16b   : > { %v3250_v50 = vadd.f32 %v1834_v49, %v4207_v30  ;;  %v1836_v53 = vpop.f32.mrb[1].mxu0 }
 0x16c   : > { %v1837_v55 = vpop.f32.mrb[2].mxu0  ;;  %v3205_v53 = vld [vmem:[%s4306_s27 + $0x18] sm:$0xff]  }
 0x16d   : > { %vm2073_vm1 = vcmp.ge.f32.partialorder %v3250_v50, 0.0  ;;  %v2121_v58 = vmul.f32 0.2, %v3250_v50  ;;  %v3251_v61 = vadd.f32 %v1837_v55, %v4209_v47  ;;  %v1839_v62 = vpop.f32.mrb[3].mxu0  ;;  %v3122_v5 = vunpack.c.h.bf16 %v3205_v53 }
 0x16f   : > { %v2169_v0 = vsel %vm2073_vm1, %v3250_v50, %v2121_v58  ;;  %vm2074_vm2 = vcmp.ge.f32.partialorder %v3251_v61, 0.0  ;;  %v2122_v59 = vmul.f32 0.2, %v3251_v61 }
 0x170   : > { %v2313_v3 = vadd.f32 %v3109_v54, %v2169_v0 }
 0x171   : > { %v2170_v30 = vsel %vm2074_vm2, %v3251_v61, %v2122_v59 }
 0x172   : > { %v3059_v4 = vpack.c.bf16 %v2313_v3, %v2313_v3  ;;  %v2314_v7 = vadd.f32 %v3110_v51, %v2170_v30  ;;  %v1842_v9 = vpop.f32.mrb[4].mxu0  ;;  %v3121_v51 = vunpack.c.l.bf16 %v3205_v53  ;;  %v3208_v53 = vld [vmem:[%s4306_s27 + $0x30] sm:$0xff]  }
 0x173   : > { %v3252_v47 = vadd.f32 %v1842_v9, %v4217_v37  ;;  %v1844_v10 = vpop.f32.mrb[5].mxu0 }
 0x174   : > { %2554 = vst.msk [vmem:[%s4314_s29] sm:$0xf] %vm2553_vm3, %v3059_v4  ;;  %v3060_v12 = vpack.c.bf16 %v2314_v7, %v2314_v7  ;;  %v1845_v15 = vpop.f32.mrb[6].mxu0 }
 0x175   : > { %vm2075_vm4 = vcmp.ge.f32.partialorder %v3252_v47, 0.0  ;;  %v2123_v16 = vmul.f32 0.2, %v3252_v47  ;;  %v3253_v19 = vadd.f32 %v1845_v15, %v4219_v52  ;;  %v1847_v21 = vpop.f32.mrb[7].mxu0 }
 0x176   : > { %2555 = vst.msk [vmem:[%s4314_s29 + $0x4] sm:$0xf] %vm2553_vm3, %v3060_v12 }
 0x177   : > { %v2171_v24 = vsel %vm2075_vm4, %v3252_v47, %v2123_v16  ;;  %vm2076_vm5 = vcmp.ge.f32.partialorder %v3253_v19, 0.0  ;;  %v2124_v25 = vmul.f32 0.2, %v3253_v19  ;;  %v3206_v47 = vld [vmem:[%s4306_s27 + $0x20] sm:$0xff]  }
 0x178   : > { %v2315_v37 = vadd.f32 %v3113_v14, %v2171_v24 }
 0x179   : > { %v2172_v29 = vsel %vm2076_vm5, %v3253_v19, %v2124_v25  ;;  %v3125_v19 = vunpack.c.l.bf16 %v3206_v47 }
 0x17a   : > { %v3061_v32 = vpack.c.bf16 %v2315_v37, %v2315_v37  ;;  %v2316_v33 = vadd.f32 %v3114_v23, %v2172_v29  ;;  %v1850_v35 = vpop.f32.mrb[8].mxu0  ;;  %v3126_v37 = vunpack.c.h.bf16 %v3206_v47 }
 0x17b   : > { %v3254_v36 = vadd.f32 %v1850_v35, %v4227_v56  ;;  %v1852_v39 = vpop.f32.mrb[9].mxu0 }
 0x17c   : > { %2556 = vst.msk [vmem:[%s4314_s29 + $0x8] sm:$0xf] %vm2553_vm3, %v3061_v32  ;;  %v3062_v52 = vpack.c.bf16 %v2316_v33, %v2316_v33  ;;  %v1853_v42 = vpop.f32.mrb[10].mxu0  ;;  %v3207_v33 = vld [vmem:[%s4306_s27 + $0x28] sm:$0xff]  }
 0x17d   : > { %vm2077_vm6 = vcmp.ge.f32.partialorder %v3254_v36, 0.0  ;;  %v2125_v44 = vmul.f32 0.2, %v3254_v36  ;;  %v3255_v8 = vadd.f32 %v1853_v42, %v4229_v60  ;;  %v1855_v20 = vpop.f32.mrb[11].mxu0  ;;  %v3129_v42 = vunpack.c.l.bf16 %v3207_v33 }
 0x17e   : > { %2557 = vst.msk [vmem:[%s4314_s29 + $0xc] sm:$0xf] %vm2553_vm3, %v3062_v52 }
 0x17f   : > { %v2173_v48 = vsel %vm2077_vm6, %v3254_v36, %v2125_v44  ;;  %vm2078_vm7 = vcmp.ge.f32.partialorder %v3255_v8, 0.0  ;;  %v2126_v49 = vmul.f32 0.2, %v3255_v8 }
 0x180   : > { %v2317_v56 = vadd.f32 %v3117_v38, %v2173_v48  ;;  %v3130_v48 = vunpack.c.h.bf16 %v3207_v33 }
 0x181   : > { %v2174_v50 = vsel %vm2078_vm7, %v3255_v8, %v2126_v49 }
 0x182   : > { %v3063_v54 = vpack.c.bf16 %v2317_v56, %v2317_v56  ;;  %v2318_v55 = vadd.f32 %v3118_v1, %v2174_v50  ;;  %v1858_v58 = vpop.f32.mrb[12].mxu0 }
 0x183   : > { %v3256_v61 = vadd.f32 %v1858_v58, %v4237_v63  ;;  %v1860_v62 = vpop.f32.mrb[13].mxu0 }
 0x184   : > { %2558 = vst.msk [vmem:[%s4314_s29 + $0x10] sm:$0xf] %vm2553_vm3, %v3063_v54  ;;  %v3064_v60 = vpack.c.bf16 %v2318_v55, %v2318_v55  ;;  %v1861_v0 = vpop.f32.mrb[14].mxu0 }
 0x185   : > { %vm2079_vm8 = vcmp.ge.f32.partialorder %v3256_v61, 0.0  ;;  %v2127_v59 = vmul.f32 0.2, %v3256_v61  ;;  %v3257_v3 = vadd.f32 %v1861_v0, %v4239_v57  ;;  %v1863_v30 = vpop.f32.mrb[15].mxu0 }
 0x186   : > { %2559 = vst.msk [vmem:[%s4314_s29 + $0x14] sm:$0xf] %vm2553_vm3, %v3064_v60  ;;  %v3133_v60 = vunpack.c.l.bf16 %v3208_v53  ;;  %v3134_v30 = vunpack.c.h.bf16 %v3208_v53 }
 0x187   : > { %v2175_v4 = vsel %vm2079_vm8, %v3256_v61, %v2127_v59  ;;  %vm2080_vm9 = vcmp.ge.f32.partialorder %v3257_v3, 0.0  ;;  %v2128_v7 = vmul.f32 0.2, %v3257_v3 }
 0x188   : > { %v2319_v63 = vadd.f32 %v3121_v51, %v2175_v4 }
 0x189   : > { %v2176_v9 = vsel %vm2080_vm9, %v3257_v3, %v2128_v7 }
 0x18a   : > { %v3065_v10 = vpack.c.bf16 %v2319_v63, %v2319_v63  ;;  %v2320_v12 = vadd.f32 %v3122_v5, %v2176_v9  ;;  %v1866_v14 = vpop.f32.mrb[16].mxu0  ;;  %v3209_v63 = vld [vmem:[%s4306_s27 + $0x38] sm:$0xff]  }
 0x18b   : > { %v3258_v15 = vadd.f32 %v1866_v14, %v4247_v2  ;;  %v1868_v16 = vpop.f32.mrb[17].mxu0 }
 0x18c   : > { %2560 = vst.msk [vmem:[%s4314_s29 + $0x18] sm:$0xf] %vm2553_vm3, %v3065_v10  ;;  %v3066_v57 = vpack.c.bf16 %v2320_v12, %v2320_v12  ;;  %v1869_v21 = vpop.f32.mrb[18].mxu0 }
 0x18d   : > { %vm2081_vm10 = vcmp.ge.f32.partialorder %v3258_v15, 0.0  ;;  %v2129_v23 = vmul.f32 0.2, %v3258_v15  ;;  %v3259_v24 = vadd.f32 %v1869_v21, %v4249_v6  ;;  %v1871_v25 = vpop.f32.mrb[19].mxu0 }
 0x18e   : > { %2561 = vst.msk [vmem:[%s4314_s29 + $0x1c] sm:$0xf] %vm2553_vm3, %v3066_v57 }
 0x18f   : > { %v2177_v29 = vsel %vm2081_vm10, %v3258_v15, %v2129_v23  ;;  %vm2082_vm11 = vcmp.ge.f32.partialorder %v3259_v24, 0.0  ;;  %v2130_v31 = vmul.f32 0.2, %v3259_v24  ;;  %v3137_v15 = vunpack.c.l.bf16 %v3209_v63 }
 0x190   : > { %v2321_v2 = vadd.f32 %v3125_v19, %v2177_v29  ;;  %v3138_v23 = vunpack.c.h.bf16 %v3209_v63  ;;  %v3210_v29 = vld [vmem:[%s4306_s27 + $0x40] sm:$0xff]  }
 0x191   : > { %v2178_v32 = vsel %vm2082_vm11, %v3259_v24, %v2130_v31 }
 0x192   : > { %v3067_v35 = vpack.c.bf16 %v2321_v2, %v2321_v2  ;;  %v2322_v36 = vadd.f32 %v3126_v37, %v2178_v32  ;;  %v1874_v39 = vpop.f32.mrb[20].mxu0 }
 0x193   : > { %v3260_v52 = vadd.f32 %v1874_v39, %v4257_v11  ;;  %v1876_v38 = vpop.f32.mrb[21].mxu0 }
 0x194   : > { %2562 = vst.msk [vmem:[%s4314_s29 + $0x20] sm:$0xf] %vm2553_vm3, %v3067_v35  ;;  %v3068_v6 = vpack.c.bf16 %v2322_v36, %v2322_v36  ;;  %v1877_v44 = vpop.f32.mrb[22].mxu0  ;;  %v3141_v36 = vunpack.c.l.bf16 %v3210_v29 }
 0x195   : > { %vm2083_vm12 = vcmp.ge.f32.partialorder %v3260_v52, 0.0  ;;  %v2131_v8 = vmul.f32 0.2, %v3260_v52  ;;  %v3261_v20 = vadd.f32 %v1877_v44, %v4259_v13  ;;  %v1879_v1 = vpop.f32.mrb[23].mxu0 }
 0x196   : > { %2563 = vst.msk [vmem:[%s4314_s29 + $0x24] sm:$0xf] %vm2553_vm3, %v3068_v6  ;;  %v3211_v1 = vld [vmem:[%s4306_s27 + $0x48] sm:$0xff]  }
 0x197   : > { %v2179_v49 = vsel %vm2083_vm12, %v3260_v52, %v2131_v8  ;;  %vm2084_vm13 = vcmp.ge.f32.partialorder %v3261_v20, 0.0  ;;  %v2132_v56 = vmul.f32 0.2, %v3261_v20  ;;  %v3145_v53 = vunpack.c.l.bf16 %v3211_v1 }
 0x198   : > { %v2323_v11 = vadd.f32 %v3129_v42, %v2179_v49  ;;  %v3142_v42 = vunpack.c.h.bf16 %v3210_v29 }
 0x199   : > { %v2180_v50 = vsel %vm2084_vm13, %v3261_v20, %v2132_v56 }
 0x19a   : > { %v3069_v54 = vpack.c.bf16 %v2323_v11, %v2323_v11  ;;  %v2324_v55 = vadd.f32 %v3130_v48, %v2180_v50  ;;  %v1882_v58 = vpop.f32.mrb[24].mxu0 }
 0x19b   : > { %v3262_v61 = vadd.f32 %v1882_v58, %v4267_v18  ;;  %v1884_v62 = vpop.f32.mrb[25].mxu0 }
 0x19c   : > { %2564 = vst.msk [vmem:[%s4314_s29 + $0x28] sm:$0xf] %vm2553_vm3, %v3069_v54  ;;  %v3070_v13 = vpack.c.bf16 %v2324_v55, %v2324_v55  ;;  %v1885_v51 = vpop.f32.mrb[26].mxu0  ;;  %v3146_v62 = vunpack.c.h.bf16 %v3211_v1 }
 0x19d   : > { %vm2085_vm14 = vcmp.ge.f32.partialorder %v3262_v61, 0.0  ;;  %v2133_v0 = vmul.f32 0.2, %v3262_v61  ;;  %v3263_v59 = vadd.f32 %v1885_v51, %v4270_v22  ;;  %v1887_v3 = vpop.f32.mrb[27].mxu0 }
 0x19e   : > { %2565 = vst.msk [vmem:[%s4314_s29 + $0x2c] sm:$0xf] %vm2553_vm3, %v3070_v13 }
 0x19f   : > { %v2181_v5 = vsel %vm2085_vm14, %v3262_v61, %v2133_v0  ;;  %vm2086_vm15 = vcmp.ge.f32.partialorder %v3263_v59, 0.0  ;;  %v2134_v4 = vmul.f32 0.2, %v3263_v59  ;;  %v3212_v0 = vld [vmem:[%s4306_s27 + $0x50] sm:$0xff]  }
 0x1a0   : > { %v2325_v18 = vadd.f32 %v3133_v60, %v2181_v5 }
 0x1a1   : > { %v2182_v7 = vsel %vm2086_vm15, %v3263_v59, %v2134_v4 }
 0x1a2   : > { %v3071_v9 = vpack.c.bf16 %v2325_v18, %v2325_v18  ;;  %v2326_v47 = vadd.f32 %v3134_v30, %v2182_v7  ;;  %v1890_v10 = vpop.f32.mrb[28].mxu0  ;;  %v3149_v18 = vunpack.c.l.bf16 %v3212_v0 }
 0x1a3   : > { %v3264_v12 = vadd.f32 %v1890_v10, %v4277_v27  ;;  %v1892_v14 = vpop.f32.mrb[29].mxu0  ;;  %v3150_v10 = vunpack.c.h.bf16 %v3212_v0 }
 0x1a4   : > { %2566 = vst.msk [vmem:[%s4314_s29 + $0x30] sm:$0xf] %vm2553_vm3, %v3071_v9  ;;  %v3072_v22 = vpack.c.bf16 %v2326_v47, %v2326_v47  ;;  %v1893_v16 = vpop.f32.mrb[30].mxu0 }
 0x1a5   : > { %vm2087_vm0 = vcmp.ge.f32.partialorder %v3264_v12, 0.0  ;;  %v2135_v57 = vmul.f32 0.2, %v3264_v12  ;;  %v3265_v19 = vadd.f32 %v1893_v16, %v4279_v26  ;;  %v1895_v21 = vpop.f32.mrb[31].mxu0 }
 0x1a6   : > { %2567 = vst.msk [vmem:[%s4314_s29 + $0x34] sm:$0xf] %vm2553_vm3, %v3072_v22 }
 0x1a7   : > { %v2183_v24 = vsel %vm2087_vm0, %v3264_v12, %v2135_v57  ;;  %vm2088_vm1 = vcmp.ge.f32.partialorder %v3265_v19, 0.0  ;;  %v2136_v25 = vmul.f32 0.2, %v3265_v19 }
 0x1a8   : > { %v2327_v27 = vadd.f32 %v3137_v15, %v2183_v24  ;;  %v3213_v15 = vld [vmem:[%s4306_s27 + $0x58] sm:$0xff]  }
 0x1a9   : > { %v2184_v37 = vsel %vm2088_vm1, %v3265_v19, %v2136_v25  ;;  %v3153_v24 = vunpack.c.l.bf16 %v3213_v15 }
 0x1aa   : > { %v3073_v31 = vpack.c.bf16 %v2327_v27, %v2327_v27  ;;  %v2328_v2 = vadd.f32 %v3138_v23, %v2184_v37  ;;  %v1898_v32 = vpop.f32.mrb[32].mxu0 }
 0x1ab   : > { %v3266_v33 = vadd.f32 %v1898_v32, %v4285_v34  ;;  %v1900_v35 = vpop.f32.mrb[33].mxu0 }
 0x1ac   : > { %2568 = vst.msk [vmem:[%s4314_s29 + $0x38] sm:$0xf] %vm2553_vm3, %v3073_v31  ;;  %v3074_v26 = vpack.c.bf16 %v2328_v2, %v2328_v2  ;;  %v1901_v39 = vpop.f32.mrb[34].mxu0  ;;  %v3154_v31 = vunpack.c.h.bf16 %v3213_v15 }
 0x1ad   : > { %vm2089_vm2 = vcmp.ge.f32.partialorder %v3266_v33, 0.0  ;;  %v2137_v52 = vmul.f32 0.2, %v3266_v33  ;;  %v3267_v38 = vadd.f32 %v1901_v39, %v4287_v28  ;;  %v1903_v6 = vpop.f32.mrb[35].mxu0 }
 0x1ae   : > { %2569 = vst.msk [vmem:[%s4314_s29 + $0x3c] sm:$0xf] %vm2553_vm3, %v3074_v26  ;;  %v3214_v26 = vld [vmem:[%s4306_s27 + $0x60] sm:$0xff]  }
 0x1af   : > { %v2185_v44 = vsel %vm2089_vm2, %v3266_v33, %v2137_v52  ;;  %vm2090_vm4 = vcmp.ge.f32.partialorder %v3267_v38, 0.0  ;;  %v2138_v8 = vmul.f32 0.2, %v3267_v38 }
 0x1b0   : > { %v2329_v34 = vadd.f32 %v3141_v36, %v2185_v44 }
 0x1b1   : > { %v2186_v20 = vsel %vm2090_vm4, %v3267_v38, %v2138_v8  ;;  %v3157_v8 = vunpack.c.l.bf16 %v3214_v26 }
 0x1b2   : > { %v3075_v48 = vpack.c.bf16 %v2329_v34, %v2329_v34  ;;  %v2330_v49 = vadd.f32 %v3142_v42, %v2186_v20  ;;  %v1906_v56 = vpop.f32.mrb[36].mxu0 }
 0x1b3   : > { %v3268_v11 = vadd.f32 %v1906_v56, %v4290_v40  ;;  %v1908_v50 = vpop.f32.mrb[37].mxu0  ;;  %v3158_v56 = vunpack.c.h.bf16 %v3214_v26 }
 0x1b4   : > { %2570 = vst.msk [vmem:[%s4314_s29 + $0x40] sm:$0xf] %vm2553_vm3, %v3075_v48  ;;  %v3076_v28 = vpack.c.bf16 %v2330_v49, %v2330_v49  ;;  %v1909_v54 = vpop.f32.mrb[38].mxu0 }
 0x1b5   : > { %vm2091_vm5 = vcmp.ge.f32.partialorder %v3268_v11, 0.0  ;;  %v2139_v55 = vmul.f32 0.2, %v3268_v11  ;;  %v3269_v58 = vadd.f32 %v1909_v54, %v4292_v41  ;;  %v1911_v61 = vpop.f32.mrb[39].mxu0 }
 0x1b6   : > { %2571 = vst.msk [vmem:[%s4314_s29 + $0x44] sm:$0xf] %vm2553_vm3, %v3076_v28 }
 0x1b7   : > { %v2187_v13 = vsel %vm2091_vm5, %v3268_v11, %v2139_v55  ;;  %vm2092_vm6 = vcmp.ge.f32.partialorder %v3269_v58, 0.0  ;;  %v2140_v60 = vmul.f32 0.2, %v3269_v58  ;;  %v3215_v55 = vld [vmem:[%s4306_s27 + $0x68] sm:$0xff]  }
 0x1b8   : > { %v2331_v40 = vadd.f32 %v3145_v53, %v2187_v13 }
 0x1b9   : > { %v2188_v51 = vsel %vm2092_vm6, %v3269_v58, %v2140_v60 }
 0x1ba   : > { %v3077_v59 = vpack.c.bf16 %v2331_v40, %v2331_v40  ;;  %v2332_v3 = vadd.f32 %v3146_v62, %v2188_v51  ;;  %v1914_v30 = vpop.f32.mrb[40].mxu0 }
 0x1bb   : > { %v3270_v5 = vadd.f32 %v1914_v30, %v4294_v43  ;;  %v1916_v4 = vpop.f32.mrb[41].mxu0 }
 0x1bc   : > { %2572 = vst.msk [vmem:[%s4314_s29 + $0x48] sm:$0xf] %vm2553_vm3, %v3077_v59  ;;  %v3078_v41 = vpack.c.bf16 %v2332_v3, %v2332_v3  ;;  %v1917_v7 = vpop.f32.mrb[42].mxu0  ;;  %v3161_v59 = vunpack.c.l.bf16 %v3215_v55 }
 0x1bd   : > { %vm2093_vm7 = vcmp.ge.f32.partialorder %v3270_v5, 0.0  ;;  %v2141_v63 = vmul.f32 0.2, %v3270_v5  ;;  %v3271_v9 = vadd.f32 %v1917_v7, %v4296_v45  ;;  %v1919_v47 = vpop.f32.mrb[43].mxu0 }
 0x1be   : > { %2573 = vst.msk [vmem:[%s4314_s29 + $0x4c] sm:$0xf] %vm2553_vm3, %v3078_v41 }
 0x1bf   : > { %v2189_v12 = vsel %vm2093_vm7, %v3270_v5, %v2141_v63  ;;  %vm2094_vm8 = vcmp.ge.f32.partialorder %v3271_v9, 0.0  ;;  %v2142_v14 = vmul.f32 0.2, %v3271_v9 }
 0x1c0   : > { %v2333_v43 = vadd.f32 %v3149_v18, %v2189_v12  ;;  %v3162_v18 = vunpack.c.h.bf16 %v3215_v55  ;;  %v3216_v12 = vld [vmem:[%s4306_s27 + $0x70] sm:$0xff]  }
 0x1c1   : > { %v2190_v22 = vsel %vm2094_vm8, %v3271_v9, %v2142_v14 }
 0x1c2   : > { %v3079_v16 = vpack.c.bf16 %v2333_v43, %v2333_v43  ;;  %v2334_v57 = vadd.f32 %v3150_v10, %v2190_v22  ;;  %v1922_v19 = vpop.f32.mrb[44].mxu0 }
 0x1c3   : > { %v3272_v21 = vadd.f32 %v1922_v19, %v4298_v17  ;;  %v1924_v23 = vpop.f32.mrb[45].mxu0 }
 0x1c4   : > { %2574 = vst.msk [vmem:[%s4314_s29 + $0x50] sm:$0xf] %vm2553_vm3, %v3079_v16  ;;  %v3080_v45 = vpack.c.bf16 %v2334_v57, %v2334_v57  ;;  %v1925_v25 = vpop.f32.mrb[46].mxu0  ;;  %v3165_v23 = vunpack.c.l.bf16 %v3216_v12 }
 0x1c5   : > { %vm2095_vm9 = vcmp.ge.f32.partialorder %v3272_v21, 0.0  ;;  %v2143_v27 = vmul.f32 0.2, %v3272_v21  ;;  %v3273_v37 = vadd.f32 %v1925_v25, %v4301_v46  ;;  %v1927_v29 = vpop.f32.mrb[47].mxu0 }
 0x1c6   : > { %2575 = vst.msk [vmem:[%s4314_s29 + $0x54] sm:$0xf] %vm2553_vm3, %v3080_v45  ;;  %v3166_v29 = vunpack.c.h.bf16 %v3216_v12 }
 0x1c7   : > { %v2191_v2 = vsel %vm2095_vm9, %v3272_v21, %v2143_v27  ;;  %vm2096_vm10 = vcmp.ge.f32.partialorder %v3273_v37, 0.0  ;;  %v2144_v32 = vmul.f32 0.2, %v3273_v37 }
 0x1c8   : > { %v2335_v17 = vadd.f32 %v3153_v24, %v2191_v2 }
 0x1c9   : > { %v2192_v33 = vsel %vm2096_vm10, %v3273_v37, %v2144_v32 }
 0x1ca   : > { %v1272_v35 = vpop.f32.mrb[48].mxu1  ;;  %v3081_v36 = vpack.c.bf16 %v2335_v17, %v2335_v17  ;;  %v2336_v39 = vadd.f32 %v3154_v31, %v2192_v33  ;;  %v1930_v52 = vpop.f32.mrb[48].mxu0 }
 0x1cb   : > { %v1274_v38 = vpop.f32.mrb[49].mxu1  ;;  %v3274_v6 = vadd.f32 %v1930_v52, %v1272_v35  ;;  %v1932_v42 = vpop.f32.mrb[49].mxu0  ;;  %v3217_v35 = vld [vmem:[%s4306_s27 + $0x78] sm:$0xff]  }
 0x1cc   : > { %v1275_v46 = vpop.f32.mrb[50].mxu1  ;;  %2576 = vst.msk [vmem:[%s4314_s29 + $0x58] sm:$0xf] %vm2553_vm3, %v3081_v36  ;;  %v3082_v44 = vpack.c.bf16 %v2336_v39, %v2336_v39  ;;  %v1933_v34 = vpop.f32.mrb[50].mxu0 }
 0x1cd   : > { %v1277_v20 = vpop.f32.mrb[51].mxu1  ;;  %vm2097_vm11 = vcmp.ge.f32.partialorder %v3274_v6, 0.0  ;;  %v2145_v1 = vmul.f32 0.2, %v3274_v6  ;;  %v3275_v48 = vadd.f32 %v1933_v34, %v1275_v46  ;;  %v1935_v49 = vpop.f32.mrb[51].mxu0 }
 0x1ce   : > { %2577 = vst.msk [vmem:[%s4314_s29 + $0x5c] sm:$0xf] %vm2553_vm3, %v3082_v44  ;;  %v3169_v44 = vunpack.c.l.bf16 %v3217_v35  ;;  %v3170_v49 = vunpack.c.h.bf16 %v3217_v35 }
 0x1cf   : > { %v2193_v11 = vsel %vm2097_vm11, %v3274_v6, %v2145_v1  ;;  %vm2098_vm12 = vcmp.ge.f32.partialorder %v3275_v48, 0.0  ;;  %v2146_v50 = vmul.f32 0.2, %v3275_v48 }
 0x1d0   : > { %v2337_v28 = vadd.f32 %v3157_v8, %v2193_v11 }
 0x1d1   : > { %v2194_v53 = vsel %vm2098_vm12, %v3275_v48, %v2146_v50 }
 0x1d2   : > { %v1280_v54 = vpop.f32.mrb[52].mxu1  ;;  %v3083_v58 = vpack.c.bf16 %v2337_v28, %v2337_v28  ;;  %v2338_v61 = vadd.f32 %v3158_v56, %v2194_v53  ;;  %v1938_v62 = vpop.f32.mrb[52].mxu0 }
 0x1d3   : > { %v1282_v13 = vpop.f32.mrb[53].mxu1  ;;  %v3276_v60 = vadd.f32 %v1938_v62, %v1280_v54  ;;  %v1940_v40 = vpop.f32.mrb[53].mxu0  ;;  %v3218_v54 = vld [vmem:[%s4306_s27 + $0x80] sm:$0xff]  }
 0x1d4   : > { %v1283_v51 = vpop.f32.mrb[54].mxu1  ;;  %2578 = vst.msk [vmem:[%s4314_s29 + $0x60] sm:$0xf] %vm2553_vm3, %v3083_v58  ;;  %v3084_v0 = vpack.c.bf16 %v2338_v61, %v2338_v61  ;;  %v1941_v3 = vpop.f32.mrb[54].mxu0 }
 0x1d5   : > { %v1285_v30 = vpop.f32.mrb[55].mxu1  ;;  %vm2099_vm13 = vcmp.ge.f32.partialorder %v3276_v60, 0.0  ;;  %v2147_v5 = vmul.f32 0.2, %v3276_v60  ;;  %v3277_v4 = vadd.f32 %v1941_v3, %v1283_v51  ;;  %v1943_v41 = vpop.f32.mrb[55].mxu0 }
 0x1d6   : > { %2579 = vst.msk [vmem:[%s4314_s29 + $0x64] sm:$0xf] %vm2553_vm3, %v3084_v0  ;;  %v3173_v0 = vunpack.c.l.bf16 %v3218_v54  ;;  %v3174_v41 = vunpack.c.h.bf16 %v3218_v54 }
 0x1d7   : > { %v2195_v7 = vsel %vm2099_vm13, %v3276_v60, %v2147_v5  ;;  %vm2100_vm14 = vcmp.ge.f32.partialorder %v3277_v4, 0.0  ;;  %v2148_v63 = vmul.f32 0.2, %v3277_v4 }
 0x1d8   : > { %v2339_v9 = vadd.f32 %v3161_v59, %v2195_v7 }
 0x1d9   : > { %v2196_v47 = vsel %vm2100_vm14, %v3277_v4, %v2148_v63 }
 0x1da   : > { %v1288_v10 = vpop.f32.mrb[56].mxu1  ;;  %v3085_v14 = vpack.c.bf16 %v2339_v9, %v2339_v9  ;;  %v2340_v43 = vadd.f32 %v3162_v18, %v2196_v47  ;;  %v1946_v22 = vpop.f32.mrb[56].mxu0 }
 0x1db   : > { %v1290_v15 = vpop.f32.mrb[57].mxu1  ;;  %v3278_v16 = vadd.f32 %v1946_v22, %v1288_v10  ;;  %v1948_v57 = vpop.f32.mrb[57].mxu0  ;;  %v3219_v10 = vld [vmem:[%s4306_s27 + $0x88] sm:$0xff]  }
 0x1dc   : > { %v1291_v19 = vpop.f32.mrb[58].mxu1  ;;  %2580 = vst.msk [vmem:[%s4314_s29 + $0x68] sm:$0xf] %vm2553_vm3, %v3085_v14  ;;  %v3086_v21 = vpack.c.bf16 %v2340_v43, %v2340_v43  ;;  %v1949_v45 = vpop.f32.mrb[58].mxu0 }
 0x1dd   : > { %v1293_v24 = vpop.f32.mrb[59].mxu1  ;;  %vm2101_vm15 = vcmp.ge.f32.partialorder %v3278_v16, 0.0  ;;  %v2149_v25 = vmul.f32 0.2, %v3278_v16  ;;  %v3279_v27 = vadd.f32 %v1949_v45, %v1291_v19  ;;  %v1951_v37 = vpop.f32.mrb[59].mxu0 }
 0x1de   : > { %2581 = vst.msk [vmem:[%s4314_s29 + $0x6c] sm:$0xf] %vm2553_vm3, %v3086_v21  ;;  %v3177_v21 = vunpack.c.l.bf16 %v3219_v10  ;;  %v3178_v37 = vunpack.c.h.bf16 %v3219_v10 }
 0x1df   : > { %v2197_v31 = vsel %vm2101_vm15, %v3278_v16, %v2149_v25  ;;  %vm2102_vm0 = vcmp.ge.f32.partialorder %v3279_v27, 0.0  ;;  %v2150_v2 = vmul.f32 0.2, %v3279_v27 }
 0x1e0   : > { %v2341_v32 = vadd.f32 %v3165_v23, %v2197_v31 }
 0x1e1   : > { %v2198_v17 = vsel %vm2102_vm0, %v3279_v27, %v2150_v2 }
 0x1e2   : > { %v1296_v33 = vpop.f32.mrb[60].mxu1  ;;  %v3087_v26 = vpack.c.bf16 %v2341_v32, %v2341_v32  ;;  %v2342_v36 = vadd.f32 %v3166_v29, %v2198_v17  ;;  %v1954_v39 = vpop.f32.mrb[60].mxu0 }
 0x1e3   : > { %v1298_v52 = vpop.f32.mrb[61].mxu1  ;;  %v3280_v38 = vadd.f32 %v1954_v39, %v1296_v33  ;;  %v1956_v6 = vpop.f32.mrb[61].mxu0  ;;  %v3220_v33 = vld [vmem:[%s4306_s27 + $0x90] sm:$0xff]  }
 0x1e4   : > { %v1299_v42 = vpop.f32.mrb[62].mxu1  ;;  %2582 = vst.msk [vmem:[%s4314_s29 + $0x70] sm:$0xf] %vm2553_vm3, %v3087_v26  ;;  %v3088_v46 = vpack.c.bf16 %v2342_v36, %v2342_v36  ;;  %v1957_v8 = vpop.f32.mrb[62].mxu0 }
 0x1e5   : > { %v1301_v34 = vpop.f32.mrb[63].mxu1  ;;  %vm2103_vm1 = vcmp.ge.f32.partialorder %v3280_v38, 0.0  ;;  %v2151_v20 = vmul.f32 0.2, %v3280_v38  ;;  %v3281_v1 = vadd.f32 %v1957_v8, %v1299_v42  ;;  %v1959_v48 = vpop.f32.mrb[63].mxu0 }
 0x1e6   : > { %2583 = vst.msk [vmem:[%s4314_s29 + $0x74] sm:$0xf] %vm2553_vm3, %v3088_v46  ;;  %v3181_v46 = vunpack.c.l.bf16 %v3220_v33  ;;  %v3182_v48 = vunpack.c.h.bf16 %v3220_v33 }
 0x1e7   : > { %v2199_v56 = vsel %vm2103_vm1, %v3280_v38, %v2151_v20  ;;  %vm2104_vm2 = vcmp.ge.f32.partialorder %v3281_v1, 0.0  ;;  %v2152_v11 = vmul.f32 0.2, %v3281_v1 }
 0x1e8   : > { %v2343_v50 = vadd.f32 %v3169_v44, %v2199_v56 }
 0x1e9   : > { %v2200_v28 = vsel %vm2104_vm2, %v3281_v1, %v2152_v11 }
 0x1ea   : > { %v1304_v53 = vpop.f32.mrb[64].mxu1  ;;  %v3089_v55 = vpack.c.bf16 %v2343_v50, %v2343_v50  ;;  %v2344_v58 = vadd.f32 %v3170_v49, %v2200_v28  ;;  %v1962_v61 = vpop.f32.mrb[64].mxu0 }
 0x1eb   : > { %v1306_v62 = vpop.f32.mrb[65].mxu1  ;;  %v3282_v13 = vadd.f32 %v1962_v61, %v1304_v53  ;;  %v1964_v60 = vpop.f32.mrb[65].mxu0  ;;  %v3221_v53 = vld [vmem:[%s4306_s27 + $0x98] sm:$0xff]  }
 0x1ec   : > { %v1307_v40 = vpop.f32.mrb[66].mxu1  ;;  %2584 = vst.msk [vmem:[%s4314_s29 + $0x78] sm:$0xf] %vm2553_vm3, %v3089_v55  ;;  %v3090_v51 = vpack.c.bf16 %v2344_v58, %v2344_v58  ;;  %v1965_v59 = vpop.f32.mrb[66].mxu0 }
 0x1ed   : > { %v1309_v3 = vpop.f32.mrb[67].mxu1  ;;  %vm2105_vm4 = vcmp.ge.f32.partialorder %v3282_v13, 0.0  ;;  %v2153_v30 = vmul.f32 0.2, %v3282_v13  ;;  %v3283_v5 = vadd.f32 %v1965_v59, %v1307_v40  ;;  %v1967_v4 = vpop.f32.mrb[67].mxu0 }
 0x1ee   : > { %2585 = vst.msk [vmem:[%s4314_s29 + $0x7c] sm:$0xf] %vm2553_vm3, %v3090_v51  ;;  %v3185_v51 = vunpack.c.l.bf16 %v3221_v53  ;;  %v3186_v4 = vunpack.c.h.bf16 %v3221_v53 }
 0x1ef   : > { %v2201_v18 = vsel %vm2105_vm4, %v3282_v13, %v2153_v30  ;;  %vm2106_vm5 = vcmp.ge.f32.partialorder %v3283_v5, 0.0  ;;  %v2154_v7 = vmul.f32 0.2, %v3283_v5 }
 0x1f0   : > { %v2345_v63 = vadd.f32 %v3173_v0, %v2201_v18 }
 0x1f1   : > { %v2202_v9 = vsel %vm2106_vm5, %v3283_v5, %v2154_v7 }
 0x1f2   : > { %v1312_v47 = vpop.f32.mrb[68].mxu1  ;;  %v3091_v12 = vpack.c.bf16 %v2345_v63, %v2345_v63  ;;  %v2346_v14 = vadd.f32 %v3174_v41, %v2202_v9  ;;  %v1970_v43 = vpop.f32.mrb[68].mxu0 }
 0x1f3   : > { %v1314_v22 = vpop.f32.mrb[69].mxu1  ;;  %v3284_v15 = vadd.f32 %v1970_v43, %v1312_v47  ;;  %v1972_v16 = vpop.f32.mrb[69].mxu0  ;;  %v3222_v47 = vld [vmem:[%s4306_s27 + $0xa0] sm:$0xff]  }
 0x1f4   : > { %v1315_v57 = vpop.f32.mrb[70].mxu1  ;;  %2586 = vst.msk [vmem:[%s4314_s29 + $0x80] sm:$0xf] %vm2553_vm3, %v3091_v12  ;;  %v3092_v19 = vpack.c.bf16 %v2346_v14, %v2346_v14  ;;  %v1973_v23 = vpop.f32.mrb[70].mxu0 }
 0x1f5   : > { %v1317_v45 = vpop.f32.mrb[71].mxu1  ;;  %vm2107_vm6 = vcmp.ge.f32.partialorder %v3284_v15, 0.0  ;;  %v2155_v24 = vmul.f32 0.2, %v3284_v15  ;;  %v3285_v25 = vadd.f32 %v1973_v23, %v1315_v57  ;;  %v1975_v27 = vpop.f32.mrb[71].mxu0 }
 0x1f6   : > { %2587 = vst.msk [vmem:[%s4314_s29 + $0x84] sm:$0xf] %vm2553_vm3, %v3092_v19  ;;  %v3189_v19 = vunpack.c.l.bf16 %v3222_v47  ;;  %v3190_v27 = vunpack.c.h.bf16 %v3222_v47 }
 0x1f7   : > { %v2203_v29 = vsel %vm2107_vm6, %v3284_v15, %v2155_v24  ;;  %vm2108_vm7 = vcmp.ge.f32.partialorder %v3285_v25, 0.0  ;;  %v2156_v31 = vmul.f32 0.2, %v3285_v25 }
 0x1f8   : > { %v2347_v2 = vadd.f32 %v3177_v21, %v2203_v29 }
 0x1f9   : > { %v2204_v32 = vsel %vm2108_vm7, %v3285_v25, %v2156_v31 }
 0x1fa   : > { %v1320_v17 = vpop.f32.mrb[72].mxu1  ;;  %v3093_v35 = vpack.c.bf16 %v2347_v2, %v2347_v2  ;;  %v2348_v26 = vadd.f32 %v3178_v37, %v2204_v32  ;;  %v1978_v36 = vpop.f32.mrb[72].mxu0 }
 0x1fb   : > { %v1322_v39 = vpop.f32.mrb[73].mxu1  ;;  %v3286_v52 = vadd.f32 %v1978_v36, %v1320_v17  ;;  %v1980_v38 = vpop.f32.mrb[73].mxu0  ;;  %v3223_v17 = vld [vmem:[%s4306_s27 + $0xa8] sm:$0xff]  }
 0x1fc   : > { %v1323_v6 = vpop.f32.mrb[74].mxu1  ;;  %2588 = vst.msk [vmem:[%s4314_s29 + $0x88] sm:$0xf] %vm2553_vm3, %v3093_v35  ;;  %v3094_v42 = vpack.c.bf16 %v2348_v26, %v2348_v26  ;;  %v1981_v44 = vpop.f32.mrb[74].mxu0 }
 0x1fd   : > { %v1325_v8 = vpop.f32.mrb[75].mxu1  ;;  %vm2109_vm8 = vcmp.ge.f32.partialorder %v3286_v52, 0.0  ;;  %v2157_v34 = vmul.f32 0.2, %v3286_v52  ;;  %v3287_v20 = vadd.f32 %v1981_v44, %v1323_v6  ;;  %v1983_v1 = vpop.f32.mrb[75].mxu0 }
 0x1fe   : > { %2589 = vst.msk [vmem:[%s4314_s29 + $0x8c] sm:$0xf] %vm2553_vm3, %v3094_v42  ;;  %v3193_v42 = vunpack.c.l.bf16 %v3223_v17  ;;  %v3194_v1 = vunpack.c.h.bf16 %v3223_v17 }
 0x1ff   : > { %v2205_v49 = vsel %vm2109_vm8, %v3286_v52, %v2157_v34  ;;  %vm2110_vm9 = vcmp.ge.f32.partialorder %v3287_v20, 0.0  ;;  %v2158_v56 = vmul.f32 0.2, %v3287_v20 }
 0x200   : > { %v2349_v11 = vadd.f32 %v3181_v46, %v2205_v49 }
 0x201   : > { %v2206_v50 = vsel %vm2110_vm9, %v3287_v20, %v2158_v56 }
 0x202   : > { %v1328_v28 = vpop.f32.mrb[76].mxu1  ;;  %v3095_v54 = vpack.c.bf16 %v2349_v11, %v2349_v11  ;;  %v2350_v55 = vadd.f32 %v3182_v48, %v2206_v50  ;;  %v1986_v58 = vpop.f32.mrb[76].mxu0 }
 0x203   : > { %v1330_v61 = vpop.f32.mrb[77].mxu1  ;;  %v3288_v62 = vadd.f32 %v1986_v58, %v1328_v28  ;;  %v1988_v13 = vpop.f32.mrb[77].mxu0  ;;  %v3224_v28 = vld [vmem:[%s4306_s27 + $0xb0] sm:$0xff]  }
 0x204   : > { %v1331_v60 = vpop.f32.mrb[78].mxu1  ;;  %2590 = vst.msk [vmem:[%s4314_s29 + $0x90] sm:$0xf] %vm2553_vm3, %v3095_v54  ;;  %v3096_v40 = vpack.c.bf16 %v2350_v55, %v2350_v55  ;;  %v1989_v0 = vpop.f32.mrb[78].mxu0 }
 0x205   : > { %v1333_v59 = vpop.f32.mrb[79].mxu1  ;;  %vm2111_vm10 = vcmp.ge.f32.partialorder %v3288_v62, 0.0  ;;  %v2159_v3 = vmul.f32 0.2, %v3288_v62  ;;  %v3289_v30 = vadd.f32 %v1989_v0, %v1331_v60  ;;  %v1991_v5 = vpop.f32.mrb[79].mxu0 }
 0x206   : > { %2591 = vst.msk [vmem:[%s4314_s29 + $0x94] sm:$0xf] %vm2553_vm3, %v3096_v40  ;;  %v3197_v40 = vunpack.c.l.bf16 %v3224_v28  ;;  %v3198_v5 = vunpack.c.h.bf16 %v3224_v28 }
 0x207   : > { %v2207_v41 = vsel %vm2111_vm10, %v3288_v62, %v2159_v3  ;;  %vm2112_vm11 = vcmp.ge.f32.partialorder %v3289_v30, 0.0  ;;  %v2160_v18 = vmul.f32 0.2, %v3289_v30 }
 0x208   : > { %v2351_v7 = vadd.f32 %v3185_v51, %v2207_v41 }
 0x209   : > { %v2208_v63 = vsel %vm2112_vm11, %v3289_v30, %v2160_v18 }
 0x20a   : > { %v1336_v9 = vpop.f32.mrb[80].mxu1  ;;  %v3097_v10 = vpack.c.bf16 %v2351_v7, %v2351_v7  ;;  %v2352_v12 = vadd.f32 %v3186_v4, %v2208_v63  ;;  %v1994_v14 = vpop.f32.mrb[80].mxu0 }
 0x20b   : > { %v1338_v43 = vpop.f32.mrb[81].mxu1  ;;  %v3290_v22 = vadd.f32 %v1994_v14, %v1336_v9  ;;  %v1996_v15 = vpop.f32.mrb[81].mxu0  ;;  %v3225_v9 = vld [vmem:[%s4306_s27 + $0xb8] sm:$0xff]  }
 0x20c   : > { %v1339_v16 = vpop.f32.mrb[82].mxu1  ;;  %2592 = vst.msk [vmem:[%s4314_s29 + $0x98] sm:$0xf] %vm2553_vm3, %v3097_v10  ;;  %v3098_v57 = vpack.c.bf16 %v2352_v12, %v2352_v12  ;;  %v1997_v21 = vpop.f32.mrb[82].mxu0 }
 0x20d   : > { %v1341_v23 = vpop.f32.mrb[83].mxu1  ;;  %vm2113_vm12 = vcmp.ge.f32.partialorder %v3290_v22, 0.0  ;;  %v2161_v45 = vmul.f32 0.2, %v3290_v22  ;;  %v3291_v24 = vadd.f32 %v1997_v21, %v1339_v16  ;;  %v1999_v25 = vpop.f32.mrb[83].mxu0 }
 0x20e   : > { %2593 = vst.msk [vmem:[%s4314_s29 + $0x9c] sm:$0xf] %vm2553_vm3, %v3098_v57  ;;  %v3201_v57 = vunpack.c.l.bf16 %v3225_v9  ;;  %v3202_v25 = vunpack.c.h.bf16 %v3225_v9 }
 0x20f   : > { %v2209_v37 = vsel %vm2113_vm12, %v3290_v22, %v2161_v45  ;;  %vm2114_vm13 = vcmp.ge.f32.partialorder %v3291_v24, 0.0  ;;  %v2162_v29 = vmul.f32 0.2, %v3291_v24 }
 0x210   : > { %v2353_v31 = vadd.f32 %v3189_v19, %v2209_v37 }
 0x211   : > { %v2210_v2 = vsel %vm2114_vm13, %v3291_v24, %v2162_v29 }
 0x212   : > { %v1344_v32 = vpop.f32.mrb[84].mxu1  ;;  %v3099_v33 = vpack.c.bf16 %v2353_v31, %v2353_v31  ;;  %v2354_v35 = vadd.f32 %v3190_v27, %v2210_v2  ;;  %v2002_v26 = vpop.f32.mrb[84].mxu0 }
 0x213   : > { %v1346_v36 = vpop.f32.mrb[85].mxu1  ;;  %v3292_v39 = vadd.f32 %v2002_v26, %v1344_v32  ;;  %v2004_v52 = vpop.f32.mrb[85].mxu0 }
 0x214   : > { %v1347_v38 = vpop.f32.mrb[86].mxu1  ;;  %2594 = vst.msk [vmem:[%s4314_s29 + $0xa0] sm:$0xf] %vm2553_vm3, %v3099_v33  ;;  %v3100_v6 = vpack.c.bf16 %v2354_v35, %v2354_v35  ;;  %v2005_v46 = vpop.f32.mrb[86].mxu0 }
 0x215   : > { %v1349_v44 = vpop.f32.mrb[87].mxu1  ;;  %vm2115_vm14 = vcmp.ge.f32.partialorder %v3292_v39, 0.0  ;;  %v2163_v8 = vmul.f32 0.2, %v3292_v39  ;;  %v3293_v34 = vadd.f32 %v2005_v46, %v1347_v38  ;;  %v2007_v20 = vpop.f32.mrb[87].mxu0 }
 0x216   : > { %2595 = vst.msk [vmem:[%s4314_s29 + $0xa4] sm:$0xf] %vm2553_vm3, %v3100_v6 }
 0x217   : > { %v2211_v48 = vsel %vm2115_vm14, %v3292_v39, %v2163_v8  ;;  %vm2116_vm15 = vcmp.ge.f32.partialorder %v3293_v34, 0.0  ;;  %v2164_v49 = vmul.f32 0.2, %v3293_v34 }
 0x218   : > { %v2355_v56 = vadd.f32 %v3193_v42, %v2211_v48 }
 0x219   : > { %v2212_v11 = vsel %vm2116_vm15, %v3293_v34, %v2164_v49 }
 0x21a   : > { %v1352_v50 = vpop.f32.mrb[88].mxu1  ;;  %v3101_v53 = vpack.c.bf16 %v2355_v56, %v2355_v56  ;;  %v2356_v54 = vadd.f32 %v3194_v1, %v2212_v11  ;;  %v2010_v55 = vpop.f32.mrb[88].mxu0 }
 0x21b   : > { %v1354_v58 = vpop.f32.mrb[89].mxu1  ;;  %v3294_v61 = vadd.f32 %v2010_v55, %v1352_v50  ;;  %v2012_v62 = vpop.f32.mrb[89].mxu0 }
 0x21c   : > { %v1355_v13 = vpop.f32.mrb[90].mxu1  ;;  %2596 = vst.msk [vmem:[%s4314_s29 + $0xa8] sm:$0xf] %vm2553_vm3, %v3101_v53  ;;  %v3102_v60 = vpack.c.bf16 %v2356_v54, %v2356_v54  ;;  %v2013_v51 = vpop.f32.mrb[90].mxu0 }
 0x21d   : > { %v1357_v0 = vpop.f32.mrb[91].mxu1  ;;  %vm2117_vm0 = vcmp.ge.f32.partialorder %v3294_v61, 0.0  ;;  %v2165_v59 = vmul.f32 0.2, %v3294_v61  ;;  %v3295_v3 = vadd.f32 %v2013_v51, %v1355_v13  ;;  %v2015_v30 = vpop.f32.mrb[91].mxu0 }
 0x21e   : > { %2597 = vst.msk [vmem:[%s4314_s29 + $0xac] sm:$0xf] %vm2553_vm3, %v3102_v60 }
 0x21f   : > { %v2213_v4 = vsel %vm2117_vm0, %v3294_v61, %v2165_v59  ;;  %vm2118_vm1 = vcmp.ge.f32.partialorder %v3295_v3, 0.0  ;;  %v2166_v41 = vmul.f32 0.2, %v3295_v3 }
 0x220   : > { %v2357_v18 = vadd.f32 %v3197_v40, %v2213_v4 }
 0x221   : > { %v2214_v7 = vsel %vm2118_vm1, %v3295_v3, %v2166_v41 }
 0x222   : > { %v1360_v63 = vpop.f32.mrb[92].mxu1  ;;  %v3103_v47 = vpack.c.bf16 %v2357_v18, %v2357_v18  ;;  %v2358_v10 = vadd.f32 %v3198_v5, %v2214_v7  ;;  %v2018_v12 = vpop.f32.mrb[92].mxu0 }
 0x223   : > { %v1362_v14 = vpop.f32.mrb[93].mxu1  ;;  %v3296_v43 = vadd.f32 %v2018_v12, %v1360_v63  ;;  %v2020_v22 = vpop.f32.mrb[93].mxu0 }
 0x224   : > { %v1363_v15 = vpop.f32.mrb[94].mxu1  ;;  %2598 = vst.msk [vmem:[%s4314_s29 + $0xb0] sm:$0xf] %vm2553_vm3, %v3103_v47  ;;  %v3104_v16 = vpack.c.bf16 %v2358_v10, %v2358_v10  ;;  %v2021_v19 = vpop.f32.mrb[94].mxu0 }
 0x225   : > { %v1365_v21 = vpop.f32.mrb[95].mxu1  ;;  %vm2119_vm2 = vcmp.ge.f32.partialorder %v3296_v43, 0.0  ;;  %v2167_v23 = vmul.f32 0.2, %v3296_v43  ;;  %v3297_v45 = vadd.f32 %v2021_v19, %v1363_v15  ;;  %v2023_v24 = vpop.f32.mrb[95].mxu0 }
 0x226   : > { %2599 = vst.msk [vmem:[%s4314_s29 + $0xb4] sm:$0xf] %vm2553_vm3, %v3104_v16 }
 0x227   : > { %v2215_v27 = vsel %vm2119_vm2, %v3296_v43, %v2167_v23  ;;  %vm2120_vm4 = vcmp.ge.f32.partialorder %v3297_v45, 0.0  ;;  %v2168_v37 = vmul.f32 0.2, %v3297_v45 }
 0x228   : > { %v2359_v29 = vadd.f32 %v3201_v57, %v2215_v27 }
 0x229   : > { %v2216_v31 = vsel %vm2120_vm4, %v3297_v45, %v2168_v37 }
 0x22a   : > { %v3105_v2 = vpack.c.bf16 %v2359_v29, %v2359_v29  ;;  %v2360_v32 = vadd.f32 %v3202_v25, %v2216_v31 }
 0x22c   : > { %2600 = vst.msk [vmem:[%s4314_s29 + $0xb8] sm:$0xf] %vm2553_vm3, %v3105_v2  ;;  %v3106_v17 = vpack.c.bf16 %v2360_v32, %v2360_v32 }
 0x22e   : > { %2601 = vst.msk [vmem:[%s4314_s29 + $0xbc] sm:$0xf] %vm2553_vm3, %v3106_v17 }
 0x22f PF: > { %s13_s14 = sadd.s32 1, %s3583_s14   ;;  %s4470_s12 = smov %s3579_s13 }
 0x230   : > { %p10_p5 = scmp.ge.s32.totalorder %s13_s14, 4   ;;  %s4471_s13 = smov %s4473_s15 }
 0x232   :  { %12 = sbr.rel (!%p10_p5) target bundleno = 2 (0x2), region = 67 }

// kernel: unet_discriminator_sn.17
= control target key start
LH: loop header
LB: loop body
LE: loop exit
PB: predicated region body
PF: predicated region fallthrough
CT: control target
= control target key end

     0   :  { %s2913_s9 = smov 0   ;;  %s2915_s10 = smov 0   ;;  %s3415_s0 = inlined_call_operand.vmem [shape: bf16[2,432,96], index: 0, kind: input, shape index: {}]   ;;  %s3416_s1 = inlined_call_operand.vmem [shape: bf16[3,96,32], index: 1, kind: input, shape index: {}]   ;;  %s3417_s2 = inlined_call_operand.vmem [shape: bf16[2,384,32], index: 2, kind: output, shape index: {}]  }
   0x1   :  { %s2917_s11 = smov 0  }
   0x2 LB: > { %s24_s12 = sadd.s32 1, %s2892_s10  ;;  %p2093_p0 = scmp.ge.s32.totalorder %s2896_s11, 1  ;;  %s2896_s11 = sphi %s2917_s11, %s12_s11   ;;  %s2892_s10 = sphi %s2915_s10, %s3419_s10   ;;  %s2888_s9 = sphi %s2913_s9, %s3418_s9  }
   0x3   : > { %p26_p1 = scmp.ge.s32.totalorder %s24_s12, 2  ;;  %p126_p2 = scmp.lt.s32.totalorder %s2896_s11, 3 }
   0x5   : > { %s3421_s12 = smov (%p26_p1, %s24_s12), 0  ;;  %p127_p3 = pnand %p2093_p0, %p126_p2 }
   0x6   : > { %v2784_v0 = vld [vmem:[%s3416_s1 + $0x30] sm:$0xff] (!%p127_p3)   ;;  %p152_p4 = scmp.lt.s32.totalorder (!%p127_p3), %s2888_s9, 1  ;;  %v2785_v1 = vld [vmem:[%s3416_s1] sm:$0xff] (!%p127_p3)   ;;  %v2786_v2 = vld [vmem:[%s3416_s1 + $0x38] sm:$0xff] (!%p127_p3)   ;;  %vm400_vm0 = vcmask (!%p127_p3), 785408   ;;  %vm1959_vm3 = vcmask (!%p127_p3), 257024  }
   0x7   : > { %130 = sbr.rel (%p127_p3) target bundleno = 390 (0x186), region = 28  ;;  %2470 = vmatprep.subr.bf16.mxu1 (!%p127_p3), %v2784_v0  ;;  %2530 = vmatprep.subr.bf16.mxu0 (!%p127_p3), %v2785_v1  ;;  %v2945_v3 = vld [vmem:[%s3416_s1 + $0x8] sm:$0xff] (!%p127_p3)   ;;  %v2788_v4 = vld [vmem:[%s3416_s1 + $0x40] sm:$0xff] (!%p127_p3)   ;;  %v2954_v5 = vld [vmem:[%s3416_s1 + $0x10] sm:$0xff] (!%p127_p3)  }
   0x8   : > { %2471 = vmatpush3.bf16.msra.mxu1 (!%p127_p3), %v2784_v0  ;;  %2531 = vmatpush3.bf16.msra.mxu0 (!%p127_p3), %v2785_v1  ;;  %v2790_v6 = vld [vmem:[%s3416_s1 + $0x48] sm:$0xff] (!%p127_p3)   ;;  %v2965_v7 = vld [vmem:[%s3416_s1 + $0x18] sm:$0xff] (!%p127_p3)   ;;  %v2792_v8 = vld [vmem:[%s3416_s1 + $0x50] sm:$0xff] (!%p127_p3)  }
   0x9   : > { %2472 = vmatprep.subr.bf16.mxu1 (!%p127_p3), %v2786_v2  ;;  %2532 = vmatprep.subr.bf16.mxu0 (!%p127_p3), %v2945_v3  ;;  %v2982_v11 = vld [vmem:[%s3416_s1 + $0x20] sm:$0xff] (!%p127_p3)   ;;  %v2794_v14 = vld [vmem:[%s3416_s1 + $0x58] sm:$0xff] (!%p127_p3)   ;;  %v2994_v15 = vld [vmem:[%s3416_s1 + $0x28] sm:$0xff] (!%p127_p3)  }
   0xa   : > { %v2801_v19 = vld [vmem:[%s3416_s1 + $0x60] sm:$0xff] (!%p127_p3)   ;;  %v2805_v26 = vld [vmem:[%s3416_s1 + $0x68] sm:$0xff] (!%p127_p3)   ;;  %v2810_v31 = vld [vmem:[%s3416_s1 + $0x70] sm:$0xff] (!%p127_p3)  }
   0xb   : > { %v2815_v36 = vld [vmem:[%s3416_s1 + $0x78] sm:$0xff] (!%p127_p3)   ;;  %v2820_v41 = vld [vmem:[%s3416_s1 + $0x80] sm:$0xff] (!%p127_p3)   ;;  %v2825_v46 = vld [vmem:[%s3416_s1 + $0x88] sm:$0xff] (!%p127_p3)  }
   0xc   : > { %2473 = vmatpush3.bf16.msra.mxu1 (!%p127_p3), %v2786_v2  ;;  %2533 = vmatpush3.bf16.msra.mxu0 (!%p127_p3), %v2945_v3 }
   0xd   : > { %2474 = vmatprep.subr.bf16.mxu1 (!%p127_p3), %v2788_v4  ;;  %2534 = vmatprep.subr.bf16.mxu0 (!%p127_p3), %v2954_v5 }
   0xe   : > { %s3423_s9 = smov (!%p152_p4, %s2888_s9), 1 }
   0xf   : > { %s2758_s25 = smul.u32 216, %s3423_s9 }
  0x10   : > { %2475 = vmatpush3.bf16.msra.mxu1 %v2788_v4  ;;  %2535 = vmatpush3.bf16.msra.mxu0 %v2954_v5  ;;  %s2759_s29 = smul.u32 192, %s3423_s9 }
  0x11   : > { %s2970_s4 = scalar_lea.vmem %s3415_s0, %s2758_s25  ;;  %2476 = vmatprep.subr.bf16.mxu1 %v2790_v6  ;;  %2536 = vmatprep.subr.bf16.mxu0 %v2965_v7 }
  0x12   : > { %v171_v9 = vld [vmem:[%s2970_s4 + $0xc] sm:$0xf]  ;;  %v172_v10 = vld [vmem:[%s2970_s4 + $0x10] sm:$0xf]  ;;  %v2800_v13 = vld [vmem:[%s2970_s4] sm:$0xff]  }
  0x13   : > { %v2108_v12 = vcombine.low %v171_v9, %v172_v10  ;;  %2542 = vmatprep.mubr.msk.bf16.mxu0 %vm400_vm0, %v2800_v13  ;;  %v173_v16 = vld [vmem:[%s2970_s4 + $0x14] sm:$0xf]  ;;  %v174_v17 = vld [vmem:[%s2970_s4 + $0x18] sm:$0xf]  ;;  %v170_v18 = vld [vmem:[%s2970_s4 + $0x8] sm:$0xf] }
  0x14   : > { %2477 = vmatpush3.bf16.msra.mxu1 %v2790_v6  ;;  %2537 = vmatpush3.bf16.msra.mxu0 %v2965_v7  ;;  %v175_v20 = vld [vmem:[%s2970_s4 + $0x1c] sm:$0xf]  ;;  %v176_v21 = vld [vmem:[%s2970_s4 + $0x20] sm:$0xf]  ;;  %v2109_v22 = vcombine.low %v173_v16, %v174_v17  ;;  %v2163_v23 = vcombine.low %v170_v18, %v171_v9  ;;  %v2164_v25 = vcombine.low %v172_v10, %v173_v16  ;;  %v177_v27 = vld [vmem:[%s2970_s4 + $0x24] sm:$0xf] }
  0x15   : > { %2482 = vmatprep.mubr.msk.bf16.mxu1 %vm400_vm0, %v2108_v12  ;;  %2478 = vmatprep.subr.bf16.mxu1 %v2792_v8  ;;  %v2110_v24 = vcombine.low %v175_v20, %v176_v21  ;;  %v178_v28 = vld [vmem:[%s2970_s4 + $0x28] sm:$0xf]  ;;  %v179_v29 = vld [vmem:[%s2970_s4 + $0x2c] sm:$0xf]  ;;  %v180_v30 = vld [vmem:[%s2970_s4 + $0x30] sm:$0xf]  ;;  %v2165_v33 = vcombine.low %v174_v17, %v175_v20  ;;  %v2166_v35 = vcombine.low %v176_v21, %v177_v27 }
  0x16   : > { %2538 = vmatprep.subr.bf16.mxu0 %v2982_v11  ;;  %v2111_v32 = vcombine.low %v177_v27, %v178_v28  ;;  %v2112_v34 = vcombine.low %v179_v29, %v180_v30  ;;  %v181_v37 = vld [vmem:[%s2970_s4 + $0x34] sm:$0xf]  ;;  %v182_v38 = vld [vmem:[%s2970_s4 + $0x38] sm:$0xf]  ;;  %v183_v39 = vld [vmem:[%s2970_s4 + $0x3c] sm:$0xf]  ;;  %v2167_v43 = vcombine.low %v178_v28, %v179_v29 }
  0x17   : > { %v184_v40 = vld [vmem:[%s2970_s4 + $0x40] sm:$0xf]  ;;  %v2113_v42 = vcombine.low %v181_v37, %v182_v38  ;;  %v2168_v45 = vcombine.low %v180_v30, %v181_v37  ;;  %v185_v47 = vld [vmem:[%s2970_s4 + $0x44] sm:$0xf]  ;;  %v186_v48 = vld [vmem:[%s2970_s4 + $0x48] sm:$0xf]  ;;  %v2169_v52 = vcombine.low %v182_v38, %v183_v39 }
  0x18   : > { %2479 = vmatpush3.bf16.msra.mxu1 %v2792_v8  ;;  %2539 = vmatpush3.bf16.msra.mxu0 %v2982_v11  ;;  %v2114_v44 = vcombine.low %v183_v39, %v184_v40  ;;  %v187_v49 = vld [vmem:[%s2970_s4 + $0x4c] sm:$0xf]  ;;  %v188_v50 = vld [vmem:[%s2970_s4 + $0x50] sm:$0xf]  ;;  %v2115_v51 = vcombine.low %v185_v47, %v186_v48  ;;  %v2170_v54 = vcombine.low %v184_v40, %v185_v47  ;;  %v189_v55 = vld [vmem:[%s2970_s4 + $0x54] sm:$0xf] }
  0x19   : > { %2480 = vmatprep.subr.bf16.mxu1 %v2794_v14  ;;  %2540 = vmatprep.subr.bf16.mxu0 %v2994_v15  ;;  %v2116_v53 = vcombine.low %v187_v49, %v188_v50  ;;  %v190_v56 = vld [vmem:[%s2970_s4 + $0x58] sm:$0xf]  ;;  %v191_v57 = vld [vmem:[%s2970_s4 + $0x5c] sm:$0xf]  ;;  %v3065_v58 = vld [vmem:[%s2970_s4 + $0x60] sm:$0xf]  ;;  %v2171_v60 = vcombine.low %v186_v48, %v187_v49  ;;  %v2172_v62 = vcombine.low %v188_v50, %v189_v55 }
  0x1a   : > { %v2117_v59 = vcombine.low %v189_v55, %v190_v56  ;;  %v2118_v61 = vcombine.low %v191_v57, %v3065_v58  ;;  %v3072_v63 = vld [vmem:[%s2970_s4 + $0x64] sm:$0xf]  ;;  %v3075_v0 = vld [vmem:[%s2970_s4 + $0x68] sm:$0xf]  ;;  %v3082_v2 = vld [vmem:[%s2970_s4 + $0x70] sm:$0xf]  ;;  %v2173_v4 = vcombine.low %v190_v56, %v191_v57 }
  0x1b   : > { %v2828_v6 = vld [vmem:[%s2970_s4 + $0x18] sm:$0xff]   ;;  %v3103_v10 = vld [vmem:[%s2970_s4 + $0x80] sm:$0xf]  ;;  %v3118_v16 = vld [vmem:[%s2970_s4 + $0x88] sm:$0xf]  ;;  %v2174_v49 = vcombine.low %v3065_v58, %v3072_v63 }
  0x1c   : > { %2481 = vmatpush3.bf16.msra.mxu1 %v2794_v14  ;;  %2541 = vmatpush3.bf16.msra.mxu0 %v2994_v15  ;;  %v3096_v8 = vld [vmem:[%s2970_s4 + $0x78] sm:$0xf]  ;;  %v3100_v9 = vld [vmem:[%s2970_s4 + $0x7c] sm:$0xf]  ;;  %v2830_v12 = vld [vmem:[%s2970_s4 + $0x20] sm:$0xff]  }
  0x1d   : > { %2650 = vmatprep.subr.bf16.mxu1 %v2785_v1  ;;  %2590 = vmatprep.subr.bf16.mxu0 %v2801_v19  ;;  %v2122_v13 = vcombine.low %v3100_v9, %v3103_v10  ;;  %v2832_v14 = vld [vmem:[%s2970_s4 + $0x28] sm:$0xff]   ;;  %v3125_v18 = vld [vmem:[%s2970_s4 + $0x90] sm:$0xf]  ;;  %v2838_v28 = vld [vmem:[%s2970_s4 + $0x40] sm:$0xff]   ;;  %v2177_v55 = vcombine.low %v3096_v8, %v3100_v9 }
  0x1e   : > { %v3122_v17 = vld [vmem:[%s2970_s4 + $0x8c] sm:$0xf]  ;;  %v2834_v20 = vld [vmem:[%s2970_s4 + $0x30] sm:$0xff]   ;;  %v2844_v38 = vld [vmem:[%s2970_s4 + $0x58] sm:$0xff]  }
  0x1f   : > { %2483 = vmatmul.mubr.msk.bf16.vlgmr.msra.gmra.mrb[0].mxu1 %vm400_vm0, %v2109_v22  ;;  %2543 = vmatmul.mubr.msk.bf16.vlgmr.msra.gmra.mrb[0].mxu0 %vm400_vm0, %v2163_v23  ;;  %v2124_v21 = vcombine.low %v3122_v17, %v3125_v18  ;;  %v2836_v22 = vld [vmem:[%s2970_s4 + $0x38] sm:$0xff]   ;;  %v3137_v23 = vld [vmem:[%s2970_s4 + $0x94] sm:$0xf]  ;;  %v2840_v30 = vld [vmem:[%s2970_s4 + $0x48] sm:$0xff]  }
  0x20   : > { %2656 = vmatpush3.bf16.msra.mxu1 %v2785_v1  ;;  %2591 = vmatpush3.bf16.msra.mxu0 %v2801_v19  ;;  %v3079_v1 = vld [vmem:[%s2970_s4 + $0x6c] sm:$0xf]  ;;  %v213_v39 = vld [vmem:[%s2970_s4 + $0xb4] sm:$0xf]  ;;  %v3182_v40 = vld [vmem:[%s2970_s4 + $0xb8] sm:$0xf] }
  0x21   : > { %2486 = vmatprep.mubr.msk.bf16.mxu1 %vm400_vm0, %v2110_v24  ;;  %2546 = vmatprep.mubr.msk.bf16.mxu0 %vm400_vm0, %v2164_v25  ;;  %v3140_v24 = vld [vmem:[%s2970_s4 + $0x98] sm:$0xf]  ;;  %v3144_v25 = vld [vmem:[%s2970_s4 + $0x9c] sm:$0xf]  ;;  %v2849_v47 = vld [vmem:[%s2970_s4 + $0xc4] sm:$0xff]  }
  0x22   : > { %2592 = vmatprep.subr.bf16.mxu0 %v2805_v26  ;;  %2651 = vmatprep.subr.bf16.mxu1 %v2945_v3  ;;  %v2125_v27 = vcombine.low %v3137_v23, %v3140_v24  ;;  %v2850_v48 = vld [vmem:[%s2970_s4 + $0x70] sm:$0xff]   ;;  %v2852_v50 = vld [vmem:[%s2970_s4 + $0x78] sm:$0xff]  }
  0x23   : > { %v2857_v56 = vld [vmem:[%s2970_s4 + $0x90] sm:$0xff]   ;;  %v2859_v58 = vld [vmem:[%s2970_s4 + $0x98] sm:$0xff]  }
  0x24   : > { %2657 = vmatpush3.bf16.msra.mxu1 %v2945_v3  ;;  %2593 = vmatpush3.bf16.msra.mxu0 %v2805_v26  ;;  %v2119_v3 = vcombine.low %v3072_v63, %v3075_v0  ;;  %v3147_v26 = vld [vmem:[%s2970_s4 + $0xa0] sm:$0xf]  ;;  %v2181_v63 = vcombine.low %v3140_v24, %v3144_v25 }
  0x25   : > { %2652 = vmatprep.subr.bf16.mxu1 %v2954_v5  ;;  %2594 = vmatprep.subr.bf16.mxu0 %v2810_v31  ;;  %v2126_v29 = vcombine.low %v3144_v25, %v3147_v26 }
  0x27   : > { %2487 = vmatmul.mubr.msk.bf16.gmra.mrb[4].mxu1 %vm400_vm0, %v2111_v32  ;;  %2547 = vmatmul.mubr.msk.bf16.gmra.mrb[4].mxu0 %vm400_vm0, %v2165_v33  ;;  %v3162_v32 = vld [vmem:[%s2970_s4 + $0xa8] sm:$0xf]  ;;  %v3166_v33 = vld [vmem:[%s2970_s4 + $0xac] sm:$0xf] }
  0x28   : > { %2490 = vmatprep.mubr.msk.bf16.mxu1 %vm400_vm0, %v2112_v34  ;;  %2550 = vmatprep.mubr.msk.bf16.mxu0 %vm400_vm0, %v2166_v35  ;;  %v3169_v34 = vld [vmem:[%s2970_s4 + $0xb0] sm:$0xf] }
  0x29   : > { %2595 = vmatpush3.bf16.msra.mxu0 %v2810_v31  ;;  %2658 = vmatpush3.bf16.msra.mxu1 %v2954_v5  ;;  %v2120_v5 = vcombine.low %v3079_v1, %v3082_v2  ;;  %v3159_v31 = vld [vmem:[%s2970_s4 + $0xa4] sm:$0xf]  ;;  %v2128_v37 = vcombine.low %v3166_v33, %v3169_v34 }
  0x2a   : > { %2596 = vmatprep.subr.bf16.mxu0 %v2815_v36  ;;  %2653 = vmatprep.subr.bf16.mxu1 %v2965_v7  ;;  %v2127_v35 = vcombine.low %v3159_v31, %v3162_v32 }
  0x2d   : > { %2597 = vmatpush3.bf16.msra.mxu0 %v2815_v36  ;;  %2659 = vmatpush3.bf16.msra.mxu1 %v2965_v7  ;;  %v3093_v7 = vld [vmem:[%s2970_s4 + $0x74] sm:$0xf] }
  0x2e   : > { %2598 = vmatprep.subr.bf16.mxu0 %v2820_v41  ;;  %2654 = vmatprep.subr.bf16.mxu1 %v2982_v11  ;;  %v2842_v36 = vld [vmem:[%s2970_s4 + $0x50] sm:$0xff]  }
  0x2f   : > { %2491 = vmatmul.mubr.msk.bf16.gmra.mrb[8].mxu1 %vm400_vm0, %v2113_v42  ;;  %2551 = vmatmul.mubr.msk.bf16.gmra.mrb[8].mxu0 %vm400_vm0, %v2167_v43  ;;  %v228_v42 = vld [vmem:[%s2970_s4 + $0xc0] sm:$0xf]  ;;  %v2129_v43 = vcombine.low %v213_v39, %v3182_v40 }
  0x30   : > { %2494 = vmatprep.mubr.msk.bf16.mxu1 %vm400_vm0, %v2114_v44  ;;  %2554 = vmatprep.mubr.msk.bf16.mxu0 %vm400_vm0, %v2168_v45  ;;  %v2846_v44 = vld [vmem:[%s2970_s4 + $0x60] sm:$0xff]  }
  0x31   : > { %2599 = vmatpush3.bf16.msra.mxu0 %v2820_v41  ;;  %2660 = vmatpush3.bf16.msra.mxu1 %v2982_v11  ;;  %v2121_v11 = vcombine.low %v3093_v7, %v3096_v8  ;;  %v215_v41 = vld [vmem:[%s2970_s4 + $0xbc] sm:$0xf]  ;;  %v2873_v8 = vld [vmem:[%s2970_s4 + $0xd0] sm:$0xff]  }
  0x32   : > { %2600 = vmatprep.subr.bf16.mxu0 %v2825_v46  ;;  %2655 = vmatprep.subr.bf16.mxu1 %v2994_v15  ;;  %v2130_v45 = vcombine.low %v215_v41, %v228_v42 }
  0x35   : > { %2601 = vmatpush3.bf16.msra.mxu0 %v2825_v46  ;;  %2661 = vmatpush3.bf16.msra.mxu1 %v2994_v15  ;;  %v3115_v15 = vld [vmem:[%s2970_s4 + $0x84] sm:$0xf]  ;;  %v2848_v46 = vld [vmem:[%s2970_s4 + $0x68] sm:$0xff]  }
  0x36   : > { %v2123_v19 = vcombine.low %v3115_v15, %v3118_v16  ;;  %v2178_v57 = vcombine.low %v3103_v10, %v3115_v15 }
  0x37   : > { %2495 = vmatmul.mubr.msk.bf16.gmra.mrb[12].mxu1 %vm400_vm0, %v2115_v51  ;;  %2555 = vmatmul.mubr.msk.bf16.gmra.mrb[12].mxu0 %vm400_vm0, %v2169_v52  ;;  %v2175_v51 = vcombine.low %v3075_v0, %v3079_v1  ;;  %v2853_v52 = vld [vmem:[%s2970_s4 + $0x80] sm:$0xff]   ;;  %v2865_v0 = vld [vmem:[%s2970_s4 + $0xb0] sm:$0xff]   ;;  %v2182_v1 = vcombine.low %v3147_v26, %v3159_v31 }
  0x38   : > { %2498 = vmatprep.mubr.msk.bf16.mxu1 %vm400_vm0, %v2116_v53  ;;  %2558 = vmatprep.mubr.msk.bf16.mxu0 %vm400_vm0, %v2170_v54  ;;  %v2176_v53 = vcombine.low %v3082_v2, %v3093_v7  ;;  %v2855_v54 = vld [vmem:[%s2970_s4 + $0x88] sm:$0xff]   ;;  %v2867_v2 = vld [vmem:[%s2970_s4 + $0xb8] sm:$0xff]   ;;  %v2185_v7 = vcombine.low %v3182_v40, %v215_v41 }
  0x3f   : > { %2499 = vmatmul.mubr.msk.bf16.gmra.mrb[16].mxu1 %vm400_vm0, %v2117_v59  ;;  %2559 = vmatmul.mubr.msk.bf16.gmra.mrb[16].mxu0 %vm400_vm0, %v2171_v60  ;;  %v2179_v59 = vcombine.low %v3118_v16, %v3122_v17  ;;  %v2861_v60 = vld [vmem:[%s2970_s4 + $0xa0] sm:$0xff]  }
  0x40   : > { %2502 = vmatprep.mubr.msk.bf16.mxu1 %vm400_vm0, %v2118_v61  ;;  %2562 = vmatprep.mubr.msk.bf16.mxu0 %vm400_vm0, %v2172_v62  ;;  %v2180_v61 = vcombine.low %v3125_v18, %v3137_v23  ;;  %v2863_v62 = vld [vmem:[%s2970_s4 + $0xa8] sm:$0xff]  }
  0x47   : > { %2503 = vmatmul.mubr.msk.bf16.gmra.mrb[20].mxu1 %vm400_vm0, %v2119_v3  ;;  %2563 = vmatmul.mubr.msk.bf16.gmra.mrb[20].mxu0 %vm400_vm0, %v2173_v4  ;;  %v2183_v3 = vcombine.low %v3162_v32, %v3166_v33  ;;  %v2869_v4 = vld [vmem:[%s2970_s4 + $0xc0] sm:$0xff]  }
  0x48   : > { %2506 = vmatprep.mubr.msk.bf16.mxu1 %vm400_vm0, %v2120_v5  ;;  %2602 = vmatprep.mubr.msk.bf16.mxu0 %vm400_vm0, %v2828_v6  ;;  %v2184_v5 = vcombine.low %v3169_v34, %v213_v39  ;;  %v2871_v6 = vld [vmem:[%s2970_s4 + $0xc8] sm:$0xff]   ;;  %s3292_s4 = scalar_lea.vmem %s3417_s2, %s2759_s29 }
  0x4f   : > { %2507 = vmatmul.mubr.msk.bf16.gmra.mrb[24].mxu1 %vm400_vm0, %v2121_v11  ;;  %2603 = vmatmul.mubr.msk.bf16.vlgmr.msra.gmra.mrb[0].mxu0 %vm400_vm0, %v2830_v12 }
  0x50   : > { %2510 = vmatprep.mubr.msk.bf16.mxu1 %vm400_vm0, %v2122_v13  ;;  %2606 = vmatprep.mubr.msk.bf16.mxu0 %vm400_vm0, %v2832_v14 }
  0x57   : > { %2511 = vmatmul.mubr.msk.bf16.gmra.mrb[28].mxu1 %vm400_vm0, %v2123_v19  ;;  %2607 = vmatmul.mubr.msk.bf16.gmra.mrb[4].mxu0 %vm400_vm0, %v2834_v20 }
  0x58   : > { %2514 = vmatprep.mubr.msk.bf16.mxu1 %vm400_vm0, %v2124_v21  ;;  %2610 = vmatprep.mubr.msk.bf16.mxu0 %vm400_vm0, %v2836_v22 }
  0x5f   : > { %2515 = vmatmul.mubr.msk.bf16.gmra.mrb[32].mxu1 %vm400_vm0, %v2125_v27  ;;  %2611 = vmatmul.mubr.msk.bf16.gmra.mrb[8].mxu0 %vm400_vm0, %v2838_v28 }
  0x60   : > { %2518 = vmatprep.mubr.msk.bf16.mxu1 %vm400_vm0, %v2126_v29  ;;  %2614 = vmatprep.mubr.msk.bf16.mxu0 %vm400_vm0, %v2840_v30 }
  0x67   : > { %2519 = vmatmul.mubr.msk.bf16.gmra.mrb[36].mxu1 %vm400_vm0, %v2127_v35  ;;  %2615 = vmatmul.mubr.msk.bf16.gmra.mrb[12].mxu0 %vm400_vm0, %v2842_v36 }
  0x68   : > { %2522 = vmatprep.mubr.msk.bf16.mxu1 %vm400_vm0, %v2128_v37  ;;  %2618 = vmatprep.mubr.msk.bf16.mxu0 %vm400_vm0, %v2844_v38 }
  0x6f   : > { %2523 = vmatmul.mubr.msk.bf16.gmra.mrb[40].mxu1 %vm400_vm0, %v2129_v43  ;;  %2619 = vmatmul.mubr.msk.bf16.gmra.mrb[16].mxu0 %vm400_vm0, %v2846_v44 }
  0x70   : > { %2526 = vmatprep.mubr.msk.bf16.mxu1 %vm400_vm0, %v2130_v45  ;;  %2622 = vmatprep.mubr.msk.bf16.mxu0 %vm400_vm0, %v2848_v46 }
  0x77   : > { %2527 = vmatmul.mubr.msk.bf16.gmra.mrb[44].mxu1 %vm400_vm0, %v2849_v47  ;;  %2623 = vmatmul.mubr.msk.bf16.gmra.mrb[20].mxu0 %vm400_vm0, %v2850_v48 }
  0x78   : > { %2566 = vmatprep.mubr.msk.bf16.mxu1 %vm400_vm0, %v2174_v49  ;;  %2626 = vmatprep.mubr.msk.bf16.mxu0 %vm400_vm0, %v2852_v50 }
  0x7f   : > { %2567 = vmatmul.mubr.msk.bf16.vlgmr.msra.gmra.mrb[24].mxu1 %vm400_vm0, %v2175_v51  ;;  %2627 = vmatmul.mubr.msk.bf16.gmra.mrb[24].mxu0 %vm400_vm0, %v2853_v52 }
  0x80   : > { %2570 = vmatprep.mubr.msk.bf16.mxu1 %vm400_vm0, %v2176_v53  ;;  %2630 = vmatprep.mubr.msk.bf16.mxu0 %vm400_vm0, %v2855_v54 }
  0x87   : > { %2571 = vmatmul.mubr.msk.bf16.gmra.mrb[28].mxu1 %vm400_vm0, %v2177_v55  ;;  %2631 = vmatmul.mubr.msk.bf16.gmra.mrb[28].mxu0 %vm400_vm0, %v2857_v56 }
  0x88   : > { %2574 = vmatprep.mubr.msk.bf16.mxu1 %vm400_vm0, %v2178_v57  ;;  %2634 = vmatprep.mubr.msk.bf16.mxu0 %vm400_vm0, %v2859_v58 }
  0x8f   : > { %2575 = vmatmul.mubr.msk.bf16.gmra.mrb[32].mxu1 %vm400_vm0, %v2179_v59  ;;  %2635 = vmatmul.mubr.msk.bf16.gmra.mrb[32].mxu0 %vm400_vm0, %v2861_v60 }
  0x90   : > { %2578 = vmatprep.mubr.msk.bf16.mxu1 %vm400_vm0, %v2180_v61  ;;  %2638 = vmatprep.mubr.msk.bf16.mxu0 %vm400_vm0, %v2863_v62 }
  0x97   : > { %2579 = vmatmul.mubr.msk.bf16.gmra.mrb[36].mxu1 %vm400_vm0, %v2181_v63  ;;  %2639 = vmatmul.mubr.msk.bf16.gmra.mrb[36].mxu0 %vm400_vm0, %v2865_v0 }
  0x98   : > { %2582 = vmatprep.mubr.msk.bf16.mxu1 %vm400_vm0, %v2182_v1  ;;  %2642 = vmatprep.mubr.msk.bf16.mxu0 %vm400_vm0, %v2867_v2 }
  0x9f   : > { %2583 = vmatmul.mubr.msk.bf16.gmra.mrb[40].mxu1 %vm400_vm0, %v2183_v3  ;;  %2643 = vmatmul.mubr.msk.bf16.gmra.mrb[40].mxu0 %vm400_vm0, %v2869_v4 }
  0xa0   : > { %2586 = vmatprep.mubr.msk.bf16.mxu1 %vm400_vm0, %v2184_v5  ;;  %2646 = vmatprep.mubr.msk.bf16.mxu0 %vm400_vm0, %v2871_v6 }
  0xa7   : > { %2587 = vmatmul.mubr.msk.bf16.gmra.mrb[44].mxu1 %vm400_vm0, %v2185_v7  ;;  %2647 = vmatmul.mubr.msk.bf16.gmra.mrb[44].mxu0 %vm400_vm0, %v2873_v8 }
  0xf2   : > { %v2484_v9 = vpop.f32.mrb[0].mxu1 }
  0xf3   : > { %v507_v10 = vpop.f32.mrb[1].mxu1 }
  0xf4   : > { %v2485_v11 = vpop.f32.mrb[2].mxu1 }
  0xf5   : > { %v510_v12 = vpop.f32.mrb[3].mxu1 }
  0xfa   : > { %v2488_v13 = vpop.f32.mrb[4].mxu1 }
  0xfb   : > { %v523_v14 = vpop.f32.mrb[5].mxu1 }
  0xfc   : > { %v2489_v15 = vpop.f32.mrb[6].mxu1 }
  0xfd   : > { %v526_v16 = vpop.f32.mrb[7].mxu1 }
 0x102   : > { %v3256_v17 = vpop.f32.mrb[8].mxu1 }
 0x103   : > { %v3258_v18 = vpop.f32.mrb[9].mxu1 }
 0x104   : > { %v3260_v19 = vpop.f32.mrb[10].mxu1 }
 0x105   : > { %v3262_v20 = vpop.f32.mrb[11].mxu1 }
 0x10a   : > { %v3264_v21 = vpop.f32.mrb[12].mxu1 }
 0x10b   : > { %v3266_v22 = vpop.f32.mrb[13].mxu1 }
 0x10c   : > { %v3268_v23 = vpop.f32.mrb[14].mxu1 }
 0x10d   : > { %v3270_v24 = vpop.f32.mrb[15].mxu1 }
 0x112   : > { %v3272_v25 = vpop.f32.mrb[16].mxu1 }
 0x113   : > { %v3274_v26 = vpop.f32.mrb[17].mxu1 }
 0x114   : > { %v3276_v27 = vpop.f32.mrb[18].mxu1 }
 0x115   : > { %v3278_v28 = vpop.f32.mrb[19].mxu1 }
 0x11a   : > { %v3280_v29 = vpop.f32.mrb[20].mxu1 }
 0x11b   : > { %v3282_v30 = vpop.f32.mrb[21].mxu1 }
 0x11c   : > { %v3284_v31 = vpop.f32.mrb[22].mxu1 }
 0x11d   : > { %v3286_v32 = vpop.f32.mrb[23].mxu1 }
 0x122   : > { %v2604_v33 = vpop.f32.mrb[0].mxu0 }
 0x123   : > { %v2662_v34 = vadd.f32 %v2604_v33, %v2484_v9  ;;  %v1384_v35 = vpop.f32.mrb[1].mxu0 }
 0x124   : > { %v2663_v36 = vadd.f32 %v1384_v35, %v507_v10  ;;  %v2605_v37 = vpop.f32.mrb[2].mxu0 }
 0x125   : > { %vm1625_vm1 = vcmp.ge.f32.partialorder %v2662_v34, 0.0  ;;  %v1673_v38 = vmul.f32 0.2, %v2662_v34  ;;  %v2664_v39 = vadd.f32 %v2605_v37, %v2485_v11  ;;  %v1387_v40 = vpop.f32.mrb[3].mxu0 }
 0x126   : > { %vm1623_vm2 = vcmp.ge.f32.partialorder %v2663_v36, 0.0  ;;  %v1671_v41 = vmul.f32 0.2, %v2663_v36  ;;  %v2665_v42 = vadd.f32 %v1387_v40, %v510_v12 }
 0x127   : > { %v1721_v43 = vsel %vm1625_vm1, %v2662_v34, %v1673_v38  ;;  %vm1626_vm4 = vcmp.ge.f32.partialorder %v2664_v39, 0.0  ;;  %v1674_v44 = vmul.f32 0.2, %v2664_v39 }
 0x128   : > { %v2334_v45 = vpack.c.bf16 %v1721_v43, %v1721_v43  ;;  %v1719_v46 = vsel %vm1623_vm2, %v2663_v36, %v1671_v41  ;;  %vm1624_vm5 = vcmp.ge.f32.partialorder %v2665_v42, 0.0  ;;  %v1672_v47 = vmul.f32 0.2, %v2665_v42 }
 0x129   : > { %v2332_v48 = vpack.c.bf16 %v1719_v46, %v1719_v46  ;;  %v1722_v49 = vsel %vm1626_vm4, %v2664_v39, %v1674_v44 }
 0x12a   : > { %1962 = vst.msk [vmem:[%s3292_s4 + $0x8] sm:$0xf] %vm1959_vm3, %v2334_v45  ;;  %v2335_v50 = vpack.c.bf16 %v1722_v49, %v1722_v49  ;;  %v1720_v51 = vsel %vm1624_vm5, %v2665_v42, %v1672_v47  ;;  %v2608_v52 = vpop.f32.mrb[4].mxu0 }
 0x12b   : > { %1960 = vst.msk [vmem:[%s3292_s4] sm:$0xf] %vm1959_vm3, %v2332_v48  ;;  %v2333_v53 = vpack.c.bf16 %v1720_v51, %v1720_v51  ;;  %v2666_v54 = vadd.f32 %v2608_v52, %v2488_v13  ;;  %v1400_v55 = vpop.f32.mrb[5].mxu0 }
 0x12c   : > { %1963 = vst.msk [vmem:[%s3292_s4 + $0xc] sm:$0xf] %vm1959_vm3, %v2335_v50  ;;  %v2667_v56 = vadd.f32 %v1400_v55, %v523_v14  ;;  %v2609_v57 = vpop.f32.mrb[6].mxu0 }
 0x12d   : > { %1961 = vst.msk [vmem:[%s3292_s4 + $0x4] sm:$0xf] %vm1959_vm3, %v2333_v53  ;;  %vm1629_vm6 = vcmp.ge.f32.partialorder %v2666_v54, 0.0  ;;  %v1677_v58 = vmul.f32 0.2, %v2666_v54  ;;  %v2668_v59 = vadd.f32 %v2609_v57, %v2489_v15  ;;  %v1403_v60 = vpop.f32.mrb[7].mxu0 }
 0x12e   : > { %vm1627_vm7 = vcmp.ge.f32.partialorder %v2667_v56, 0.0  ;;  %v1675_v61 = vmul.f32 0.2, %v2667_v56  ;;  %v2669_v62 = vadd.f32 %v1403_v60, %v526_v16 }
 0x12f   : > { %v1725_v63 = vsel %vm1629_vm6, %v2666_v54, %v1677_v58  ;;  %vm1630_vm8 = vcmp.ge.f32.partialorder %v2668_v59, 0.0  ;;  %v1678_v0 = vmul.f32 0.2, %v2668_v59 }
 0x130   : > { %v2338_v1 = vpack.c.bf16 %v1725_v63, %v1725_v63  ;;  %v1723_v2 = vsel %vm1627_vm7, %v2667_v56, %v1675_v61  ;;  %vm1628_vm9 = vcmp.ge.f32.partialorder %v2669_v62, 0.0  ;;  %v1676_v3 = vmul.f32 0.2, %v2669_v62 }
 0x131   : > { %v2336_v4 = vpack.c.bf16 %v1723_v2, %v1723_v2  ;;  %v1726_v5 = vsel %vm1630_vm8, %v2668_v59, %v1678_v0 }
 0x132   : > { %1966 = vst.msk [vmem:[%s3292_s4 + $0x18] sm:$0xf] %vm1959_vm3, %v2338_v1  ;;  %v2339_v6 = vpack.c.bf16 %v1726_v5, %v1726_v5  ;;  %v1724_v7 = vsel %vm1628_vm9, %v2669_v62, %v1676_v3  ;;  %v2612_v8 = vpop.f32.mrb[8].mxu0 }
 0x133   : > { %1964 = vst.msk [vmem:[%s3292_s4 + $0x10] sm:$0xf] %vm1959_vm3, %v2336_v4  ;;  %v2337_v9 = vpack.c.bf16 %v1724_v7, %v1724_v7  ;;  %v2670_v10 = vadd.f32 %v2612_v8, %v3256_v17  ;;  %v1416_v11 = vpop.f32.mrb[9].mxu0 }
 0x134   : > { %1967 = vst.msk [vmem:[%s3292_s4 + $0x1c] sm:$0xf] %vm1959_vm3, %v2339_v6  ;;  %v2671_v12 = vadd.f32 %v1416_v11, %v3258_v18  ;;  %v2613_v13 = vpop.f32.mrb[10].mxu0 }
 0x135   : > { %1965 = vst.msk [vmem:[%s3292_s4 + $0x14] sm:$0xf] %vm1959_vm3, %v2337_v9  ;;  %vm1633_vm10 = vcmp.ge.f32.partialorder %v2670_v10, 0.0  ;;  %v1681_v14 = vmul.f32 0.2, %v2670_v10  ;;  %v2672_v15 = vadd.f32 %v2613_v13, %v3260_v19  ;;  %v1419_v16 = vpop.f32.mrb[11].mxu0 }
 0x136   : > { %vm1631_vm11 = vcmp.ge.f32.partialorder %v2671_v12, 0.0  ;;  %v1679_v33 = vmul.f32 0.2, %v2671_v12  ;;  %v2673_v34 = vadd.f32 %v1419_v16, %v3262_v20 }
 0x137   : > { %v1729_v17 = vsel %vm1633_vm10, %v2670_v10, %v1681_v14  ;;  %vm1634_vm12 = vcmp.ge.f32.partialorder %v2672_v15, 0.0  ;;  %v1682_v35 = vmul.f32 0.2, %v2672_v15 }
 0x138   : > { %v2342_v36 = vpack.c.bf16 %v1729_v17, %v1729_v17  ;;  %v1727_v18 = vsel %vm1631_vm11, %v2671_v12, %v1679_v33  ;;  %vm1632_vm13 = vcmp.ge.f32.partialorder %v2673_v34, 0.0  ;;  %v1680_v37 = vmul.f32 0.2, %v2673_v34 }
 0x139   : > { %v2340_v38 = vpack.c.bf16 %v1727_v18, %v1727_v18  ;;  %v1730_v39 = vsel %vm1634_vm12, %v2672_v15, %v1682_v35 }
 0x13a   : > { %1970 = vst.msk [vmem:[%s3292_s4 + $0x28] sm:$0xf] %vm1959_vm3, %v2342_v36  ;;  %v2343_v19 = vpack.c.bf16 %v1730_v39, %v1730_v39  ;;  %v1728_v40 = vsel %vm1632_vm13, %v2673_v34, %v1680_v37  ;;  %v2616_v41 = vpop.f32.mrb[12].mxu0 }
 0x13b   : > { %1968 = vst.msk [vmem:[%s3292_s4 + $0x20] sm:$0xf] %vm1959_vm3, %v2340_v38  ;;  %v2341_v42 = vpack.c.bf16 %v1728_v40, %v1728_v40  ;;  %v2674_v20 = vadd.f32 %v2616_v41, %v3264_v21  ;;  %v1432_v43 = vpop.f32.mrb[13].mxu0 }
 0x13c   : > { %1971 = vst.msk [vmem:[%s3292_s4 + $0x2c] sm:$0xf] %vm1959_vm3, %v2343_v19  ;;  %v2675_v44 = vadd.f32 %v1432_v43, %v3266_v22  ;;  %v2617_v45 = vpop.f32.mrb[14].mxu0 }
 0x13d   : > { %1969 = vst.msk [vmem:[%s3292_s4 + $0x24] sm:$0xf] %vm1959_vm3, %v2341_v42  ;;  %vm1637_vm14 = vcmp.ge.f32.partialorder %v2674_v20, 0.0  ;;  %v1685_v46 = vmul.f32 0.2, %v2674_v20  ;;  %v2676_v47 = vadd.f32 %v2617_v45, %v3268_v23  ;;  %v1435_v48 = vpop.f32.mrb[15].mxu0 }
 0x13e   : > { %vm1635_vm15 = vcmp.ge.f32.partialorder %v2675_v44, 0.0  ;;  %v1683_v49 = vmul.f32 0.2, %v2675_v44  ;;  %v2677_v50 = vadd.f32 %v1435_v48, %v3270_v24 }
 0x13f   : > { %v1733_v21 = vsel %vm1637_vm14, %v2674_v20, %v1685_v46  ;;  %vm1638_vm0 = vcmp.ge.f32.partialorder %v2676_v47, 0.0  ;;  %v1686_v51 = vmul.f32 0.2, %v2676_v47 }
 0x140   : > { %v2346_v52 = vpack.c.bf16 %v1733_v21, %v1733_v21  ;;  %v1731_v22 = vsel %vm1635_vm15, %v2675_v44, %v1683_v49  ;;  %vm1636_vm1 = vcmp.ge.f32.partialorder %v2677_v50, 0.0  ;;  %v1684_v53 = vmul.f32 0.2, %v2677_v50 }
 0x141   : > { %v2344_v54 = vpack.c.bf16 %v1731_v22, %v1731_v22  ;;  %v1734_v55 = vsel %vm1638_vm0, %v2676_v47, %v1686_v51 }
 0x142   : > { %1974 = vst.msk [vmem:[%s3292_s4 + $0x38] sm:$0xf] %vm1959_vm3, %v2346_v52  ;;  %v2347_v23 = vpack.c.bf16 %v1734_v55, %v1734_v55  ;;  %v1732_v56 = vsel %vm1636_vm1, %v2677_v50, %v1684_v53  ;;  %v2620_v57 = vpop.f32.mrb[16].mxu0 }
 0x143   : > { %1972 = vst.msk [vmem:[%s3292_s4 + $0x30] sm:$0xf] %vm1959_vm3, %v2344_v54  ;;  %v2345_v58 = vpack.c.bf16 %v1732_v56, %v1732_v56  ;;  %v2678_v24 = vadd.f32 %v2620_v57, %v3272_v25  ;;  %v1448_v59 = vpop.f32.mrb[17].mxu0 }
 0x144   : > { %1975 = vst.msk [vmem:[%s3292_s4 + $0x3c] sm:$0xf] %vm1959_vm3, %v2347_v23  ;;  %v2679_v60 = vadd.f32 %v1448_v59, %v3274_v26  ;;  %v2621_v61 = vpop.f32.mrb[18].mxu0 }
 0x145   : > { %1973 = vst.msk [vmem:[%s3292_s4 + $0x34] sm:$0xf] %vm1959_vm3, %v2345_v58  ;;  %vm1641_vm2 = vcmp.ge.f32.partialorder %v2678_v24, 0.0  ;;  %v1689_v62 = vmul.f32 0.2, %v2678_v24  ;;  %v2680_v63 = vadd.f32 %v2621_v61, %v3276_v27  ;;  %v1451_v0 = vpop.f32.mrb[19].mxu0 }
 0x146   : > { %vm1639_vm4 = vcmp.ge.f32.partialorder %v2679_v60, 0.0  ;;  %v1687_v1 = vmul.f32 0.2, %v2679_v60  ;;  %v2681_v2 = vadd.f32 %v1451_v0, %v3278_v28 }
 0x147   : > { %v1737_v25 = vsel %vm1641_vm2, %v2678_v24, %v1689_v62  ;;  %vm1642_vm5 = vcmp.ge.f32.partialorder %v2680_v63, 0.0  ;;  %v1690_v3 = vmul.f32 0.2, %v2680_v63 }
 0x148   : > { %v2350_v4 = vpack.c.bf16 %v1737_v25, %v1737_v25  ;;  %v1735_v26 = vsel %vm1639_vm4, %v2679_v60, %v1687_v1  ;;  %vm1640_vm6 = vcmp.ge.f32.partialorder %v2681_v2, 0.0  ;;  %v1688_v5 = vmul.f32 0.2, %v2681_v2 }
 0x149   : > { %v2348_v6 = vpack.c.bf16 %v1735_v26, %v1735_v26  ;;  %v1738_v7 = vsel %vm1642_vm5, %v2680_v63, %v1690_v3 }
 0x14a   : > { %1978 = vst.msk [vmem:[%s3292_s4 + $0x48] sm:$0xf] %vm1959_vm3, %v2350_v4  ;;  %v2351_v27 = vpack.c.bf16 %v1738_v7, %v1738_v7  ;;  %v1736_v8 = vsel %vm1640_vm6, %v2681_v2, %v1688_v5  ;;  %v2624_v9 = vpop.f32.mrb[20].mxu0 }
 0x14b   : > { %1976 = vst.msk [vmem:[%s3292_s4 + $0x40] sm:$0xf] %vm1959_vm3, %v2348_v6  ;;  %v2349_v10 = vpack.c.bf16 %v1736_v8, %v1736_v8  ;;  %v2682_v28 = vadd.f32 %v2624_v9, %v3280_v29  ;;  %v1464_v11 = vpop.f32.mrb[21].mxu0 }
 0x14c   : > { %1979 = vst.msk [vmem:[%s3292_s4 + $0x4c] sm:$0xf] %vm1959_vm3, %v2351_v27  ;;  %v2683_v12 = vadd.f32 %v1464_v11, %v3282_v30  ;;  %v2625_v13 = vpop.f32.mrb[22].mxu0 }
 0x14d   : > { %1977 = vst.msk [vmem:[%s3292_s4 + $0x44] sm:$0xf] %vm1959_vm3, %v2349_v10  ;;  %vm1645_vm7 = vcmp.ge.f32.partialorder %v2682_v28, 0.0  ;;  %v1693_v14 = vmul.f32 0.2, %v2682_v28  ;;  %v2684_v15 = vadd.f32 %v2625_v13, %v3284_v31  ;;  %v1467_v16 = vpop.f32.mrb[23].mxu0 }
 0x14e   : > { %vm1643_vm8 = vcmp.ge.f32.partialorder %v2683_v12, 0.0  ;;  %v1691_v33 = vmul.f32 0.2, %v2683_v12  ;;  %v2685_v34 = vadd.f32 %v1467_v16, %v3286_v32 }
 0x14f   : > { %v1741_v29 = vsel %vm1645_vm7, %v2682_v28, %v1693_v14  ;;  %vm1646_vm9 = vcmp.ge.f32.partialorder %v2684_v15, 0.0  ;;  %v1694_v17 = vmul.f32 0.2, %v2684_v15 }
 0x150   : > { %v2354_v35 = vpack.c.bf16 %v1741_v29, %v1741_v29  ;;  %v1739_v36 = vsel %vm1643_vm8, %v2683_v12, %v1691_v33  ;;  %vm1644_vm10 = vcmp.ge.f32.partialorder %v2685_v34, 0.0  ;;  %v1692_v30 = vmul.f32 0.2, %v2685_v34 }
 0x151   : > { %v2352_v18 = vpack.c.bf16 %v1739_v36, %v1739_v36  ;;  %v1742_v37 = vsel %vm1646_vm9, %v2684_v15, %v1694_v17 }
 0x152   : > { %v2568_v38 = vpop.f32.mrb[24].mxu1  ;;  %1982 = vst.msk [vmem:[%s3292_s4 + $0x58] sm:$0xf] %vm1959_vm3, %v2354_v35  ;;  %v2355_v31 = vpack.c.bf16 %v1742_v37, %v1742_v37  ;;  %v1740_v39 = vsel %vm1644_vm10, %v2685_v34, %v1692_v30  ;;  %v2628_v19 = vpop.f32.mrb[24].mxu0 }
 0x153   : > { %v966_v40 = vpop.f32.mrb[25].mxu1  ;;  %1980 = vst.msk [vmem:[%s3292_s4 + $0x50] sm:$0xf] %vm1959_vm3, %v2352_v18  ;;  %v2353_v32 = vpack.c.bf16 %v1740_v39, %v1740_v39  ;;  %v2686_v41 = vadd.f32 %v2628_v19, %v2568_v38  ;;  %v1480_v42 = vpop.f32.mrb[25].mxu0 }
 0x154   : > { %v2569_v20 = vpop.f32.mrb[26].mxu1  ;;  %1983 = vst.msk [vmem:[%s3292_s4 + $0x5c] sm:$0xf] %vm1959_vm3, %v2355_v31  ;;  %v2687_v43 = vadd.f32 %v1480_v42, %v966_v40  ;;  %v2629_v44 = vpop.f32.mrb[26].mxu0 }
 0x155   : > { %v969_v45 = vpop.f32.mrb[27].mxu1  ;;  %1981 = vst.msk [vmem:[%s3292_s4 + $0x54] sm:$0xf] %vm1959_vm3, %v2353_v32  ;;  %vm1649_vm11 = vcmp.ge.f32.partialorder %v2686_v41, 0.0  ;;  %v1697_v46 = vmul.f32 0.2, %v2686_v41  ;;  %v2688_v47 = vadd.f32 %v2629_v44, %v2569_v20 }
 0x156   : > { %v1483_v48 = vpop.f32.mrb[27].mxu0  ;;  %vm1647_vm12 = vcmp.ge.f32.partialorder %v2687_v43, 0.0  ;;  %v1695_v49 = vmul.f32 0.2, %v2687_v43 }
 0x157   : > { %v2689_v50 = vadd.f32 %v1483_v48, %v969_v45  ;;  %v1745_v21 = vsel %vm1649_vm11, %v2686_v41, %v1697_v46  ;;  %vm1650_vm13 = vcmp.ge.f32.partialorder %v2688_v47, 0.0  ;;  %v1698_v51 = vmul.f32 0.2, %v2688_v47 }
 0x158   : > { %v2358_v52 = vpack.c.bf16 %v1745_v21, %v1745_v21  ;;  %v1743_v22 = vsel %vm1647_vm12, %v2687_v43, %v1695_v49 }
 0x159   : > { %vm1648_vm14 = vcmp.ge.f32.partialorder %v2689_v50, 0.0  ;;  %v1696_v53 = vmul.f32 0.2, %v2689_v50  ;;  %v2356_v54 = vpack.c.bf16 %v1743_v22, %v1743_v22  ;;  %v1746_v55 = vsel %vm1650_vm13, %v2688_v47, %v1698_v51 }
 0x15a   : > { %v2572_v23 = vpop.f32.mrb[28].mxu1  ;;  %1986 = vst.msk [vmem:[%s3292_s4 + $0x68] sm:$0xf] %vm1959_vm3, %v2358_v52  ;;  %v2359_v56 = vpack.c.bf16 %v1746_v55, %v1746_v55  ;;  %v2632_v58 = vpop.f32.mrb[28].mxu0 }
 0x15b   : > { %v1744_v57 = vsel %vm1648_vm14, %v2689_v50, %v1696_v53  ;;  %v982_v24 = vpop.f32.mrb[29].mxu1  ;;  %1984 = vst.msk [vmem:[%s3292_s4 + $0x60] sm:$0xf] %vm1959_vm3, %v2356_v54  ;;  %v2690_v60 = vadd.f32 %v2632_v58, %v2572_v23  ;;  %v1496_v61 = vpop.f32.mrb[29].mxu0 }
 0x15c   : > { %v2357_v59 = vpack.c.bf16 %v1744_v57, %v1744_v57  ;;  %v2573_v62 = vpop.f32.mrb[30].mxu1  ;;  %1987 = vst.msk [vmem:[%s3292_s4 + $0x6c] sm:$0xf] %vm1959_vm3, %v2359_v56  ;;  %v2691_v63 = vadd.f32 %v1496_v61, %v982_v24  ;;  %v2633_v0 = vpop.f32.mrb[30].mxu0 }
 0x15d   : > { %v985_v1 = vpop.f32.mrb[31].mxu1  ;;  %vm1653_vm15 = vcmp.ge.f32.partialorder %v2690_v60, 0.0  ;;  %v1701_v2 = vmul.f32 0.2, %v2690_v60  ;;  %v2692_v25 = vadd.f32 %v2633_v0, %v2573_v62  ;;  %v1499_v3 = vpop.f32.mrb[31].mxu0 }
 0x15e   : > { %1985 = vst.msk [vmem:[%s3292_s4 + $0x64] sm:$0xf] %vm1959_vm3, %v2357_v59  ;;  %vm1651_vm0 = vcmp.ge.f32.partialorder %v2691_v63, 0.0  ;;  %v1699_v4 = vmul.f32 0.2, %v2691_v63  ;;  %v2693_v26 = vadd.f32 %v1499_v3, %v985_v1 }
 0x15f   : > { %v1749_v5 = vsel %vm1653_vm15, %v2690_v60, %v1701_v2  ;;  %vm1654_vm1 = vcmp.ge.f32.partialorder %v2692_v25, 0.0  ;;  %v1702_v6 = vmul.f32 0.2, %v2692_v25 }
 0x160   : > { %v2362_v7 = vpack.c.bf16 %v1749_v5, %v1749_v5  ;;  %v1747_v27 = vsel %vm1651_vm0, %v2691_v63, %v1699_v4  ;;  %vm1652_vm2 = vcmp.ge.f32.partialorder %v2693_v26, 0.0  ;;  %v1700_v8 = vmul.f32 0.2, %v2693_v26 }
 0x161   : > { %v2360_v9 = vpack.c.bf16 %v1747_v27, %v1747_v27  ;;  %v1750_v10 = vsel %vm1654_vm1, %v2692_v25, %v1702_v6 }
 0x162   : > { %v2576_v28 = vpop.f32.mrb[32].mxu1  ;;  %1990 = vst.msk [vmem:[%s3292_s4 + $0x78] sm:$0xf] %vm1959_vm3, %v2362_v7  ;;  %v2363_v11 = vpack.c.bf16 %v1750_v10, %v1750_v10  ;;  %v1748_v12 = vsel %vm1652_vm2, %v2693_v26, %v1700_v8  ;;  %v2636_v13 = vpop.f32.mrb[32].mxu0 }
 0x163   : > { %v998_v14 = vpop.f32.mrb[33].mxu1  ;;  %1988 = vst.msk [vmem:[%s3292_s4 + $0x70] sm:$0xf] %vm1959_vm3, %v2360_v9  ;;  %v2361_v15 = vpack.c.bf16 %v1748_v12, %v1748_v12  ;;  %v2694_v16 = vadd.f32 %v2636_v13, %v2576_v28  ;;  %v1512_v33 = vpop.f32.mrb[33].mxu0 }
 0x164   : > { %v2577_v34 = vpop.f32.mrb[34].mxu1  ;;  %1991 = vst.msk [vmem:[%s3292_s4 + $0x7c] sm:$0xf] %vm1959_vm3, %v2363_v11  ;;  %v2695_v29 = vadd.f32 %v1512_v33, %v998_v14  ;;  %v2637_v17 = vpop.f32.mrb[34].mxu0 }
 0x165   : > { %v1001_v35 = vpop.f32.mrb[35].mxu1  ;;  %1989 = vst.msk [vmem:[%s3292_s4 + $0x74] sm:$0xf] %vm1959_vm3, %v2361_v15  ;;  %vm1657_vm4 = vcmp.ge.f32.partialorder %v2694_v16, 0.0  ;;  %v1705_v36 = vmul.f32 0.2, %v2694_v16  ;;  %v2696_v30 = vadd.f32 %v2637_v17, %v2577_v34 }
 0x166   : > { %v1515_v18 = vpop.f32.mrb[35].mxu0  ;;  %vm1655_vm5 = vcmp.ge.f32.partialorder %v2695_v29, 0.0  ;;  %v1703_v37 = vmul.f32 0.2, %v2695_v29 }
 0x167   : > { %v2697_v38 = vadd.f32 %v1515_v18, %v1001_v35  ;;  %v1753_v31 = vsel %vm1657_vm4, %v2694_v16, %v1705_v36  ;;  %vm1658_vm6 = vcmp.ge.f32.partialorder %v2696_v30, 0.0  ;;  %v1706_v39 = vmul.f32 0.2, %v2696_v30 }
 0x168   : > { %v2366_v19 = vpack.c.bf16 %v1753_v31, %v1753_v31  ;;  %v1751_v40 = vsel %vm1655_vm5, %v2695_v29, %v1703_v37 }
 0x169   : > { %vm1656_vm7 = vcmp.ge.f32.partialorder %v2697_v38, 0.0  ;;  %v1704_v32 = vmul.f32 0.2, %v2697_v38  ;;  %v2364_v41 = vpack.c.bf16 %v1751_v40, %v1751_v40  ;;  %v1754_v42 = vsel %vm1658_vm6, %v2696_v30, %v1706_v39 }
 0x16a   : > { %v2580_v20 = vpop.f32.mrb[36].mxu1  ;;  %1994 = vst.msk [vmem:[%s3292_s4 + $0x88] sm:$0xf] %vm1959_vm3, %v2366_v19  ;;  %v2367_v43 = vpack.c.bf16 %v1754_v42, %v1754_v42  ;;  %v2640_v45 = vpop.f32.mrb[36].mxu0 }
 0x16b   : > { %v1752_v44 = vsel %vm1656_vm7, %v2697_v38, %v1704_v32  ;;  %v1014_v46 = vpop.f32.mrb[37].mxu1  ;;  %1992 = vst.msk [vmem:[%s3292_s4 + $0x80] sm:$0xf] %vm1959_vm3, %v2364_v41  ;;  %v2698_v48 = vadd.f32 %v2640_v45, %v2580_v20  ;;  %v1528_v49 = vpop.f32.mrb[37].mxu0 }
 0x16c   : > { %v2365_v47 = vpack.c.bf16 %v1752_v44, %v1752_v44  ;;  %v2581_v50 = vpop.f32.mrb[38].mxu1  ;;  %1995 = vst.msk [vmem:[%s3292_s4 + $0x8c] sm:$0xf] %vm1959_vm3, %v2367_v43  ;;  %v2699_v21 = vadd.f32 %v1528_v49, %v1014_v46  ;;  %v2641_v51 = vpop.f32.mrb[38].mxu0 }
 0x16d   : > { %v1017_v52 = vpop.f32.mrb[39].mxu1  ;;  %vm1661_vm8 = vcmp.ge.f32.partialorder %v2698_v48, 0.0  ;;  %v1709_v22 = vmul.f32 0.2, %v2698_v48  ;;  %v2700_v53 = vadd.f32 %v2641_v51, %v2581_v50  ;;  %v1531_v54 = vpop.f32.mrb[39].mxu0 }
 0x16e   : > { %1993 = vst.msk [vmem:[%s3292_s4 + $0x84] sm:$0xf] %vm1959_vm3, %v2365_v47  ;;  %vm1659_vm9 = vcmp.ge.f32.partialorder %v2699_v21, 0.0  ;;  %v1707_v55 = vmul.f32 0.2, %v2699_v21  ;;  %v2701_v23 = vadd.f32 %v1531_v54, %v1017_v52 }
 0x16f   : > { %v1757_v56 = vsel %vm1661_vm8, %v2698_v48, %v1709_v22  ;;  %vm1662_vm10 = vcmp.ge.f32.partialorder %v2700_v53, 0.0  ;;  %v1710_v57 = vmul.f32 0.2, %v2700_v53 }
 0x170   : > { %v2370_v58 = vpack.c.bf16 %v1757_v56, %v1757_v56  ;;  %v1755_v24 = vsel %vm1659_vm9, %v2699_v21, %v1707_v55  ;;  %vm1660_vm11 = vcmp.ge.f32.partialorder %v2701_v23, 0.0  ;;  %v1708_v59 = vmul.f32 0.2, %v2701_v23 }
 0x171   : > { %v2368_v60 = vpack.c.bf16 %v1755_v24, %v1755_v24  ;;  %v1758_v61 = vsel %vm1662_vm10, %v2700_v53, %v1710_v57 }
 0x172   : > { %v2584_v62 = vpop.f32.mrb[40].mxu1  ;;  %1998 = vst.msk [vmem:[%s3292_s4 + $0x98] sm:$0xf] %vm1959_vm3, %v2370_v58  ;;  %v2371_v63 = vpack.c.bf16 %v1758_v61, %v1758_v61  ;;  %v1756_v0 = vsel %vm1660_vm11, %v2701_v23, %v1708_v59  ;;  %v2644_v1 = vpop.f32.mrb[40].mxu0 }
 0x173   : > { %v1030_v2 = vpop.f32.mrb[41].mxu1  ;;  %1996 = vst.msk [vmem:[%s3292_s4 + $0x90] sm:$0xf] %vm1959_vm3, %v2368_v60  ;;  %v2369_v25 = vpack.c.bf16 %v1756_v0, %v1756_v0  ;;  %v2702_v3 = vadd.f32 %v2644_v1, %v2584_v62  ;;  %v1544_v4 = vpop.f32.mrb[41].mxu0 }
 0x174   : > { %v2585_v26 = vpop.f32.mrb[42].mxu1  ;;  %1999 = vst.msk [vmem:[%s3292_s4 + $0x9c] sm:$0xf] %vm1959_vm3, %v2371_v63  ;;  %v2703_v5 = vadd.f32 %v1544_v4, %v1030_v2  ;;  %v2645_v6 = vpop.f32.mrb[42].mxu0 }
 0x175   : > { %v1033_v7 = vpop.f32.mrb[43].mxu1  ;;  %1997 = vst.msk [vmem:[%s3292_s4 + $0x94] sm:$0xf] %vm1959_vm3, %v2369_v25  ;;  %vm1665_vm12 = vcmp.ge.f32.partialorder %v2702_v3, 0.0  ;;  %v1713_v27 = vmul.f32 0.2, %v2702_v3  ;;  %v2704_v8 = vadd.f32 %v2645_v6, %v2585_v26 }
 0x176   : > { %v1547_v9 = vpop.f32.mrb[43].mxu0  ;;  %vm1663_vm13 = vcmp.ge.f32.partialorder %v2703_v5, 0.0  ;;  %v1711_v10 = vmul.f32 0.2, %v2703_v5 }
 0x177   : > { %v2705_v28 = vadd.f32 %v1547_v9, %v1033_v7  ;;  %v1761_v11 = vsel %vm1665_vm12, %v2702_v3, %v1713_v27  ;;  %vm1666_vm14 = vcmp.ge.f32.partialorder %v2704_v8, 0.0  ;;  %v1714_v12 = vmul.f32 0.2, %v2704_v8 }
 0x178   : > { %v2374_v13 = vpack.c.bf16 %v1761_v11, %v1761_v11  ;;  %v1759_v14 = vsel %vm1663_vm13, %v2703_v5, %v1711_v10 }
 0x179   : > { %vm1664_vm15 = vcmp.ge.f32.partialorder %v2705_v28, 0.0  ;;  %v1712_v15 = vmul.f32 0.2, %v2705_v28  ;;  %v2372_v16 = vpack.c.bf16 %v1759_v14, %v1759_v14  ;;  %v1762_v33 = vsel %vm1666_vm14, %v2704_v8, %v1714_v12 }
 0x17a   : > { %v2588_v34 = vpop.f32.mrb[44].mxu1  ;;  %2002 = vst.msk [vmem:[%s3292_s4 + $0xa8] sm:$0xf] %vm1959_vm3, %v2374_v13  ;;  %v2375_v29 = vpack.c.bf16 %v1762_v33, %v1762_v33  ;;  %v2648_v35 = vpop.f32.mrb[44].mxu0 }
 0x17b   : > { %v1760_v17 = vsel %vm1664_vm15, %v2705_v28, %v1712_v15  ;;  %v1046_v36 = vpop.f32.mrb[45].mxu1  ;;  %2000 = vst.msk [vmem:[%s3292_s4 + $0xa0] sm:$0xf] %vm1959_vm3, %v2372_v16  ;;  %v2706_v18 = vadd.f32 %v2648_v35, %v2588_v34  ;;  %v1560_v37 = vpop.f32.mrb[45].mxu0 }
 0x17c   : > { %v2373_v30 = vpack.c.bf16 %v1760_v17, %v1760_v17  ;;  %v2589_v38 = vpop.f32.mrb[46].mxu1  ;;  %2003 = vst.msk [vmem:[%s3292_s4 + $0xac] sm:$0xf] %vm1959_vm3, %v2375_v29  ;;  %v2707_v31 = vadd.f32 %v1560_v37, %v1046_v36  ;;  %v2649_v39 = vpop.f32.mrb[46].mxu0 }
 0x17d   : > { %v1049_v19 = vpop.f32.mrb[47].mxu1  ;;  %vm1669_vm0 = vcmp.ge.f32.partialorder %v2706_v18, 0.0  ;;  %v1717_v40 = vmul.f32 0.2, %v2706_v18  ;;  %v2708_v32 = vadd.f32 %v2649_v39, %v2589_v38  ;;  %v1563_v41 = vpop.f32.mrb[47].mxu0 }
 0x17e   : > { %2001 = vst.msk [vmem:[%s3292_s4 + $0xa4] sm:$0xf] %vm1959_vm3, %v2373_v30  ;;  %vm1667_vm1 = vcmp.ge.f32.partialorder %v2707_v31, 0.0  ;;  %v1715_v42 = vmul.f32 0.2, %v2707_v31  ;;  %v2709_v20 = vadd.f32 %v1563_v41, %v1049_v19 }
 0x17f   : > { %v1765_v43 = vsel %vm1669_vm0, %v2706_v18, %v1717_v40  ;;  %vm1670_vm2 = vcmp.ge.f32.partialorder %v2708_v32, 0.0  ;;  %v1718_v44 = vmul.f32 0.2, %v2708_v32 }
 0x180   : > { %v2378_v45 = vpack.c.bf16 %v1765_v43, %v1765_v43  ;;  %v1763_v46 = vsel %vm1667_vm1, %v2707_v31, %v1715_v42  ;;  %vm1668_vm4 = vcmp.ge.f32.partialorder %v2709_v20, 0.0  ;;  %v1716_v47 = vmul.f32 0.2, %v2709_v20 }
 0x181   : > { %v2376_v48 = vpack.c.bf16 %v1763_v46, %v1763_v46  ;;  %v1766_v49 = vsel %vm1670_vm2, %v2708_v32, %v1718_v44 }
 0x182   : > { %2006 = vst.msk [vmem:[%s3292_s4 + $0xb8] sm:$0xf] %vm1959_vm3, %v2378_v45  ;;  %v2379_v50 = vpack.c.bf16 %v1766_v49, %v1766_v49  ;;  %v1764_v21 = vsel %vm1668_vm4, %v2709_v20, %v1716_v47 }
 0x183   : > { %2004 = vst.msk [vmem:[%s3292_s4 + $0xb0] sm:$0xf] %vm1959_vm3, %v2376_v48  ;;  %v2377_v51 = vpack.c.bf16 %v1764_v21, %v1764_v21 }
 0x184   : > { %2007 = vst.msk [vmem:[%s3292_s4 + $0xbc] sm:$0xf] %vm1959_vm3, %v2379_v50 }
 0x185   : > { %2005 = vst.msk [vmem:[%s3292_s4 + $0xb4] sm:$0xf] %vm1959_vm3, %v2377_v51 }
 0x186 PF: > { %s12_s11 = sadd.s32 1, %s2896_s11   ;;  %s3418_s9 = smov %s2892_s10 }
 0x187   : > { %p9_p5 = scmp.ge.s32.totalorder %s12_s11, 4   ;;  %s3419_s10 = smov %s3421_s12 }
 0x189   :  { %11 = sbr.rel (!%p9_p5) target bundleno = 2 (0x2), region = 60 }

// kernel: unet_discriminator_sn.19
= control target key start
LH: loop header
LB: loop body
LE: loop exit
PB: predicated region body
PF: predicated region fallthrough
CT: control target
= control target key end

     0   :  { %s2752_s12 = smov 0   ;;  %s2754_s13 = smov 0   ;;  %s3200_s0 = inlined_call_operand.vmem [shape: bf16[2,432,96], index: 0, kind: input, shape index: {}]   ;;  %s3201_s1 = inlined_call_operand.vmem [shape: bf16[3,96,32], index: 1, kind: input, shape index: {}]   ;;  %s3202_s2 = inlined_call_operand.vmem [shape: f32[1,32], index: 2, kind: input, shape index: {}]   ;;  %s3203_s3 = inlined_call_operand.vmem [shape: f32[2,384,32], index: 3, kind: output, shape index: {}]  }
   0x1   :  { %s2756_s14 = smov 0  }
   0x2 LB: > { %s25_s15 = sadd.s32 1, %s2726_s13  ;;  %p1974_p0 = scmp.ge.s32.totalorder %s2730_s14, 1  ;;  %s2730_s14 = sphi %s2756_s14, %s13_s14   ;;  %s2726_s13 = sphi %s2754_s13, %s3205_s13   ;;  %s2722_s12 = sphi %s2752_s12, %s3204_s12  }
   0x3   : > { %p27_p1 = scmp.ge.s32.totalorder %s25_s15, 2  ;;  %p151_p2 = scmp.lt.s32.totalorder %s2730_s14, 3 }
   0x5   : > { %s3207_s15 = smov (%p27_p1, %s25_s15), 0  ;;  %p152_p3 = pnand %p1974_p0, %p151_p2 }
   0x6   : > { %v2618_v0 = vld [vmem:[%s3201_s1] sm:$0xff] (!%p152_p3)   ;;  %p179_p4 = scmp.lt.s32.totalorder (!%p152_p3), %s2722_s12, 1  ;;  %v2619_v1 = vld [vmem:[%s3201_s1 + $0x30] sm:$0xff] (!%p152_p3)   ;;  %v2620_v2 = vld [vmem:[%s3201_s1 + $0x8] sm:$0xff] (!%p152_p3)   ;;  %vm418_vm0 = vcmask (!%p152_p3), 785408   ;;  %vm1840_vm1 = vcmask (!%p152_p3), 261120  }
   0x7   : > { %155 = sbr.rel (%p152_p3) target bundleno = 387 (0x183), region = 32  ;;  %2256 = vmatprep.subr.bf16.mxu1 (!%p152_p3), %v2618_v0  ;;  %2316 = vmatprep.subr.bf16.mxu0 (!%p152_p3), %v2619_v1  ;;  %v2621_v3 = vld [vmem:[%s3201_s1 + $0x38] sm:$0xff] (!%p152_p3)   ;;  %v2622_v4 = vld [vmem:[%s3201_s1 + $0x10] sm:$0xff] (!%p152_p3)   ;;  %v2790_v5 = vld [vmem:[%s3201_s1 + $0x40] sm:$0xff] (!%p152_p3)  }
   0x8   : > { %2257 = vmatpush3.bf16.msra.mxu1 (!%p152_p3), %v2618_v0  ;;  %2317 = vmatpush3.bf16.msra.mxu0 (!%p152_p3), %v2619_v1  ;;  %v2624_v6 = vld [vmem:[%s3201_s1 + $0x18] sm:$0xff] (!%p152_p3)   ;;  %v2800_v7 = vld [vmem:[%s3201_s1 + $0x48] sm:$0xff] (!%p152_p3)   ;;  %v2626_v8 = vld [vmem:[%s3201_s1 + $0x20] sm:$0xff] (!%p152_p3)  }
   0x9   : > { %2258 = vmatprep.subr.bf16.mxu1 (!%p152_p3), %v2620_v2  ;;  %2318 = vmatprep.subr.bf16.mxu0 (!%p152_p3), %v2621_v3  ;;  %v2813_v9 = vld [vmem:[%s3201_s1 + $0x50] sm:$0xff] (!%p152_p3)   ;;  %v2628_v12 = vld [vmem:[%s3201_s1 + $0x28] sm:$0xff] (!%p152_p3)   ;;  %v2829_v13 = vld [vmem:[%s3201_s1 + $0x58] sm:$0xff] (!%p152_p3)  }
   0xa   : > { %v2634_v15 = vld [vmem:[%s3201_s1 + $0x60] sm:$0xff] (!%p152_p3)   ;;  %v2639_v19 = vld [vmem:[%s3201_s1 + $0x68] sm:$0xff] (!%p152_p3)   ;;  %v2644_v21 = vld [vmem:[%s3201_s1 + $0x70] sm:$0xff] (!%p152_p3)  }
   0xb   : > { %v2649_v25 = vld [vmem:[%s3201_s1 + $0x78] sm:$0xff] (!%p152_p3)   ;;  %v2654_v27 = vld [vmem:[%s3201_s1 + $0x80] sm:$0xff] (!%p152_p3)   ;;  %v2659_v31 = vld [vmem:[%s3201_s1 + $0x88] sm:$0xff] (!%p152_p3)  }
   0xc   : > { %2259 = vmatpush3.bf16.msra.mxu1 (!%p152_p3), %v2620_v2  ;;  %2319 = vmatpush3.bf16.msra.mxu0 (!%p152_p3), %v2621_v3 }
   0xd   : > { %2260 = vmatprep.subr.bf16.mxu1 (!%p152_p3), %v2622_v4  ;;  %2320 = vmatprep.subr.bf16.mxu0 (!%p152_p3), %v2790_v5 }
   0xe   : > { %s3209_s12 = smov (!%p179_p4, %s2722_s12), 1 }
   0xf   : > { %s2592_s28 = smul.u32 216, %s3209_s12 }
  0x10   : > { %2261 = vmatpush3.bf16.msra.mxu1 %v2622_v4  ;;  %2321 = vmatpush3.bf16.msra.mxu0 %v2790_v5 }
  0x11   : > { %s2805_s8 = scalar_lea.vmem %s3200_s0, %s2592_s28  ;;  %2262 = vmatprep.subr.bf16.mxu1 %v2624_v6  ;;  %2322 = vmatprep.subr.bf16.mxu0 %v2800_v7 }
  0x12   : > { %v2630_v10 = vld [vmem:[%s2805_s8] sm:$0xff]   ;;  %v2631_v11 = vld [vmem:[%s2805_s8 + $0xc] sm:$0xff]   ;;  %v2633_v16 = vld [vmem:[%s2805_s8 + $0x14] sm:$0xff]  }
  0x13   : > { %2268 = vmatprep.mubr.msk.bf16.mxu1 %vm418_vm0, %v2630_v10  ;;  %2328 = vmatprep.mubr.msk.bf16.mxu0 %vm418_vm0, %v2631_v11  ;;  %v2632_v14 = vld [vmem:[%s2805_s8 + $0x8] sm:$0xff]   ;;  %v2635_v17 = vld [vmem:[%s2805_s8 + $0x10] sm:$0xff]   ;;  %v2636_v18 = vld [vmem:[%s2805_s8 + $0x1c] sm:$0xff]  }
  0x14   : > { %2263 = vmatpush3.bf16.msra.mxu1 %v2624_v6  ;;  %2323 = vmatpush3.bf16.msra.mxu0 %v2800_v7  ;;  %v2637_v20 = vld [vmem:[%s2805_s8 + $0x18] sm:$0xff]   ;;  %v2638_v22 = vld [vmem:[%s2805_s8 + $0x24] sm:$0xff]   ;;  %v2641_v24 = vld [vmem:[%s2805_s8 + $0x2c] sm:$0xff]  }
  0x15   : > { %2264 = vmatprep.subr.bf16.mxu1 %v2626_v8  ;;  %2324 = vmatprep.subr.bf16.mxu0 %v2813_v9  ;;  %v2640_v23 = vld [vmem:[%s2805_s8 + $0x20] sm:$0xff]   ;;  %v2642_v26 = vld [vmem:[%s2805_s8 + $0x28] sm:$0xff]   ;;  %v2643_v28 = vld [vmem:[%s2805_s8 + $0x34] sm:$0xff]  }
  0x16   : > { %v2645_v29 = vld [vmem:[%s2805_s8 + $0x30] sm:$0xff]   ;;  %v2646_v30 = vld [vmem:[%s2805_s8 + $0x3c] sm:$0xff]   ;;  %v2648_v33 = vld [vmem:[%s2805_s8 + $0x44] sm:$0xff]  }
  0x17   : > { %v2647_v32 = vld [vmem:[%s2805_s8 + $0x38] sm:$0xff]   ;;  %v2650_v34 = vld [vmem:[%s2805_s8 + $0x40] sm:$0xff]   ;;  %v2651_v35 = vld [vmem:[%s2805_s8 + $0x4c] sm:$0xff]  }
  0x18   : > { %2265 = vmatpush3.bf16.msra.mxu1 %v2626_v8  ;;  %2325 = vmatpush3.bf16.msra.mxu0 %v2813_v9  ;;  %v2652_v36 = vld [vmem:[%s2805_s8 + $0x48] sm:$0xff]   ;;  %v2653_v37 = vld [vmem:[%s2805_s8 + $0x54] sm:$0xff]   ;;  %v2656_v39 = vld [vmem:[%s2805_s8 + $0x5c] sm:$0xff]  }
  0x19   : > { %2266 = vmatprep.subr.bf16.mxu1 %v2628_v12  ;;  %2326 = vmatprep.subr.bf16.mxu0 %v2829_v13  ;;  %v2655_v38 = vld [vmem:[%s2805_s8 + $0x50] sm:$0xff]   ;;  %v2657_v40 = vld [vmem:[%s2805_s8 + $0x58] sm:$0xff]   ;;  %v2658_v41 = vld [vmem:[%s2805_s8 + $0x64] sm:$0xff]  }
  0x1a   : > { %v2660_v42 = vld [vmem:[%s2805_s8 + $0x60] sm:$0xff]   ;;  %v2661_v43 = vld [vmem:[%s2805_s8 + $0x18] sm:$0xff]   ;;  %v2662_v44 = vld [vmem:[%s2805_s8 + $0x68] sm:$0xff]  }
  0x1b   : > { %v2663_v45 = vld [vmem:[%s2805_s8 + $0x20] sm:$0xff]   ;;  %v2664_v46 = vld [vmem:[%s2805_s8 + $0x70] sm:$0xff]   ;;  %v2665_v47 = vld [vmem:[%s2805_s8 + $0x28] sm:$0xff]  }
  0x1c   : > { %2267 = vmatpush3.bf16.msra.mxu1 %v2628_v12  ;;  %2327 = vmatpush3.bf16.msra.mxu0 %v2829_v13  ;;  %v2666_v48 = vld [vmem:[%s2805_s8 + $0x78] sm:$0xff]   ;;  %v2667_v49 = vld [vmem:[%s2805_s8 + $0x30] sm:$0xff]   ;;  %v2668_v50 = vld [vmem:[%s2805_s8 + $0x80] sm:$0xff]  }
  0x1d   : > { %2436 = vmatprep.subr.bf16.mxu1 %v2619_v1  ;;  %2376 = vmatprep.subr.bf16.mxu0 %v2634_v15  ;;  %v2669_v51 = vld [vmem:[%s2805_s8 + $0x38] sm:$0xff]   ;;  %v2670_v52 = vld [vmem:[%s2805_s8 + $0x88] sm:$0xff]   ;;  %v2671_v53 = vld [vmem:[%s2805_s8 + $0x40] sm:$0xff]  }
  0x1e   : > { %v2672_v54 = vld [vmem:[%s2805_s8 + $0x90] sm:$0xff]   ;;  %v2673_v55 = vld [vmem:[%s2805_s8 + $0x48] sm:$0xff]   ;;  %v2674_v56 = vld [vmem:[%s2805_s8 + $0x98] sm:$0xff]  }
  0x1f   : > { %2269 = vmatmul.mubr.msk.bf16.vlgmr.msra.gmra.mrb[0].mxu1 %vm418_vm0, %v2632_v14  ;;  %2329 = vmatmul.mubr.msk.bf16.vlgmr.msra.gmra.mrb[0].mxu0 %vm418_vm0, %v2633_v16  ;;  %v2675_v57 = vld [vmem:[%s2805_s8 + $0x50] sm:$0xff]   ;;  %v2676_v58 = vld [vmem:[%s2805_s8 + $0xa0] sm:$0xff]   ;;  %v2677_v59 = vld [vmem:[%s2805_s8 + $0x58] sm:$0xff]  }
  0x20   : > { %2442 = vmatpush3.bf16.msra.mxu1 %v2619_v1  ;;  %2377 = vmatpush3.bf16.msra.mxu0 %v2634_v15  ;;  %v2678_v60 = vld [vmem:[%s2805_s8 + $0xa8] sm:$0xff]   ;;  %v2679_v61 = vld [vmem:[%s2805_s8 + $0x60] sm:$0xff]   ;;  %v2680_v62 = vld [vmem:[%s2805_s8 + $0xb0] sm:$0xff]  }
  0x21   : > { %2272 = vmatprep.mubr.msk.bf16.mxu1 %vm418_vm0, %v2635_v17  ;;  %2332 = vmatprep.mubr.msk.bf16.mxu0 %vm418_vm0, %v2636_v18  ;;  %v2681_v63 = vld [vmem:[%s2805_s8 + $0x68] sm:$0xff]   ;;  %v2682_v0 = vld [vmem:[%s2805_s8 + $0xb8] sm:$0xff]   ;;  %v2683_v1 = vld [vmem:[%s2805_s8 + $0x70] sm:$0xff]  }
  0x22   : > { %2378 = vmatprep.subr.bf16.mxu0 %v2639_v19  ;;  %2437 = vmatprep.subr.bf16.mxu1 %v2621_v3  ;;  %v2684_v2 = vld [vmem:[%s2805_s8 + $0x6c] sm:$0xff]   ;;  %v2686_v4 = vld [vmem:[%s2805_s8 + $0x74] sm:$0xff]   ;;  %v2688_v6 = vld [vmem:[%s2805_s8 + $0x7c] sm:$0xff]  }
  0x23   : > { %v2690_v8 = vld [vmem:[%s2805_s8 + $0x84] sm:$0xff]   ;;  %v2692_v10 = vld [vmem:[%s2805_s8 + $0x8c] sm:$0xff]   ;;  %v2693_v11 = vld [vmem:[%s2805_s8 + $0x98] sm:$0xff]  }
  0x24   : > { %2443 = vmatpush3.bf16.msra.mxu1 %v2621_v3  ;;  %2379 = vmatpush3.bf16.msra.mxu0 %v2639_v19  ;;  %v2685_v3 = vld [vmem:[%s2805_s8 + $0x78] sm:$0xff]   ;;  %v2697_v15 = vld [vmem:[%s2805_s8 + $0xa8] sm:$0xff]   ;;  %v2699_v17 = vld [vmem:[%s2805_s8 + $0xb0] sm:$0xff]  }
  0x25   : > { %2438 = vmatprep.subr.bf16.mxu1 %v2790_v5  ;;  %2380 = vmatprep.subr.bf16.mxu0 %v2644_v21  ;;  %v2694_v12 = vld [vmem:[%s2805_s8 + $0x94] sm:$0xff]   ;;  %v2696_v14 = vld [vmem:[%s2805_s8 + $0x9c] sm:$0xff]   ;;  %v2698_v16 = vld [vmem:[%s2805_s8 + $0xa4] sm:$0xff]  }
  0x26   : > { %v2700_v18 = vld [vmem:[%s2805_s8 + $0xac] sm:$0xff]   ;;  %v2701_v19 = vld [vmem:[%s2805_s8 + $0xb8] sm:$0xff]  }
  0x27   : > { %2273 = vmatmul.mubr.msk.bf16.gmra.mrb[4].mxu1 %vm418_vm0, %v2637_v20  ;;  %2333 = vmatmul.mubr.msk.bf16.gmra.mrb[4].mxu0 %vm418_vm0, %v2638_v22  ;;  %v2702_v20 = vld [vmem:[%s2805_s8 + $0xb4] sm:$0xff]   ;;  %v2704_v22 = vld [vmem:[%s2805_s8 + $0xbc] sm:$0xff]  }
  0x28   : > { %2276 = vmatprep.mubr.msk.bf16.mxu1 %vm418_vm0, %v2640_v23  ;;  %2336 = vmatprep.mubr.msk.bf16.mxu0 %vm418_vm0, %v2641_v24  ;;  %v2705_v23 = vld [vmem:[%s2805_s8 + $0xc8] sm:$0xff]  }
  0x29   : > { %2381 = vmatpush3.bf16.msra.mxu0 %v2644_v21  ;;  %2444 = vmatpush3.bf16.msra.mxu1 %v2790_v5  ;;  %v2687_v5 = vld [vmem:[%s2805_s8 + $0x80] sm:$0xff]  }
  0x2a   : > { %2382 = vmatprep.subr.bf16.mxu0 %v2649_v25  ;;  %2439 = vmatprep.subr.bf16.mxu1 %v2800_v7  ;;  %v2703_v21 = vld [vmem:[%s2805_s8 + $0xc0] sm:$0xff]  }
  0x2b   : > { %v2706_v24 = vld [vmem:[%s2805_s8 + $0xc4] sm:$0xff]  }
  0x2d   : > { %2383 = vmatpush3.bf16.msra.mxu0 %v2649_v25  ;;  %2445 = vmatpush3.bf16.msra.mxu1 %v2800_v7  ;;  %v2689_v7 = vld [vmem:[%s2805_s8 + $0x88] sm:$0xff]   ;;  %v2707_v25 = vld [vmem:[%s2805_s8 + $0xd0] sm:$0xff]  }
  0x2e   : > { %2384 = vmatprep.subr.bf16.mxu0 %v2654_v27  ;;  %2440 = vmatprep.subr.bf16.mxu1 %v2813_v9 }
  0x2f   : > { %2277 = vmatmul.mubr.msk.bf16.gmra.mrb[8].mxu1 %vm418_vm0, %v2642_v26  ;;  %2337 = vmatmul.mubr.msk.bf16.gmra.mrb[8].mxu0 %vm418_vm0, %v2643_v28 }
  0x30   : > { %2280 = vmatprep.mubr.msk.bf16.mxu1 %vm418_vm0, %v2645_v29  ;;  %2340 = vmatprep.mubr.msk.bf16.mxu0 %vm418_vm0, %v2646_v30 }
  0x31   : > { %2385 = vmatpush3.bf16.msra.mxu0 %v2654_v27  ;;  %2446 = vmatpush3.bf16.msra.mxu1 %v2813_v9  ;;  %v2691_v9 = vld [vmem:[%s2805_s8 + $0x90] sm:$0xff]  }
  0x32   : > { %2386 = vmatprep.subr.bf16.mxu0 %v2659_v31  ;;  %2441 = vmatprep.subr.bf16.mxu1 %v2829_v13 }
  0x35   : > { %2387 = vmatpush3.bf16.msra.mxu0 %v2659_v31  ;;  %2447 = vmatpush3.bf16.msra.mxu1 %v2829_v13  ;;  %v2695_v13 = vld [vmem:[%s2805_s8 + $0xa0] sm:$0xff]   ;;  %s2593_s8 = smul.u32 384, %s3209_s12 }
  0x37   : > { %2281 = vmatmul.mubr.msk.bf16.gmra.mrb[12].mxu1 %vm418_vm0, %v2647_v32  ;;  %2341 = vmatmul.mubr.msk.bf16.gmra.mrb[12].mxu0 %vm418_vm0, %v2648_v33  ;;  %s3035_s11 = scalar_lea.vmem %s3203_s3, %s2593_s8 }
  0x38   : > { %2284 = vmatprep.mubr.msk.bf16.mxu1 %vm418_vm0, %v2650_v34  ;;  %2344 = vmatprep.mubr.msk.bf16.mxu0 %vm418_vm0, %v2651_v35 }
  0x3f   : > { %2285 = vmatmul.mubr.msk.bf16.gmra.mrb[16].mxu1 %vm418_vm0, %v2652_v36  ;;  %2345 = vmatmul.mubr.msk.bf16.gmra.mrb[16].mxu0 %vm418_vm0, %v2653_v37 }
  0x40   : > { %2288 = vmatprep.mubr.msk.bf16.mxu1 %vm418_vm0, %v2655_v38  ;;  %2348 = vmatprep.mubr.msk.bf16.mxu0 %vm418_vm0, %v2656_v39 }
  0x47   : > { %2289 = vmatmul.mubr.msk.bf16.gmra.mrb[20].mxu1 %vm418_vm0, %v2657_v40  ;;  %2349 = vmatmul.mubr.msk.bf16.gmra.mrb[20].mxu0 %vm418_vm0, %v2658_v41 }
  0x48   : > { %2292 = vmatprep.mubr.msk.bf16.mxu1 %vm418_vm0, %v2660_v42  ;;  %2388 = vmatprep.mubr.msk.bf16.mxu0 %vm418_vm0, %v2661_v43 }
  0x4f   : > { %2293 = vmatmul.mubr.msk.bf16.gmra.mrb[24].mxu1 %vm418_vm0, %v2662_v44  ;;  %2389 = vmatmul.mubr.msk.bf16.vlgmr.msra.gmra.mrb[0].mxu0 %vm418_vm0, %v2663_v45 }
  0x50   : > { %2296 = vmatprep.mubr.msk.bf16.mxu1 %vm418_vm0, %v2664_v46  ;;  %2392 = vmatprep.mubr.msk.bf16.mxu0 %vm418_vm0, %v2665_v47 }
  0x57   : > { %2297 = vmatmul.mubr.msk.bf16.gmra.mrb[28].mxu1 %vm418_vm0, %v2666_v48  ;;  %2393 = vmatmul.mubr.msk.bf16.gmra.mrb[4].mxu0 %vm418_vm0, %v2667_v49 }
  0x58   : > { %2300 = vmatprep.mubr.msk.bf16.mxu1 %vm418_vm0, %v2668_v50  ;;  %2396 = vmatprep.mubr.msk.bf16.mxu0 %vm418_vm0, %v2669_v51  ;;  %v3027_v50 = vld [vmem:[%s3202_s2] ss:$0 sm:$0xff] }
  0x5f   : > { %2301 = vmatmul.mubr.msk.bf16.gmra.mrb[32].mxu1 %vm418_vm0, %v2670_v52  ;;  %2397 = vmatmul.mubr.msk.bf16.gmra.mrb[8].mxu0 %vm418_vm0, %v2671_v53 }
  0x60   : > { %2304 = vmatprep.mubr.msk.bf16.mxu1 %vm418_vm0, %v2672_v54  ;;  %2400 = vmatprep.mubr.msk.bf16.mxu0 %vm418_vm0, %v2673_v55 }
  0x67   : > { %2305 = vmatmul.mubr.msk.bf16.gmra.mrb[36].mxu1 %vm418_vm0, %v2674_v56  ;;  %2401 = vmatmul.mubr.msk.bf16.gmra.mrb[12].mxu0 %vm418_vm0, %v2675_v57 }
  0x68   : > { %2308 = vmatprep.mubr.msk.bf16.mxu1 %vm418_vm0, %v2676_v58  ;;  %2404 = vmatprep.mubr.msk.bf16.mxu0 %vm418_vm0, %v2677_v59 }
  0x6f   : > { %2309 = vmatmul.mubr.msk.bf16.gmra.mrb[40].mxu1 %vm418_vm0, %v2678_v60  ;;  %2405 = vmatmul.mubr.msk.bf16.gmra.mrb[16].mxu0 %vm418_vm0, %v2679_v61 }
  0x70   : > { %2312 = vmatprep.mubr.msk.bf16.mxu1 %vm418_vm0, %v2680_v62  ;;  %2408 = vmatprep.mubr.msk.bf16.mxu0 %vm418_vm0, %v2681_v63 }
  0x77   : > { %2313 = vmatmul.mubr.msk.bf16.gmra.mrb[44].mxu1 %vm418_vm0, %v2682_v0  ;;  %2409 = vmatmul.mubr.msk.bf16.gmra.mrb[20].mxu0 %vm418_vm0, %v2683_v1 }
  0x78   : > { %2352 = vmatprep.mubr.msk.bf16.mxu1 %vm418_vm0, %v2684_v2  ;;  %2412 = vmatprep.mubr.msk.bf16.mxu0 %vm418_vm0, %v2685_v3 }
  0x7f   : > { %2353 = vmatmul.mubr.msk.bf16.vlgmr.msra.gmra.mrb[24].mxu1 %vm418_vm0, %v2686_v4  ;;  %2413 = vmatmul.mubr.msk.bf16.gmra.mrb[24].mxu0 %vm418_vm0, %v2687_v5 }
  0x80   : > { %2356 = vmatprep.mubr.msk.bf16.mxu1 %vm418_vm0, %v2688_v6  ;;  %2416 = vmatprep.mubr.msk.bf16.mxu0 %vm418_vm0, %v2689_v7 }
  0x87   : > { %2357 = vmatmul.mubr.msk.bf16.gmra.mrb[28].mxu1 %vm418_vm0, %v2690_v8  ;;  %2417 = vmatmul.mubr.msk.bf16.gmra.mrb[28].mxu0 %vm418_vm0, %v2691_v9 }
  0x88   : > { %2360 = vmatprep.mubr.msk.bf16.mxu1 %vm418_vm0, %v2692_v10  ;;  %2420 = vmatprep.mubr.msk.bf16.mxu0 %vm418_vm0, %v2693_v11 }
  0x8f   : > { %2361 = vmatmul.mubr.msk.bf16.gmra.mrb[32].mxu1 %vm418_vm0, %v2694_v12  ;;  %2421 = vmatmul.mubr.msk.bf16.gmra.mrb[32].mxu0 %vm418_vm0, %v2695_v13 }
  0x90   : > { %2364 = vmatprep.mubr.msk.bf16.mxu1 %vm418_vm0, %v2696_v14  ;;  %2424 = vmatprep.mubr.msk.bf16.mxu0 %vm418_vm0, %v2697_v15 }
  0x97   : > { %2365 = vmatmul.mubr.msk.bf16.gmra.mrb[36].mxu1 %vm418_vm0, %v2698_v16  ;;  %2425 = vmatmul.mubr.msk.bf16.gmra.mrb[36].mxu0 %vm418_vm0, %v2699_v17 }
  0x98   : > { %2368 = vmatprep.mubr.msk.bf16.mxu1 %vm418_vm0, %v2700_v18  ;;  %2428 = vmatprep.mubr.msk.bf16.mxu0 %vm418_vm0, %v2701_v19 }
  0x9f   : > { %2369 = vmatmul.mubr.msk.bf16.gmra.mrb[40].mxu1 %vm418_vm0, %v2702_v20  ;;  %2429 = vmatmul.mubr.msk.bf16.gmra.mrb[40].mxu0 %vm418_vm0, %v2703_v21 }
  0xa0   : > { %2372 = vmatprep.mubr.msk.bf16.mxu1 %vm418_vm0, %v2704_v22  ;;  %2432 = vmatprep.mubr.msk.bf16.mxu0 %vm418_vm0, %v2705_v23 }
  0xa7   : > { %2373 = vmatmul.mubr.msk.bf16.gmra.mrb[44].mxu1 %vm418_vm0, %v2706_v24  ;;  %2433 = vmatmul.mubr.msk.bf16.gmra.mrb[44].mxu0 %vm418_vm0, %v2707_v25 }
  0xf2   : > { %v2270_v26 = vpop.f32.mrb[0].mxu1 }
  0xf3   : > { %v525_v27 = vpop.f32.mrb[1].mxu1  ;;  %v534_v51 = vadd.f32 %v2270_v26, %v3027_v50 }
  0xf4   : > { %v2271_v28 = vpop.f32.mrb[2].mxu1  ;;  %v526_v52 = vadd.f32 %v3027_v50, %v525_v27 }
  0xf5   : > { %v528_v29 = vpop.f32.mrb[3].mxu1  ;;  %v537_v54 = vadd.f32 %v2271_v28, %v3027_v50 }
  0xf6   : > { %v529_v57 = vadd.f32 %v3027_v50, %v528_v29 }
  0xfa   : > { %v2274_v30 = vpop.f32.mrb[4].mxu1 }
  0xfb   : > { %v541_v31 = vpop.f32.mrb[5].mxu1  ;;  %v550_v63 = vadd.f32 %v2274_v30, %v3027_v50 }
  0xfc   : > { %v2275_v32 = vpop.f32.mrb[6].mxu1  ;;  %v542_v0 = vadd.f32 %v3027_v50, %v541_v31 }
  0xfd   : > { %v544_v33 = vpop.f32.mrb[7].mxu1  ;;  %v553_v2 = vadd.f32 %v2275_v32, %v3027_v50 }
  0xfe   : > { %v545_v5 = vadd.f32 %v3027_v50, %v544_v33 }
 0x102   : > { %v2278_v34 = vpop.f32.mrb[8].mxu1 }
 0x103   : > { %v557_v35 = vpop.f32.mrb[9].mxu1  ;;  %v566_v11 = vadd.f32 %v2278_v34, %v3027_v50 }
 0x104   : > { %v2279_v36 = vpop.f32.mrb[10].mxu1  ;;  %v558_v12 = vadd.f32 %v3027_v50, %v557_v35 }
 0x105   : > { %v560_v37 = vpop.f32.mrb[11].mxu1  ;;  %v569_v14 = vadd.f32 %v2279_v36, %v3027_v50 }
 0x106   : > { %v561_v17 = vadd.f32 %v3027_v50, %v560_v37 }
 0x10a   : > { %v3000_v38 = vpop.f32.mrb[12].mxu1 }
 0x10b   : > { %v3002_v39 = vpop.f32.mrb[13].mxu1  ;;  %v582_v23 = vadd.f32 %v3000_v38, %v3027_v50 }
 0x10c   : > { %v3004_v40 = vpop.f32.mrb[14].mxu1  ;;  %v574_v24 = vadd.f32 %v3027_v50, %v3002_v39 }
 0x10d   : > { %v3006_v41 = vpop.f32.mrb[15].mxu1  ;;  %v585_v26 = vadd.f32 %v3004_v40, %v3027_v50 }
 0x10e   : > { %v577_v29 = vadd.f32 %v3027_v50, %v3006_v41 }
 0x112   : > { %v3008_v42 = vpop.f32.mrb[16].mxu1 }
 0x113   : > { %v3010_v43 = vpop.f32.mrb[17].mxu1  ;;  %v598_v35 = vadd.f32 %v3008_v42, %v3027_v50 }
 0x114   : > { %v3012_v44 = vpop.f32.mrb[18].mxu1  ;;  %v590_v36 = vadd.f32 %v3027_v50, %v3010_v43 }
 0x115   : > { %v3014_v45 = vpop.f32.mrb[19].mxu1  ;;  %v601_v38 = vadd.f32 %v3012_v44, %v3027_v50 }
 0x116   : > { %v593_v41 = vadd.f32 %v3027_v50, %v3014_v45 }
 0x11a   : > { %v3016_v46 = vpop.f32.mrb[20].mxu1 }
 0x11b   : > { %v3018_v47 = vpop.f32.mrb[21].mxu1  ;;  %v614_v43 = vadd.f32 %v3016_v46, %v3027_v50 }
 0x11c   : > { %v3020_v48 = vpop.f32.mrb[22].mxu1  ;;  %v606_v44 = vadd.f32 %v3027_v50, %v3018_v47 }
 0x11d   : > { %v3022_v49 = vpop.f32.mrb[23].mxu1 }
 0x122   : > { %v2390_v53 = vpop.f32.mrb[0].mxu0 }
 0x123   : > { %v2449_v55 = vadd.f32 %v2390_v53, %v534_v51  ;;  %v1601_v56 = vpop.f32.mrb[1].mxu0 }
 0x124   : > { %v2451_v58 = vadd.f32 %v1601_v56, %v526_v52  ;;  %v2391_v59 = vpop.f32.mrb[2].mxu0 }
 0x125   : > { %1843 = vst.msk [vmem:[%s3035_s11 + $0x10] sm:$0xff] %vm1840_vm1, %v2449_v55  ;;  %v2453_v60 = vadd.f32 %v2391_v59, %v537_v54  ;;  %v1604_v61 = vpop.f32.mrb[3].mxu0  ;;  %v617_v55 = vadd.f32 %v3020_v48, %v3027_v50 }
 0x126   : > { %1841 = vst.msk [vmem:[%s3035_s11] sm:$0xff] %vm1840_vm1, %v2451_v58  ;;  %v2455_v62 = vadd.f32 %v1604_v61, %v529_v57  ;;  %v609_v58 = vadd.f32 %v3027_v50, %v3022_v49 }
 0x127   : > { %1844 = vst.msk [vmem:[%s3035_s11 + $0x18] sm:$0xff] %vm1840_vm1, %v2453_v60 }
 0x128   : > { %1842 = vst.msk [vmem:[%s3035_s11 + $0x8] sm:$0xff] %vm1840_vm1, %v2455_v62 }
 0x12a   : > { %v2394_v1 = vpop.f32.mrb[4].mxu0 }
 0x12b   : > { %v2457_v3 = vadd.f32 %v2394_v1, %v550_v63  ;;  %v1617_v4 = vpop.f32.mrb[5].mxu0 }
 0x12c   : > { %v2459_v6 = vadd.f32 %v1617_v4, %v542_v0  ;;  %v2395_v7 = vpop.f32.mrb[6].mxu0 }
 0x12d   : > { %1847 = vst.msk [vmem:[%s3035_s11 + $0x30] sm:$0xff] %vm1840_vm1, %v2457_v3  ;;  %v2461_v8 = vadd.f32 %v2395_v7, %v553_v2  ;;  %v1620_v9 = vpop.f32.mrb[7].mxu0 }
 0x12e   : > { %1845 = vst.msk [vmem:[%s3035_s11 + $0x20] sm:$0xff] %vm1840_vm1, %v2459_v6  ;;  %v2463_v10 = vadd.f32 %v1620_v9, %v545_v5 }
 0x12f   : > { %1848 = vst.msk [vmem:[%s3035_s11 + $0x38] sm:$0xff] %vm1840_vm1, %v2461_v8 }
 0x130   : > { %1846 = vst.msk [vmem:[%s3035_s11 + $0x28] sm:$0xff] %vm1840_vm1, %v2463_v10 }
 0x132   : > { %v2398_v13 = vpop.f32.mrb[8].mxu0 }
 0x133   : > { %v2465_v15 = vadd.f32 %v2398_v13, %v566_v11  ;;  %v1633_v16 = vpop.f32.mrb[9].mxu0 }
 0x134   : > { %v2467_v18 = vadd.f32 %v1633_v16, %v558_v12  ;;  %v2399_v19 = vpop.f32.mrb[10].mxu0 }
 0x135   : > { %1851 = vst.msk [vmem:[%s3035_s11 + $0x50] sm:$0xff] %vm1840_vm1, %v2465_v15  ;;  %v2469_v20 = vadd.f32 %v2399_v19, %v569_v14  ;;  %v1636_v21 = vpop.f32.mrb[11].mxu0 }
 0x136   : > { %1849 = vst.msk [vmem:[%s3035_s11 + $0x40] sm:$0xff] %vm1840_vm1, %v2467_v18  ;;  %v2471_v22 = vadd.f32 %v1636_v21, %v561_v17 }
 0x137   : > { %1852 = vst.msk [vmem:[%s3035_s11 + $0x58] sm:$0xff] %vm1840_vm1, %v2469_v20 }
 0x138   : > { %1850 = vst.msk [vmem:[%s3035_s11 + $0x48] sm:$0xff] %vm1840_vm1, %v2471_v22 }
 0x13a   : > { %v2402_v25 = vpop.f32.mrb[12].mxu0 }
 0x13b   : > { %v2473_v27 = vadd.f32 %v2402_v25, %v582_v23  ;;  %v1649_v28 = vpop.f32.mrb[13].mxu0 }
 0x13c   : > { %v2475_v30 = vadd.f32 %v1649_v28, %v574_v24  ;;  %v2403_v31 = vpop.f32.mrb[14].mxu0 }
 0x13d   : > { %1855 = vst.msk [vmem:[%s3035_s11 + $0x70] sm:$0xff] %vm1840_vm1, %v2473_v27  ;;  %v2477_v32 = vadd.f32 %v2403_v31, %v585_v26  ;;  %v1652_v33 = vpop.f32.mrb[15].mxu0 }
 0x13e   : > { %1853 = vst.msk [vmem:[%s3035_s11 + $0x60] sm:$0xff] %vm1840_vm1, %v2475_v30  ;;  %v2479_v34 = vadd.f32 %v1652_v33, %v577_v29 }
 0x13f   : > { %1856 = vst.msk [vmem:[%s3035_s11 + $0x78] sm:$0xff] %vm1840_vm1, %v2477_v32 }
 0x140   : > { %1854 = vst.msk [vmem:[%s3035_s11 + $0x68] sm:$0xff] %vm1840_vm1, %v2479_v34 }
 0x142   : > { %v2406_v37 = vpop.f32.mrb[16].mxu0 }
 0x143   : > { %v2481_v39 = vadd.f32 %v2406_v37, %v598_v35  ;;  %v1665_v40 = vpop.f32.mrb[17].mxu0 }
 0x144   : > { %v2483_v51 = vadd.f32 %v1665_v40, %v590_v36  ;;  %v2407_v52 = vpop.f32.mrb[18].mxu0 }
 0x145   : > { %1859 = vst.msk [vmem:[%s3035_s11 + $0x90] sm:$0xff] %vm1840_vm1, %v2481_v39  ;;  %v2485_v53 = vadd.f32 %v2407_v52, %v601_v38  ;;  %v1668_v54 = vpop.f32.mrb[19].mxu0 }
 0x146   : > { %1857 = vst.msk [vmem:[%s3035_s11 + $0x80] sm:$0xff] %vm1840_vm1, %v2483_v51  ;;  %v2487_v42 = vadd.f32 %v1668_v54, %v593_v41 }
 0x147   : > { %1860 = vst.msk [vmem:[%s3035_s11 + $0x98] sm:$0xff] %vm1840_vm1, %v2485_v53 }
 0x148   : > { %1858 = vst.msk [vmem:[%s3035_s11 + $0x88] sm:$0xff] %vm1840_vm1, %v2487_v42 }
 0x14a   : > { %v2410_v45 = vpop.f32.mrb[20].mxu0 }
 0x14b   : > { %v2489_v56 = vadd.f32 %v2410_v45, %v614_v43  ;;  %v1681_v57 = vpop.f32.mrb[21].mxu0 }
 0x14c   : > { %v2491_v59 = vadd.f32 %v1681_v57, %v606_v44  ;;  %v2411_v60 = vpop.f32.mrb[22].mxu0 }
 0x14d   : > { %1863 = vst.msk [vmem:[%s3035_s11 + $0xb0] sm:$0xff] %vm1840_vm1, %v2489_v56  ;;  %v2493_v61 = vadd.f32 %v2411_v60, %v617_v55  ;;  %v1684_v62 = vpop.f32.mrb[23].mxu0 }
 0x14e   : > { %1861 = vst.msk [vmem:[%s3035_s11 + $0xa0] sm:$0xff] %vm1840_vm1, %v2491_v59  ;;  %v2495_v46 = vadd.f32 %v1684_v62, %v609_v58 }
 0x14f   : > { %1864 = vst.msk [vmem:[%s3035_s11 + $0xb8] sm:$0xff] %vm1840_vm1, %v2493_v61 }
 0x150   : > { %1862 = vst.msk [vmem:[%s3035_s11 + $0xa8] sm:$0xff] %vm1840_vm1, %v2495_v46 }
 0x152   : > { %v2354_v47 = vpop.f32.mrb[24].mxu1  ;;  %v2414_v63 = vpop.f32.mrb[24].mxu0 }
 0x153   : > { %v2496_v48 = vadd.f32 %v2354_v47, %v3027_v50  ;;  %v1135_v49 = vpop.f32.mrb[25].mxu1  ;;  %v1697_v1 = vpop.f32.mrb[25].mxu0 }
 0x154   : > { %v2498_v0 = vadd.f32 %v3027_v50, %v1135_v49  ;;  %v2355_v2 = vpop.f32.mrb[26].mxu1  ;;  %v2415_v5 = vpop.f32.mrb[26].mxu0 }
 0x155   : > { %v2497_v3 = vadd.f32 %v2496_v48, %v2414_v63  ;;  %v2500_v4 = vadd.f32 %v2355_v2, %v3027_v50  ;;  %v1138_v6 = vpop.f32.mrb[27].mxu1  ;;  %v1700_v9 = vpop.f32.mrb[27].mxu0 }
 0x156   : > { %v2499_v7 = vadd.f32 %v2498_v0, %v1697_v1  ;;  %v2502_v8 = vadd.f32 %v3027_v50, %v1138_v6 }
 0x157   : > { %1867 = vst.msk [vmem:[%s3035_s11 + $0xd0] sm:$0xff] %vm1840_vm1, %v2497_v3  ;;  %v2501_v10 = vadd.f32 %v2500_v4, %v2415_v5 }
 0x158   : > { %1865 = vst.msk [vmem:[%s3035_s11 + $0xc0] sm:$0xff] %vm1840_vm1, %v2499_v7  ;;  %v2503_v11 = vadd.f32 %v2502_v8, %v1700_v9 }
 0x159   : > { %1868 = vst.msk [vmem:[%s3035_s11 + $0xd8] sm:$0xff] %vm1840_vm1, %v2501_v10 }
 0x15a   : > { %1866 = vst.msk [vmem:[%s3035_s11 + $0xc8] sm:$0xff] %vm1840_vm1, %v2503_v11  ;;  %v2358_v12 = vpop.f32.mrb[28].mxu1  ;;  %v2418_v14 = vpop.f32.mrb[28].mxu0 }
 0x15b   : > { %v2504_v13 = vadd.f32 %v2358_v12, %v3027_v50  ;;  %v1151_v15 = vpop.f32.mrb[29].mxu1  ;;  %v1713_v17 = vpop.f32.mrb[29].mxu0 }
 0x15c   : > { %v2506_v16 = vadd.f32 %v3027_v50, %v1151_v15  ;;  %v2359_v18 = vpop.f32.mrb[30].mxu1  ;;  %v2419_v21 = vpop.f32.mrb[30].mxu0 }
 0x15d   : > { %v2505_v19 = vadd.f32 %v2504_v13, %v2418_v14  ;;  %v2508_v20 = vadd.f32 %v2359_v18, %v3027_v50  ;;  %v1154_v22 = vpop.f32.mrb[31].mxu1  ;;  %v1716_v25 = vpop.f32.mrb[31].mxu0 }
 0x15e   : > { %v2507_v23 = vadd.f32 %v2506_v16, %v1713_v17  ;;  %v2510_v24 = vadd.f32 %v3027_v50, %v1154_v22 }
 0x15f   : > { %1871 = vst.msk [vmem:[%s3035_s11 + $0xf0] sm:$0xff] %vm1840_vm1, %v2505_v19  ;;  %v2509_v26 = vadd.f32 %v2508_v20, %v2419_v21 }
 0x160   : > { %1869 = vst.msk [vmem:[%s3035_s11 + $0xe0] sm:$0xff] %vm1840_vm1, %v2507_v23  ;;  %v2511_v27 = vadd.f32 %v2510_v24, %v1716_v25 }
 0x161   : > { %1872 = vst.msk [vmem:[%s3035_s11 + $0xf8] sm:$0xff] %vm1840_vm1, %v2509_v26 }
 0x162   : > { %1870 = vst.msk [vmem:[%s3035_s11 + $0xe8] sm:$0xff] %vm1840_vm1, %v2511_v27  ;;  %v2362_v28 = vpop.f32.mrb[32].mxu1  ;;  %v2422_v30 = vpop.f32.mrb[32].mxu0 }
 0x163   : > { %v2512_v29 = vadd.f32 %v2362_v28, %v3027_v50  ;;  %v1167_v31 = vpop.f32.mrb[33].mxu1  ;;  %v1729_v33 = vpop.f32.mrb[33].mxu0 }
 0x164   : > { %v2514_v32 = vadd.f32 %v3027_v50, %v1167_v31  ;;  %v2363_v34 = vpop.f32.mrb[34].mxu1  ;;  %v2423_v37 = vpop.f32.mrb[34].mxu0 }
 0x165   : > { %v2513_v35 = vadd.f32 %v2512_v29, %v2422_v30  ;;  %v2516_v36 = vadd.f32 %v2363_v34, %v3027_v50  ;;  %v1170_v38 = vpop.f32.mrb[35].mxu1  ;;  %v1732_v41 = vpop.f32.mrb[35].mxu0 }
 0x166   : > { %v2515_v39 = vadd.f32 %v2514_v32, %v1729_v33  ;;  %v2518_v40 = vadd.f32 %v3027_v50, %v1170_v38 }
 0x167   : > { %1875 = vst.msk [vmem:[%s3035_s11 + $0x110] sm:$0xff] %vm1840_vm1, %v2513_v35  ;;  %v2517_v51 = vadd.f32 %v2516_v36, %v2423_v37 }
 0x168   : > { %1873 = vst.msk [vmem:[%s3035_s11 + $0x100] sm:$0xff] %vm1840_vm1, %v2515_v39  ;;  %v2519_v52 = vadd.f32 %v2518_v40, %v1732_v41 }
 0x169   : > { %1876 = vst.msk [vmem:[%s3035_s11 + $0x118] sm:$0xff] %vm1840_vm1, %v2517_v51 }
 0x16a   : > { %1874 = vst.msk [vmem:[%s3035_s11 + $0x108] sm:$0xff] %vm1840_vm1, %v2519_v52  ;;  %v2366_v53 = vpop.f32.mrb[36].mxu1  ;;  %v2426_v42 = vpop.f32.mrb[36].mxu0 }
 0x16b   : > { %v2520_v54 = vadd.f32 %v2366_v53, %v3027_v50  ;;  %v1183_v43 = vpop.f32.mrb[37].mxu1  ;;  %v1745_v45 = vpop.f32.mrb[37].mxu0 }
 0x16c   : > { %v2522_v44 = vadd.f32 %v3027_v50, %v1183_v43  ;;  %v2367_v55 = vpop.f32.mrb[38].mxu1  ;;  %v2427_v58 = vpop.f32.mrb[38].mxu0 }
 0x16d   : > { %v2521_v56 = vadd.f32 %v2520_v54, %v2426_v42  ;;  %v2524_v57 = vadd.f32 %v2367_v55, %v3027_v50  ;;  %v1186_v59 = vpop.f32.mrb[39].mxu1  ;;  %v1748_v62 = vpop.f32.mrb[39].mxu0 }
 0x16e   : > { %v2523_v60 = vadd.f32 %v2522_v44, %v1745_v45  ;;  %v2526_v61 = vadd.f32 %v3027_v50, %v1186_v59 }
 0x16f   : > { %1879 = vst.msk [vmem:[%s3035_s11 + $0x130] sm:$0xff] %vm1840_vm1, %v2521_v56  ;;  %v2525_v46 = vadd.f32 %v2524_v57, %v2427_v58 }
 0x170   : > { %1877 = vst.msk [vmem:[%s3035_s11 + $0x120] sm:$0xff] %vm1840_vm1, %v2523_v60  ;;  %v2527_v47 = vadd.f32 %v2526_v61, %v1748_v62 }
 0x171   : > { %1880 = vst.msk [vmem:[%s3035_s11 + $0x138] sm:$0xff] %vm1840_vm1, %v2525_v46 }
 0x172   : > { %1878 = vst.msk [vmem:[%s3035_s11 + $0x128] sm:$0xff] %vm1840_vm1, %v2527_v47  ;;  %v2370_v48 = vpop.f32.mrb[40].mxu1  ;;  %v2430_v49 = vpop.f32.mrb[40].mxu0 }
 0x173   : > { %v2528_v63 = vadd.f32 %v2370_v48, %v3027_v50  ;;  %v1199_v0 = vpop.f32.mrb[41].mxu1  ;;  %v1761_v2 = vpop.f32.mrb[41].mxu0 }
 0x174   : > { %v2530_v1 = vadd.f32 %v3027_v50, %v1199_v0  ;;  %v2371_v3 = vpop.f32.mrb[42].mxu1  ;;  %v2431_v6 = vpop.f32.mrb[42].mxu0 }
 0x175   : > { %v2529_v4 = vadd.f32 %v2528_v63, %v2430_v49  ;;  %v2532_v5 = vadd.f32 %v2371_v3, %v3027_v50  ;;  %v1202_v7 = vpop.f32.mrb[43].mxu1  ;;  %v1764_v10 = vpop.f32.mrb[43].mxu0 }
 0x176   : > { %v2531_v8 = vadd.f32 %v2530_v1, %v1761_v2  ;;  %v2534_v9 = vadd.f32 %v3027_v50, %v1202_v7 }
 0x177   : > { %1883 = vst.msk [vmem:[%s3035_s11 + $0x150] sm:$0xff] %vm1840_vm1, %v2529_v4  ;;  %v2533_v11 = vadd.f32 %v2532_v5, %v2431_v6 }
 0x178   : > { %1881 = vst.msk [vmem:[%s3035_s11 + $0x140] sm:$0xff] %vm1840_vm1, %v2531_v8  ;;  %v2535_v12 = vadd.f32 %v2534_v9, %v1764_v10 }
 0x179   : > { %1884 = vst.msk [vmem:[%s3035_s11 + $0x158] sm:$0xff] %vm1840_vm1, %v2533_v11 }
 0x17a   : > { %1882 = vst.msk [vmem:[%s3035_s11 + $0x148] sm:$0xff] %vm1840_vm1, %v2535_v12  ;;  %v2374_v13 = vpop.f32.mrb[44].mxu1  ;;  %v2434_v15 = vpop.f32.mrb[44].mxu0 }
 0x17b   : > { %v2536_v14 = vadd.f32 %v2374_v13, %v3027_v50  ;;  %v1215_v16 = vpop.f32.mrb[45].mxu1  ;;  %v1777_v18 = vpop.f32.mrb[45].mxu0 }
 0x17c   : > { %v2538_v17 = vadd.f32 %v3027_v50, %v1215_v16  ;;  %v2375_v19 = vpop.f32.mrb[46].mxu1  ;;  %v2435_v22 = vpop.f32.mrb[46].mxu0 }
 0x17d   : > { %v2537_v20 = vadd.f32 %v2536_v14, %v2434_v15  ;;  %v2540_v21 = vadd.f32 %v2375_v19, %v3027_v50  ;;  %v1218_v23 = vpop.f32.mrb[47].mxu1  ;;  %v1780_v26 = vpop.f32.mrb[47].mxu0 }
 0x17e   : > { %v2539_v24 = vadd.f32 %v2538_v17, %v1777_v18  ;;  %v2542_v25 = vadd.f32 %v3027_v50, %v1218_v23 }
 0x17f   : > { %1887 = vst.msk [vmem:[%s3035_s11 + $0x170] sm:$0xff] %vm1840_vm1, %v2537_v20  ;;  %v2541_v27 = vadd.f32 %v2540_v21, %v2435_v22 }
 0x180   : > { %1885 = vst.msk [vmem:[%s3035_s11 + $0x160] sm:$0xff] %vm1840_vm1, %v2539_v24  ;;  %v2543_v28 = vadd.f32 %v2542_v25, %v1780_v26 }
 0x181   : > { %1888 = vst.msk [vmem:[%s3035_s11 + $0x178] sm:$0xff] %vm1840_vm1, %v2541_v27 }
 0x182   : > { %1886 = vst.msk [vmem:[%s3035_s11 + $0x168] sm:$0xff] %vm1840_vm1, %v2543_v28 }
 0x183 PF: > { %s13_s14 = sadd.s32 1, %s2730_s14   ;;  %s3204_s12 = smov %s2726_s13 }
 0x184   : > { %p10_p5 = scmp.ge.s32.totalorder %s13_s14, 4   ;;  %s3205_s13 = smov %s3207_s15 }
 0x186   :  { %12 = sbr.rel (!%p10_p5) target bundleno = 2 (0x2), region = 64 }

</bundles_post_ra>
